<compile_context>
chip_gen: v6e
topology: v6e:2x2x1
jax: 0.10.0
libtpu: 0.0.40
codegen_flags: <defaults>
</compile_context>

<pallas_src>
import math

import jax
import jax.numpy as jnp
from jax.experimental import pallas as pl
from jax.experimental.pallas import tpu as pltpu


# ---------------------------------------------------------------------------
# helpers
# ---------------------------------------------------------------------------
def _round_up(x, m):
    return ((x + m - 1) // m) * m


def _full_spec(shape):
    """Whole-array block for a grid=(1,) pallas_call."""
    n = len(shape)
    return pl.BlockSpec(shape, lambda i: (0,) * n)


# ---------------------------------------------------------------------------
# The single fused kernel
# ---------------------------------------------------------------------------
def _make_fused_kernel(*, B, act_dim, hdim, ph, pw, n_pool, n_h2, n_h3, out_w,
                       compute_logp):
    """conv1+ReLU+pool -> conv2+ReLU -> conv3+ReLU -> MLP heads -> log-prob.

    Row layout of the conv stage: rows are (r, c, b) with batch innermost, so a
    conv window tap (dy, dx) is simply a row shift of (dy*pw + dx)*B and all
    gathers are static slices of VMEM values.  Garbage rows produced at the
    right/bottom grid edges (and in the zero padding) never feed a *valid*
    downstream output position.
    """
    hs, ws = ph - 2, pw - 2                       # conv3 output grid
    taps = [(0, 0), (0, 1), (1, 0), (1, 1)]

    def kernel(p1_ref, c1w_ref, c1b_ref, c2w_ref, c2b_ref, c3w_ref, c3b_ref,
               w0_hbm, b0_ref,
               mw1_ref, mb1_ref, mw2_ref, mb2_ref, mw3_ref, mb3_ref,
               mw4_ref, mb4_ref,
               vw1_ref, vb1_ref, vw2_ref, vb2_ref,
               logstd_ref, act_ref,
               out_ref,
               w0_vmem, emb_vmem, w0_sem):
        f32 = jnp.float32

        # Start the (largest) w0 HBM->VMEM DMA immediately; it overlaps with the
        # whole conv stage and is waited on just before the first MLP matmul.
        w0_cp = pltpu.make_async_copy(w0_hbm, w0_vmem, w0_sem.at[0])
        w0_cp.start()

        # ---- conv1 (2x2, C->16) + ReLU: one K=4C matmul over all 4 pool offsets
        h1 = jnp.dot(p1_ref[...], c1w_ref[...], preferred_element_type=f32)
        h1 = jnp.maximum(h1 + c1b_ref[...], 0.0)                  # (4*n_pool, 16)

        # ---- 2x2 max-pool (floor): elementwise max of the 4 pool-offset groups
        pooled = jnp.maximum(
            jnp.maximum(h1[0:n_pool], h1[n_pool:2 * n_pool]),
            jnp.maximum(h1[2 * n_pool:3 * n_pool], h1[3 * n_pool:4 * n_pool]))

        # ---- conv2 (2x2, 16->32) + ReLU: single K=64 matmul (taps concat on K)
        lhs2 = jnp.concatenate(
            [pooled[(dr * pw + dc) * B:(dr * pw + dc) * B + n_h2, :]
             for dr, dc in taps], axis=1)                          # (n_h2, 64)
        h2 = jnp.dot(lhs2, c2w_ref[...], preferred_element_type=f32)
        h2 = jnp.maximum(h2 + c2b_ref[...], 0.0)                   # (n_h2, 32)

        # ---- conv3 (2x2, 32->64) + ReLU: single K=128 matmul ----
        lhs3 = jnp.concatenate(
            [h2[(di * pw + dj) * B:(di * pw + dj) * B + n_h3, :]
             for di, dj in taps], axis=1)                          # (n_h3, 128)
        h3 = jnp.dot(lhs3, c3w_ref[...], preferred_element_type=f32)
        h3 = jnp.maximum(h3 + c3b_ref[...], 0.0)                   # (n_h3, 64)

        # ---- flatten the hs*ws valid conv3 positions into (B, emb) rows ------
        # (the torch NCHW-flatten permutation is folded into w0's rows at init)
        for r in range(hs):
            for c in range(ws):
                src = (r * pw + c) * B
                dst = (r * ws + c) * 64
                emb_vmem[:, dst:dst + 64] = h3[src:src + B, :]

        # ---- MLP heads (bf16 weights on the MXU, f32 accumulation / ReLU) ----
        def lin(x, w_ref, b_ref, relu):
            y = jnp.dot(x.astype(jnp.bfloat16), w_ref[...],
                        preferred_element_type=f32) + b_ref[...]
            return jnp.maximum(y, 0.0) if relu else y

        w0_cp.wait()                                               # w0 landed in VMEM
        h0 = lin(emb_vmem[...], w0_vmem, b0_ref, relu=True)        # (B, 2*hdim)

        hm = h0[:, :hdim]                                          # mu head
        hm = lin(hm, mw1_ref, mb1_ref, relu=True)
        hm = lin(hm, mw2_ref, mb2_ref, relu=True)
        hm = lin(hm, mw3_ref, mb3_ref, relu=True)
        mu = lin(hm, mw4_ref, mb4_ref, relu=False)                 # (B, act_dim)

        hv = h0[:, hdim:]                                          # value head
        hv = lin(hv, vw1_ref, vb1_ref, relu=True)
        v = lin(hv, vw2_ref, vb2_ref, relu=False)                  # (B, 1)

        if compute_logp:
            logstd = logstd_ref[...]                               # (1, act_dim)
            z = (act_ref[...] - mu) * jnp.exp(-logstd)
            lp = -0.5 * z * z - logstd - 0.5 * math.log(2.0 * math.pi)
            logp = jnp.sum(lp, axis=-1, keepdims=True)             # (B, 1)
        else:
            logp = jnp.zeros((B, 1), f32)

        parts = [mu, v, logp]
        pad = out_w - (act_dim + 2)
        if pad > 0:
            parts.append(jnp.zeros((B, pad), f32))
        out_ref[...] = jnp.concatenate(parts, axis=1)              # one packed store

    return kernel


def _fused_forward(p1, act, logstd2, params, *, B, act_dim, hdim, emb_size,
                   ph, pw, n_pool, n_h2, n_h3, out_w, compute_logp):
    kernel = _make_fused_kernel(B=B, act_dim=act_dim, hdim=hdim, ph=ph, pw=pw,
                                n_pool=n_pool, n_h2=n_h2, n_h3=n_h3,
                                out_w=out_w, compute_logp=compute_logp)
    args = (p1,
            params["c1_w"], params["c1_b"],
            params["c2_w"], params["c2_b"],
            params["c3_w"], params["c3_b"],
            params["w0"], params["b0"],
            params["mw1"], params["mb1"], params["mw2"], params["mb2"],
            params["mw3"], params["mb3"], params["mw4"], params["mb4"],
            params["vw1"], params["vb1"], params["vw2"], params["vb2"],
            logstd2, act)
    in_specs = [_full_spec(a.shape) for a in args]
    in_specs[7] = pl.BlockSpec(memory_space=pl.ANY)   # w0 stays in HBM; manual DMA

    # TODO(synk): the resident-w0 design (emb_size x 512 in VMEM) only works for
    # small observations; for larger images (esp. v7x's 64 MiB VMEM) a K-tiled
    # grid axis with an f32 accumulator is required.  Also TODO: on v7x a 2-wide
    # "parallel" grid axis could shard the heads across both TensorCores.
    assert emb_size * 2 * hdim * 2 < 24 * (1 << 20), "w0 too large for resident-VMEM design"

    return pl.pallas_call(
        kernel,
        out_shape=jax.ShapeDtypeStruct((B, out_w), jnp.float32),
        grid=(1,),
        in_specs=in_specs,
        out_specs=_full_spec((B, out_w)),
        scratch_shapes=[
            pltpu.VMEM((emb_size, 2 * hdim), jnp.bfloat16),   # w0 landing buffer
            pltpu.VMEM((B, emb_size), jnp.float32),           # flattened embedding
            pltpu.SemaphoreType.DMA((1,)),                    # w0 copy semaphore
        ],
        compiler_params=pltpu.CompilerParams(
            dimension_semantics=("arbitrary",)),
    )(*args)


# ---------------------------------------------------------------------------
# The only XLA glue: conv1 im2col on the raw observation (a few KB)
# ---------------------------------------------------------------------------
def _conv1_patches(x, ph, pw, n_pool):
    """One im2col group per 2x2 pool offset, rows ordered (r, c, b) with the
    batch innermost, zero-padded to n_pool rows per group."""
    B, C = x.shape[0], x.shape[3]
    groups = []
    for pi in range(2):
        for pj in range(2):
            pats = [x[:, pi + di: pi + di + 2 * ph: 2,
                      pj + dj: pj + dj + 2 * pw: 2, :]
                    for di in range(2) for dj in range(2)]         # 4 x (B,ph,pw,C)
            g = jnp.concatenate(pats, axis=-1)                     # (B, ph, pw, 4C)
            g = jnp.transpose(g, (1, 2, 0, 3)).reshape(ph * pw * B, 4 * C)
            g = jnp.pad(g, ((0, n_pool - ph * pw * B), (0, 0)))
            groups.append(g)
    return jnp.concatenate(groups, axis=0)                         # (4*n_pool, 4C)


# ---------------------------------------------------------------------------
# Forward pass
# ---------------------------------------------------------------------------
def forward(params, obs, act=None):
    """MLPGaussianActorCritic.forward -> ((mu, std), v, logp_a)."""
    x = obs.astype(jnp.float32)
    B, H, W, _ = x.shape
    ph, pw = (H - 1) // 2, (W - 1) // 2            # pooled map size (floor mode)
    hs, ws = ph - 2, pw - 2                        # conv3 output grid
    emb_size = hs * ws * 64
    hdim = params["mw1"].shape[0]
    act_dim = params["log_std"].shape[0]

    # Pad batch to full 8-row sublanes: fills MXU rows, keeps all in-kernel row
    # slices aligned (pad rows produce garbage that is sliced off at the end).
    BP = _round_up(B, 8)
    if BP != B:
        x = jnp.pad(x, ((0, BP - B), (0, 0), (0, 0), (0, 0)))

    n_h3 = ph * pw * BP                            # conv3 rows (full pooled grid)
    sh = (pw + 1) * BP                             # largest conv-window row shift
    n_h2 = _round_up(n_h3 + sh, 8)                 # conv2 rows (+ shift headroom)
    n_pool = _round_up(n_h2 + sh, 8)               # pooled-map rows per group
    out_w = max(8, act_dim + 2)

    p1 = _conv1_patches(x, ph, pw, n_pool)

    compute_logp = act is not None
    if compute_logp:
        act_in = jnp.pad(act.astype(jnp.float32), ((0, BP - B), (0, 0)))
    else:
        act_in = jnp.zeros((BP, act_dim), jnp.float32)
    logstd2 = params["log_std"].reshape(1, -1)     # single source of truth

    out = _fused_forward(p1, act_in, logstd2, params,
                         B=BP, act_dim=act_dim, hdim=hdim, emb_size=emb_size,
                         ph=ph, pw=pw, n_pool=n_pool, n_h2=n_h2, n_h3=n_h3,
                         out_w=out_w, compute_logp=compute_logp)

    mu = out[:B, :act_dim]
    v = out[:B, act_dim]
    std = jnp.exp(params["log_std"])
    logp_a = out[:B, act_dim + 1] if compute_logp else None
    # TODO(synk): torch.distributions.Normal has no Pallas equivalent; the policy
    # distribution is returned as its sufficient statistics (mu, std).
    return (mu, std), v, logp_a


# ---------------------------------------------------------------------------
# Deterministic parameter init (synthetic weights; shapes from __init__)
# ---------------------------------------------------------------------------
def init_params(key, obs_dim, act_dim, mlp_hidden_size=256):
    H, W, C = obs_dim
    ph, pw = (H - 1) // 2, (W - 1) // 2
    hs, ws = ph - 2, pw - 2
    emb_size = hs * ws * 64

    def dense(k, fan_in, fan_out):
        kw, kb = jax.random.split(k)
        scale = 1.0 / jnp.sqrt(jnp.float32(fan_in))
        w = jax.random.normal(kw, (fan_in, fan_out), jnp.float32) * scale
        b = jax.random.normal(kb, (fan_out,), jnp.float32) * 0.01
        return w, b

    keys = jax.random.split(key, 16)
    p = {}

    # Conv weights as im2col matrices, rows ordered (kh, kw, Cin) with Cin
    # fastest: real torch Conv2d weights (Cout, Cin, kh, kw) pack as
    #   W_im2col[(kh_i*2+kw_j)*Cin + c, cout] = W_torch[cout, c, kh_i, kw_j]
    w, b = dense(keys[0], 4 * C, 16)
    p["c1_w"], p["c1_b"] = w, b.reshape(1, -1)
    w, b = dense(keys[1], 4 * 16, 32)
    p["c2_w"], p["c2_b"] = w, b.reshape(1, -1)
    w, b = dense(keys[2], 4 * 32, 64)
    p["c3_w"], p["c3_b"] = w, b.reshape(1, -1)

    # Shared first MLP layer: generate both heads' first layers in torch
    # (NCHW-flatten) row order, permute rows to the kernel's (spatial-major,
    # channel-minor) embedding order, concat output columns (mu | v) -> 512 wide,
    # and store in bf16 (halves the dominant HBM->VMEM DMA).
    mu_w0, mu_b0 = dense(keys[3], emb_size, mlp_hidden_size)
    v_w0, v_b0 = dense(keys[8], emb_size, mlp_hidden_size)
    w0 = jnp.concatenate([mu_w0, v_w0], axis=1)                    # NCHW row order
    w0 = (w0.reshape(64, hs * ws, 2 * mlp_hidden_size)
            .transpose(1, 0, 2).reshape(emb_size, 2 * mlp_hidden_size))
    p["w0"] = w0.astype(jnp.bfloat16)
    p["b0"] = jnp.concatenate([mu_b0, v_b0]).reshape(1, -1)

    # remaining mu_net layers: 256->256 (x3), 256->act_dim   (bf16 weights)
    for li in range(1, 5):
        fan_out = act_dim if li == 4 else mlp_hidden_size
        w, b = dense(keys[3 + li], mlp_hidden_size, fan_out)
        p[f"mw{li}"], p[f"mb{li}"] = w.astype(jnp.bfloat16), b.reshape(1, -1)

    # remaining v layers: 256->256, 256->1                    (bf16 weights)
    for li in range(1, 3):
        fan_out = 1 if li == 2 else mlp_hidden_size
        w, b = dense(keys[8 + li], mlp_hidden_size, fan_out)
        p[f"vw{li}"], p[f"vb{li}"] = w.astype(jnp.bfloat16), b.reshape(1, -1)

    p["log_std"] = -0.5 * jnp.ones((act_dim,), jnp.float32)
    return p


# ---------------------------------------------------------------------------
if __name__ == "__main__":
    key = jax.random.PRNGKey(0)
    B, H, W, C = 2, 16, 16, 3
    act_dim = 4

    k_obs, k_act, k_param = jax.random.split(key, 3)
    obs = jax.random.uniform(k_obs, (B, H, W, C), dtype=jnp.float32)   # NHWC obs
    act = jax.random.normal(k_act, (B, act_dim), dtype=jnp.float32)
    params = init_params(k_param, (H, W, C), act_dim)

    fwd = jax.jit(forward)
    (mu, std), v, logp_a = fwd(params, obs, act)
    jax.block_until_ready((mu, std, v, logp_a))

    assert mu.shape == (B, act_dim)
    assert std.shape == (act_dim,)
    assert v.shape == (B,)
    assert logp_a.shape == (B,)
    print("KERNEL_OK")
</pallas_src>

<mosaic_0001>
module attributes {stable_mosaic.version = 11 : i64} {
  func.func @kernel(%arg0: i32, %arg1: memref<2080x12xf32, #tpu.memory_space<vmem>>, %arg2: memref<12x16xf32, #tpu.memory_space<vmem>>, %arg3: memref<1x16xf32, #tpu.memory_space<vmem>>, %arg4: memref<64x32xf32, #tpu.memory_space<vmem>>, %arg5: memref<1x32xf32, #tpu.memory_space<vmem>>, %arg6: memref<128x64xf32, #tpu.memory_space<vmem>>, %arg7: memref<1x64xf32, #tpu.memory_space<vmem>>, %arg8: memref<1600x512xbf16, #tpu.memory_space<any>>, %arg9: memref<1x512xf32, #tpu.memory_space<vmem>>, %arg10: memref<256x256xbf16, #tpu.memory_space<vmem>>, %arg11: memref<1x256xf32, #tpu.memory_space<vmem>>, %arg12: memref<256x256xbf16, #tpu.memory_space<vmem>>, %arg13: memref<1x256xf32, #tpu.memory_space<vmem>>, %arg14: memref<256x256xbf16, #tpu.memory_space<vmem>>, %arg15: memref<1x256xf32, #tpu.memory_space<vmem>>, %arg16: memref<256x4xbf16, #tpu.memory_space<vmem>>, %arg17: memref<1x4xf32, #tpu.memory_space<vmem>>, %arg18: memref<256x256xbf16, #tpu.memory_space<vmem>>, %arg19: memref<1x256xf32, #tpu.memory_space<vmem>>, %arg20: memref<256x1xbf16, #tpu.memory_space<vmem>>, %arg21: memref<1x1xf32, #tpu.memory_space<vmem>>, %arg22: memref<1x4xf32, #tpu.memory_space<vmem>>, %arg23: memref<8x4xf32, #tpu.memory_space<vmem>>, %arg24: memref<8x8xf32, #tpu.memory_space<vmem>>, %arg25: memref<1600x512xbf16, #tpu.memory_space<vmem>>, %arg26: memref<8x1600xf32, #tpu.memory_space<vmem>>, %arg27: memref<1x!tpu.dma_semaphore, #tpu.memory_space<semaphore_mem>>) attributes {dimension_semantics = [#tpu.dimension_semantics<arbitrary>], iteration_bounds = array<i64: 1>, scalar_prefetch = 0 : i64, scratch_operands = 3 : i64, tpu.core_type = #tpu.core_type<tc>, window_params = [{pipeline_mode = #tpu.pipeline_mode<synchronous>, transform_indices = @transform_0, window_bounds = array<i64: 2080, 12>}, {pipeline_mode = #tpu.pipeline_mode<synchronous>, transform_indices = @transform_1, window_bounds = array<i64: 12, 16>}, {pipeline_mode = #tpu.pipeline_mode<synchronous>, transform_indices = @transform_2, window_bounds = array<i64: 1, 16>}, {pipeline_mode = #tpu.pipeline_mode<synchronous>, transform_indices = @transform_3, window_bounds = array<i64: 64, 32>}, {pipeline_mode = #tpu.pipeline_mode<synchronous>, transform_indices = @transform_4, window_bounds = array<i64: 1, 32>}, {pipeline_mode = #tpu.pipeline_mode<synchronous>, transform_indices = @transform_5, window_bounds = array<i64: 128, 64>}, {pipeline_mode = #tpu.pipeline_mode<synchronous>, transform_indices = @transform_6, window_bounds = array<i64: 1, 64>}, {}, {pipeline_mode = #tpu.pipeline_mode<synchronous>, transform_indices = @transform_8, window_bounds = array<i64: 1, 512>}, {pipeline_mode = #tpu.pipeline_mode<synchronous>, transform_indices = @transform_9, window_bounds = array<i64: 256, 256>}, {pipeline_mode = #tpu.pipeline_mode<synchronous>, transform_indices = @transform_10, window_bounds = array<i64: 1, 256>}, {pipeline_mode = #tpu.pipeline_mode<synchronous>, transform_indices = @transform_11, window_bounds = array<i64: 256, 256>}, {pipeline_mode = #tpu.pipeline_mode<synchronous>, transform_indices = @transform_12, window_bounds = array<i64: 1, 256>}, {pipeline_mode = #tpu.pipeline_mode<synchronous>, transform_indices = @transform_13, window_bounds = array<i64: 256, 256>}, {pipeline_mode = #tpu.pipeline_mode<synchronous>, transform_indices = @transform_14, window_bounds = array<i64: 1, 256>}, {pipeline_mode = #tpu.pipeline_mode<synchronous>, transform_indices = @transform_15, window_bounds = array<i64: 256, 4>}, {pipeline_mode = #tpu.pipeline_mode<synchronous>, transform_indices = @transform_16, window_bounds = array<i64: 1, 4>}, {pipeline_mode = #tpu.pipeline_mode<synchronous>, transform_indices = @transform_17, window_bounds = array<i64: 256, 256>}, {pipeline_mode = #tpu.pipeline_mode<synchronous>, transform_indices = @transform_18, window_bounds = array<i64: 1, 256>}, {pipeline_mode = #tpu.pipeline_mode<synchronous>, transform_indices = @transform_19, window_bounds = array<i64: 256, 1>}, {pipeline_mode = #tpu.pipeline_mode<synchronous>, transform_indices = @transform_20, window_bounds = array<i64: 1, 1>}, {pipeline_mode = #tpu.pipeline_mode<synchronous>, transform_indices = @transform_21, window_bounds = array<i64: 1, 4>}, {pipeline_mode = #tpu.pipeline_mode<synchronous>, transform_indices = @transform_22, window_bounds = array<i64: 8, 4>}, {pipeline_mode = #tpu.pipeline_mode<synchronous>, transform_indices = @transform_23, window_bounds = array<i64: 8, 8>}]} {
    %c0_i32 = arith.constant 0 : i32
    %0 = tpu.memref_slice %arg27[%c0_i32] : memref<1x!tpu.dma_semaphore, #tpu.memory_space<semaphore_mem>> -> memref<1x!tpu.dma_semaphore, #tpu.memory_space<semaphore_mem>>
    %1 = tpu.memref_squeeze %0 : memref<1x!tpu.dma_semaphore, #tpu.memory_space<semaphore_mem>> -> memref<!tpu.dma_semaphore, #tpu.memory_space<semaphore_mem>>
    tpu.enqueue_dma source(%arg8 : memref<1600x512xbf16, #tpu.memory_space<any>>) target(%arg25 : memref<1600x512xbf16, #tpu.memory_space<vmem>>) target_semaphore(%1 : memref<!tpu.dma_semaphore, #tpu.memory_space<semaphore_mem>>)
    %c0 = arith.constant 0 : index
    %c0_0 = arith.constant 0 : index
    %2 = vector.load %arg1[%c0, %c0_0] : memref<2080x12xf32, #tpu.memory_space<vmem>>, vector<2080x12xf32>
    %c0_1 = arith.constant 0 : index
    %c0_2 = arith.constant 0 : index
    %3 = vector.load %arg2[%c0_1, %c0_2] : memref<12x16xf32, #tpu.memory_space<vmem>>, vector<12x16xf32>
    %cst = arith.constant dense<0.000000e+00> : vector<2080x16xf32>
    %4 = tpu.matmul %2, %3, %cst {dimension_numbers = #tpu.dot_dimension_numbers<[1], [0], [0], [1], [0, 0, 1, 1], [], []>} : vector<2080x12xf32>, vector<12x16xf32>, vector<2080x16xf32> -> vector<2080x16xf32>
    %c0_3 = arith.constant 0 : index
    %c0_4 = arith.constant 0 : index
    %5 = vector.load %arg3[%c0_3, %c0_4] : memref<1x16xf32, #tpu.memory_space<vmem>>, vector<1x16xf32>
    %6 = vector.broadcast %5 : vector<1x16xf32> to vector<2080x16xf32>
    %7 = arith.addf %4, %6 : vector<2080x16xf32>
    %cst_5 = arith.constant 0.000000e+00 : f32
    %8 = vector.broadcast %cst_5 : f32 to vector<2080x16xf32>
    %9 = arith.maximumf %7, %8 : vector<2080x16xf32>
    %10 = vector.extract_strided_slice %9 {offsets = [0, 0], sizes = [520, 16], strides = [1, 1]} : vector<2080x16xf32> to vector<520x16xf32>
    %11 = vector.extract_strided_slice %9 {offsets = [520, 0], sizes = [520, 16], strides = [1, 1]} : vector<2080x16xf32> to vector<520x16xf32>
    %12 = arith.maximumf %10, %11 : vector<520x16xf32>
    %13 = vector.extract_strided_slice %9 {offsets = [1040, 0], sizes = [520, 16], strides = [1, 1]} : vector<2080x16xf32> to vector<520x16xf32>
    %14 = vector.extract_strided_slice %9 {offsets = [1560, 0], sizes = [520, 16], strides = [1, 1]} : vector<2080x16xf32> to vector<520x16xf32>
    %15 = arith.maximumf %13, %14 : vector<520x16xf32>
    %16 = arith.maximumf %12, %15 : vector<520x16xf32>
    %17 = vector.extract_strided_slice %16 {offsets = [0, 0], sizes = [456, 16], strides = [1, 1]} : vector<520x16xf32> to vector<456x16xf32>
    %18 = vector.extract_strided_slice %16 {offsets = [8, 0], sizes = [456, 16], strides = [1, 1]} : vector<520x16xf32> to vector<456x16xf32>
    %19 = vector.extract_strided_slice %16 {offsets = [56, 0], sizes = [456, 16], strides = [1, 1]} : vector<520x16xf32> to vector<456x16xf32>
    %20 = vector.extract_strided_slice %16 {offsets = [64, 0], sizes = [456, 16], strides = [1, 1]} : vector<520x16xf32> to vector<456x16xf32>
    %21 = tpu.concatenate %17, %18, %19, %20 in 1 : vector<456x16xf32>, vector<456x16xf32>, vector<456x16xf32>, vector<456x16xf32> -> vector<456x64xf32>
    %c0_6 = arith.constant 0 : index
    %c0_7 = arith.constant 0 : index
    %22 = vector.load %arg4[%c0_6, %c0_7] : memref<64x32xf32, #tpu.memory_space<vmem>>, vector<64x32xf32>
    %cst_8 = arith.constant dense<0.000000e+00> : vector<456x32xf32>
    %23 = tpu.matmul %21, %22, %cst_8 {dimension_numbers = #tpu.dot_dimension_numbers<[1], [0], [0], [1], [0, 0, 1, 1], [], []>} : vector<456x64xf32>, vector<64x32xf32>, vector<456x32xf32> -> vector<456x32xf32>
    %c0_9 = arith.constant 0 : index
    %c0_10 = arith.constant 0 : index
    %24 = vector.load %arg5[%c0_9, %c0_10] : memref<1x32xf32, #tpu.memory_space<vmem>>, vector<1x32xf32>
    %25 = vector.broadcast %24 : vector<1x32xf32> to vector<456x32xf32>
    %26 = arith.addf %23, %25 : vector<456x32xf32>
    %cst_11 = arith.constant 0.000000e+00 : f32
    %27 = vector.broadcast %cst_11 : f32 to vector<456x32xf32>
    %28 = arith.maximumf %26, %27 : vector<456x32xf32>
    %29 = vector.extract_strided_slice %28 {offsets = [0, 0], sizes = [392, 32], strides = [1, 1]} : vector<456x32xf32> to vector<392x32xf32>
    %30 = vector.extract_strided_slice %28 {offsets = [8, 0], sizes = [392, 32], strides = [1, 1]} : vector<456x32xf32> to vector<392x32xf32>
    %31 = vector.extract_strided_slice %28 {offsets = [56, 0], sizes = [392, 32], strides = [1, 1]} : vector<456x32xf32> to vector<392x32xf32>
    %32 = vector.extract_strided_slice %28 {offsets = [64, 0], sizes = [392, 32], strides = [1, 1]} : vector<456x32xf32> to vector<392x32xf32>
    %33 = tpu.concatenate %29, %30, %31, %32 in 1 : vector<392x32xf32>, vector<392x32xf32>, vector<392x32xf32>, vector<392x32xf32> -> vector<392x128xf32>
    %c0_12 = arith.constant 0 : index
    %c0_13 = arith.constant 0 : index
    %34 = vector.load %arg6[%c0_12, %c0_13] : memref<128x64xf32, #tpu.memory_space<vmem>>, vector<128x64xf32>
    %cst_14 = arith.constant dense<0.000000e+00> : vector<392x64xf32>
    %35 = tpu.matmul %33, %34, %cst_14 {dimension_numbers = #tpu.dot_dimension_numbers<[1], [0], [0], [1], [0, 0, 1, 1], [], []>} : vector<392x128xf32>, vector<128x64xf32>, vector<392x64xf32> -> vector<392x64xf32>
    %c0_15 = arith.constant 0 : index
    %c0_16 = arith.constant 0 : index
    %36 = vector.load %arg7[%c0_15, %c0_16] : memref<1x64xf32, #tpu.memory_space<vmem>>, vector<1x64xf32>
    %37 = vector.broadcast %36 : vector<1x64xf32> to vector<392x64xf32>
    %38 = arith.addf %35, %37 : vector<392x64xf32>
    %cst_17 = arith.constant 0.000000e+00 : f32
    %39 = vector.broadcast %cst_17 : f32 to vector<392x64xf32>
    %40 = arith.maximumf %38, %39 : vector<392x64xf32>
    %41 = vector.extract_strided_slice %40 {offsets = [0, 0], sizes = [8, 64], strides = [1, 1]} : vector<392x64xf32> to vector<8x64xf32>
    %c0_18 = arith.constant 0 : index
    %c0_19 = arith.constant 0 : index
    %42 = vector.load %arg26[%c0_18, %c0_19] : memref<8x1600xf32, #tpu.memory_space<vmem>>, vector<8x64xf32>
    tpu.vector_store %arg26[%c0_18, %c0_19], %41 {strides = array<i32>} : memref<8x1600xf32, #tpu.memory_space<vmem>>, vector<8x64xf32>,
    %43 = vector.extract_strided_slice %40 {offsets = [8, 0], sizes = [8, 64], strides = [1, 1]} : vector<392x64xf32> to vector<8x64xf32>
    %c0_20 = arith.constant 0 : index
    %c64 = arith.constant 64 : index
    %44 = vector.load %arg26[%c0_20, %c64] : memref<8x1600xf32, #tpu.memory_space<vmem>>, vector<8x64xf32>
    tpu.vector_store %arg26[%c0_20, %c64], %43 {strides = array<i32>} : memref<8x1600xf32, #tpu.memory_space<vmem>>, vector<8x64xf32>,
    %45 = vector.extract_strided_slice %40 {offsets = [16, 0], sizes = [8, 64], strides = [1, 1]} : vector<392x64xf32> to vector<8x64xf32>
    %c0_21 = arith.constant 0 : index
    %c128 = arith.constant 128 : index
    %46 = vector.load %arg26[%c0_21, %c128] : memref<8x1600xf32, #tpu.memory_space<vmem>>, vector<8x64xf32>
    tpu.vector_store %arg26[%c0_21, %c128], %45 {strides = array<i32>} : memref<8x1600xf32, #tpu.memory_space<vmem>>, vector<8x64xf32>,
    %47 = vector.extract_strided_slice %40 {offsets = [24, 0], sizes = [8, 64], strides = [1, 1]} : vector<392x64xf32> to vector<8x64xf32>
    %c0_22 = arith.constant 0 : index
    %c192 = arith.constant 192 : index
    %48 = vector.load %arg26[%c0_22, %c192] : memref<8x1600xf32, #tpu.memory_space<vmem>>, vector<8x64xf32>
    tpu.vector_store %arg26[%c0_22, %c192], %47 {strides = array<i32>} : memref<8x1600xf32, #tpu.memory_space<vmem>>, vector<8x64xf32>,
    %49 = vector.extract_strided_slice %40 {offsets = [32, 0], sizes = [8, 64], strides = [1, 1]} : vector<392x64xf32> to vector<8x64xf32>
    %c0_23 = arith.constant 0 : index
    %c256 = arith.constant 256 : index
    %50 = vector.load %arg26[%c0_23, %c256] : memref<8x1600xf32, #tpu.memory_space<vmem>>, vector<8x64xf32>
    tpu.vector_store %arg26[%c0_23, %c256], %49 {strides = array<i32>} : memref<8x1600xf32, #tpu.memory_space<vmem>>, vector<8x64xf32>,
    %51 = vector.extract_strided_slice %40 {offsets = [56, 0], sizes = [8, 64], strides = [1, 1]} : vector<392x64xf32> to vector<8x64xf32>
    %c0_24 = arith.constant 0 : index
    %c320 = arith.constant 320 : index
    %52 = vector.load %arg26[%c0_24, %c320] : memref<8x1600xf32, #tpu.memory_space<vmem>>, vector<8x64xf32>
    tpu.vector_store %arg26[%c0_24, %c320], %51 {strides = array<i32>} : memref<8x1600xf32, #tpu.memory_space<vmem>>, vector<8x64xf32>,
    %53 = vector.extract_strided_slice %40 {offsets = [64, 0], sizes = [8, 64], strides = [1, 1]} : vector<392x64xf32> to vector<8x64xf32>
    %c0_25 = arith.constant 0 : index
    %c384 = arith.constant 384 : index
    %54 = vector.load %arg26[%c0_25, %c384] : memref<8x1600xf32, #tpu.memory_space<vmem>>, vector<8x64xf32>
    tpu.vector_store %arg26[%c0_25, %c384], %53 {strides = array<i32>} : memref<8x1600xf32, #tpu.memory_space<vmem>>, vector<8x64xf32>,
    %55 = vector.extract_strided_slice %40 {offsets = [72, 0], sizes = [8, 64], strides = [1, 1]} : vector<392x64xf32> to vector<8x64xf32>
    %c0_26 = arith.constant 0 : index
    %c448 = arith.constant 448 : index
    %56 = vector.load %arg26[%c0_26, %c448] : memref<8x1600xf32, #tpu.memory_space<vmem>>, vector<8x64xf32>
    tpu.vector_store %arg26[%c0_26, %c448], %55 {strides = array<i32>} : memref<8x1600xf32, #tpu.memory_space<vmem>>, vector<8x64xf32>,
    %57 = vector.extract_strided_slice %40 {offsets = [80, 0], sizes = [8, 64], strides = [1, 1]} : vector<392x64xf32> to vector<8x64xf32>
    %c0_27 = arith.constant 0 : index
    %c512 = arith.constant 512 : index
    %58 = vector.load %arg26[%c0_27, %c512] : memref<8x1600xf32, #tpu.memory_space<vmem>>, vector<8x64xf32>
    tpu.vector_store %arg26[%c0_27, %c512], %57 {strides = array<i32>} : memref<8x1600xf32, #tpu.memory_space<vmem>>, vector<8x64xf32>,
    %59 = vector.extract_strided_slice %40 {offsets = [88, 0], sizes = [8, 64], strides = [1, 1]} : vector<392x64xf32> to vector<8x64xf32>
    %c0_28 = arith.constant 0 : index
    %c576 = arith.constant 576 : index
    %60 = vector.load %arg26[%c0_28, %c576] : memref<8x1600xf32, #tpu.memory_space<vmem>>, vector<8x64xf32>
    tpu.vector_store %arg26[%c0_28, %c576], %59 {strides = array<i32>} : memref<8x1600xf32, #tpu.memory_space<vmem>>, vector<8x64xf32>,
    %61 = vector.extract_strided_slice %40 {offsets = [112, 0], sizes = [8, 64], strides = [1, 1]} : vector<392x64xf32> to vector<8x64xf32>
    %c0_29 = arith.constant 0 : index
    %c640 = arith.constant 640 : index
    %62 = vector.load %arg26[%c0_29, %c640] : memref<8x1600xf32, #tpu.memory_space<vmem>>, vector<8x64xf32>
    tpu.vector_store %arg26[%c0_29, %c640], %61 {strides = array<i32>} : memref<8x1600xf32, #tpu.memory_space<vmem>>, vector<8x64xf32>,
    %63 = vector.extract_strided_slice %40 {offsets = [120, 0], sizes = [8, 64], strides = [1, 1]} : vector<392x64xf32> to vector<8x64xf32>
    %c0_30 = arith.constant 0 : index
    %c704 = arith.constant 704 : index
    %64 = vector.load %arg26[%c0_30, %c704] : memref<8x1600xf32, #tpu.memory_space<vmem>>, vector<8x64xf32>
    tpu.vector_store %arg26[%c0_30, %c704], %63 {strides = array<i32>} : memref<8x1600xf32, #tpu.memory_space<vmem>>, vector<8x64xf32>,
    %65 = vector.extract_strided_slice %40 {offsets = [128, 0], sizes = [8, 64], strides = [1, 1]} : vector<392x64xf32> to vector<8x64xf32>
    %c0_31 = arith.constant 0 : index
    %c768 = arith.constant 768 : index
    %66 = vector.load %arg26[%c0_31, %c768] : memref<8x1600xf32, #tpu.memory_space<vmem>>, vector<8x64xf32>
    tpu.vector_store %arg26[%c0_31, %c768], %65 {strides = array<i32>} : memref<8x1600xf32, #tpu.memory_space<vmem>>, vector<8x64xf32>,
    %67 = vector.extract_strided_slice %40 {offsets = [136, 0], sizes = [8, 64], strides = [1, 1]} : vector<392x64xf32> to vector<8x64xf32>
    %c0_32 = arith.constant 0 : index
    %c832 = arith.constant 832 : index
    %68 = vector.load %arg26[%c0_32, %c832] : memref<8x1600xf32, #tpu.memory_space<vmem>>, vector<8x64xf32>
    tpu.vector_store %arg26[%c0_32, %c832], %67 {strides = array<i32>} : memref<8x1600xf32, #tpu.memory_space<vmem>>, vector<8x64xf32>,
    %69 = vector.extract_strided_slice %40 {offsets = [144, 0], sizes = [8, 64], strides = [1, 1]} : vector<392x64xf32> to vector<8x64xf32>
    %c0_33 = arith.constant 0 : index
    %c896 = arith.constant 896 : index
    %70 = vector.load %arg26[%c0_33, %c896] : memref<8x1600xf32, #tpu.memory_space<vmem>>, vector<8x64xf32>
    tpu.vector_store %arg26[%c0_33, %c896], %69 {strides = array<i32>} : memref<8x1600xf32, #tpu.memory_space<vmem>>, vector<8x64xf32>,
    %71 = vector.extract_strided_slice %40 {offsets = [168, 0], sizes = [8, 64], strides = [1, 1]} : vector<392x64xf32> to vector<8x64xf32>
    %c0_34 = arith.constant 0 : index
    %c960 = arith.constant 960 : index
    %72 = vector.load %arg26[%c0_34, %c960] : memref<8x1600xf32, #tpu.memory_space<vmem>>, vector<8x64xf32>
    tpu.vector_store %arg26[%c0_34, %c960], %71 {strides = array<i32>} : memref<8x1600xf32, #tpu.memory_space<vmem>>, vector<8x64xf32>,
    %73 = vector.extract_strided_slice %40 {offsets = [176, 0], sizes = [8, 64], strides = [1, 1]} : vector<392x64xf32> to vector<8x64xf32>
    %c0_35 = arith.constant 0 : index
    %c1024 = arith.constant 1024 : index
    %74 = vector.load %arg26[%c0_35, %c1024] : memref<8x1600xf32, #tpu.memory_space<vmem>>, vector<8x64xf32>
    tpu.vector_store %arg26[%c0_35, %c1024], %73 {strides = array<i32>} : memref<8x1600xf32, #tpu.memory_space<vmem>>, vector<8x64xf32>,
    %75 = vector.extract_strided_slice %40 {offsets = [184, 0], sizes = [8, 64], strides = [1, 1]} : vector<392x64xf32> to vector<8x64xf32>
    %c0_36 = arith.constant 0 : index
    %c1088 = arith.constant 1088 : index
    %76 = vector.load %arg26[%c0_36, %c1088] : memref<8x1600xf32, #tpu.memory_space<vmem>>, vector<8x64xf32>
    tpu.vector_store %arg26[%c0_36, %c1088], %75 {strides = array<i32>} : memref<8x1600xf32, #tpu.memory_space<vmem>>, vector<8x64xf32>,
    %77 = vector.extract_strided_slice %40 {offsets = [192, 0], sizes = [8, 64], strides = [1, 1]} : vector<392x64xf32> to vector<8x64xf32>
    %c0_37 = arith.constant 0 : index
    %c1152 = arith.constant 1152 : index
    %78 = vector.load %arg26[%c0_37, %c1152] : memref<8x1600xf32, #tpu.memory_space<vmem>>, vector<8x64xf32>
    tpu.vector_store %arg26[%c0_37, %c1152], %77 {strides = array<i32>} : memref<8x1600xf32, #tpu.memory_space<vmem>>, vector<8x64xf32>,
    %79 = vector.extract_strided_slice %40 {offsets = [200, 0], sizes = [8, 64], strides = [1, 1]} : vector<392x64xf32> to vector<8x64xf32>
    %c0_38 = arith.constant 0 : index
    %c1216 = arith.constant 1216 : index
    %80 = vector.load %arg26[%c0_38, %c1216] : memref<8x1600xf32, #tpu.memory_space<vmem>>, vector<8x64xf32>
    tpu.vector_store %arg26[%c0_38, %c1216], %79 {strides = array<i32>} : memref<8x1600xf32, #tpu.memory_space<vmem>>, vector<8x64xf32>,
    %81 = vector.extract_strided_slice %40 {offsets = [224, 0], sizes = [8, 64], strides = [1, 1]} : vector<392x64xf32> to vector<8x64xf32>
    %c0_39 = arith.constant 0 : index
    %c1280 = arith.constant 1280 : index
    %82 = vector.load %arg26[%c0_39, %c1280] : memref<8x1600xf32, #tpu.memory_space<vmem>>, vector<8x64xf32>
    tpu.vector_store %arg26[%c0_39, %c1280], %81 {strides = array<i32>} : memref<8x1600xf32, #tpu.memory_space<vmem>>, vector<8x64xf32>,
    %83 = vector.extract_strided_slice %40 {offsets = [232, 0], sizes = [8, 64], strides = [1, 1]} : vector<392x64xf32> to vector<8x64xf32>
    %c0_40 = arith.constant 0 : index
    %c1344 = arith.constant 1344 : index
    %84 = vector.load %arg26[%c0_40, %c1344] : memref<8x1600xf32, #tpu.memory_space<vmem>>, vector<8x64xf32>
    tpu.vector_store %arg26[%c0_40, %c1344], %83 {strides = array<i32>} : memref<8x1600xf32, #tpu.memory_space<vmem>>, vector<8x64xf32>,
    %85 = vector.extract_strided_slice %40 {offsets = [240, 0], sizes = [8, 64], strides = [1, 1]} : vector<392x64xf32> to vector<8x64xf32>
    %c0_41 = arith.constant 0 : index
    %c1408 = arith.constant 1408 : index
    %86 = vector.load %arg26[%c0_41, %c1408] : memref<8x1600xf32, #tpu.memory_space<vmem>>, vector<8x64xf32>
    tpu.vector_store %arg26[%c0_41, %c1408], %85 {strides = array<i32>} : memref<8x1600xf32, #tpu.memory_space<vmem>>, vector<8x64xf32>,
    %87 = vector.extract_strided_slice %40 {offsets = [248, 0], sizes = [8, 64], strides = [1, 1]} : vector<392x64xf32> to vector<8x64xf32>
    %c0_42 = arith.constant 0 : index
    %c1472 = arith.constant 1472 : index
    %88 = vector.load %arg26[%c0_42, %c1472] : memref<8x1600xf32, #tpu.memory_space<vmem>>, vector<8x64xf32>
    tpu.vector_store %arg26[%c0_42, %c1472], %87 {strides = array<i32>} : memref<8x1600xf32, #tpu.memory_space<vmem>>, vector<8x64xf32>,
    %89 = vector.extract_strided_slice %40 {offsets = [256, 0], sizes = [8, 64], strides = [1, 1]} : vector<392x64xf32> to vector<8x64xf32>
    %c0_43 = arith.constant 0 : index
    %c1536 = arith.constant 1536 : index
    %90 = vector.load %arg26[%c0_43, %c1536] : memref<8x1600xf32, #tpu.memory_space<vmem>>, vector<8x64xf32>
    tpu.vector_store %arg26[%c0_43, %c1536], %89 {strides = array<i32>} : memref<8x1600xf32, #tpu.memory_space<vmem>>, vector<8x64xf32>,
    %c0_i32_44 = arith.constant 0 : i32
    %91 = tpu.memref_slice %arg27[%c0_i32_44] : memref<1x!tpu.dma_semaphore, #tpu.memory_space<semaphore_mem>> -> memref<1x!tpu.dma_semaphore, #tpu.memory_space<semaphore_mem>>
    %92 = tpu.memref_squeeze %91 : memref<1x!tpu.dma_semaphore, #tpu.memory_space<semaphore_mem>> -> memref<!tpu.dma_semaphore, #tpu.memory_space<semaphore_mem>>
    tpu.wait_dma2 semaphore(%92 : memref<!tpu.dma_semaphore, #tpu.memory_space<semaphore_mem>>) src(%arg8 : memref<1600x512xbf16, #tpu.memory_space<any>>) dst(%arg25 : memref<1600x512xbf16, #tpu.memory_space<vmem>>)
    %c0_45 = arith.constant 0 : index
    %c0_46 = arith.constant 0 : index
    %93 = vector.load %arg26[%c0_45, %c0_46] : memref<8x1600xf32, #tpu.memory_space<vmem>>, vector<8x1600xf32>
    %94 = arith.truncf %93 : vector<8x1600xf32> to vector<8x1600xbf16>
    %c0_47 = arith.constant 0 : index
    %c0_48 = arith.constant 0 : index
    %95 = vector.load %arg25[%c0_47, %c0_48] : memref<1600x512xbf16, #tpu.memory_space<vmem>>, vector<1600x512xbf16>
    %cst_49 = arith.constant dense<0.000000e+00> : vector<8x512xf32>
    %96 = tpu.matmul %94, %95, %cst_49 {dimension_numbers = #tpu.dot_dimension_numbers<[1], [0], [0], [1], [0, 0, 1, 1], [], []>} : vector<8x1600xbf16>, vector<1600x512xbf16>, vector<8x512xf32> -> vector<8x512xf32>
    %c0_50 = arith.constant 0 : index
    %c0_51 = arith.constant 0 : index
    %97 = vector.load %arg9[%c0_50, %c0_51] : memref<1x512xf32, #tpu.memory_space<vmem>>, vector<1x512xf32>
    %98 = vector.broadcast %97 : vector<1x512xf32> to vector<8x512xf32>
    %99 = arith.addf %96, %98 : vector<8x512xf32>
    %cst_52 = arith.constant 0.000000e+00 : f32
    %100 = vector.broadcast %cst_52 : f32 to vector<8x512xf32>
    %101 = arith.maximumf %99, %100 : vector<8x512xf32>
    %102 = vector.extract_strided_slice %101 {offsets = [0, 0], sizes = [8, 256], strides = [1, 1]} : vector<8x512xf32> to vector<8x256xf32>
    %103 = arith.truncf %102 : vector<8x256xf32> to vector<8x256xbf16>
    %c0_53 = arith.constant 0 : index
    %c0_54 = arith.constant 0 : index
    %104 = vector.load %arg10[%c0_53, %c0_54] : memref<256x256xbf16, #tpu.memory_space<vmem>>, vector<256x256xbf16>
    %cst_55 = arith.constant dense<0.000000e+00> : vector<8x256xf32>
    %105 = tpu.matmul %103, %104, %cst_55 {dimension_numbers = #tpu.dot_dimension_numbers<[1], [0], [0], [1], [0, 0, 1, 1], [], []>} : vector<8x256xbf16>, vector<256x256xbf16>, vector<8x256xf32> -> vector<8x256xf32>
    %c0_56 = arith.constant 0 : index
    %c0_57 = arith.constant 0 : index
    %106 = vector.load %arg11[%c0_56, %c0_57] : memref<1x256xf32, #tpu.memory_space<vmem>>, vector<1x256xf32>
    %107 = vector.broadcast %106 : vector<1x256xf32> to vector<8x256xf32>
    %108 = arith.addf %105, %107 : vector<8x256xf32>
    %cst_58 = arith.constant 0.000000e+00 : f32
    %109 = vector.broadcast %cst_58 : f32 to vector<8x256xf32>
    %110 = arith.maximumf %108, %109 : vector<8x256xf32>
    %111 = arith.truncf %110 : vector<8x256xf32> to vector<8x256xbf16>
    %c0_59 = arith.constant 0 : index
    %c0_60 = arith.constant 0 : index
    %112 = vector.load %arg12[%c0_59, %c0_60] : memref<256x256xbf16, #tpu.memory_space<vmem>>, vector<256x256xbf16>
    %cst_61 = arith.constant dense<0.000000e+00> : vector<8x256xf32>
    %113 = tpu.matmul %111, %112, %cst_61 {dimension_numbers = #tpu.dot_dimension_numbers<[1], [0], [0], [1], [0, 0, 1, 1], [], []>} : vector<8x256xbf16>, vector<256x256xbf16>, vector<8x256xf32> -> vector<8x256xf32>
    %c0_62 = arith.constant 0 : index
    %c0_63 = arith.constant 0 : index
    %114 = vector.load %arg13[%c0_62, %c0_63] : memref<1x256xf32, #tpu.memory_space<vmem>>, vector<1x256xf32>
    %115 = vector.broadcast %114 : vector<1x256xf32> to vector<8x256xf32>
    %116 = arith.addf %113, %115 : vector<8x256xf32>
    %cst_64 = arith.constant 0.000000e+00 : f32
    %117 = vector.broadcast %cst_64 : f32 to vector<8x256xf32>
    %118 = arith.maximumf %116, %117 : vector<8x256xf32>
    %119 = arith.truncf %118 : vector<8x256xf32> to vector<8x256xbf16>
    %c0_65 = arith.constant 0 : index
    %c0_66 = arith.constant 0 : index
    %120 = vector.load %arg14[%c0_65, %c0_66] : memref<256x256xbf16, #tpu.memory_space<vmem>>, vector<256x256xbf16>
    %cst_67 = arith.constant dense<0.000000e+00> : vector<8x256xf32>
    %121 = tpu.matmul %119, %120, %cst_67 {dimension_numbers = #tpu.dot_dimension_numbers<[1], [0], [0], [1], [0, 0, 1, 1], [], []>} : vector<8x256xbf16>, vector<256x256xbf16>, vector<8x256xf32> -> vector<8x256xf32>
    %c0_68 = arith.constant 0 : index
    %c0_69 = arith.constant 0 : index
    %122 = vector.load %arg15[%c0_68, %c0_69] : memref<1x256xf32, #tpu.memory_space<vmem>>, vector<1x256xf32>
    %123 = vector.broadcast %122 : vector<1x256xf32> to vector<8x256xf32>
    %124 = arith.addf %121, %123 : vector<8x256xf32>
    %cst_70 = arith.constant 0.000000e+00 : f32
    %125 = vector.broadcast %cst_70 : f32 to vector<8x256xf32>
    %126 = arith.maximumf %124, %125 : vector<8x256xf32>
    %127 = arith.truncf %126 : vector<8x256xf32> to vector<8x256xbf16>
    %c0_71 = arith.constant 0 : index
    %c0_72 = arith.constant 0 : index
    %128 = vector.load %arg16[%c0_71, %c0_72] : memref<256x4xbf16, #tpu.memory_space<vmem>>, vector<256x4xbf16>
    %cst_73 = arith.constant dense<0.000000e+00> : vector<8x4xf32>
    %129 = tpu.matmul %127, %128, %cst_73 {dimension_numbers = #tpu.dot_dimension_numbers<[1], [0], [0], [1], [0, 0, 1, 1], [], []>} : vector<8x256xbf16>, vector<256x4xbf16>, vector<8x4xf32> -> vector<8x4xf32>
    %c0_74 = arith.constant 0 : index
    %c0_75 = arith.constant 0 : index
    %130 = vector.load %arg17[%c0_74, %c0_75] : memref<1x4xf32, #tpu.memory_space<vmem>>, vector<1x4xf32>
    %131 = vector.broadcast %130 : vector<1x4xf32> to vector<8x4xf32>
    %132 = arith.addf %129, %131 : vector<8x4xf32>
    %133 = vector.extract_strided_slice %101 {offsets = [0, 256], sizes = [8, 256], strides = [1, 1]} : vector<8x512xf32> to vector<8x256xf32>
    %134 = arith.truncf %133 : vector<8x256xf32> to vector<8x256xbf16>
    %c0_76 = arith.constant 0 : index
    %c0_77 = arith.constant 0 : index
    %135 = vector.load %arg18[%c0_76, %c0_77] : memref<256x256xbf16, #tpu.memory_space<vmem>>, vector<256x256xbf16>
    %cst_78 = arith.constant dense<0.000000e+00> : vector<8x256xf32>
    %136 = tpu.matmul %134, %135, %cst_78 {dimension_numbers = #tpu.dot_dimension_numbers<[1], [0], [0], [1], [0, 0, 1, 1], [], []>} : vector<8x256xbf16>, vector<256x256xbf16>, vector<8x256xf32> -> vector<8x256xf32>
    %c0_79 = arith.constant 0 : index
    %c0_80 = arith.constant 0 : index
    %137 = vector.load %arg19[%c0_79, %c0_80] : memref<1x256xf32, #tpu.memory_space<vmem>>, vector<1x256xf32>
    %138 = vector.broadcast %137 : vector<1x256xf32> to vector<8x256xf32>
    %139 = arith.addf %136, %138 : vector<8x256xf32>
    %cst_81 = arith.constant 0.000000e+00 : f32
    %140 = vector.broadcast %cst_81 : f32 to vector<8x256xf32>
    %141 = arith.maximumf %139, %140 : vector<8x256xf32>
    %142 = arith.truncf %141 : vector<8x256xf32> to vector<8x256xbf16>
    %c0_82 = arith.constant 0 : index
    %c0_83 = arith.constant 0 : index
    %143 = vector.load %arg20[%c0_82, %c0_83] : memref<256x1xbf16, #tpu.memory_space<vmem>>, vector<256x1xbf16>
    %cst_84 = arith.constant dense<0.000000e+00> : vector<8x1xf32>
    %144 = tpu.matmul %142, %143, %cst_84 {dimension_numbers = #tpu.dot_dimension_numbers<[1], [0], [0], [1], [0, 0, 1, 1], [], []>} : vector<8x256xbf16>, vector<256x1xbf16>, vector<8x1xf32> -> vector<8x1xf32>
    %c0_85 = arith.constant 0 : index
    %c0_86 = arith.constant 0 : index
    %145 = vector.load %arg21[%c0_85, %c0_86] : memref<1x1xf32, #tpu.memory_space<vmem>>, vector<1x1xf32>
    %146 = vector.broadcast %145 : vector<1x1xf32> to vector<8x1xf32>
    %147 = arith.addf %144, %146 : vector<8x1xf32>
    %c0_87 = arith.constant 0 : index
    %c0_88 = arith.constant 0 : index
    %148 = vector.load %arg22[%c0_87, %c0_88] : memref<1x4xf32, #tpu.memory_space<vmem>>, vector<1x4xf32>
    %c0_89 = arith.constant 0 : index
    %c0_90 = arith.constant 0 : index
    %149 = vector.load %arg23[%c0_89, %c0_90] : memref<8x4xf32, #tpu.memory_space<vmem>>, vector<8x4xf32>
    %150 = arith.subf %149, %132 : vector<8x4xf32>
    %cst_91 = arith.constant 0.000000e+00 : f32
    %151 = vector.broadcast %cst_91 : f32 to vector<1x4xf32>
    %152 = arith.subf %151, %148 : vector<1x4xf32>
    %153 = math.exp %152 : vector<1x4xf32>
    %154 = vector.broadcast %153 : vector<1x4xf32> to vector<8x4xf32>
    %155 = arith.mulf %150, %154 : vector<8x4xf32>
    %cst_92 = arith.constant -5.000000e-01 : f32
    %156 = vector.broadcast %cst_92 : f32 to vector<8x4xf32>
    %157 = arith.mulf %156, %155 : vector<8x4xf32>
    %158 = arith.mulf %157, %155 : vector<8x4xf32>
    %159 = vector.broadcast %148 : vector<1x4xf32> to vector<8x4xf32>
    %160 = arith.subf %158, %159 : vector<8x4xf32>
    %cst_93 = arith.constant 0.918938517 : f32
    %161 = vector.broadcast %cst_93 : f32 to vector<8x4xf32>
    %162 = arith.subf %160, %161 : vector<8x4xf32>
    %cst_94 = arith.constant dense<0.000000e+00> : vector<8xf32>
    %163 = vector.multi_reduction <add>, %162, %cst_94 [1] : vector<8x4xf32> to vector<8xf32>
    %164 = vector.shape_cast %163 : vector<8xf32> to vector<8x1xf32>
    %cst_95 = arith.constant 0.000000e+00 : f32
    %165 = vector.broadcast %cst_95 : f32 to vector<8x2xf32>
    %166 = tpu.concatenate %132, %147, %164, %165 in 1 : vector<8x4xf32>, vector<8x1xf32>, vector<8x1xf32>, vector<8x2xf32> -> vector<8x8xf32>
    %c0_96 = arith.constant 0 : index
    %c0_97 = arith.constant 0 : index
    %167 = vector.load %arg24[%c0_96, %c0_97] : memref<8x8xf32, #tpu.memory_space<vmem>>, vector<8x8xf32>
    tpu.vector_store %arg24[%c0_96, %c0_97], %166 {strides = array<i32>} : memref<8x8xf32, #tpu.memory_space<vmem>>, vector<8x8xf32>,
    return
  }
  func.func @transform_0(%arg0: i32) -> (i32, i32) {
    %c0_i32 = arith.constant 0 : i32
    %c0_i32_0 = arith.constant 0 : i32
    %c0_i32_1 = arith.constant 0 : i32
    return %c0_i32, %c0_i32_0 : i32, i32
  }
  func.func @transform_1(%arg0: i32) -> (i32, i32) {
    %c0_i32 = arith.constant 0 : i32
    %c0_i32_0 = arith.constant 0 : i32
    %c0_i32_1 = arith.constant 0 : i32
    return %c0_i32, %c0_i32_0 : i32, i32
  }
  func.func @transform_2(%arg0: i32) -> (i32, i32) {
    %c0_i32 = arith.constant 0 : i32
    %c0_i32_0 = arith.constant 0 : i32
    %c0_i32_1 = arith.constant 0 : i32
    return %c0_i32, %c0_i32_0 : i32, i32
  }
  func.func @transform_3(%arg0: i32) -> (i32, i32) {
    %c0_i32 = arith.constant 0 : i32
    %c0_i32_0 = arith.constant 0 : i32
    %c0_i32_1 = arith.constant 0 : i32
    return %c0_i32, %c0_i32_0 : i32, i32
  }
  func.func @transform_4(%arg0: i32) -> (i32, i32) {
    %c0_i32 = arith.constant 0 : i32
    %c0_i32_0 = arith.constant 0 : i32
    %c0_i32_1 = arith.constant 0 : i32
    return %c0_i32, %c0_i32_0 : i32, i32
  }
  func.func @transform_5(%arg0: i32) -> (i32, i32) {
    %c0_i32 = arith.constant 0 : i32
    %c0_i32_0 = arith.constant 0 : i32
    %c0_i32_1 = arith.constant 0 : i32
    return %c0_i32, %c0_i32_0 : i32, i32
  }
  func.func @transform_6(%arg0: i32) -> (i32, i32) {
    %c0_i32 = arith.constant 0 : i32
    %c0_i32_0 = arith.constant 0 : i32
    %c0_i32_1 = arith.constant 0 : i32
    return %c0_i32, %c0_i32_0 : i32, i32
  }
  func.func @transform_8(%arg0: i32) -> (i32, i32) {
    %c0_i32 = arith.constant 0 : i32
    %c0_i32_0 = arith.constant 0 : i32
    %c0_i32_1 = arith.constant 0 : i32
    return %c0_i32, %c0_i32_0 : i32, i32
  }
  func.func @transform_9(%arg0: i32) -> (i32, i32) {
    %c0_i32 = arith.constant 0 : i32
    %c0_i32_0 = arith.constant 0 : i32
    %c0_i32_1 = arith.constant 0 : i32
    return %c0_i32, %c0_i32_0 : i32, i32
  }
  func.func @transform_10(%arg0: i32) -> (i32, i32) {
    %c0_i32 = arith.constant 0 : i32
    %c0_i32_0 = arith.constant 0 : i32
    %c0_i32_1 = arith.constant 0 : i32
    return %c0_i32, %c0_i32_0 : i32, i32
  }
  func.func @transform_11(%arg0: i32) -> (i32, i32) {
    %c0_i32 = arith.constant 0 : i32
    %c0_i32_0 = arith.constant 0 : i32
    %c0_i32_1 = arith.constant 0 : i32
    return %c0_i32, %c0_i32_0 : i32, i32
  }
  func.func @transform_12(%arg0: i32) -> (i32, i32) {
    %c0_i32 = arith.constant 0 : i32
    %c0_i32_0 = arith.constant 0 : i32
    %c0_i32_1 = arith.constant 0 : i32
    return %c0_i32, %c0_i32_0 : i32, i32
  }
  func.func @transform_13(%arg0: i32) -> (i32, i32) {
    %c0_i32 = arith.constant 0 : i32
    %c0_i32_0 = arith.constant 0 : i32
    %c0_i32_1 = arith.constant 0 : i32
    return %c0_i32, %c0_i32_0 : i32, i32
  }
  func.func @transform_14(%arg0: i32) -> (i32, i32) {
    %c0_i32 = arith.constant 0 : i32
    %c0_i32_0 = arith.constant 0 : i32
    %c0_i32_1 = arith.constant 0 : i32
    return %c0_i32, %c0_i32_0 : i32, i32
  }
  func.func @transform_15(%arg0: i32) -> (i32, i32) {
    %c0_i32 = arith.constant 0 : i32
    %c0_i32_0 = arith.constant 0 : i32
    %c0_i32_1 = arith.constant 0 : i32
    return %c0_i32, %c0_i32_0 : i32, i32
  }
  func.func @transform_16(%arg0: i32) -> (i32, i32) {
    %c0_i32 = arith.constant 0 : i32
    %c0_i32_0 = arith.constant 0 : i32
    %c0_i32_1 = arith.constant 0 : i32
    return %c0_i32, %c0_i32_0 : i32, i32
  }
  func.func @transform_17(%arg0: i32) -> (i32, i32) {
    %c0_i32 = arith.constant 0 : i32
    %c0_i32_0 = arith.constant 0 : i32
    %c0_i32_1 = arith.constant 0 : i32
    return %c0_i32, %c0_i32_0 : i32, i32
  }
  func.func @transform_18(%arg0: i32) -> (i32, i32) {
    %c0_i32 = arith.constant 0 : i32
    %c0_i32_0 = arith.constant 0 : i32
    %c0_i32_1 = arith.constant 0 : i32
    return %c0_i32, %c0_i32_0 : i32, i32
  }
  func.func @transform_19(%arg0: i32) -> (i32, i32) {
    %c0_i32 = arith.constant 0 : i32
    %c0_i32_0 = arith.constant 0 : i32
    %c0_i32_1 = arith.constant 0 : i32
    return %c0_i32, %c0_i32_0 : i32, i32
  }
  func.func @transform_20(%arg0: i32) -> (i32, i32) {
    %c0_i32 = arith.constant 0 : i32
    %c0_i32_0 = arith.constant 0 : i32
    %c0_i32_1 = arith.constant 0 : i32
    return %c0_i32, %c0_i32_0 : i32, i32
  }
  func.func @transform_21(%arg0: i32) -> (i32, i32) {
    %c0_i32 = arith.constant 0 : i32
    %c0_i32_0 = arith.constant 0 : i32
    %c0_i32_1 = arith.constant 0 : i32
    return %c0_i32, %c0_i32_0 : i32, i32
  }
  func.func @transform_22(%arg0: i32) -> (i32, i32) {
    %c0_i32 = arith.constant 0 : i32
    %c0_i32_0 = arith.constant 0 : i32
    %c0_i32_1 = arith.constant 0 : i32
    return %c0_i32, %c0_i32_0 : i32, i32
  }
  func.func @transform_23(%arg0: i32) -> (i32, i32) {
    %c0_i32 = arith.constant 0 : i32
    %c0_i32_0 = arith.constant 0 : i32
    %c0_i32_1 = arith.constant 0 : i32
    return %c0_i32, %c0_i32_0 : i32, i32
  }
}

</mosaic_0001>

<bundles_post_ra>
// kernel: forward.1
= control target key start
LH: loop header
LB: loop body
LE: loop exit
PB: predicated region body
PF: predicated region fallthrough
CT: control target
= control target key end

     0   :  { %s20671_s0 = inlined_call_operand.vmem [shape: f32[2080,12], index: 0, kind: input, shape index: {}]   ;;  %s20672_s1 = inlined_call_operand.vmem [shape: f32[12,16], index: 1, kind: input, shape index: {}]   ;;  %s20673_s2 = inlined_call_operand.vmem [shape: f32[1,16], index: 2, kind: input, shape index: {}]   ;;  %s20674_s3 = inlined_call_operand.vmem [shape: f32[64,32], index: 3, kind: input, shape index: {}]   ;;  %s20675_s4 = inlined_call_operand.vmem [shape: f32[1,32], index: 4, kind: input, shape index: {}]   ;;  %s20676_s5 = inlined_call_operand.vmem [shape: f32[128,64], index: 5, kind: input, shape index: {}]   ;;  %s20677_s6 = inlined_call_operand.vmem [shape: f32[1,64], index: 6, kind: input, shape index: {}]   ;;  %s20678_s7 = inlined_call_operand.vmem [shape: bf16[1600,512], index: 7, kind: input, shape index: {}]   ;;  %s20679_s8 = inlined_call_operand.vmem [shape: f32[1,512], index: 8, kind: input, shape index: {}]   ;;  %s20680_s9 = inlined_call_operand.vmem [shape: bf16[256,256], index: 9, kind: input, shape index: {}]   ;;  %s20681_s10 = inlined_call_operand.vmem [shape: f32[1,256], index: 10, kind: input, shape index: {}]   ;;  %s20682_s11 = inlined_call_operand.vmem [shape: bf16[256,256], index: 11, kind: input, shape index: {}]   ;;  %s20683_s12 = inlined_call_operand.vmem [shape: f32[1,256], index: 12, kind: input, shape index: {}]   ;;  %s20684_s13 = inlined_call_operand.vmem [shape: bf16[256,256], index: 13, kind: input, shape index: {}]   ;;  %s20685_s14 = inlined_call_operand.vmem [shape: f32[1,256], index: 14, kind: input, shape index: {}]   ;;  %s20686_s15 = inlined_call_operand.vmem [shape: bf16[256,4], index: 15, kind: input, shape index: {}]   ;;  %s20687_s16 = inlined_call_operand.vmem [shape: f32[1,4], index: 16, kind: input, shape index: {}]   ;;  %s20688_s17 = inlined_call_operand.vmem [shape: bf16[256,256], index: 17, kind: input, shape index: {}]   ;;  %s20689_s18 = inlined_call_operand.vmem [shape: f32[1,256], index: 18, kind: input, shape index: {}]   ;;  %s20690_s19 = inlined_call_operand.vmem [shape: bf16[256,1], index: 19, kind: input, shape index: {}]   ;;  %s20691_s20 = inlined_call_operand.<no memory space> [shape: f32[1,1], index: 20, kind: input, shape index: {}]   ;;  %s20692_s21 = inlined_call_operand.vmem [shape: f32[1,4], index: 21, kind: input, shape index: {}]   ;;  %s20693_s22 = inlined_call_operand.vmem [shape: f32[8,4], index: 22, kind: input, shape index: {}]   ;;  %s20694_s23 = inlined_call_operand.vmem [shape: f32[8,8], index: 23, kind: output, shape index: {}]  }
   0x1   :  { %21126 = sst [smem:[#allocation493_spill]] %s20671_s0  ;;  %v28_v0 = vstv %s20691_s20 }
   0x2   :  { %21127 = sst [smem:[#allocation494_spill]] %s20672_s1  ;;  %29 = vst [vmem:[#allocation5] sm:$0x1] %v28_v0 }
   0x3   :  { %21128 = sst [smem:[#allocation495_spill]] %s20673_s2 }
   0x4   :  { %21129 = sst [smem:[#allocation496_spill]] %s20674_s3 }
   0x5   :  { %21130 = sst [smem:[#allocation497_spill]] %s20675_s4 }
   0x6   :  { %21131 = sst [smem:[#allocation498_spill]] %s20676_s5 }
   0x7   :  { %21132 = sst [smem:[#allocation499_spill]] %s20677_s6 }
   0x8   :  { %21133 = sst [smem:[#allocation500_spill]] %s20678_s7 }
   0x9   :  { %s21134_s5 = sld [smem:[#allocation500_spill]] }
   0xf   :  { %v13440_v1 = vld [vmem:[%s21134_s5] sm:$0xff]  ;;  %v13445_v2 = vld [vmem:[%s21134_s5 + $0x8] sm:$0xff]  ;;  %v13450_v3 = vld [vmem:[%s21134_s5 + $0x10] sm:$0xff] }
  0x10   :  { %21135 = vst [vmem:[#allocation8_spill] sm:$0xff] %v13440_v1  ;;  %21136 = vst [vmem:[#allocation9_spill] sm:$0xff] %v13445_v2  ;;  %v13455_v4 = vld [vmem:[%s21134_s5 + $0x18] sm:$0xff]  ;;  %v13460_v5 = vld [vmem:[%s21134_s5 + $0x20] sm:$0xff] }
  0x11   :  { %21137 = vst [vmem:[#allocation10_spill] sm:$0xff] %v13450_v3  ;;  %21138 = vst [vmem:[#allocation11_spill] sm:$0xff] %v13455_v4  ;;  %v13465_v6 = vld [vmem:[%s21134_s5 + $0x28] sm:$0xff]  ;;  %v13470_v7 = vld [vmem:[%s21134_s5 + $0x30] sm:$0xff] }
  0x12   :  { %21139 = vst [vmem:[#allocation12_spill] sm:$0xff] %v13460_v5  ;;  %21140 = vst [vmem:[#allocation13_spill] sm:$0xff] %v13465_v6  ;;  %v13475_v8 = vld [vmem:[%s21134_s5 + $0x38] sm:$0xff]  ;;  %v13480_v9 = vld [vmem:[%s21134_s5 + $0x40] sm:$0xff] }
  0x13   :  { %21141 = vst [vmem:[#allocation14_spill] sm:$0xff] %v13470_v7  ;;  %21142 = vst [vmem:[#allocation15_spill] sm:$0xff] %v13475_v8  ;;  %v13485_v10 = vld [vmem:[%s21134_s5 + $0x48] sm:$0xff]  ;;  %v13490_v11 = vld [vmem:[%s21134_s5 + $0x50] sm:$0xff] }
  0x14   :  { %21143 = vst [vmem:[#allocation16_spill] sm:$0xff] %v13480_v9  ;;  %21144 = vst [vmem:[#allocation17_spill] sm:$0xff] %v13485_v10  ;;  %v13495_v12 = vld [vmem:[%s21134_s5 + $0x58] sm:$0xff]  ;;  %v13500_v13 = vld [vmem:[%s21134_s5 + $0x60] sm:$0xff] }
  0x15   :  { %21145 = vst [vmem:[#allocation18_spill] sm:$0xff] %v13490_v11  ;;  %21146 = vst [vmem:[#allocation19_spill] sm:$0xff] %v13495_v12  ;;  %v13505_v14 = vld [vmem:[%s21134_s5 + $0x68] sm:$0xff]  ;;  %v13510_v15 = vld [vmem:[%s21134_s5 + $0x70] sm:$0xff] }
  0x16   :  { %21147 = vst [vmem:[#allocation20_spill] sm:$0xff] %v13500_v13  ;;  %21148 = vst [vmem:[#allocation21_spill] sm:$0xff] %v13505_v14  ;;  %v13515_v16 = vld [vmem:[%s21134_s5 + $0x78] sm:$0xff]  ;;  %v13520_v17 = vld [vmem:[%s21134_s5 + $0x80] sm:$0xff] }
  0x17   :  { %21149 = vst [vmem:[#allocation22_spill] sm:$0xff] %v13510_v15  ;;  %21150 = vst [vmem:[#allocation23_spill] sm:$0xff] %v13515_v16  ;;  %v13525_v18 = vld [vmem:[%s21134_s5 + $0x88] sm:$0xff]  ;;  %v13530_v19 = vld [vmem:[%s21134_s5 + $0x90] sm:$0xff] }
  0x18   :  { %21151 = vst [vmem:[#allocation24_spill] sm:$0xff] %v13520_v17  ;;  %21152 = vst [vmem:[#allocation25_spill] sm:$0xff] %v13525_v18  ;;  %v13535_v20 = vld [vmem:[%s21134_s5 + $0x98] sm:$0xff]  ;;  %v13540_v21 = vld [vmem:[%s21134_s5 + $0xa0] sm:$0xff] }
  0x19   :  { %21153 = vst [vmem:[#allocation26_spill] sm:$0xff] %v13530_v19  ;;  %21154 = vst [vmem:[#allocation27_spill] sm:$0xff] %v13535_v20  ;;  %v13545_v22 = vld [vmem:[%s21134_s5 + $0xa8] sm:$0xff]  ;;  %v13550_v23 = vld [vmem:[%s21134_s5 + $0xb0] sm:$0xff] }
  0x1a   :  { %21155 = vst [vmem:[#allocation28_spill] sm:$0xff] %v13540_v21  ;;  %21156 = vst [vmem:[#allocation29_spill] sm:$0xff] %v13545_v22  ;;  %v13555_v24 = vld [vmem:[%s21134_s5 + $0xb8] sm:$0xff]  ;;  %v13560_v25 = vld [vmem:[%s21134_s5 + $0xc0] sm:$0xff] }
  0x1b   :  { %21157 = vst [vmem:[#allocation30_spill] sm:$0xff] %v13550_v23  ;;  %21158 = vst [vmem:[#allocation31_spill] sm:$0xff] %v13555_v24  ;;  %v13565_v26 = vld [vmem:[%s21134_s5 + $0xc8] sm:$0xff]  ;;  %v13570_v27 = vld [vmem:[%s21134_s5 + $0xd0] sm:$0xff] }
  0x1c   :  { %21159 = vst [vmem:[#allocation32_spill] sm:$0xff] %v13560_v25  ;;  %21160 = vst [vmem:[#allocation33_spill] sm:$0xff] %v13565_v26  ;;  %v13575_v28 = vld [vmem:[%s21134_s5 + $0xd8] sm:$0xff]  ;;  %v13580_v29 = vld [vmem:[%s21134_s5 + $0xe0] sm:$0xff] }
  0x1d   :  { %21161 = vst [vmem:[#allocation34_spill] sm:$0xff] %v13570_v27  ;;  %21162 = vst [vmem:[#allocation35_spill] sm:$0xff] %v13575_v28  ;;  %v13585_v30 = vld [vmem:[%s21134_s5 + $0xe8] sm:$0xff]  ;;  %v13590_v31 = vld [vmem:[%s21134_s5 + $0xf0] sm:$0xff] }
  0x1e   :  { %21163 = vst [vmem:[#allocation36_spill] sm:$0xff] %v13580_v29  ;;  %21164 = vst [vmem:[#allocation37_spill] sm:$0xff] %v13585_v30  ;;  %v13595_v32 = vld [vmem:[%s21134_s5 + $0xf8] sm:$0xff]  ;;  %v13600_v33 = vld [vmem:[%s21134_s5 + $0x100] sm:$0xff] }
  0x1f   :  { %21165 = vst [vmem:[#allocation38_spill] sm:$0xff] %v13590_v31  ;;  %21166 = vst [vmem:[#allocation39_spill] sm:$0xff] %v13595_v32  ;;  %v13605_v34 = vld [vmem:[%s21134_s5 + $0x108] sm:$0xff]  ;;  %v13610_v35 = vld [vmem:[%s21134_s5 + $0x110] sm:$0xff] }
  0x20   :  { %21167 = vst [vmem:[#allocation40_spill] sm:$0xff] %v13600_v33  ;;  %21168 = vst [vmem:[#allocation41_spill] sm:$0xff] %v13605_v34  ;;  %v13615_v36 = vld [vmem:[%s21134_s5 + $0x118] sm:$0xff]  ;;  %v13620_v37 = vld [vmem:[%s21134_s5 + $0x120] sm:$0xff] }
  0x21   :  { %21169 = vst [vmem:[#allocation42_spill] sm:$0xff] %v13610_v35  ;;  %21170 = vst [vmem:[#allocation43_spill] sm:$0xff] %v13615_v36  ;;  %v13625_v38 = vld [vmem:[%s21134_s5 + $0x128] sm:$0xff]  ;;  %v13630_v39 = vld [vmem:[%s21134_s5 + $0x130] sm:$0xff] }
  0x22   :  { %21171 = vst [vmem:[#allocation44_spill] sm:$0xff] %v13620_v37  ;;  %21172 = vst [vmem:[#allocation45_spill] sm:$0xff] %v13625_v38  ;;  %v13635_v40 = vld [vmem:[%s21134_s5 + $0x138] sm:$0xff]  ;;  %v13640_v41 = vld [vmem:[%s21134_s5 + $0x140] sm:$0xff] }
  0x23   :  { %21173 = vst [vmem:[#allocation46_spill] sm:$0xff] %v13630_v39  ;;  %21174 = vst [vmem:[#allocation47_spill] sm:$0xff] %v13635_v40  ;;  %v13645_v42 = vld [vmem:[%s21134_s5 + $0x148] sm:$0xff]  ;;  %v13650_v43 = vld [vmem:[%s21134_s5 + $0x150] sm:$0xff] }
  0x24   :  { %21175 = vst [vmem:[#allocation48_spill] sm:$0xff] %v13640_v41  ;;  %21176 = vst [vmem:[#allocation49_spill] sm:$0xff] %v13645_v42  ;;  %v13655_v44 = vld [vmem:[%s21134_s5 + $0x158] sm:$0xff]  ;;  %v13660_v45 = vld [vmem:[%s21134_s5 + $0x160] sm:$0xff] }
  0x25   :  { %21177 = vst [vmem:[#allocation50_spill] sm:$0xff] %v13650_v43  ;;  %21178 = vst [vmem:[#allocation51_spill] sm:$0xff] %v13655_v44  ;;  %v13665_v46 = vld [vmem:[%s21134_s5 + $0x168] sm:$0xff]  ;;  %v13670_v47 = vld [vmem:[%s21134_s5 + $0x170] sm:$0xff] }
  0x26   :  { %21179 = vst [vmem:[#allocation52_spill] sm:$0xff] %v13660_v45  ;;  %21180 = vst [vmem:[#allocation53_spill] sm:$0xff] %v13665_v46  ;;  %v13675_v48 = vld [vmem:[%s21134_s5 + $0x178] sm:$0xff]  ;;  %v13680_v49 = vld [vmem:[%s21134_s5 + $0x180] sm:$0xff] }
  0x27   :  { %21181 = vst [vmem:[#allocation54_spill] sm:$0xff] %v13670_v47  ;;  %21182 = vst [vmem:[#allocation55_spill] sm:$0xff] %v13675_v48  ;;  %v13685_v50 = vld [vmem:[%s21134_s5 + $0x188] sm:$0xff]  ;;  %v13690_v51 = vld [vmem:[%s21134_s5 + $0x190] sm:$0xff] }
  0x28   :  { %21183 = vst [vmem:[#allocation56_spill] sm:$0xff] %v13680_v49  ;;  %21184 = vst [vmem:[#allocation57_spill] sm:$0xff] %v13685_v50  ;;  %v13695_v52 = vld [vmem:[%s21134_s5 + $0x198] sm:$0xff]  ;;  %v13700_v53 = vld [vmem:[%s21134_s5 + $0x1a0] sm:$0xff] }
  0x29   :  { %21185 = vst [vmem:[#allocation58_spill] sm:$0xff] %v13690_v51  ;;  %21186 = vst [vmem:[#allocation59_spill] sm:$0xff] %v13695_v52  ;;  %v13705_v54 = vld [vmem:[%s21134_s5 + $0x1a8] sm:$0xff]  ;;  %v13710_v55 = vld [vmem:[%s21134_s5 + $0x1b0] sm:$0xff] }
  0x2a   :  { %21187 = vst [vmem:[#allocation60_spill] sm:$0xff] %v13700_v53  ;;  %21188 = vst [vmem:[#allocation61_spill] sm:$0xff] %v13705_v54  ;;  %v13715_v56 = vld [vmem:[%s21134_s5 + $0x1b8] sm:$0xff]  ;;  %v13720_v57 = vld [vmem:[%s21134_s5 + $0x1c0] sm:$0xff] }
  0x2b   :  { %21189 = vst [vmem:[#allocation62_spill] sm:$0xff] %v13710_v55  ;;  %21190 = vst [vmem:[#allocation63_spill] sm:$0xff] %v13715_v56  ;;  %v13725_v58 = vld [vmem:[%s21134_s5 + $0x1c8] sm:$0xff]  ;;  %v13730_v59 = vld [vmem:[%s21134_s5 + $0x1d0] sm:$0xff] }
  0x2c   :  { %21191 = vst [vmem:[#allocation64_spill] sm:$0xff] %v13720_v57  ;;  %21192 = vst [vmem:[#allocation65_spill] sm:$0xff] %v13725_v58  ;;  %v13735_v60 = vld [vmem:[%s21134_s5 + $0x1d8] sm:$0xff]  ;;  %v13740_v61 = vld [vmem:[%s21134_s5 + $0x1e0] sm:$0xff] }
  0x2d   :  { %21193 = vst [vmem:[#allocation66_spill] sm:$0xff] %v13730_v59  ;;  %21194 = vst [vmem:[#allocation67_spill] sm:$0xff] %v13735_v60  ;;  %v13745_v62 = vld [vmem:[%s21134_s5 + $0x1e8] sm:$0xff]  ;;  %v13750_v63 = vld [vmem:[%s21134_s5 + $0x1f0] sm:$0xff] }
  0x2e   :  { %21195 = vst [vmem:[#allocation68_spill] sm:$0xff] %v13740_v61  ;;  %21196 = vst [vmem:[#allocation69_spill] sm:$0xff] %v13745_v62  ;;  %v13755_v0 = vld [vmem:[%s21134_s5 + $0x1f8] sm:$0xff]  ;;  %v13760_v34 = vld [vmem:[%s21134_s5 + $0x200] sm:$0xff] }
  0x2f   :  { %21197 = vst [vmem:[#allocation70_spill] sm:$0xff] %v13750_v63  ;;  %21198 = vst [vmem:[#allocation71_spill] sm:$0xff] %v13755_v0  ;;  %v13765_v36 = vld [vmem:[%s21134_s5 + $0x208] sm:$0xff]  ;;  %v13770_v38 = vld [vmem:[%s21134_s5 + $0x210] sm:$0xff] }
  0x30   :  { %21199 = vst [vmem:[#allocation72_spill] sm:$0xff] %v13760_v34  ;;  %21200 = vst [vmem:[#allocation73_spill] sm:$0xff] %v13765_v36  ;;  %v13775_v40 = vld [vmem:[%s21134_s5 + $0x218] sm:$0xff]  ;;  %v13780_v42 = vld [vmem:[%s21134_s5 + $0x220] sm:$0xff] }
  0x31   :  { %21201 = vst [vmem:[#allocation74_spill] sm:$0xff] %v13770_v38  ;;  %21202 = vst [vmem:[#allocation75_spill] sm:$0xff] %v13775_v40  ;;  %v13785_v44 = vld [vmem:[%s21134_s5 + $0x228] sm:$0xff]  ;;  %v13790_v36 = vld [vmem:[%s21134_s5 + $0x230] sm:$0xff] }
  0x32   :  { %21203 = vst [vmem:[#allocation76_spill] sm:$0xff] %v13780_v42  ;;  %21204 = vst [vmem:[#allocation77_spill] sm:$0xff] %v13785_v44  ;;  %v13795_v46 = vld [vmem:[%s21134_s5 + $0x238] sm:$0xff]  ;;  %v13800_v40 = vld [vmem:[%s21134_s5 + $0x240] sm:$0xff] }
  0x33   :  { %21205 = vst [vmem:[#allocation78_spill] sm:$0xff] %v13790_v36  ;;  %21206 = vst [vmem:[#allocation79_spill] sm:$0xff] %v13795_v46  ;;  %v13805_v48 = vld [vmem:[%s21134_s5 + $0x248] sm:$0xff]  ;;  %v13810_v44 = vld [vmem:[%s21134_s5 + $0x250] sm:$0xff] }
  0x34   :  { %21207 = vst [vmem:[#allocation80_spill] sm:$0xff] %v13800_v40  ;;  %21208 = vst [vmem:[#allocation81_spill] sm:$0xff] %v13805_v48  ;;  %v13815_v50 = vld [vmem:[%s21134_s5 + $0x258] sm:$0xff]  ;;  %v13820_v46 = vld [vmem:[%s21134_s5 + $0x260] sm:$0xff] }
  0x35   :  { %21209 = vst [vmem:[#allocation82_spill] sm:$0xff] %v13810_v44  ;;  %21210 = vst [vmem:[#allocation83_spill] sm:$0xff] %v13815_v50  ;;  %v13825_v52 = vld [vmem:[%s21134_s5 + $0x268] sm:$0xff]  ;;  %v13830_v48 = vld [vmem:[%s21134_s5 + $0x270] sm:$0xff] }
  0x36   :  { %21211 = vst [vmem:[#allocation84_spill] sm:$0xff] %v13820_v46  ;;  %21212 = vst [vmem:[#allocation85_spill] sm:$0xff] %v13825_v52  ;;  %v13835_v54 = vld [vmem:[%s21134_s5 + $0x278] sm:$0xff]  ;;  %v13840_v50 = vld [vmem:[%s21134_s5 + $0x280] sm:$0xff] }
  0x37   :  { %21213 = vst [vmem:[#allocation86_spill] sm:$0xff] %v13830_v48  ;;  %21214 = vst [vmem:[#allocation87_spill] sm:$0xff] %v13835_v54  ;;  %v13845_v56 = vld [vmem:[%s21134_s5 + $0x288] sm:$0xff]  ;;  %v13850_v52 = vld [vmem:[%s21134_s5 + $0x290] sm:$0xff] }
  0x38   :  { %21215 = vst [vmem:[#allocation88_spill] sm:$0xff] %v13840_v50  ;;  %21216 = vst [vmem:[#allocation89_spill] sm:$0xff] %v13845_v56  ;;  %v13855_v58 = vld [vmem:[%s21134_s5 + $0x298] sm:$0xff]  ;;  %v13860_v54 = vld [vmem:[%s21134_s5 + $0x2a0] sm:$0xff] }
  0x39   :  { %21217 = vst [vmem:[#allocation90_spill] sm:$0xff] %v13850_v52  ;;  %21218 = vst [vmem:[#allocation91_spill] sm:$0xff] %v13855_v58  ;;  %v13865_v60 = vld [vmem:[%s21134_s5 + $0x2a8] sm:$0xff]  ;;  %v13870_v56 = vld [vmem:[%s21134_s5 + $0x2b0] sm:$0xff] }
  0x3a   :  { %21219 = vst [vmem:[#allocation92_spill] sm:$0xff] %v13860_v54  ;;  %21220 = vst [vmem:[#allocation93_spill] sm:$0xff] %v13865_v60  ;;  %v13875_v62 = vld [vmem:[%s21134_s5 + $0x2b8] sm:$0xff]  ;;  %v13880_v58 = vld [vmem:[%s21134_s5 + $0x2c0] sm:$0xff] }
  0x3b   :  { %21221 = vst [vmem:[#allocation94_spill] sm:$0xff] %v13870_v56  ;;  %21222 = vst [vmem:[#allocation95_spill] sm:$0xff] %v13875_v62  ;;  %v13885_v0 = vld [vmem:[%s21134_s5 + $0x2c8] sm:$0xff]  ;;  %v13890_v60 = vld [vmem:[%s21134_s5 + $0x2d0] sm:$0xff] }
  0x3c   :  { %21223 = vst [vmem:[#allocation96_spill] sm:$0xff] %v13880_v58  ;;  %21224 = vst [vmem:[#allocation97_spill] sm:$0xff] %v13885_v0  ;;  %v13895_v2 = vld [vmem:[%s21134_s5 + $0x2d8] sm:$0xff]  ;;  %v13900_v62 = vld [vmem:[%s21134_s5 + $0x2e0] sm:$0xff] }
  0x3d   :  { %21225 = vst [vmem:[#allocation98_spill] sm:$0xff] %v13890_v60  ;;  %21226 = vst [vmem:[#allocation99_spill] sm:$0xff] %v13895_v2  ;;  %v13905_v4 = vld [vmem:[%s21134_s5 + $0x2e8] sm:$0xff]  ;;  %v13910_v0 = vld [vmem:[%s21134_s5 + $0x2f0] sm:$0xff] }
  0x3e   :  { %21227 = vst [vmem:[#allocation100_spill] sm:$0xff] %v13900_v62  ;;  %21228 = vst [vmem:[#allocation101_spill] sm:$0xff] %v13905_v4  ;;  %v13915_v6 = vld [vmem:[%s21134_s5 + $0x2f8] sm:$0xff]  ;;  %v13920_v2 = vld [vmem:[%s21134_s5 + $0x300] sm:$0xff] }
  0x3f   :  { %21229 = vst [vmem:[#allocation102_spill] sm:$0xff] %v13910_v0  ;;  %21230 = vst [vmem:[#allocation103_spill] sm:$0xff] %v13915_v6  ;;  %v13925_v8 = vld [vmem:[%s21134_s5 + $0x308] sm:$0xff]  ;;  %v13930_v4 = vld [vmem:[%s21134_s5 + $0x310] sm:$0xff] }
  0x40   :  { %21231 = vst [vmem:[#allocation104_spill] sm:$0xff] %v13920_v2  ;;  %21232 = vst [vmem:[#allocation105_spill] sm:$0xff] %v13925_v8  ;;  %v13935_v10 = vld [vmem:[%s21134_s5 + $0x318] sm:$0xff]  ;;  %v13940_v6 = vld [vmem:[%s21134_s5 + $0x320] sm:$0xff] }
  0x41   :  { %21233 = vst [vmem:[#allocation106_spill] sm:$0xff] %v13930_v4  ;;  %21234 = vst [vmem:[#allocation107_spill] sm:$0xff] %v13935_v10  ;;  %v13945_v12 = vld [vmem:[%s21134_s5 + $0x328] sm:$0xff]  ;;  %v13950_v8 = vld [vmem:[%s21134_s5 + $0x330] sm:$0xff] }
  0x42   :  { %21235 = vst [vmem:[#allocation108_spill] sm:$0xff] %v13940_v6  ;;  %21236 = vst [vmem:[#allocation109_spill] sm:$0xff] %v13945_v12  ;;  %v13955_v14 = vld [vmem:[%s21134_s5 + $0x338] sm:$0xff]  ;;  %v13960_v10 = vld [vmem:[%s21134_s5 + $0x340] sm:$0xff] }
  0x43   :  { %21237 = vst [vmem:[#allocation110_spill] sm:$0xff] %v13950_v8  ;;  %21238 = vst [vmem:[#allocation111_spill] sm:$0xff] %v13955_v14  ;;  %v13965_v16 = vld [vmem:[%s21134_s5 + $0x348] sm:$0xff]  ;;  %v13970_v12 = vld [vmem:[%s21134_s5 + $0x350] sm:$0xff] }
  0x44   :  { %21239 = vst [vmem:[#allocation112_spill] sm:$0xff] %v13960_v10  ;;  %21240 = vst [vmem:[#allocation113_spill] sm:$0xff] %v13965_v16  ;;  %v13975_v18 = vld [vmem:[%s21134_s5 + $0x358] sm:$0xff]  ;;  %v13980_v14 = vld [vmem:[%s21134_s5 + $0x360] sm:$0xff] }
  0x45   :  { %21241 = vst [vmem:[#allocation114_spill] sm:$0xff] %v13970_v12  ;;  %21242 = vst [vmem:[#allocation115_spill] sm:$0xff] %v13975_v18  ;;  %v13985_v20 = vld [vmem:[%s21134_s5 + $0x368] sm:$0xff]  ;;  %v13990_v16 = vld [vmem:[%s21134_s5 + $0x370] sm:$0xff] }
  0x46   :  { %21243 = vst [vmem:[#allocation116_spill] sm:$0xff] %v13980_v14  ;;  %21244 = vst [vmem:[#allocation117_spill] sm:$0xff] %v13985_v20  ;;  %v13995_v22 = vld [vmem:[%s21134_s5 + $0x378] sm:$0xff]  ;;  %v14000_v18 = vld [vmem:[%s21134_s5 + $0x380] sm:$0xff] }
  0x47   :  { %21245 = vst [vmem:[#allocation118_spill] sm:$0xff] %v13990_v16  ;;  %21246 = vst [vmem:[#allocation119_spill] sm:$0xff] %v13995_v22  ;;  %v14005_v24 = vld [vmem:[%s21134_s5 + $0x388] sm:$0xff]  ;;  %v14010_v20 = vld [vmem:[%s21134_s5 + $0x390] sm:$0xff] }
  0x48   :  { %21247 = vst [vmem:[#allocation120_spill] sm:$0xff] %v14000_v18  ;;  %21248 = vst [vmem:[#allocation121_spill] sm:$0xff] %v14005_v24  ;;  %v14015_v26 = vld [vmem:[%s21134_s5 + $0x398] sm:$0xff]  ;;  %v14020_v22 = vld [vmem:[%s21134_s5 + $0x3a0] sm:$0xff] }
  0x49   :  { %21249 = vst [vmem:[#allocation122_spill] sm:$0xff] %v14010_v20  ;;  %21250 = vst [vmem:[#allocation123_spill] sm:$0xff] %v14015_v26  ;;  %v14025_v28 = vld [vmem:[%s21134_s5 + $0x3a8] sm:$0xff]  ;;  %v14030_v24 = vld [vmem:[%s21134_s5 + $0x3b0] sm:$0xff] }
  0x4a   :  { %21251 = vst [vmem:[#allocation124_spill] sm:$0xff] %v14020_v22  ;;  %21252 = vst [vmem:[#allocation125_spill] sm:$0xff] %v14025_v28  ;;  %v14035_v30 = vld [vmem:[%s21134_s5 + $0x3b8] sm:$0xff]  ;;  %v14040_v26 = vld [vmem:[%s21134_s5 + $0x3c0] sm:$0xff] }
  0x4b   :  { %21253 = vst [vmem:[#allocation126_spill] sm:$0xff] %v14030_v24  ;;  %21254 = vst [vmem:[#allocation127_spill] sm:$0xff] %v14035_v30  ;;  %v14045_v32 = vld [vmem:[%s21134_s5 + $0x3c8] sm:$0xff]  ;;  %v14050_v28 = vld [vmem:[%s21134_s5 + $0x3d0] sm:$0xff] }
  0x4c   :  { %21255 = vst [vmem:[#allocation128_spill] sm:$0xff] %v14040_v26  ;;  %21256 = vst [vmem:[#allocation129_spill] sm:$0xff] %v14045_v32  ;;  %v14055_v2 = vld [vmem:[%s21134_s5 + $0x3d8] sm:$0xff]  ;;  %v14060_v30 = vld [vmem:[%s21134_s5 + $0x3e0] sm:$0xff] }
  0x4d   :  { %21257 = vst [vmem:[#allocation130_spill] sm:$0xff] %v14050_v28  ;;  %21258 = vst [vmem:[#allocation131_spill] sm:$0xff] %v14055_v2  ;;  %v14065_v4 = vld [vmem:[%s21134_s5 + $0x3e8] sm:$0xff]  ;;  %v14070_v32 = vld [vmem:[%s21134_s5 + $0x3f0] sm:$0xff] }
  0x4e   :  { %21259 = vst [vmem:[#allocation132_spill] sm:$0xff] %v14060_v30  ;;  %21260 = vst [vmem:[#allocation133_spill] sm:$0xff] %v14065_v4  ;;  %v14075_v6 = vld [vmem:[%s21134_s5 + $0x3f8] sm:$0xff]  ;;  %v14080_v2 = vld [vmem:[%s21134_s5 + $0x400] sm:$0xff] }
  0x4f   :  { %21261 = vst [vmem:[#allocation134_spill] sm:$0xff] %v14070_v32  ;;  %21262 = vst [vmem:[#allocation135_spill] sm:$0xff] %v14075_v6  ;;  %v14085_v8 = vld [vmem:[%s21134_s5 + $0x408] sm:$0xff]  ;;  %v14090_v4 = vld [vmem:[%s21134_s5 + $0x410] sm:$0xff] }
  0x50   :  { %21263 = vst [vmem:[#allocation136_spill] sm:$0xff] %v14080_v2  ;;  %21264 = vst [vmem:[#allocation137_spill] sm:$0xff] %v14085_v8  ;;  %v14095_v10 = vld [vmem:[%s21134_s5 + $0x418] sm:$0xff]  ;;  %v14100_v6 = vld [vmem:[%s21134_s5 + $0x420] sm:$0xff] }
  0x51   :  { %21265 = vst [vmem:[#allocation138_spill] sm:$0xff] %v14090_v4  ;;  %21266 = vst [vmem:[#allocation139_spill] sm:$0xff] %v14095_v10  ;;  %v14105_v12 = vld [vmem:[%s21134_s5 + $0x428] sm:$0xff]  ;;  %v14110_v8 = vld [vmem:[%s21134_s5 + $0x430] sm:$0xff] }
  0x52   :  { %21267 = vst [vmem:[#allocation140_spill] sm:$0xff] %v14100_v6  ;;  %21268 = vst [vmem:[#allocation141_spill] sm:$0xff] %v14105_v12  ;;  %v14115_v14 = vld [vmem:[%s21134_s5 + $0x438] sm:$0xff]  ;;  %v14120_v10 = vld [vmem:[%s21134_s5 + $0x440] sm:$0xff] }
  0x53   :  { %21269 = vst [vmem:[#allocation142_spill] sm:$0xff] %v14110_v8  ;;  %21270 = vst [vmem:[#allocation143_spill] sm:$0xff] %v14115_v14  ;;  %v14125_v16 = vld [vmem:[%s21134_s5 + $0x448] sm:$0xff]  ;;  %v14130_v12 = vld [vmem:[%s21134_s5 + $0x450] sm:$0xff] }
  0x54   :  { %21271 = vst [vmem:[#allocation144_spill] sm:$0xff] %v14120_v10  ;;  %21272 = vst [vmem:[#allocation145_spill] sm:$0xff] %v14125_v16  ;;  %v14135_v18 = vld [vmem:[%s21134_s5 + $0x458] sm:$0xff]  ;;  %v14140_v14 = vld [vmem:[%s21134_s5 + $0x460] sm:$0xff] }
  0x55   :  { %21273 = vst [vmem:[#allocation146_spill] sm:$0xff] %v14130_v12  ;;  %21274 = vst [vmem:[#allocation147_spill] sm:$0xff] %v14135_v18  ;;  %v14145_v20 = vld [vmem:[%s21134_s5 + $0x468] sm:$0xff]  ;;  %v14150_v16 = vld [vmem:[%s21134_s5 + $0x470] sm:$0xff] }
  0x56   :  { %21275 = vst [vmem:[#allocation148_spill] sm:$0xff] %v14140_v14  ;;  %21276 = vst [vmem:[#allocation149_spill] sm:$0xff] %v14145_v20  ;;  %v14155_v22 = vld [vmem:[%s21134_s5 + $0x478] sm:$0xff]  ;;  %v14160_v18 = vld [vmem:[%s21134_s5 + $0x480] sm:$0xff] }
  0x57   :  { %21277 = vst [vmem:[#allocation150_spill] sm:$0xff] %v14150_v16  ;;  %21278 = vst [vmem:[#allocation151_spill] sm:$0xff] %v14155_v22  ;;  %v14165_v24 = vld [vmem:[%s21134_s5 + $0x488] sm:$0xff]  ;;  %v14170_v20 = vld [vmem:[%s21134_s5 + $0x490] sm:$0xff] }
  0x58   :  { %21279 = vst [vmem:[#allocation152_spill] sm:$0xff] %v14160_v18  ;;  %21280 = vst [vmem:[#allocation153_spill] sm:$0xff] %v14165_v24  ;;  %v14175_v26 = vld [vmem:[%s21134_s5 + $0x498] sm:$0xff]  ;;  %v14180_v22 = vld [vmem:[%s21134_s5 + $0x4a0] sm:$0xff] }
  0x59   :  { %21281 = vst [vmem:[#allocation154_spill] sm:$0xff] %v14170_v20  ;;  %21282 = vst [vmem:[#allocation155_spill] sm:$0xff] %v14175_v26  ;;  %v14185_v28 = vld [vmem:[%s21134_s5 + $0x4a8] sm:$0xff]  ;;  %v14190_v24 = vld [vmem:[%s21134_s5 + $0x4b0] sm:$0xff] }
  0x5a   :  { %21283 = vst [vmem:[#allocation156_spill] sm:$0xff] %v14180_v22  ;;  %21284 = vst [vmem:[#allocation157_spill] sm:$0xff] %v14185_v28  ;;  %v14195_v30 = vld [vmem:[%s21134_s5 + $0x4b8] sm:$0xff]  ;;  %v14200_v26 = vld [vmem:[%s21134_s5 + $0x4c0] sm:$0xff] }
  0x5b   :  { %21285 = vst [vmem:[#allocation158_spill] sm:$0xff] %v14190_v24  ;;  %21286 = vst [vmem:[#allocation159_spill] sm:$0xff] %v14195_v30  ;;  %v14205_v32 = vld [vmem:[%s21134_s5 + $0x4c8] sm:$0xff]  ;;  %v14210_v28 = vld [vmem:[%s21134_s5 + $0x4d0] sm:$0xff] }
  0x5c   :  { %21287 = vst [vmem:[#allocation160_spill] sm:$0xff] %v14200_v26  ;;  %21288 = vst [vmem:[#allocation161_spill] sm:$0xff] %v14205_v32  ;;  %v14215_v34 = vld [vmem:[%s21134_s5 + $0x4d8] sm:$0xff]  ;;  %v14220_v30 = vld [vmem:[%s21134_s5 + $0x4e0] sm:$0xff] }
  0x5d   :  { %21289 = vst [vmem:[#allocation162_spill] sm:$0xff] %v14210_v28  ;;  %21290 = vst [vmem:[#allocation163_spill] sm:$0xff] %v14215_v34  ;;  %v14225_v38 = vld [vmem:[%s21134_s5 + $0x4e8] sm:$0xff]  ;;  %v14230_v32 = vld [vmem:[%s21134_s5 + $0x4f0] sm:$0xff] }
  0x5e   :  { %21291 = vst [vmem:[#allocation164_spill] sm:$0xff] %v14220_v30  ;;  %21292 = vst [vmem:[#allocation165_spill] sm:$0xff] %v14225_v38  ;;  %v14235_v42 = vld [vmem:[%s21134_s5 + $0x4f8] sm:$0xff]  ;;  %v14240_v34 = vld [vmem:[%s21134_s5 + $0x500] sm:$0xff] }
  0x5f   :  { %21293 = vst [vmem:[#allocation166_spill] sm:$0xff] %v14230_v32  ;;  %21294 = vst [vmem:[#allocation167_spill] sm:$0xff] %v14235_v42  ;;  %v14245_v36 = vld [vmem:[%s21134_s5 + $0x508] sm:$0xff]  ;;  %v14250_v38 = vld [vmem:[%s21134_s5 + $0x510] sm:$0xff] }
  0x60   :  { %21295 = vst [vmem:[#allocation168_spill] sm:$0xff] %v14240_v34  ;;  %21296 = vst [vmem:[#allocation169_spill] sm:$0xff] %v14245_v36  ;;  %v14255_v40 = vld [vmem:[%s21134_s5 + $0x518] sm:$0xff]  ;;  %v14260_v42 = vld [vmem:[%s21134_s5 + $0x520] sm:$0xff] }
  0x61   :  { %21297 = vst [vmem:[#allocation170_spill] sm:$0xff] %v14250_v38  ;;  %21298 = vst [vmem:[#allocation171_spill] sm:$0xff] %v14255_v40  ;;  %v14265_v44 = vld [vmem:[%s21134_s5 + $0x528] sm:$0xff]  ;;  %v14270_v36 = vld [vmem:[%s21134_s5 + $0x530] sm:$0xff] }
  0x62   :  { %21299 = vst [vmem:[#allocation172_spill] sm:$0xff] %v14260_v42  ;;  %21300 = vst [vmem:[#allocation173_spill] sm:$0xff] %v14265_v44  ;;  %v14275_v46 = vld [vmem:[%s21134_s5 + $0x538] sm:$0xff]  ;;  %v14280_v40 = vld [vmem:[%s21134_s5 + $0x540] sm:$0xff] }
  0x63   :  { %21301 = vst [vmem:[#allocation174_spill] sm:$0xff] %v14270_v36  ;;  %21302 = vst [vmem:[#allocation175_spill] sm:$0xff] %v14275_v46  ;;  %v14285_v48 = vld [vmem:[%s21134_s5 + $0x548] sm:$0xff]  ;;  %v14290_v44 = vld [vmem:[%s21134_s5 + $0x550] sm:$0xff] }
  0x64   :  { %21303 = vst [vmem:[#allocation176_spill] sm:$0xff] %v14280_v40  ;;  %21304 = vst [vmem:[#allocation177_spill] sm:$0xff] %v14285_v48  ;;  %v14295_v50 = vld [vmem:[%s21134_s5 + $0x558] sm:$0xff]  ;;  %v14300_v46 = vld [vmem:[%s21134_s5 + $0x560] sm:$0xff] }
  0x65   :  { %21305 = vst [vmem:[#allocation178_spill] sm:$0xff] %v14290_v44  ;;  %21306 = vst [vmem:[#allocation179_spill] sm:$0xff] %v14295_v50  ;;  %v14305_v52 = vld [vmem:[%s21134_s5 + $0x568] sm:$0xff]  ;;  %v14310_v48 = vld [vmem:[%s21134_s5 + $0x570] sm:$0xff] }
  0x66   :  { %21307 = vst [vmem:[#allocation180_spill] sm:$0xff] %v14300_v46  ;;  %21308 = vst [vmem:[#allocation181_spill] sm:$0xff] %v14305_v52  ;;  %v14315_v54 = vld [vmem:[%s21134_s5 + $0x578] sm:$0xff]  ;;  %v14320_v50 = vld [vmem:[%s21134_s5 + $0x580] sm:$0xff] }
  0x67   :  { %21309 = vst [vmem:[#allocation182_spill] sm:$0xff] %v14310_v48  ;;  %21310 = vst [vmem:[#allocation183_spill] sm:$0xff] %v14315_v54  ;;  %v14325_v56 = vld [vmem:[%s21134_s5 + $0x588] sm:$0xff]  ;;  %v14330_v52 = vld [vmem:[%s21134_s5 + $0x590] sm:$0xff] }
  0x68   :  { %21311 = vst [vmem:[#allocation184_spill] sm:$0xff] %v14320_v50  ;;  %21312 = vst [vmem:[#allocation185_spill] sm:$0xff] %v14325_v56  ;;  %v14335_v58 = vld [vmem:[%s21134_s5 + $0x598] sm:$0xff]  ;;  %v14340_v54 = vld [vmem:[%s21134_s5 + $0x5a0] sm:$0xff] }
  0x69   :  { %21313 = vst [vmem:[#allocation186_spill] sm:$0xff] %v14330_v52  ;;  %21314 = vst [vmem:[#allocation187_spill] sm:$0xff] %v14335_v58  ;;  %v14345_v60 = vld [vmem:[%s21134_s5 + $0x5a8] sm:$0xff]  ;;  %v14350_v56 = vld [vmem:[%s21134_s5 + $0x5b0] sm:$0xff] }
  0x6a   :  { %21315 = vst [vmem:[#allocation188_spill] sm:$0xff] %v14340_v54  ;;  %21316 = vst [vmem:[#allocation189_spill] sm:$0xff] %v14345_v60  ;;  %v14355_v34 = vld [vmem:[%s21134_s5 + $0x5b8] sm:$0xff]  ;;  %v14360_v58 = vld [vmem:[%s21134_s5 + $0x5c0] sm:$0xff] }
  0x6b   :  { %21317 = vst [vmem:[#allocation190_spill] sm:$0xff] %v14350_v56  ;;  %21318 = vst [vmem:[#allocation191_spill] sm:$0xff] %v14355_v34  ;;  %v14365_v38 = vld [vmem:[%s21134_s5 + $0x5c8] sm:$0xff]  ;;  %v14370_v60 = vld [vmem:[%s21134_s5 + $0x5d0] sm:$0xff] }
  0x6c   :  { %21319 = vst [vmem:[#allocation192_spill] sm:$0xff] %v14360_v58  ;;  %21320 = vst [vmem:[#allocation193_spill] sm:$0xff] %v14365_v38  ;;  %v14375_v62 = vld [vmem:[%s21134_s5 + $0x5d8] sm:$0xff]  ;;  %v14380_v34 = vld [vmem:[%s21134_s5 + $0x5e0] sm:$0xff] }
  0x6d   :  { %21321 = vst [vmem:[#allocation194_spill] sm:$0xff] %v14370_v60  ;;  %21322 = vst [vmem:[#allocation195_spill] sm:$0xff] %v14375_v62  ;;  %v14385_v0 = vld [vmem:[%s21134_s5 + $0x5e8] sm:$0xff]  ;;  %v14390_v38 = vld [vmem:[%s21134_s5 + $0x5f0] sm:$0xff] }
  0x6e   :  { %21323 = vst [vmem:[#allocation196_spill] sm:$0xff] %v14380_v34  ;;  %21324 = vst [vmem:[#allocation197_spill] sm:$0xff] %v14385_v0  ;;  %v14395_v42 = vld [vmem:[%s21134_s5 + $0x5f8] sm:$0xff]  ;;  %v14400_v62 = vld [vmem:[%s21134_s5 + $0x600] sm:$0xff] }
  0x6f   :  { %21325 = vst [vmem:[#allocation198_spill] sm:$0xff] %v14390_v38  ;;  %21326 = vst [vmem:[#allocation199_spill] sm:$0xff] %v14395_v42  ;;  %v14405_v36 = vld [vmem:[%s21134_s5 + $0x608] sm:$0xff]  ;;  %v14410_v0 = vld [vmem:[%s21134_s5 + $0x610] sm:$0xff] }
  0x70   :  { %21327 = vst [vmem:[#allocation200_spill] sm:$0xff] %v14400_v62  ;;  %21328 = vst [vmem:[#allocation201_spill] sm:$0xff] %v14405_v36  ;;  %v14415_v33 = vld [vmem:[%s21134_s5 + $0x618] sm:$0xff]  ;;  %v14420_v42 = vld [vmem:[%s21134_s5 + $0x620] sm:$0xff] }
  0x71   :  { %21329 = vst [vmem:[#allocation202_spill] sm:$0xff] %v14410_v0  ;;  %21330 = vst [vmem:[#allocation203_spill] sm:$0xff] %v14415_v33  ;;  %v14425_v62 = vld [vmem:[%s21134_s5 + $0x628] sm:$0xff]  ;;  %v14430_v36 = vld [vmem:[%s21134_s5 + $0x630] sm:$0xff] }
  0x72   :  { %21331 = vst [vmem:[#allocation204_spill] sm:$0xff] %v14420_v42  ;;  %21332 = vst [vmem:[#allocation205_spill] sm:$0xff] %v14425_v62  ;;  %v14435_v0 = vld [vmem:[%s21134_s5 + $0x638] sm:$0xff]  ;;  %v14440_v33 = vld [vmem:[%s21134_s5 + $0x640] sm:$0xff] }
  0x73   :  { %21333 = vst [vmem:[#allocation206_spill] sm:$0xff] %v14430_v36  ;;  %21334 = vst [vmem:[#allocation207_spill] sm:$0xff] %v14435_v0  ;;  %v14445_v42 = vld [vmem:[%s21134_s5 + $0x648] sm:$0xff]  ;;  %v14450_v62 = vld [vmem:[%s21134_s5 + $0x650] sm:$0xff] }
  0x74   :  { %21335 = vst [vmem:[#allocation208_spill] sm:$0xff] %v14440_v33  ;;  %21336 = vst [vmem:[#allocation209_spill] sm:$0xff] %v14445_v42  ;;  %v14455_v36 = vld [vmem:[%s21134_s5 + $0x658] sm:$0xff]  ;;  %v14460_v0 = vld [vmem:[%s21134_s5 + $0x660] sm:$0xff] }
  0x75   :  { %21337 = vst [vmem:[#allocation210_spill] sm:$0xff] %v14450_v62  ;;  %21338 = vst [vmem:[#allocation211_spill] sm:$0xff] %v14455_v36  ;;  %v14465_v33 = vld [vmem:[%s21134_s5 + $0x668] sm:$0xff]  ;;  %v14470_v42 = vld [vmem:[%s21134_s5 + $0x670] sm:$0xff] }
  0x76   :  { %21339 = vst [vmem:[#allocation212_spill] sm:$0xff] %v14460_v0  ;;  %21340 = vst [vmem:[#allocation213_spill] sm:$0xff] %v14465_v33  ;;  %v14475_v62 = vld [vmem:[%s21134_s5 + $0x678] sm:$0xff]  ;;  %v14480_v36 = vld [vmem:[%s21134_s5 + $0x680] sm:$0xff] }
  0x77   :  { %21341 = vst [vmem:[#allocation214_spill] sm:$0xff] %v14470_v42  ;;  %21342 = vst [vmem:[#allocation215_spill] sm:$0xff] %v14475_v62  ;;  %v14485_v0 = vld [vmem:[%s21134_s5 + $0x688] sm:$0xff]  ;;  %v14490_v33 = vld [vmem:[%s21134_s5 + $0x690] sm:$0xff] }
  0x78   :  { %21343 = vst [vmem:[#allocation216_spill] sm:$0xff] %v14480_v36  ;;  %21344 = vst [vmem:[#allocation217_spill] sm:$0xff] %v14485_v0  ;;  %v14495_v42 = vld [vmem:[%s21134_s5 + $0x698] sm:$0xff]  ;;  %v14500_v62 = vld [vmem:[%s21134_s5 + $0x6a0] sm:$0xff] }
  0x79   :  { %21345 = vst [vmem:[#allocation218_spill] sm:$0xff] %v14490_v33  ;;  %21346 = vst [vmem:[#allocation219_spill] sm:$0xff] %v14495_v42  ;;  %v14505_v36 = vld [vmem:[%s21134_s5 + $0x6a8] sm:$0xff]  ;;  %v14510_v0 = vld [vmem:[%s21134_s5 + $0x6b0] sm:$0xff] }
  0x7a   :  { %21347 = vst [vmem:[#allocation220_spill] sm:$0xff] %v14500_v62  ;;  %21348 = vst [vmem:[#allocation221_spill] sm:$0xff] %v14505_v36  ;;  %v14515_v33 = vld [vmem:[%s21134_s5 + $0x6b8] sm:$0xff]  ;;  %v14520_v42 = vld [vmem:[%s21134_s5 + $0x6c0] sm:$0xff] }
  0x7b   :  { %21349 = vst [vmem:[#allocation222_spill] sm:$0xff] %v14510_v0  ;;  %21350 = vst [vmem:[#allocation223_spill] sm:$0xff] %v14515_v33  ;;  %v14525_v62 = vld [vmem:[%s21134_s5 + $0x6c8] sm:$0xff]  ;;  %v14530_v36 = vld [vmem:[%s21134_s5 + $0x6d0] sm:$0xff] }
  0x7c   :  { %21351 = vst [vmem:[#allocation224_spill] sm:$0xff] %v14520_v42  ;;  %21352 = vst [vmem:[#allocation225_spill] sm:$0xff] %v14525_v62  ;;  %v14535_v0 = vld [vmem:[%s21134_s5 + $0x6d8] sm:$0xff]  ;;  %v14540_v33 = vld [vmem:[%s21134_s5 + $0x6e0] sm:$0xff] }
  0x7d   :  { %21353 = vst [vmem:[#allocation226_spill] sm:$0xff] %v14530_v36  ;;  %21354 = vst [vmem:[#allocation227_spill] sm:$0xff] %v14535_v0  ;;  %v14545_v42 = vld [vmem:[%s21134_s5 + $0x6e8] sm:$0xff]  ;;  %v14550_v62 = vld [vmem:[%s21134_s5 + $0x6f0] sm:$0xff] }
  0x7e   :  { %21355 = vst [vmem:[#allocation228_spill] sm:$0xff] %v14540_v33  ;;  %21356 = vst [vmem:[#allocation229_spill] sm:$0xff] %v14545_v42  ;;  %v14555_v36 = vld [vmem:[%s21134_s5 + $0x6f8] sm:$0xff]  ;;  %v14560_v0 = vld [vmem:[%s21134_s5 + $0x700] sm:$0xff] }
  0x7f   :  { %21357 = vst [vmem:[#allocation230_spill] sm:$0xff] %v14550_v62  ;;  %21358 = vst [vmem:[#allocation231_spill] sm:$0xff] %v14555_v36  ;;  %v14565_v33 = vld [vmem:[%s21134_s5 + $0x708] sm:$0xff]  ;;  %v14570_v42 = vld [vmem:[%s21134_s5 + $0x710] sm:$0xff] }
  0x80   :  { %21359 = vst [vmem:[#allocation232_spill] sm:$0xff] %v14560_v0  ;;  %21360 = vst [vmem:[#allocation233_spill] sm:$0xff] %v14565_v33  ;;  %v14575_v62 = vld [vmem:[%s21134_s5 + $0x718] sm:$0xff]  ;;  %v14580_v36 = vld [vmem:[%s21134_s5 + $0x720] sm:$0xff] }
  0x81   :  { %21361 = vst [vmem:[#allocation234_spill] sm:$0xff] %v14570_v42  ;;  %21362 = vst [vmem:[#allocation235_spill] sm:$0xff] %v14575_v62  ;;  %v14585_v0 = vld [vmem:[%s21134_s5 + $0x728] sm:$0xff]  ;;  %v14590_v33 = vld [vmem:[%s21134_s5 + $0x730] sm:$0xff] }
  0x82   :  { %21363 = vst [vmem:[#allocation236_spill] sm:$0xff] %v14580_v36  ;;  %21364 = vst [vmem:[#allocation237_spill] sm:$0xff] %v14585_v0  ;;  %v14595_v42 = vld [vmem:[%s21134_s5 + $0x738] sm:$0xff]  ;;  %v14600_v62 = vld [vmem:[%s21134_s5 + $0x740] sm:$0xff] }
  0x83   :  { %21365 = vst [vmem:[#allocation238_spill] sm:$0xff] %v14590_v33  ;;  %21366 = vst [vmem:[#allocation239_spill] sm:$0xff] %v14595_v42  ;;  %v14605_v36 = vld [vmem:[%s21134_s5 + $0x748] sm:$0xff]  ;;  %v14610_v0 = vld [vmem:[%s21134_s5 + $0x750] sm:$0xff] }
  0x84   :  { %21367 = vst [vmem:[#allocation240_spill] sm:$0xff] %v14600_v62  ;;  %21368 = vst [vmem:[#allocation241_spill] sm:$0xff] %v14605_v36  ;;  %v14615_v33 = vld [vmem:[%s21134_s5 + $0x758] sm:$0xff]  ;;  %v14620_v42 = vld [vmem:[%s21134_s5 + $0x760] sm:$0xff] }
  0x85   :  { %21369 = vst [vmem:[#allocation242_spill] sm:$0xff] %v14610_v0  ;;  %21370 = vst [vmem:[#allocation243_spill] sm:$0xff] %v14615_v33  ;;  %v14625_v62 = vld [vmem:[%s21134_s5 + $0x768] sm:$0xff]  ;;  %v14630_v36 = vld [vmem:[%s21134_s5 + $0x770] sm:$0xff] }
  0x86   :  { %21371 = vst [vmem:[#allocation244_spill] sm:$0xff] %v14620_v42  ;;  %21372 = vst [vmem:[#allocation245_spill] sm:$0xff] %v14625_v62  ;;  %v14635_v0 = vld [vmem:[%s21134_s5 + $0x778] sm:$0xff]  ;;  %v14640_v33 = vld [vmem:[%s21134_s5 + $0x780] sm:$0xff] }
  0x87   :  { %21373 = vst [vmem:[#allocation246_spill] sm:$0xff] %v14630_v36  ;;  %21374 = vst [vmem:[#allocation247_spill] sm:$0xff] %v14635_v0  ;;  %v14645_v42 = vld [vmem:[%s21134_s5 + $0x788] sm:$0xff]  ;;  %v14650_v62 = vld [vmem:[%s21134_s5 + $0x790] sm:$0xff] }
  0x88   :  { %21375 = vst [vmem:[#allocation248_spill] sm:$0xff] %v14640_v33  ;;  %21376 = vst [vmem:[#allocation249_spill] sm:$0xff] %v14645_v42  ;;  %v14655_v36 = vld [vmem:[%s21134_s5 + $0x798] sm:$0xff]  ;;  %v14660_v0 = vld [vmem:[%s21134_s5 + $0x7a0] sm:$0xff] }
  0x89   :  { %21377 = vst [vmem:[#allocation250_spill] sm:$0xff] %v14650_v62  ;;  %21378 = vst [vmem:[#allocation251_spill] sm:$0xff] %v14655_v36  ;;  %v14665_v33 = vld [vmem:[%s21134_s5 + $0x7a8] sm:$0xff]  ;;  %v14670_v42 = vld [vmem:[%s21134_s5 + $0x7b0] sm:$0xff] }
  0x8a   :  { %21379 = vst [vmem:[#allocation252_spill] sm:$0xff] %v14660_v0  ;;  %21380 = vst [vmem:[#allocation253_spill] sm:$0xff] %v14665_v33  ;;  %v14675_v62 = vld [vmem:[%s21134_s5 + $0x7b8] sm:$0xff]  ;;  %v14680_v36 = vld [vmem:[%s21134_s5 + $0x7c0] sm:$0xff] }
  0x8b   :  { %21381 = vst [vmem:[#allocation254_spill] sm:$0xff] %v14670_v42  ;;  %21382 = vst [vmem:[#allocation255_spill] sm:$0xff] %v14675_v62  ;;  %v14685_v0 = vld [vmem:[%s21134_s5 + $0x7c8] sm:$0xff]  ;;  %v14690_v33 = vld [vmem:[%s21134_s5 + $0x7d0] sm:$0xff] }
  0x8c   :  { %21383 = vst [vmem:[#allocation256_spill] sm:$0xff] %v14680_v36  ;;  %21384 = vst [vmem:[#allocation257_spill] sm:$0xff] %v14685_v0  ;;  %v14695_v42 = vld [vmem:[%s21134_s5 + $0x7d8] sm:$0xff]  ;;  %v14700_v62 = vld [vmem:[%s21134_s5 + $0x7e0] sm:$0xff] }
  0x8d   :  { %21385 = vst [vmem:[#allocation258_spill] sm:$0xff] %v14690_v33  ;;  %21386 = vst [vmem:[#allocation259_spill] sm:$0xff] %v14695_v42  ;;  %v14705_v36 = vld [vmem:[%s21134_s5 + $0x7e8] sm:$0xff]  ;;  %v14710_v0 = vld [vmem:[%s21134_s5 + $0x7f0] sm:$0xff] }
  0x8e   :  { %21387 = vst [vmem:[#allocation260_spill] sm:$0xff] %v14700_v62  ;;  %21388 = vst [vmem:[#allocation261_spill] sm:$0xff] %v14705_v36  ;;  %v14715_v33 = vld [vmem:[%s21134_s5 + $0x7f8] sm:$0xff]  ;;  %v14720_v42 = vld [vmem:[%s21134_s5 + $0x800] sm:$0xff] }
  0x8f   :  { %21389 = vst [vmem:[#allocation262_spill] sm:$0xff] %v14710_v0  ;;  %21390 = vst [vmem:[#allocation263_spill] sm:$0xff] %v14715_v33  ;;  %v14725_v62 = vld [vmem:[%s21134_s5 + $0x808] sm:$0xff]  ;;  %v14730_v36 = vld [vmem:[%s21134_s5 + $0x810] sm:$0xff] }
  0x90   :  { %21391 = vst [vmem:[#allocation264_spill] sm:$0xff] %v14720_v42  ;;  %21392 = vst [vmem:[#allocation265_spill] sm:$0xff] %v14725_v62  ;;  %v14735_v0 = vld [vmem:[%s21134_s5 + $0x818] sm:$0xff]  ;;  %v14740_v33 = vld [vmem:[%s21134_s5 + $0x820] sm:$0xff] }
  0x91   :  { %21393 = vst [vmem:[#allocation266_spill] sm:$0xff] %v14730_v36  ;;  %21394 = vst [vmem:[#allocation267_spill] sm:$0xff] %v14735_v0  ;;  %v14745_v42 = vld [vmem:[%s21134_s5 + $0x828] sm:$0xff]  ;;  %v14750_v62 = vld [vmem:[%s21134_s5 + $0x830] sm:$0xff] }
  0x92   :  { %21395 = vst [vmem:[#allocation268_spill] sm:$0xff] %v14740_v33  ;;  %21396 = vst [vmem:[#allocation269_spill] sm:$0xff] %v14745_v42  ;;  %v14755_v36 = vld [vmem:[%s21134_s5 + $0x838] sm:$0xff]  ;;  %v14760_v0 = vld [vmem:[%s21134_s5 + $0x840] sm:$0xff] }
  0x93   :  { %21397 = vst [vmem:[#allocation270_spill] sm:$0xff] %v14750_v62  ;;  %21398 = vst [vmem:[#allocation271_spill] sm:$0xff] %v14755_v36  ;;  %v14765_v33 = vld [vmem:[%s21134_s5 + $0x848] sm:$0xff]  ;;  %v14770_v42 = vld [vmem:[%s21134_s5 + $0x850] sm:$0xff] }
  0x94   :  { %21399 = vst [vmem:[#allocation272_spill] sm:$0xff] %v14760_v0  ;;  %21400 = vst [vmem:[#allocation273_spill] sm:$0xff] %v14765_v33  ;;  %v14775_v62 = vld [vmem:[%s21134_s5 + $0x858] sm:$0xff]  ;;  %v14780_v36 = vld [vmem:[%s21134_s5 + $0x860] sm:$0xff] }
  0x95   :  { %21401 = vst [vmem:[#allocation274_spill] sm:$0xff] %v14770_v42  ;;  %21402 = vst [vmem:[#allocation275_spill] sm:$0xff] %v14775_v62  ;;  %v14785_v0 = vld [vmem:[%s21134_s5 + $0x868] sm:$0xff]  ;;  %v14790_v33 = vld [vmem:[%s21134_s5 + $0x870] sm:$0xff] }
  0x96   :  { %21403 = vst [vmem:[#allocation276_spill] sm:$0xff] %v14780_v36  ;;  %21404 = vst [vmem:[#allocation277_spill] sm:$0xff] %v14785_v0  ;;  %v14795_v42 = vld [vmem:[%s21134_s5 + $0x878] sm:$0xff]  ;;  %v14800_v62 = vld [vmem:[%s21134_s5 + $0x880] sm:$0xff] }
  0x97   :  { %21405 = vst [vmem:[#allocation278_spill] sm:$0xff] %v14790_v33  ;;  %21406 = vst [vmem:[#allocation279_spill] sm:$0xff] %v14795_v42  ;;  %v14805_v36 = vld [vmem:[%s21134_s5 + $0x888] sm:$0xff]  ;;  %v14810_v0 = vld [vmem:[%s21134_s5 + $0x890] sm:$0xff] }
  0x98   :  { %21407 = vst [vmem:[#allocation280_spill] sm:$0xff] %v14800_v62  ;;  %21408 = vst [vmem:[#allocation281_spill] sm:$0xff] %v14805_v36  ;;  %v14815_v33 = vld [vmem:[%s21134_s5 + $0x898] sm:$0xff]  ;;  %v14820_v42 = vld [vmem:[%s21134_s5 + $0x8a0] sm:$0xff] }
  0x99   :  { %21409 = vst [vmem:[#allocation282_spill] sm:$0xff] %v14810_v0  ;;  %21410 = vst [vmem:[#allocation283_spill] sm:$0xff] %v14815_v33  ;;  %v14825_v62 = vld [vmem:[%s21134_s5 + $0x8a8] sm:$0xff]  ;;  %v14830_v36 = vld [vmem:[%s21134_s5 + $0x8b0] sm:$0xff] }
  0x9a   :  { %21411 = vst [vmem:[#allocation284_spill] sm:$0xff] %v14820_v42  ;;  %21412 = vst [vmem:[#allocation285_spill] sm:$0xff] %v14825_v62  ;;  %v14835_v0 = vld [vmem:[%s21134_s5 + $0x8b8] sm:$0xff]  ;;  %v14840_v33 = vld [vmem:[%s21134_s5 + $0x8c0] sm:$0xff] }
  0x9b   :  { %21413 = vst [vmem:[#allocation286_spill] sm:$0xff] %v14830_v36  ;;  %21414 = vst [vmem:[#allocation287_spill] sm:$0xff] %v14835_v0  ;;  %v14845_v42 = vld [vmem:[%s21134_s5 + $0x8c8] sm:$0xff]  ;;  %v14850_v62 = vld [vmem:[%s21134_s5 + $0x8d0] sm:$0xff] }
  0x9c   :  { %21415 = vst [vmem:[#allocation288_spill] sm:$0xff] %v14840_v33  ;;  %21416 = vst [vmem:[#allocation289_spill] sm:$0xff] %v14845_v42  ;;  %v14855_v36 = vld [vmem:[%s21134_s5 + $0x8d8] sm:$0xff]  ;;  %v14860_v0 = vld [vmem:[%s21134_s5 + $0x8e0] sm:$0xff] }
  0x9d   :  { %21417 = vst [vmem:[#allocation290_spill] sm:$0xff] %v14850_v62  ;;  %21418 = vst [vmem:[#allocation291_spill] sm:$0xff] %v14855_v36  ;;  %v14865_v33 = vld [vmem:[%s21134_s5 + $0x8e8] sm:$0xff]  ;;  %v14870_v42 = vld [vmem:[%s21134_s5 + $0x8f0] sm:$0xff] }
  0x9e   :  { %21419 = vst [vmem:[#allocation292_spill] sm:$0xff] %v14860_v0  ;;  %21420 = vst [vmem:[#allocation293_spill] sm:$0xff] %v14865_v33  ;;  %v14875_v62 = vld [vmem:[%s21134_s5 + $0x8f8] sm:$0xff]  ;;  %v14880_v36 = vld [vmem:[%s21134_s5 + $0x900] sm:$0xff] }
  0x9f   :  { %21421 = vst [vmem:[#allocation294_spill] sm:$0xff] %v14870_v42  ;;  %21422 = vst [vmem:[#allocation295_spill] sm:$0xff] %v14875_v62  ;;  %v14885_v0 = vld [vmem:[%s21134_s5 + $0x908] sm:$0xff]  ;;  %v14890_v33 = vld [vmem:[%s21134_s5 + $0x910] sm:$0xff] }
  0xa0   :  { %21423 = vst [vmem:[#allocation296_spill] sm:$0xff] %v14880_v36  ;;  %21424 = vst [vmem:[#allocation297_spill] sm:$0xff] %v14885_v0  ;;  %v14895_v42 = vld [vmem:[%s21134_s5 + $0x918] sm:$0xff]  ;;  %v14900_v62 = vld [vmem:[%s21134_s5 + $0x920] sm:$0xff] }
  0xa1   :  { %21425 = vst [vmem:[#allocation298_spill] sm:$0xff] %v14890_v33  ;;  %21426 = vst [vmem:[#allocation299_spill] sm:$0xff] %v14895_v42  ;;  %v14905_v36 = vld [vmem:[%s21134_s5 + $0x928] sm:$0xff]  ;;  %v14910_v0 = vld [vmem:[%s21134_s5 + $0x930] sm:$0xff] }
  0xa2   :  { %21427 = vst [vmem:[#allocation300_spill] sm:$0xff] %v14900_v62  ;;  %21428 = vst [vmem:[#allocation301_spill] sm:$0xff] %v14905_v36  ;;  %v14915_v33 = vld [vmem:[%s21134_s5 + $0x938] sm:$0xff]  ;;  %v14920_v42 = vld [vmem:[%s21134_s5 + $0x940] sm:$0xff] }
  0xa3   :  { %21429 = vst [vmem:[#allocation302_spill] sm:$0xff] %v14910_v0  ;;  %21430 = vst [vmem:[#allocation303_spill] sm:$0xff] %v14915_v33  ;;  %v14925_v62 = vld [vmem:[%s21134_s5 + $0x948] sm:$0xff]  ;;  %v14930_v36 = vld [vmem:[%s21134_s5 + $0x950] sm:$0xff] }
  0xa4   :  { %21431 = vst [vmem:[#allocation304_spill] sm:$0xff] %v14920_v42  ;;  %21432 = vst [vmem:[#allocation305_spill] sm:$0xff] %v14925_v62  ;;  %v14935_v0 = vld [vmem:[%s21134_s5 + $0x958] sm:$0xff]  ;;  %v14940_v33 = vld [vmem:[%s21134_s5 + $0x960] sm:$0xff] }
  0xa5   :  { %21433 = vst [vmem:[#allocation306_spill] sm:$0xff] %v14930_v36  ;;  %21434 = vst [vmem:[#allocation307_spill] sm:$0xff] %v14935_v0  ;;  %v14945_v42 = vld [vmem:[%s21134_s5 + $0x968] sm:$0xff]  ;;  %v14950_v62 = vld [vmem:[%s21134_s5 + $0x970] sm:$0xff] }
  0xa6   :  { %21435 = vst [vmem:[#allocation308_spill] sm:$0xff] %v14940_v33  ;;  %21436 = vst [vmem:[#allocation309_spill] sm:$0xff] %v14945_v42  ;;  %v14955_v36 = vld [vmem:[%s21134_s5 + $0x978] sm:$0xff]  ;;  %v14960_v0 = vld [vmem:[%s21134_s5 + $0x980] sm:$0xff] }
  0xa7   :  { %21437 = vst [vmem:[#allocation310_spill] sm:$0xff] %v14950_v62  ;;  %21438 = vst [vmem:[#allocation311_spill] sm:$0xff] %v14955_v36  ;;  %v14965_v33 = vld [vmem:[%s21134_s5 + $0x988] sm:$0xff]  ;;  %v14970_v42 = vld [vmem:[%s21134_s5 + $0x990] sm:$0xff] }
  0xa8   :  { %21439 = vst [vmem:[#allocation312_spill] sm:$0xff] %v14960_v0  ;;  %21440 = vst [vmem:[#allocation313_spill] sm:$0xff] %v14965_v33  ;;  %v14975_v62 = vld [vmem:[%s21134_s5 + $0x998] sm:$0xff]  ;;  %v14980_v36 = vld [vmem:[%s21134_s5 + $0x9a0] sm:$0xff] }
  0xa9   :  { %21441 = vst [vmem:[#allocation314_spill] sm:$0xff] %v14970_v42  ;;  %21442 = vst [vmem:[#allocation315_spill] sm:$0xff] %v14975_v62  ;;  %v14985_v0 = vld [vmem:[%s21134_s5 + $0x9a8] sm:$0xff]  ;;  %v14990_v33 = vld [vmem:[%s21134_s5 + $0x9b0] sm:$0xff] }
  0xaa   :  { %21443 = vst [vmem:[#allocation316_spill] sm:$0xff] %v14980_v36  ;;  %21444 = vst [vmem:[#allocation317_spill] sm:$0xff] %v14985_v0  ;;  %v14995_v42 = vld [vmem:[%s21134_s5 + $0x9b8] sm:$0xff]  ;;  %v15000_v62 = vld [vmem:[%s21134_s5 + $0x9c0] sm:$0xff] }
  0xab   :  { %21445 = vst [vmem:[#allocation318_spill] sm:$0xff] %v14990_v33  ;;  %21446 = vst [vmem:[#allocation319_spill] sm:$0xff] %v14995_v42  ;;  %v15005_v36 = vld [vmem:[%s21134_s5 + $0x9c8] sm:$0xff]  ;;  %v15010_v0 = vld [vmem:[%s21134_s5 + $0x9d0] sm:$0xff] }
  0xac   :  { %21447 = vst [vmem:[#allocation320_spill] sm:$0xff] %v15000_v62  ;;  %21448 = vst [vmem:[#allocation321_spill] sm:$0xff] %v15005_v36  ;;  %v15015_v33 = vld [vmem:[%s21134_s5 + $0x9d8] sm:$0xff]  ;;  %v15020_v42 = vld [vmem:[%s21134_s5 + $0x9e0] sm:$0xff] }
  0xad   :  { %21449 = vst [vmem:[#allocation322_spill] sm:$0xff] %v15010_v0  ;;  %21450 = vst [vmem:[#allocation323_spill] sm:$0xff] %v15015_v33  ;;  %v15025_v62 = vld [vmem:[%s21134_s5 + $0x9e8] sm:$0xff]  ;;  %v15030_v36 = vld [vmem:[%s21134_s5 + $0x9f0] sm:$0xff] }
  0xae   :  { %21451 = vst [vmem:[#allocation324_spill] sm:$0xff] %v15020_v42  ;;  %21452 = vst [vmem:[#allocation325_spill] sm:$0xff] %v15025_v62  ;;  %v15035_v0 = vld [vmem:[%s21134_s5 + $0x9f8] sm:$0xff]  ;;  %v15040_v33 = vld [vmem:[%s21134_s5 + $0xa00] sm:$0xff] }
  0xaf   :  { %21453 = vst [vmem:[#allocation326_spill] sm:$0xff] %v15030_v36  ;;  %21454 = vst [vmem:[#allocation327_spill] sm:$0xff] %v15035_v0  ;;  %v15045_v42 = vld [vmem:[%s21134_s5 + $0xa08] sm:$0xff]  ;;  %v15050_v62 = vld [vmem:[%s21134_s5 + $0xa10] sm:$0xff] }
  0xb0   :  { %21455 = vst [vmem:[#allocation328_spill] sm:$0xff] %v15040_v33  ;;  %21456 = vst [vmem:[#allocation329_spill] sm:$0xff] %v15045_v42  ;;  %v15055_v36 = vld [vmem:[%s21134_s5 + $0xa18] sm:$0xff]  ;;  %v15060_v0 = vld [vmem:[%s21134_s5 + $0xa20] sm:$0xff] }
  0xb1   :  { %21457 = vst [vmem:[#allocation330_spill] sm:$0xff] %v15050_v62  ;;  %21458 = vst [vmem:[#allocation331_spill] sm:$0xff] %v15055_v36  ;;  %v15065_v33 = vld [vmem:[%s21134_s5 + $0xa28] sm:$0xff]  ;;  %v15070_v42 = vld [vmem:[%s21134_s5 + $0xa30] sm:$0xff] }
  0xb2   :  { %21459 = vst [vmem:[#allocation332_spill] sm:$0xff] %v15060_v0  ;;  %21460 = vst [vmem:[#allocation333_spill] sm:$0xff] %v15065_v33  ;;  %v15075_v62 = vld [vmem:[%s21134_s5 + $0xa38] sm:$0xff]  ;;  %v15080_v36 = vld [vmem:[%s21134_s5 + $0xa40] sm:$0xff] }
  0xb3   :  { %21461 = vst [vmem:[#allocation334_spill] sm:$0xff] %v15070_v42  ;;  %21462 = vst [vmem:[#allocation335_spill] sm:$0xff] %v15075_v62  ;;  %v15085_v0 = vld [vmem:[%s21134_s5 + $0xa48] sm:$0xff]  ;;  %v15090_v33 = vld [vmem:[%s21134_s5 + $0xa50] sm:$0xff] }
  0xb4   :  { %21463 = vst [vmem:[#allocation336_spill] sm:$0xff] %v15080_v36  ;;  %21464 = vst [vmem:[#allocation337_spill] sm:$0xff] %v15085_v0  ;;  %v15095_v42 = vld [vmem:[%s21134_s5 + $0xa58] sm:$0xff]  ;;  %v15100_v62 = vld [vmem:[%s21134_s5 + $0xa60] sm:$0xff] }
  0xb5   :  { %21465 = vst [vmem:[#allocation338_spill] sm:$0xff] %v15090_v33  ;;  %21466 = vst [vmem:[#allocation339_spill] sm:$0xff] %v15095_v42  ;;  %v15105_v36 = vld [vmem:[%s21134_s5 + $0xa68] sm:$0xff]  ;;  %v15110_v0 = vld [vmem:[%s21134_s5 + $0xa70] sm:$0xff] }
  0xb6   :  { %21467 = vst [vmem:[#allocation340_spill] sm:$0xff] %v15100_v62  ;;  %21468 = vst [vmem:[#allocation341_spill] sm:$0xff] %v15105_v36  ;;  %v15115_v33 = vld [vmem:[%s21134_s5 + $0xa78] sm:$0xff]  ;;  %v15120_v42 = vld [vmem:[%s21134_s5 + $0xa80] sm:$0xff] }
  0xb7   :  { %21469 = vst [vmem:[#allocation342_spill] sm:$0xff] %v15110_v0  ;;  %21470 = vst [vmem:[#allocation343_spill] sm:$0xff] %v15115_v33  ;;  %v15125_v62 = vld [vmem:[%s21134_s5 + $0xa88] sm:$0xff]  ;;  %v15130_v36 = vld [vmem:[%s21134_s5 + $0xa90] sm:$0xff] }
  0xb8   :  { %21471 = vst [vmem:[#allocation344_spill] sm:$0xff] %v15120_v42  ;;  %21472 = vst [vmem:[#allocation345_spill] sm:$0xff] %v15125_v62  ;;  %v15135_v0 = vld [vmem:[%s21134_s5 + $0xa98] sm:$0xff]  ;;  %v15140_v33 = vld [vmem:[%s21134_s5 + $0xaa0] sm:$0xff] }
  0xb9   :  { %21473 = vst [vmem:[#allocation346_spill] sm:$0xff] %v15130_v36  ;;  %21474 = vst [vmem:[#allocation347_spill] sm:$0xff] %v15135_v0  ;;  %v15145_v42 = vld [vmem:[%s21134_s5 + $0xaa8] sm:$0xff]  ;;  %v15150_v62 = vld [vmem:[%s21134_s5 + $0xab0] sm:$0xff] }
  0xba   :  { %21475 = vst [vmem:[#allocation348_spill] sm:$0xff] %v15140_v33  ;;  %21476 = vst [vmem:[#allocation349_spill] sm:$0xff] %v15145_v42  ;;  %v15155_v36 = vld [vmem:[%s21134_s5 + $0xab8] sm:$0xff]  ;;  %v15160_v0 = vld [vmem:[%s21134_s5 + $0xac0] sm:$0xff] }
  0xbb   :  { %21477 = vst [vmem:[#allocation350_spill] sm:$0xff] %v15150_v62  ;;  %21478 = vst [vmem:[#allocation351_spill] sm:$0xff] %v15155_v36  ;;  %v15165_v33 = vld [vmem:[%s21134_s5 + $0xac8] sm:$0xff]  ;;  %v15170_v42 = vld [vmem:[%s21134_s5 + $0xad0] sm:$0xff] }
  0xbc   :  { %21479 = vst [vmem:[#allocation352_spill] sm:$0xff] %v15160_v0  ;;  %21480 = vst [vmem:[#allocation353_spill] sm:$0xff] %v15165_v33  ;;  %v15175_v62 = vld [vmem:[%s21134_s5 + $0xad8] sm:$0xff]  ;;  %v15180_v36 = vld [vmem:[%s21134_s5 + $0xae0] sm:$0xff] }
  0xbd   :  { %21481 = vst [vmem:[#allocation354_spill] sm:$0xff] %v15170_v42  ;;  %21482 = vst [vmem:[#allocation355_spill] sm:$0xff] %v15175_v62  ;;  %v15185_v0 = vld [vmem:[%s21134_s5 + $0xae8] sm:$0xff]  ;;  %v15190_v33 = vld [vmem:[%s21134_s5 + $0xaf0] sm:$0xff] }
  0xbe   :  { %21483 = vst [vmem:[#allocation356_spill] sm:$0xff] %v15180_v36  ;;  %21484 = vst [vmem:[#allocation357_spill] sm:$0xff] %v15185_v0  ;;  %v15195_v42 = vld [vmem:[%s21134_s5 + $0xaf8] sm:$0xff]  ;;  %v15200_v62 = vld [vmem:[%s21134_s5 + $0xb00] sm:$0xff] }
  0xbf   :  { %21485 = vst [vmem:[#allocation358_spill] sm:$0xff] %v15190_v33  ;;  %21486 = vst [vmem:[#allocation359_spill] sm:$0xff] %v15195_v42  ;;  %v15205_v36 = vld [vmem:[%s21134_s5 + $0xb08] sm:$0xff]  ;;  %v15210_v0 = vld [vmem:[%s21134_s5 + $0xb10] sm:$0xff] }
  0xc0   :  { %21487 = vst [vmem:[#allocation360_spill] sm:$0xff] %v15200_v62  ;;  %21488 = vst [vmem:[#allocation361_spill] sm:$0xff] %v15205_v36  ;;  %v15215_v33 = vld [vmem:[%s21134_s5 + $0xb18] sm:$0xff]  ;;  %v15220_v42 = vld [vmem:[%s21134_s5 + $0xb20] sm:$0xff] }
  0xc1   :  { %21489 = vst [vmem:[#allocation362_spill] sm:$0xff] %v15210_v0  ;;  %21490 = vst [vmem:[#allocation363_spill] sm:$0xff] %v15215_v33  ;;  %v15225_v62 = vld [vmem:[%s21134_s5 + $0xb28] sm:$0xff]  ;;  %v15230_v36 = vld [vmem:[%s21134_s5 + $0xb30] sm:$0xff] }
  0xc2   :  { %21491 = vst [vmem:[#allocation364_spill] sm:$0xff] %v15220_v42  ;;  %21492 = vst [vmem:[#allocation365_spill] sm:$0xff] %v15225_v62  ;;  %v15235_v0 = vld [vmem:[%s21134_s5 + $0xb38] sm:$0xff]  ;;  %v15240_v33 = vld [vmem:[%s21134_s5 + $0xb40] sm:$0xff] }
  0xc3   :  { %21493 = vst [vmem:[#allocation366_spill] sm:$0xff] %v15230_v36  ;;  %21494 = vst [vmem:[#allocation367_spill] sm:$0xff] %v15235_v0  ;;  %v15245_v42 = vld [vmem:[%s21134_s5 + $0xb48] sm:$0xff]  ;;  %v15250_v62 = vld [vmem:[%s21134_s5 + $0xb50] sm:$0xff] }
  0xc4   :  { %21495 = vst [vmem:[#allocation368_spill] sm:$0xff] %v15240_v33  ;;  %21496 = vst [vmem:[#allocation369_spill] sm:$0xff] %v15245_v42  ;;  %v15255_v36 = vld [vmem:[%s21134_s5 + $0xb58] sm:$0xff]  ;;  %v15260_v0 = vld [vmem:[%s21134_s5 + $0xb60] sm:$0xff] }
  0xc5   :  { %21497 = vst [vmem:[#allocation370_spill] sm:$0xff] %v15250_v62  ;;  %21498 = vst [vmem:[#allocation371_spill] sm:$0xff] %v15255_v36  ;;  %v15265_v33 = vld [vmem:[%s21134_s5 + $0xb68] sm:$0xff]  ;;  %v15270_v42 = vld [vmem:[%s21134_s5 + $0xb70] sm:$0xff] }
  0xc6   :  { %21499 = vst [vmem:[#allocation372_spill] sm:$0xff] %v15260_v0  ;;  %21500 = vst [vmem:[#allocation373_spill] sm:$0xff] %v15265_v33  ;;  %v15275_v62 = vld [vmem:[%s21134_s5 + $0xb78] sm:$0xff]  ;;  %v15280_v36 = vld [vmem:[%s21134_s5 + $0xb80] sm:$0xff] }
  0xc7   :  { %21501 = vst [vmem:[#allocation374_spill] sm:$0xff] %v15270_v42  ;;  %21502 = vst [vmem:[#allocation375_spill] sm:$0xff] %v15275_v62  ;;  %v15285_v0 = vld [vmem:[%s21134_s5 + $0xb88] sm:$0xff]  ;;  %v15290_v33 = vld [vmem:[%s21134_s5 + $0xb90] sm:$0xff] }
  0xc8   :  { %21503 = vst [vmem:[#allocation376_spill] sm:$0xff] %v15280_v36  ;;  %21504 = vst [vmem:[#allocation377_spill] sm:$0xff] %v15285_v0  ;;  %v15295_v42 = vld [vmem:[%s21134_s5 + $0xb98] sm:$0xff]  ;;  %v15300_v62 = vld [vmem:[%s21134_s5 + $0xba0] sm:$0xff] }
  0xc9   :  { %21505 = vst [vmem:[#allocation378_spill] sm:$0xff] %v15290_v33  ;;  %21506 = vst [vmem:[#allocation379_spill] sm:$0xff] %v15295_v42  ;;  %v15305_v36 = vld [vmem:[%s21134_s5 + $0xba8] sm:$0xff]  ;;  %v15310_v0 = vld [vmem:[%s21134_s5 + $0xbb0] sm:$0xff] }
  0xca   :  { %21507 = vst [vmem:[#allocation380_spill] sm:$0xff] %v15300_v62  ;;  %21508 = vst [vmem:[#allocation381_spill] sm:$0xff] %v15305_v36  ;;  %v15315_v33 = vld [vmem:[%s21134_s5 + $0xbb8] sm:$0xff]  ;;  %v15320_v42 = vld [vmem:[%s21134_s5 + $0xbc0] sm:$0xff] }
  0xcb   :  { %21509 = vst [vmem:[#allocation382_spill] sm:$0xff] %v15310_v0  ;;  %21510 = vst [vmem:[#allocation383_spill] sm:$0xff] %v15315_v33  ;;  %v15325_v62 = vld [vmem:[%s21134_s5 + $0xbc8] sm:$0xff]  ;;  %v15330_v36 = vld [vmem:[%s21134_s5 + $0xbd0] sm:$0xff] }
  0xcc   :  { %21511 = vst [vmem:[#allocation384_spill] sm:$0xff] %v15320_v42  ;;  %21512 = vst [vmem:[#allocation385_spill] sm:$0xff] %v15325_v62  ;;  %v15335_v0 = vld [vmem:[%s21134_s5 + $0xbd8] sm:$0xff]  ;;  %v15340_v33 = vld [vmem:[%s21134_s5 + $0xbe0] sm:$0xff] }
  0xcd   :  { %21513 = vst [vmem:[#allocation386_spill] sm:$0xff] %v15330_v36  ;;  %21514 = vst [vmem:[#allocation387_spill] sm:$0xff] %v15335_v0  ;;  %v15345_v42 = vld [vmem:[%s21134_s5 + $0xbe8] sm:$0xff]  ;;  %v15350_v62 = vld [vmem:[%s21134_s5 + $0xbf0] sm:$0xff] }
  0xce   :  { %21515 = vst [vmem:[#allocation388_spill] sm:$0xff] %v15340_v33  ;;  %21516 = vst [vmem:[#allocation389_spill] sm:$0xff] %v15345_v42  ;;  %v15355_v36 = vld [vmem:[%s21134_s5 + $0xbf8] sm:$0xff]  ;;  %v15360_v0 = vld [vmem:[%s21134_s5 + $0xc00] sm:$0xff] }
  0xcf   :  { %21517 = vst [vmem:[#allocation390_spill] sm:$0xff] %v15350_v62  ;;  %21518 = vst [vmem:[#allocation391_spill] sm:$0xff] %v15355_v36  ;;  %v15365_v33 = vld [vmem:[%s21134_s5 + $0xc08] sm:$0xff]  ;;  %v15370_v42 = vld [vmem:[%s21134_s5 + $0xc10] sm:$0xff] }
  0xd0   :  { %21519 = vst [vmem:[#allocation392_spill] sm:$0xff] %v15360_v0  ;;  %21520 = vst [vmem:[#allocation393_spill] sm:$0xff] %v15365_v33  ;;  %v15375_v62 = vld [vmem:[%s21134_s5 + $0xc18] sm:$0xff]  ;;  %v15380_v36 = vld [vmem:[%s21134_s5 + $0xc20] sm:$0xff] }
  0xd1   :  { %21521 = vst [vmem:[#allocation394_spill] sm:$0xff] %v15370_v42  ;;  %21522 = vst [vmem:[#allocation395_spill] sm:$0xff] %v15375_v62  ;;  %v15385_v0 = vld [vmem:[%s21134_s5 + $0xc28] sm:$0xff]  ;;  %v15390_v33 = vld [vmem:[%s21134_s5 + $0xc30] sm:$0xff] }
  0xd2   :  { %21523 = vst [vmem:[#allocation396_spill] sm:$0xff] %v15380_v36  ;;  %21524 = vst [vmem:[#allocation397_spill] sm:$0xff] %v15385_v0  ;;  %v15395_v42 = vld [vmem:[%s21134_s5 + $0xc38] sm:$0xff]  ;;  %v15400_v62 = vld [vmem:[%s21134_s5 + $0xc40] sm:$0xff] }
  0xd3   :  { %21525 = vst [vmem:[#allocation398_spill] sm:$0xff] %v15390_v33  ;;  %21526 = vst [vmem:[#allocation399_spill] sm:$0xff] %v15395_v42  ;;  %v15405_v36 = vld [vmem:[%s21134_s5 + $0xc48] sm:$0xff]  ;;  %v15410_v0 = vld [vmem:[%s21134_s5 + $0xc50] sm:$0xff] }
  0xd4   :  { %21527 = vst [vmem:[#allocation400_spill] sm:$0xff] %v15400_v62  ;;  %21528 = vst [vmem:[#allocation401_spill] sm:$0xff] %v15405_v36  ;;  %v15415_v33 = vld [vmem:[%s21134_s5 + $0xc58] sm:$0xff]  ;;  %v15420_v42 = vld [vmem:[%s21134_s5 + $0xc60] sm:$0xff] }
  0xd5   :  { %21529 = vst [vmem:[#allocation402_spill] sm:$0xff] %v15410_v0  ;;  %21530 = vst [vmem:[#allocation403_spill] sm:$0xff] %v15415_v33  ;;  %v15425_v62 = vld [vmem:[%s21134_s5 + $0xc68] sm:$0xff]  ;;  %v15430_v36 = vld [vmem:[%s21134_s5 + $0xc70] sm:$0xff] }
  0xd6   :  { %21531 = vst [vmem:[#allocation404_spill] sm:$0xff] %v15420_v42  ;;  %21532 = vst [vmem:[#allocation405_spill] sm:$0xff] %v15425_v62  ;;  %v15435_v0 = vld [vmem:[%s21134_s5 + $0xc78] sm:$0xff] }
  0xd7   :  { %21533 = vst [vmem:[#allocation406_spill] sm:$0xff] %v15430_v36  ;;  %21534 = vst [vmem:[#allocation407_spill] sm:$0xff] %v15435_v0 }
  0xd8   :  { %915 = vsyncadd [#allocation4], 51200  ;;  %s21535_s7 = sld [smem:[#allocation494_spill]]  ;;  %vm1966_vm0 = vcmask 1043456   ;;  %vm1185_vm1 = vcmask 97280   ;;  %s13306_s2 = smov 16  }
  0xd9   :  { %s21536_s0 = sld [smem:[#allocation493_spill]]  ;;  %vm13307_vm2 = vmmov 0   ;;  %s13309_s5 = smov 32   ;;  %vm4367_vm3 = vcmask 130048   ;;  %vm4483_vm4 = vcmask 392192   ;;  %vm4425_vm5 = vcmask 261120  }
  0xda   :  { %s21550_s27 = sld [smem:[#allocation495_spill]]  ;;  %vm4556_vm6 = vcmask 523264   ;;  %s13311_s4 = smov 96   ;;  %vm5730_vm7 = vcmask 785408   ;;  %vm6119_vm8 = vcmask 1048064  }
  0xdb   :  { %s21650_s29 = sld [smem:[#allocation496_spill]] }
  0xdc   :  { %s21756_s25 = sld [smem:[#allocation498_spill]] }
  0xdd   :  { %s21776_s28 = sld [smem:[#allocation497_spill]] }
  0xde   :  { %v1177_v33 = vld [vmem:[%s21535_s7 + $0x8] sm:$0xf]  ;;  %v1176_v62 = vld [vmem:[%s21535_s7] sm:$0xff]  ;;  %s21777_s30 = sld [smem:[#allocation499_spill]] }
  0xdf   :  { %11950 = vmatprep.subr.msk.mxu0 %vm1966_vm0, %v1177_v33  ;;  %v916_v42 = vld [vmem:[%s21536_s0] sm:$0xff]  ;;  %v917_v0 = vld [vmem:[%s21536_s0 + $0x8] sm:$0xff]  ;;  %v918_v36 = vld [vmem:[%s21536_s0 + $0x10] sm:$0xff] }
  0xe0   :  { %11951 = vmatpush3.msk.msra.mxu0 %vm1966_vm0, %v1177_v33  ;;  %11954 = vmatprep.mubr.msk.f32.mxu0 %vm1185_vm1, %v916_v42  ;;  %v919_v33 = vld [vmem:[%s21536_s0 + $0x18] sm:$0xff]  ;;  %v920_v42 = vld [vmem:[%s21536_s0 + $0x20] sm:$0xff]  ;;  %v1018_v44 = vld [vmem:[%s21536_s0 + $0x330] sm:$0xff] }
  0xe1   :  { %11952 = vmatprep.subr.mxu0 %v1176_v62  ;;  %v1020_v39 = vld [vmem:[%s21536_s0 + $0x340] sm:$0xff]  ;;  %v1022_v48 = vld [vmem:[%s21536_s0 + $0x350] sm:$0xff] }
  0xe2   :  { %11953 = vmatpush3.msra.mxu0 %v1176_v62  ;;  %v921_v62 = vld [vmem:[%s21536_s0 + $0x28] sm:$0xff]  ;;  %v1024_v43 = vld [vmem:[%s21536_s0 + $0x360] sm:$0xff]  ;;  %v1026_v52 = vld [vmem:[%s21536_s0 + $0x370] sm:$0xff] }
  0xe3   :  { %11955 = vmatmul.mubr.msk.f32.vlgmr.msra.gmra.mxu0 %vm1185_vm1, %v917_v0  ;;  %v923_v0 = vld [vmem:[%s21536_s0 + $0x38] sm:$0xff]  ;;  %v1028_v47 = vld [vmem:[%s21536_s0 + $0x380] sm:$0xff]  ;;  %v1030_v56 = vld [vmem:[%s21536_s0 + $0x390] sm:$0xff] }
  0xe4   :  { %11957 = vmatprep.mubr.msk.f32.mxu0 %vm1185_vm1, %v918_v36  ;;  %v922_v36 = vld [vmem:[%s21536_s0 + $0x30] sm:$0xff]  ;;  %v1032_v51 = vld [vmem:[%s21536_s0 + $0x3a0] sm:$0xff] }
  0xe5   :  { %v1034_v60 = vld [vmem:[%s21536_s0 + $0x3b0] sm:$0xff]  ;;  %v1036_v55 = vld [vmem:[%s21536_s0 + $0x3c0] sm:$0xff] }
  0xe6   :  { %v1038_v38 = vld [vmem:[%s21536_s0 + $0x3d0] sm:$0xff]  ;;  %v1040_v59 = vld [vmem:[%s21536_s0 + $0x3e0] sm:$0xff] }
  0xe7   :  { %11958 = vmatmul.mubr.msk.f32.gmra.mxu0 %vm1185_vm1, %v919_v33  ;;  %v924_v33 = vld [vmem:[%s21536_s0 + $0x40] sm:$0xff]  ;;  %v1042_v4 = vld [vmem:[%s21536_s0 + $0x3f0] sm:$0xff] }
  0xe8   :  { %11960 = vmatprep.mubr.msk.f32.mxu0 %vm1185_vm1, %v920_v42  ;;  %v925_v42 = vld [vmem:[%s21536_s0 + $0x48] sm:$0xff]  ;;  %v1044_v63 = vld [vmem:[%s21536_s0 + $0x400] sm:$0xff]  ;;  %v1046_v8 = vld [vmem:[%s21536_s0 + $0x410] sm:$0xff] }
  0xe9   :  { %v1048_v3 = vld [vmem:[%s21536_s0 + $0x420] sm:$0xff]  ;;  %v1050_v12 = vld [vmem:[%s21536_s0 + $0x430] sm:$0xff] }
  0xea   :  { %v1052_v7 = vld [vmem:[%s21536_s0 + $0x440] sm:$0xff]  ;;  %v1054_v16 = vld [vmem:[%s21536_s0 + $0x450] sm:$0xff] }
  0xeb   :  { %11961 = vmatmul.mubr.msk.f32.gmra.mxu0 %vm1185_vm1, %v921_v62  ;;  %v926_v62 = vld [vmem:[%s21536_s0 + $0x50] sm:$0xff]  ;;  %v1056_v11 = vld [vmem:[%s21536_s0 + $0x460] sm:$0xff] }
  0xec   :  { %11963 = vmatprep.mubr.msk.f32.mxu0 %vm1185_vm1, %v922_v36  ;;  %v927_v36 = vld [vmem:[%s21536_s0 + $0x58] sm:$0xff]  ;;  %v1058_v20 = vld [vmem:[%s21536_s0 + $0x470] sm:$0xff]  ;;  %v1060_v15 = vld [vmem:[%s21536_s0 + $0x480] sm:$0xff] }
  0xed   :  { %v1062_v24 = vld [vmem:[%s21536_s0 + $0x490] sm:$0xff]  ;;  %v1064_v19 = vld [vmem:[%s21536_s0 + $0x4a0] sm:$0xff] }
  0xee   :  { %v1066_v28 = vld [vmem:[%s21536_s0 + $0x4b0] sm:$0xff]  ;;  %v1068_v32 = vld [vmem:[%s21536_s0 + $0x4c0] sm:$0xff] }
  0xef   :  { %11964 = vmatmul.mubr.msk.f32.gmra.mxu0 %vm1185_vm1, %v923_v0  ;;  %v928_v0 = vld [vmem:[%s21536_s0 + $0x60] sm:$0xff]  ;;  %v1070_v23 = vld [vmem:[%s21536_s0 + $0x4d0] sm:$0xff] }
  0xf0   :  { %11966 = vmatprep.mubr.msk.f32.mxu0 %vm1185_vm1, %v924_v33  ;;  %v929_v33 = vld [vmem:[%s21536_s0 + $0x68] sm:$0xff]  ;;  %v1072_v27 = vld [vmem:[%s21536_s0 + $0x4e0] sm:$0xff]  ;;  %v1074_v31 = vld [vmem:[%s21536_s0 + $0x4f0] sm:$0xff] }
  0xf3   :  { %11967 = vmatmul.mubr.msk.f32.gmra.mxu0 %vm1185_vm1, %v925_v42  ;;  %v930_v42 = vld [vmem:[%s21536_s0 + $0x70] sm:$0xff] }
  0xf4   :  { %11969 = vmatprep.mubr.msk.f32.mxu0 %vm1185_vm1, %v926_v62  ;;  %v931_v62 = vld [vmem:[%s21536_s0 + $0x78] sm:$0xff] }
  0xf7   :  { %11970 = vmatmul.mubr.msk.f32.gmra.mxu0 %vm1185_vm1, %v927_v36  ;;  %v932_v36 = vld [vmem:[%s21536_s0 + $0x80] sm:$0xff] }
  0xf8   :  { %11972 = vmatprep.mubr.msk.f32.mxu0 %vm1185_vm1, %v928_v0  ;;  %v933_v0 = vld [vmem:[%s21536_s0 + $0x88] sm:$0xff] }
  0xfb   :  { %11973 = vmatmul.mubr.msk.f32.gmra.mxu0 %vm1185_vm1, %v929_v33  ;;  %v934_v33 = vld [vmem:[%s21536_s0 + $0x90] sm:$0xff] }
  0xfc   :  { %11975 = vmatprep.mubr.msk.f32.mxu0 %vm1185_vm1, %v930_v42  ;;  %v935_v42 = vld [vmem:[%s21536_s0 + $0x98] sm:$0xff] }
  0xff   :  { %11976 = vmatmul.mubr.msk.f32.gmra.mxu0 %vm1185_vm1, %v931_v62  ;;  %v936_v62 = vld [vmem:[%s21536_s0 + $0xa0] sm:$0xff] }
 0x100   :  { %11978 = vmatprep.mubr.msk.f32.mxu0 %vm1185_vm1, %v932_v36  ;;  %v937_v36 = vld [vmem:[%s21536_s0 + $0xa8] sm:$0xff] }
 0x103   :  { %11979 = vmatmul.mubr.msk.f32.gmra.mxu0 %vm1185_vm1, %v933_v0  ;;  %v938_v0 = vld [vmem:[%s21536_s0 + $0xb0] sm:$0xff] }
 0x104   :  { %11981 = vmatprep.mubr.msk.f32.mxu0 %vm1185_vm1, %v934_v33  ;;  %v939_v33 = vld [vmem:[%s21536_s0 + $0xb8] sm:$0xff] }
 0x107   :  { %11982 = vmatmul.mubr.msk.f32.gmra.mxu0 %vm1185_vm1, %v935_v42  ;;  %v940_v42 = vld [vmem:[%s21536_s0 + $0xc0] sm:$0xff] }
 0x108   :  { %11984 = vmatprep.mubr.msk.f32.mxu0 %vm1185_vm1, %v936_v62  ;;  %v941_v62 = vld [vmem:[%s21536_s0 + $0xc8] sm:$0xff] }
 0x10b   :  { %11985 = vmatmul.mubr.msk.f32.gmra.mxu0 %vm1185_vm1, %v937_v36  ;;  %v942_v36 = vld [vmem:[%s21536_s0 + $0xd0] sm:$0xff] }
 0x10c   :  { %11987 = vmatprep.mubr.msk.f32.mxu0 %vm1185_vm1, %v938_v0  ;;  %v943_v0 = vld [vmem:[%s21536_s0 + $0xd8] sm:$0xff] }
 0x10f   :  { %11988 = vmatmul.mubr.msk.f32.gmra.mxu0 %vm1185_vm1, %v939_v33  ;;  %v944_v33 = vld [vmem:[%s21536_s0 + $0xe0] sm:$0xff] }
 0x110   :  { %11990 = vmatprep.mubr.msk.f32.mxu0 %vm1185_vm1, %v940_v42  ;;  %v945_v42 = vld [vmem:[%s21536_s0 + $0xe8] sm:$0xff] }
 0x113   :  { %11991 = vmatmul.mubr.msk.f32.gmra.mxu0 %vm1185_vm1, %v941_v62  ;;  %v946_v62 = vld [vmem:[%s21536_s0 + $0xf0] sm:$0xff] }
 0x114   :  { %11993 = vmatprep.mubr.msk.f32.mxu0 %vm1185_vm1, %v942_v36  ;;  %v947_v36 = vld [vmem:[%s21536_s0 + $0xf8] sm:$0xff] }
 0x117   :  { %11994 = vmatmul.mubr.msk.f32.gmra.mxu0 %vm1185_vm1, %v943_v0  ;;  %v948_v0 = vld [vmem:[%s21536_s0 + $0x100] sm:$0xff] }
 0x118   :  { %11996 = vmatprep.mubr.msk.f32.mxu0 %vm1185_vm1, %v944_v33  ;;  %v949_v33 = vld [vmem:[%s21536_s0 + $0x108] sm:$0xff] }
 0x11b   :  { %11997 = vmatmul.mubr.msk.f32.gmra.mxu0 %vm1185_vm1, %v945_v42  ;;  %v950_v42 = vld [vmem:[%s21536_s0 + $0x110] sm:$0xff] }
 0x11c   :  { %11999 = vmatprep.mubr.msk.f32.mxu0 %vm1185_vm1, %v946_v62  ;;  %v951_v62 = vld [vmem:[%s21536_s0 + $0x118] sm:$0xff] }
 0x11f   :  { %12000 = vmatmul.mubr.msk.f32.gmra.mxu0 %vm1185_vm1, %v947_v36  ;;  %v952_v36 = vld [vmem:[%s21536_s0 + $0x120] sm:$0xff] }
 0x120   :  { %12002 = vmatprep.mubr.msk.f32.mxu0 %vm1185_vm1, %v948_v0  ;;  %v953_v0 = vld [vmem:[%s21536_s0 + $0x128] sm:$0xff] }
 0x123   :  { %12003 = vmatmul.mubr.msk.f32.gmra.mxu0 %vm1185_vm1, %v949_v33  ;;  %v954_v33 = vld [vmem:[%s21536_s0 + $0x130] sm:$0xff] }
 0x124   :  { %12005 = vmatprep.mubr.msk.f32.mxu0 %vm1185_vm1, %v950_v42  ;;  %v955_v42 = vld [vmem:[%s21536_s0 + $0x138] sm:$0xff] }
 0x127   :  { %12006 = vmatmul.mubr.msk.f32.gmra.mxu0 %vm1185_vm1, %v951_v62  ;;  %v956_v62 = vld [vmem:[%s21536_s0 + $0x140] sm:$0xff] }
 0x128   :  { %12008 = vmatprep.mubr.msk.f32.mxu0 %vm1185_vm1, %v952_v36  ;;  %v957_v36 = vld [vmem:[%s21536_s0 + $0x148] sm:$0xff] }
 0x12b   :  { %12009 = vmatmul.mubr.msk.f32.gmra.mxu0 %vm1185_vm1, %v953_v0  ;;  %v958_v0 = vld [vmem:[%s21536_s0 + $0x150] sm:$0xff] }
 0x12c   :  { %12011 = vmatprep.mubr.msk.f32.mxu0 %vm1185_vm1, %v954_v33  ;;  %v959_v33 = vld [vmem:[%s21536_s0 + $0x158] sm:$0xff] }
 0x12f   :  { %12012 = vmatmul.mubr.msk.f32.gmra.mxu0 %vm1185_vm1, %v955_v42  ;;  %v960_v42 = vld [vmem:[%s21536_s0 + $0x160] sm:$0xff] }
 0x130   :  { %12014 = vmatprep.mubr.msk.f32.mxu0 %vm1185_vm1, %v956_v62  ;;  %v961_v62 = vld [vmem:[%s21536_s0 + $0x168] sm:$0xff] }
 0x133   :  { %12015 = vmatmul.mubr.msk.f32.gmra.mxu0 %vm1185_vm1, %v957_v36  ;;  %v962_v36 = vld [vmem:[%s21536_s0 + $0x170] sm:$0xff] }
 0x134   :  { %12017 = vmatprep.mubr.msk.f32.mxu0 %vm1185_vm1, %v958_v0  ;;  %v963_v0 = vld [vmem:[%s21536_s0 + $0x178] sm:$0xff] }
 0x137   :  { %12018 = vmatmul.mubr.msk.f32.gmra.mxu0 %vm1185_vm1, %v959_v33  ;;  %v964_v33 = vld [vmem:[%s21536_s0 + $0x180] sm:$0xff] }
 0x138   :  { %12020 = vmatprep.mubr.msk.f32.mxu0 %vm1185_vm1, %v960_v42  ;;  %v965_v42 = vld [vmem:[%s21536_s0 + $0x188] sm:$0xff] }
 0x13b   :  { %12021 = vmatmul.mubr.msk.f32.gmra.mxu0 %vm1185_vm1, %v961_v62  ;;  %v966_v62 = vld [vmem:[%s21536_s0 + $0x190] sm:$0xff] }
 0x13c   :  { %12023 = vmatprep.mubr.msk.f32.mxu0 %vm1185_vm1, %v962_v36  ;;  %v967_v36 = vld [vmem:[%s21536_s0 + $0x198] sm:$0xff] }
 0x13f   :  { %12024 = vmatmul.mubr.msk.f32.gmra.mxu0 %vm1185_vm1, %v963_v0  ;;  %v968_v0 = vld [vmem:[%s21536_s0 + $0x1a0] sm:$0xff] }
 0x140   :  { %12026 = vmatprep.mubr.msk.f32.mxu0 %vm1185_vm1, %v964_v33  ;;  %v969_v33 = vld [vmem:[%s21536_s0 + $0x1a8] sm:$0xff] }
 0x143   :  { %12027 = vmatmul.mubr.msk.f32.gmra.mxu0 %vm1185_vm1, %v965_v42  ;;  %v970_v42 = vld [vmem:[%s21536_s0 + $0x1b0] sm:$0xff] }
 0x144   :  { %12029 = vmatprep.mubr.msk.f32.mxu0 %vm1185_vm1, %v966_v62  ;;  %v971_v62 = vld [vmem:[%s21536_s0 + $0x1b8] sm:$0xff] }
 0x147   :  { %12030 = vmatmul.mubr.msk.f32.gmra.mxu0 %vm1185_vm1, %v967_v36  ;;  %v972_v36 = vld [vmem:[%s21536_s0 + $0x1c0] sm:$0xff] }
 0x148   :  { %12032 = vmatprep.mubr.msk.f32.mxu0 %vm1185_vm1, %v968_v0  ;;  %v973_v0 = vld [vmem:[%s21536_s0 + $0x1c8] sm:$0xff] }
 0x14b   :  { %12033 = vmatmul.mubr.msk.f32.gmra.mxu0 %vm1185_vm1, %v969_v33  ;;  %v974_v33 = vld [vmem:[%s21536_s0 + $0x1d0] sm:$0xff] }
 0x14c   :  { %12035 = vmatprep.mubr.msk.f32.mxu0 %vm1185_vm1, %v970_v42  ;;  %v975_v42 = vld [vmem:[%s21536_s0 + $0x1d8] sm:$0xff] }
 0x14f   :  { %12036 = vmatmul.mubr.msk.f32.gmra.mxu0 %vm1185_vm1, %v971_v62  ;;  %v976_v62 = vld [vmem:[%s21536_s0 + $0x1e0] sm:$0xff] }
 0x150   :  { %12038 = vmatprep.mubr.msk.f32.mxu0 %vm1185_vm1, %v972_v36  ;;  %v977_v36 = vld [vmem:[%s21536_s0 + $0x1e8] sm:$0xff] }
 0x153   :  { %12039 = vmatmul.mubr.msk.f32.gmra.mxu0 %vm1185_vm1, %v973_v0  ;;  %v978_v0 = vld [vmem:[%s21536_s0 + $0x1f0] sm:$0xff] }
 0x154   :  { %12041 = vmatprep.mubr.msk.f32.mxu0 %vm1185_vm1, %v974_v33  ;;  %v979_v33 = vld [vmem:[%s21536_s0 + $0x1f8] sm:$0xff] }
 0x157   :  { %12042 = vmatmul.mubr.msk.f32.gmra.mxu0 %vm1185_vm1, %v975_v42  ;;  %v980_v42 = vld [vmem:[%s21536_s0 + $0x200] sm:$0xff] }
 0x158   :  { %12044 = vmatprep.mubr.msk.f32.mxu0 %vm1185_vm1, %v976_v62  ;;  %v981_v62 = vld [vmem:[%s21536_s0 + $0x208] sm:$0xff] }
 0x15b   :  { %12045 = vmatmul.mubr.msk.f32.gmra.mxu0 %vm1185_vm1, %v977_v36  ;;  %v982_v36 = vld [vmem:[%s21536_s0 + $0x210] sm:$0xff] }
 0x15c   :  { %12047 = vmatprep.mubr.msk.f32.mxu0 %vm1185_vm1, %v978_v0  ;;  %v983_v0 = vld [vmem:[%s21536_s0 + $0x218] sm:$0xff] }
 0x15f   :  { %12048 = vmatmul.mubr.msk.f32.gmra.mxu0 %vm1185_vm1, %v979_v33  ;;  %v984_v33 = vld [vmem:[%s21536_s0 + $0x220] sm:$0xff] }
 0x160   :  { %12050 = vmatprep.mubr.msk.f32.mxu0 %vm1185_vm1, %v980_v42  ;;  %v985_v42 = vld [vmem:[%s21536_s0 + $0x228] sm:$0xff] }
 0x163   :  { %12051 = vmatmul.mubr.msk.f32.gmra.mxu0 %vm1185_vm1, %v981_v62  ;;  %v986_v62 = vld [vmem:[%s21536_s0 + $0x230] sm:$0xff] }
 0x164   :  { %12053 = vmatprep.mubr.msk.f32.mxu0 %vm1185_vm1, %v982_v36  ;;  %v987_v36 = vld [vmem:[%s21536_s0 + $0x238] sm:$0xff] }
 0x167   :  { %12054 = vmatmul.mubr.msk.f32.gmra.mxu0 %vm1185_vm1, %v983_v0  ;;  %v988_v0 = vld [vmem:[%s21536_s0 + $0x240] sm:$0xff] }
 0x168   :  { %12056 = vmatprep.mubr.msk.f32.mxu0 %vm1185_vm1, %v984_v33  ;;  %v989_v33 = vld [vmem:[%s21536_s0 + $0x248] sm:$0xff] }
 0x16b   :  { %12057 = vmatmul.mubr.msk.f32.gmra.mxu0 %vm1185_vm1, %v985_v42  ;;  %v990_v42 = vld [vmem:[%s21536_s0 + $0x250] sm:$0xff] }
 0x16c   :  { %12059 = vmatprep.mubr.msk.f32.mxu0 %vm1185_vm1, %v986_v62  ;;  %v991_v62 = vld [vmem:[%s21536_s0 + $0x258] sm:$0xff] }
 0x16f   :  { %12060 = vmatmul.mubr.msk.f32.gmra.mxu0 %vm1185_vm1, %v987_v36  ;;  %v992_v36 = vld [vmem:[%s21536_s0 + $0x260] sm:$0xff] }
 0x170   :  { %12062 = vmatprep.mubr.msk.f32.mxu0 %vm1185_vm1, %v988_v0  ;;  %v993_v0 = vld [vmem:[%s21536_s0 + $0x268] sm:$0xff] }
 0x173   :  { %12063 = vmatmul.mubr.msk.f32.gmra.mxu0 %vm1185_vm1, %v989_v33  ;;  %v994_v33 = vld [vmem:[%s21536_s0 + $0x270] sm:$0xff] }
 0x174   :  { %12065 = vmatprep.mubr.msk.f32.mxu0 %vm1185_vm1, %v990_v42  ;;  %v995_v42 = vld [vmem:[%s21536_s0 + $0x278] sm:$0xff] }
 0x177   :  { %12066 = vmatmul.mubr.msk.f32.gmra.mxu0 %vm1185_vm1, %v991_v62  ;;  %v996_v62 = vld [vmem:[%s21536_s0 + $0x280] sm:$0xff] }
 0x178   :  { %12068 = vmatprep.mubr.msk.f32.mxu0 %vm1185_vm1, %v992_v36  ;;  %v997_v36 = vld [vmem:[%s21536_s0 + $0x288] sm:$0xff] }
 0x17b   :  { %12069 = vmatmul.mubr.msk.f32.gmra.mxu0 %vm1185_vm1, %v993_v0  ;;  %v998_v0 = vld [vmem:[%s21536_s0 + $0x290] sm:$0xff] }
 0x17c   :  { %12071 = vmatprep.mubr.msk.f32.mxu0 %vm1185_vm1, %v994_v33  ;;  %v999_v33 = vld [vmem:[%s21536_s0 + $0x298] sm:$0xff] }
 0x17f   :  { %12072 = vmatmul.mubr.msk.f32.gmra.mxu0 %vm1185_vm1, %v995_v42  ;;  %v1000_v42 = vld [vmem:[%s21536_s0 + $0x2a0] sm:$0xff] }
 0x180   :  { %12074 = vmatprep.mubr.msk.f32.mxu0 %vm1185_vm1, %v996_v62  ;;  %v1001_v62 = vld [vmem:[%s21536_s0 + $0x2a8] sm:$0xff] }
 0x183   :  { %12075 = vmatmul.mubr.msk.f32.gmra.mxu0 %vm1185_vm1, %v997_v36  ;;  %v1002_v36 = vld [vmem:[%s21536_s0 + $0x2b0] sm:$0xff] }
 0x184   :  { %12077 = vmatprep.mubr.msk.f32.mxu0 %vm1185_vm1, %v998_v0  ;;  %v1003_v0 = vld [vmem:[%s21536_s0 + $0x2b8] sm:$0xff] }
 0x187   :  { %12078 = vmatmul.mubr.msk.f32.gmra.mxu0 %vm1185_vm1, %v999_v33  ;;  %v1004_v33 = vld [vmem:[%s21536_s0 + $0x2c0] sm:$0xff] }
 0x188   :  { %12080 = vmatprep.mubr.msk.f32.mxu0 %vm1185_vm1, %v1000_v42  ;;  %v1005_v42 = vld [vmem:[%s21536_s0 + $0x2c8] sm:$0xff] }
 0x18b   :  { %12081 = vmatmul.mubr.msk.f32.gmra.mxu0 %vm1185_vm1, %v1001_v62  ;;  %v1006_v62 = vld [vmem:[%s21536_s0 + $0x2d0] sm:$0xff] }
 0x18c   :  { %12083 = vmatprep.mubr.msk.f32.mxu0 %vm1185_vm1, %v1002_v36  ;;  %v1007_v36 = vld [vmem:[%s21536_s0 + $0x2d8] sm:$0xff] }
 0x18f   :  { %12084 = vmatmul.mubr.msk.f32.gmra.mxu0 %vm1185_vm1, %v1003_v0  ;;  %v1008_v0 = vld [vmem:[%s21536_s0 + $0x2e0] sm:$0xff] }
 0x190   :  { %12086 = vmatprep.mubr.msk.f32.mxu0 %vm1185_vm1, %v1004_v33  ;;  %v1009_v33 = vld [vmem:[%s21536_s0 + $0x2e8] sm:$0xff] }
 0x193   :  { %12087 = vmatmul.mubr.msk.f32.gmra.mxu0 %vm1185_vm1, %v1005_v42  ;;  %v1010_v42 = vld [vmem:[%s21536_s0 + $0x2f0] sm:$0xff] }
 0x194   :  { %12089 = vmatprep.mubr.msk.f32.mxu0 %vm1185_vm1, %v1006_v62  ;;  %v1011_v62 = vld [vmem:[%s21536_s0 + $0x2f8] sm:$0xff] }
 0x197   :  { %12090 = vmatmul.mubr.msk.f32.gmra.mxu0 %vm1185_vm1, %v1007_v36  ;;  %v1012_v36 = vld [vmem:[%s21536_s0 + $0x300] sm:$0xff] }
 0x198   :  { %12092 = vmatprep.mubr.msk.f32.mxu0 %vm1185_vm1, %v1008_v0  ;;  %v1013_v0 = vld [vmem:[%s21536_s0 + $0x308] sm:$0xff] }
 0x19b   :  { %12093 = vmatmul.mubr.msk.f32.gmra.mxu0 %vm1185_vm1, %v1009_v33  ;;  %v1014_v33 = vld [vmem:[%s21536_s0 + $0x310] sm:$0xff] }
 0x19c   :  { %12095 = vmatprep.mubr.msk.f32.mxu0 %vm1185_vm1, %v1010_v42 }
 0x19f   :  { %12096 = vmatmul.mubr.msk.f32.gmra.mxu0 %vm1185_vm1, %v1011_v62  ;;  %v1015_v62 = vld [vmem:[%s21536_s0 + $0x318] sm:$0xff] }
 0x1a0   :  { %12098 = vmatprep.mubr.msk.f32.mxu0 %vm1185_vm1, %v1012_v36  ;;  %v1016_v36 = vld [vmem:[%s21536_s0 + $0x320] sm:$0xff] }
 0x1a3   :  { %v15837_v42 = vpop.f32.mrf.mxu0  ;;  %12099 = vmatmul.mubr.msk.f32.gmra.mxu0 %vm1185_vm1, %v1013_v0  ;;  %v1017_v0 = vld [vmem:[%s21536_s0 + $0x328] sm:$0xff] }
 0x1a4   :  { %12101 = vmatprep.mubr.msk.f32.mxu0 %vm1185_vm1, %v1014_v33 }
 0x1a5   :  { %v15844_v35 = vpop.f32.mrf.mxu0 }
 0x1a7   :  { %v15849_v40 = vpop.f32.mrf.mxu0  ;;  %12102 = vmatmul.mubr.msk.f32.gmra.mxu0 %vm1185_vm1, %v1015_v62  ;;  %v1019_v62 = vld [vmem:[%s21536_s0 + $0x338] sm:$0xff] }
 0x1a8   :  { %12104 = vmatprep.mubr.msk.f32.mxu0 %vm1185_vm1, %v1016_v36 }
 0x1a9   :  { %v15856_v33 = vpop.f32.mrf.mxu0 }
 0x1ab   :  { %v15861_v37 = vpop.f32.mrf.mxu0  ;;  %12105 = vmatmul.mubr.msk.f32.gmra.mxu0 %vm1185_vm1, %v1017_v0 }
 0x1ac   :  { %12107 = vmatprep.mubr.msk.f32.mxu0 %vm1185_vm1, %v1018_v44  ;;  %v1021_v44 = vld [vmem:[%s21536_s0 + $0x348] sm:$0xff] }
 0x1ad   :  { %v15868_v36 = vpop.f32.mrf.mxu0 }
 0x1af   :  { %v15873_v46 = vpop.f32.mrf.mxu0  ;;  %12108 = vmatmul.mubr.msk.f32.gmra.mxu0 %vm1185_vm1, %v1019_v62 }
 0x1b0   :  { %12110 = vmatprep.mubr.msk.f32.mxu0 %vm1185_vm1, %v1020_v39  ;;  %v1023_v39 = vld [vmem:[%s21536_s0 + $0x358] sm:$0xff] }
 0x1b1   :  { %v15880_v0 = vpop.f32.mrf.mxu0 }
 0x1b3   :  { %v15885_v41 = vpop.f32.mrf.mxu0  ;;  %12111 = vmatmul.mubr.msk.f32.gmra.mxu0 %vm1185_vm1, %v1021_v44 }
 0x1b4   :  { %12113 = vmatprep.mubr.msk.f32.mxu0 %vm1185_vm1, %v1022_v48  ;;  %v1025_v48 = vld [vmem:[%s21536_s0 + $0x368] sm:$0xff] }
 0x1b5   :  { %v15892_v62 = vpop.f32.mrf.mxu0 }
 0x1b7   :  { %v15897_v50 = vpop.f32.mrf.mxu0  ;;  %12114 = vmatmul.mubr.msk.f32.gmra.mxu0 %vm1185_vm1, %v1023_v39 }
 0x1b8   :  { %12116 = vmatprep.mubr.msk.f32.mxu0 %vm1185_vm1, %v1024_v43  ;;  %v1027_v43 = vld [vmem:[%s21536_s0 + $0x378] sm:$0xff] }
 0x1b9   :  { %v15904_v44 = vpop.f32.mrf.mxu0 }
 0x1bb   :  { %v15909_v45 = vpop.f32.mrf.mxu0  ;;  %12117 = vmatmul.mubr.msk.f32.gmra.mxu0 %vm1185_vm1, %v1025_v48 }
 0x1bc   :  { %12119 = vmatprep.mubr.msk.f32.mxu0 %vm1185_vm1, %v1026_v52  ;;  %v1029_v52 = vld [vmem:[%s21536_s0 + $0x388] sm:$0xff] }
 0x1bd   :  { %v15916_v39 = vpop.f32.mrf.mxu0 }
 0x1bf   :  { %v15921_v54 = vpop.f32.mrf.mxu0  ;;  %12120 = vmatmul.mubr.msk.f32.gmra.mxu0 %vm1185_vm1, %v1027_v43 }
 0x1c0   :  { %12122 = vmatprep.mubr.msk.f32.mxu0 %vm1185_vm1, %v1028_v47  ;;  %v1031_v47 = vld [vmem:[%s21536_s0 + $0x398] sm:$0xff] }
 0x1c1   :  { %v15928_v48 = vpop.f32.mrf.mxu0 }
 0x1c3   :  { %v15933_v49 = vpop.f32.mrf.mxu0  ;;  %12123 = vmatmul.mubr.msk.f32.gmra.mxu0 %vm1185_vm1, %v1029_v52 }
 0x1c4   :  { %12125 = vmatprep.mubr.msk.f32.mxu0 %vm1185_vm1, %v1030_v56  ;;  %v1033_v56 = vld [vmem:[%s21536_s0 + $0x3a8] sm:$0xff] }
 0x1c5   :  { %v15940_v43 = vpop.f32.mrf.mxu0 }
 0x1c7   :  { %v15945_v58 = vpop.f32.mrf.mxu0  ;;  %12126 = vmatmul.mubr.msk.f32.gmra.mxu0 %vm1185_vm1, %v1031_v47 }
 0x1c8   :  { %12128 = vmatprep.mubr.msk.f32.mxu0 %vm1185_vm1, %v1032_v51  ;;  %v1035_v51 = vld [vmem:[%s21536_s0 + $0x3b8] sm:$0xff] }
 0x1c9   :  { %v15952_v52 = vpop.f32.mrf.mxu0 }
 0x1cb   :  { %v15957_v53 = vpop.f32.mrf.mxu0  ;;  %12129 = vmatmul.mubr.msk.f32.gmra.mxu0 %vm1185_vm1, %v1033_v56 }
 0x1cc   :  { %12131 = vmatprep.mubr.msk.f32.mxu0 %vm1185_vm1, %v1034_v60  ;;  %v1037_v60 = vld [vmem:[%s21536_s0 + $0x3c8] sm:$0xff] }
 0x1cd   :  { %v15964_v47 = vpop.f32.mrf.mxu0 }
 0x1cf   :  { %v15969_v34 = vpop.f32.mrf.mxu0  ;;  %12132 = vmatmul.mubr.msk.f32.gmra.mxu0 %vm1185_vm1, %v1035_v51 }
 0x1d0   :  { %12134 = vmatprep.mubr.msk.f32.mxu0 %vm1185_vm1, %v1036_v55  ;;  %v1039_v55 = vld [vmem:[%s21536_s0 + $0x3d8] sm:$0xff] }
 0x1d1   :  { %v15976_v56 = vpop.f32.mrf.mxu0 }
 0x1d3   :  { %v15981_v57 = vpop.f32.mrf.mxu0  ;;  %12135 = vmatmul.mubr.msk.f32.gmra.mxu0 %vm1185_vm1, %v1037_v60 }
 0x1d4   :  { %12137 = vmatprep.mubr.msk.f32.mxu0 %vm1185_vm1, %v1038_v38  ;;  %v1041_v38 = vld [vmem:[%s21536_s0 + $0x3e8] sm:$0xff] }
 0x1d5   :  { %v15988_v51 = vpop.f32.mrf.mxu0 }
 0x1d7   :  { %v15993_v2 = vpop.f32.mrf.mxu0  ;;  %12138 = vmatmul.mubr.msk.f32.gmra.mxu0 %vm1185_vm1, %v1039_v55 }
 0x1d8   :  { %12140 = vmatprep.mubr.msk.f32.mxu0 %vm1185_vm1, %v1040_v59  ;;  %v1043_v59 = vld [vmem:[%s21536_s0 + $0x3f8] sm:$0xff] }
 0x1d9   :  { %v16000_v60 = vpop.f32.mrf.mxu0 }
 0x1db   :  { %v16005_v61 = vpop.f32.mrf.mxu0  ;;  %12141 = vmatmul.mubr.msk.f32.gmra.mxu0 %vm1185_vm1, %v1041_v38 }
 0x1dc   :  { %12143 = vmatprep.mubr.msk.f32.mxu0 %vm1185_vm1, %v1042_v4  ;;  %v1045_v4 = vld [vmem:[%s21536_s0 + $0x408] sm:$0xff] }
 0x1dd   :  { %v16012_v55 = vpop.f32.mrf.mxu0 }
 0x1df   :  { %v16017_v6 = vpop.f32.mrf.mxu0  ;;  %12144 = vmatmul.mubr.msk.f32.gmra.mxu0 %vm1185_vm1, %v1043_v59 }
 0x1e0   :  { %12146 = vmatprep.mubr.msk.f32.mxu0 %vm1185_vm1, %v1044_v63  ;;  %v1047_v63 = vld [vmem:[%s21536_s0 + $0x418] sm:$0xff] }
 0x1e1   :  { %v16024_v38 = vpop.f32.mrf.mxu0 }
 0x1e3   :  { %v16029_v1 = vpop.f32.mrf.mxu0  ;;  %12147 = vmatmul.mubr.msk.f32.gmra.mxu0 %vm1185_vm1, %v1045_v4 }
 0x1e4   :  { %12149 = vmatprep.mubr.msk.f32.mxu0 %vm1185_vm1, %v1046_v8  ;;  %v1049_v8 = vld [vmem:[%s21536_s0 + $0x428] sm:$0xff] }
 0x1e5   :  { %v16036_v59 = vpop.f32.mrf.mxu0 }
 0x1e7   :  { %v16041_v10 = vpop.f32.mrf.mxu0  ;;  %12150 = vmatmul.mubr.msk.f32.gmra.mxu0 %vm1185_vm1, %v1047_v63 }
 0x1e8   :  { %12152 = vmatprep.mubr.msk.f32.mxu0 %vm1185_vm1, %v1048_v3  ;;  %v1051_v3 = vld [vmem:[%s21536_s0 + $0x438] sm:$0xff] }
 0x1e9   :  { %v16048_v4 = vpop.f32.mrf.mxu0 }
 0x1eb   :  { %v16053_v5 = vpop.f32.mrf.mxu0  ;;  %12153 = vmatmul.mubr.msk.f32.gmra.mxu0 %vm1185_vm1, %v1049_v8 }
 0x1ec   :  { %12155 = vmatprep.mubr.msk.f32.mxu0 %vm1185_vm1, %v1050_v12  ;;  %v1053_v12 = vld [vmem:[%s21536_s0 + $0x448] sm:$0xff] }
 0x1ed   :  { %v16060_v63 = vpop.f32.mrf.mxu0 }
 0x1ef   :  { %v16065_v14 = vpop.f32.mrf.mxu0  ;;  %12156 = vmatmul.mubr.msk.f32.gmra.mxu0 %vm1185_vm1, %v1051_v3 }
 0x1f0   :  { %12158 = vmatprep.mubr.msk.f32.mxu0 %vm1185_vm1, %v1052_v7  ;;  %v1055_v7 = vld [vmem:[%s21536_s0 + $0x458] sm:$0xff] }
 0x1f1   :  { %v16072_v8 = vpop.f32.mrf.mxu0 }
 0x1f3   :  { %v16077_v9 = vpop.f32.mrf.mxu0  ;;  %12159 = vmatmul.mubr.msk.f32.gmra.mxu0 %vm1185_vm1, %v1053_v12 }
 0x1f4   :  { %12161 = vmatprep.mubr.msk.f32.mxu0 %vm1185_vm1, %v1054_v16  ;;  %v1057_v16 = vld [vmem:[%s21536_s0 + $0x468] sm:$0xff] }
 0x1f5   :  { %v16084_v3 = vpop.f32.mrf.mxu0 }
 0x1f7   :  { %v16089_v18 = vpop.f32.mrf.mxu0  ;;  %12162 = vmatmul.mubr.msk.f32.gmra.mxu0 %vm1185_vm1, %v1055_v7 }
 0x1f8   :  { %12164 = vmatprep.mubr.msk.f32.mxu0 %vm1185_vm1, %v1056_v11  ;;  %v1059_v11 = vld [vmem:[%s21536_s0 + $0x478] sm:$0xff] }
 0x1f9   :  { %v16096_v12 = vpop.f32.mrf.mxu0 }
 0x1fb   :  { %v16101_v13 = vpop.f32.mrf.mxu0  ;;  %12165 = vmatmul.mubr.msk.f32.gmra.mxu0 %vm1185_vm1, %v1057_v16 }
 0x1fc   :  { %12167 = vmatprep.mubr.msk.f32.mxu0 %vm1185_vm1, %v1058_v20  ;;  %v1061_v20 = vld [vmem:[%s21536_s0 + $0x488] sm:$0xff] }
 0x1fd   :  { %v16108_v7 = vpop.f32.mrf.mxu0 }
 0x1ff   :  { %v16113_v22 = vpop.f32.mrf.mxu0  ;;  %12168 = vmatmul.mubr.msk.f32.gmra.mxu0 %vm1185_vm1, %v1059_v11 }
 0x200   :  { %12170 = vmatprep.mubr.msk.f32.mxu0 %vm1185_vm1, %v1060_v15  ;;  %v1063_v15 = vld [vmem:[%s21536_s0 + $0x498] sm:$0xff] }
 0x201   :  { %v16120_v16 = vpop.f32.mrf.mxu0 }
 0x203   :  { %v16125_v17 = vpop.f32.mrf.mxu0  ;;  %12171 = vmatmul.mubr.msk.f32.gmra.mxu0 %vm1185_vm1, %v1061_v20 }
 0x204   :  { %21537 = vst [vmem:[#allocation408_spill] sm:$0xff] %v16125_v17  ;;  %12173 = vmatprep.mubr.msk.f32.mxu0 %vm1185_vm1, %v1062_v24  ;;  %v1065_v24 = vld [vmem:[%s21536_s0 + $0x4a8] sm:$0xff] }
 0x205   :  { %v16132_v11 = vpop.f32.mrf.mxu0 }
 0x207   :  { %v16137_v26 = vpop.f32.mrf.mxu0  ;;  %12174 = vmatmul.mubr.msk.f32.gmra.mxu0 %vm1185_vm1, %v1063_v15 }
 0x208   :  { %21538 = vst [vmem:[#allocation409_spill] sm:$0xff] %v16137_v26  ;;  %12176 = vmatprep.mubr.msk.f32.mxu0 %vm1185_vm1, %v1064_v19  ;;  %v1067_v19 = vld [vmem:[%s21536_s0 + $0x4b8] sm:$0xff] }
 0x209   :  { %v16144_v20 = vpop.f32.mrf.mxu0 }
 0x20b   :  { %v16149_v30 = vpop.f32.mrf.mxu0  ;;  %12177 = vmatmul.mubr.msk.f32.gmra.mxu0 %vm1185_vm1, %v1065_v24 }
 0x20c   :  { %21539 = vst [vmem:[#allocation410_spill] sm:$0xff] %v16149_v30  ;;  %12179 = vmatprep.mubr.msk.f32.mxu0 %vm1185_vm1, %v1066_v28  ;;  %v1069_v28 = vld [vmem:[%s21536_s0 + $0x4c8] sm:$0xff] }
 0x20d   :  { %v16156_v15 = vpop.f32.mrf.mxu0 }
 0x20e   :  { %21540 = vst [vmem:[#allocation411_spill] sm:$0xff] %v16156_v15 }
 0x20f   :  { %v16161_v21 = vpop.f32.mrf.mxu0  ;;  %12180 = vmatmul.mubr.msk.f32.gmra.mxu0 %vm1185_vm1, %v1067_v19 }
 0x210   :  { %21541 = vst [vmem:[#allocation412_spill] sm:$0xff] %v16161_v21  ;;  %12182 = vmatprep.mubr.msk.f32.mxu0 %vm1185_vm1, %v1068_v32  ;;  %v1071_v32 = vld [vmem:[%s21536_s0 + $0x4d8] sm:$0xff] }
 0x211   :  { %v16168_v24 = vpop.f32.mrf.mxu0  ;;  %v1079_v21 = vld [vmem:[%s21536_s0 + $0x518] sm:$0xff] }
 0x212   :  { %21542 = vst [vmem:[#allocation413_spill] sm:$0xff] %v16168_v24 }
 0x213   :  { %v16173_v25 = vpop.f32.mrf.mxu0  ;;  %12183 = vmatmul.mubr.msk.f32.gmra.mxu0 %vm1185_vm1, %v1069_v28 }
 0x214   :  { %21543 = vst [vmem:[#allocation414_spill] sm:$0xff] %v16173_v25  ;;  %12185 = vmatprep.mubr.msk.f32.mxu0 %vm1185_vm1, %v1070_v23  ;;  %v1073_v23 = vld [vmem:[%s21536_s0 + $0x4e8] sm:$0xff] }
 0x215   :  { %v16180_v19 = vpop.f32.mrf.mxu0 }
 0x216   :  { %21544 = vst [vmem:[#allocation415_spill] sm:$0xff] %v16180_v19 }
 0x217   :  { %v16185_v29 = vpop.f32.mrf.mxu0  ;;  %12186 = vmatmul.mubr.msk.f32.gmra.mxu0 %vm1185_vm1, %v1071_v32 }
 0x218   :  { %21545 = vst [vmem:[#allocation416_spill] sm:$0xff] %v16185_v29  ;;  %12188 = vmatprep.mubr.msk.f32.mxu0 %vm1185_vm1, %v1072_v27  ;;  %v1075_v27 = vld [vmem:[%s21536_s0 + $0x4f8] sm:$0xff]  ;;  %v1076_v29 = vld [vmem:[%s21536_s0 + $0x500] sm:$0xff] }
 0x219   :  { %v16192_v28 = vpop.f32.mrf.mxu0 }
 0x21a   :  { %21546 = vst [vmem:[#allocation417_spill] sm:$0xff] %v16192_v28 }
 0x21b   :  { %v16197_v25 = vpop.f32.mrf.mxu0  ;;  %12189 = vmatmul.mubr.msk.f32.gmra.mxu0 %vm1185_vm1, %v1073_v23  ;;  %v16219_v23 = vld [vmem:[%s21550_s27] ss:$0 sm:$0xff] }
 0x21c   :  { %21547 = vst [vmem:[#allocation418_spill] sm:$0xff] %v16197_v25  ;;  %12191 = vmatprep.mubr.msk.f32.mxu0 %vm1185_vm1, %v1074_v31  ;;  %v1077_v31 = vld [vmem:[%s21536_s0 + $0x508] sm:$0xff] }
 0x21d   :  { %v16204_v32 = vpop.f32.mrf.mxu0 }
 0x21e   :  { %21548 = vst [vmem:[#allocation419_spill] sm:$0xff] %v16204_v32  ;;  %v1078_v32 = vld [vmem:[%s21536_s0 + $0x510] sm:$0xff] }
 0x21f   :  { %v16209_v28 = vpop.f32.mrf.mxu0  ;;  %12192 = vmatmul.mubr.msk.f32.gmra.mxu0 %vm1185_vm1, %v1075_v27  ;;  %v2037_v27 = vadd.f32 %v16219_v23, %v15844_v35  ;;  %v2047_v35 = vadd.f32 %v16219_v23, %v15856_v33  ;;  %v1082_v33 = vld [vmem:[%s21536_s0 + $0x530] sm:$0xff] }
 0x220   :  { %21549 = vst [vmem:[#allocation420_spill] sm:$0xff] %v16209_v28  ;;  %12194 = vmatprep.mubr.msk.f32.mxu0 %vm1185_vm1, %v1076_v29 }
 0x221   :  { %v16221_v25 = vpop.f32.mrf.mxu0  ;;  %v3335_v30 = vmax.f32 %v2037_v27, 0.0  ;;  %v1081_v27 = vld [vmem:[%s21536_s0 + $0x528] sm:$0xff] }
 0x222   :  { %21551 = vst [vmem:[#allocation421_spill] sm:$0xff] %v16221_v25  ;;  %v1080_v25 = vld [vmem:[%s21536_s0 + $0x520] sm:$0xff] }
 0x223   :  { %v12052_v28 = vpop.f32.mrf.mxu0  ;;  %12195 = vmatmul.mubr.msk.f32.gmra.mxu0 %vm1185_vm1, %v1077_v31 }
 0x224   :  { %v2362_v29 = vadd.f32 %v12052_v28, %v16219_v23  ;;  %12197 = vmatprep.mubr.msk.f32.mxu0 %vm1185_vm1, %v1078_v32  ;;  %v2042_v28 = vadd.f32 %v15837_v42, %v16219_v23  ;;  %v2057_v42 = vadd.f32 %v16219_v23, %v15868_v36  ;;  %v2067_v36 = vadd.f32 %v16219_v23, %v15880_v0 }
 0x225   :  { %v16234_v19 = vpop.f32.mrf.mxu0 }
 0x226   :  { %21552 = vst [vmem:[#allocation422_spill] sm:$0xff] %v16234_v19  ;;  %v3400_v24 = vmax.f32 %v2362_v29, 0.0  ;;  %v3337_v29 = vmax.f32 %v2047_v35, 0.0  ;;  %v1084_v35 = vld [vmem:[%s21536_s0 + $0x540] sm:$0xff] }
 0x227   :  { %v12055_v31 = vpop.f32.mrf.mxu0  ;;  %12198 = vmatmul.mubr.msk.f32.gmra.mxu0 %vm1185_vm1, %v1079_v21 }
 0x228   :  { %v16244_v32 = vmax.f32 %v3335_v30, %v3400_v24  ;;  %v2372_v26 = vadd.f32 %v12055_v31, %v16219_v23  ;;  %12200 = vmatprep.mubr.msk.f32.mxu0 %vm1185_vm1, %v1080_v25  ;;  %v3336_v24 = vmax.f32 %v2042_v28, 0.0  ;;  %v2052_v25 = vadd.f32 %v15849_v40, %v16219_v23 }
 0x229   :  { %v2366_v19 = vpop.f32.mrf.mxu0  ;;  %v3339_v40 = vmax.f32 %v2057_v42, 0.0 }
 0x22a   :  { %21553 = vst [vmem:[#allocation423_spill] sm:$0xff] %v16244_v32  ;;  %v3402_v21 = vmax.f32 %v2372_v26, 0.0  ;;  %v2367_v30 = vadd.f32 %v16219_v23, %v2366_v19  ;;  %v1083_v26 = vld [vmem:[%s21536_s0 + $0x538] sm:$0xff] }
 0x22b   :  { %v12058_v31 = vpop.f32.mrf.mxu0  ;;  %12201 = vmatmul.mubr.msk.f32.gmra.mxu0 %vm1185_vm1, %v1081_v27 }
 0x22c   :  { %v16260_v32 = vmax.f32 %v3337_v29, %v3402_v21  ;;  %v3401_v15 = vmax.f32 %v2367_v30, 0.0  ;;  %v2382_v17 = vadd.f32 %v12058_v31, %v16219_v23  ;;  %12203 = vmatprep.mubr.msk.f32.mxu0 %vm1185_vm1, %v1082_v33  ;;  %v2062_v33 = vadd.f32 %v15861_v37, %v16219_v23  ;;  %v1086_v37 = vld [vmem:[%s21536_s0 + $0x550] sm:$0xff] }
 0x22d   :  { %v2376_v19 = vpop.f32.mrf.mxu0  ;;  %v3338_v30 = vmax.f32 %v2052_v25, 0.0 }
 0x22e   :  { %21554 = vst [vmem:[#allocation424_spill] sm:$0xff] %v16260_v32  ;;  %v3404_v28 = vmax.f32 %v2382_v17, 0.0  ;;  %v2377_v27 = vadd.f32 %v16219_v23, %v2376_v19  ;;  %v16273_v29 = vmax.f32 %v3336_v24, %v3401_v15  ;;  %v1085_v17 = vld [vmem:[%s21536_s0 + $0x548] sm:$0xff]  ;;  %v3341_v15 = vmax.f32 %v2067_v36, 0.0 }
 0x22f   :  { %v12061_v21 = vpop.f32.mrf.mxu0  ;;  %12204 = vmatmul.mubr.msk.f32.gmra.mxu0 %vm1185_vm1, %v1083_v26  ;;  %v2077_v24 = vadd.f32 %v16219_v23, %v15892_v62  ;;  %v2072_v36 = vadd.f32 %v15873_v46, %v16219_v23  ;;  %v1087_v62 = vld [vmem:[%s21536_s0 + $0x558] sm:$0xff] }
 0x230   :  { %v16278_v31 = vmax.f32 %v3339_v40, %v3404_v28  ;;  %v3403_v0 = vmax.f32 %v2377_v27, 0.0  ;;  %v2392_v32 = vadd.f32 %v12061_v21, %v16219_v23  ;;  %12206 = vmatprep.mubr.msk.f32.mxu0 %vm1185_vm1, %v1084_v35  ;;  %v3340_v40 = vmax.f32 %v2062_v33, 0.0 }
 0x231   :  { %v2386_v42 = vpop.f32.mrf.mxu0  ;;  %v3343_v46 = vmax.f32 %v2077_v24, 0.0  ;;  %v1089_v24 = vld [vmem:[%s21536_s0 + $0x568] sm:$0xff] }
 0x232   :  { %v16290_v25 = vmax.f32 %v3338_v30, %v3403_v0  ;;  %v3406_v26 = vmax.f32 %v2392_v32, 0.0  ;;  %v2387_v19 = vadd.f32 %v16219_v23, %v2386_v42  ;;  %v2087_v32 = vadd.f32 %v16219_v23, %v15904_v44  ;;  %v1088_v30 = vld [vmem:[%s21536_s0 + $0x560] sm:$0xff] }
 0x233   :  { %v12064_v35 = vpop.f32.mrf.mxu0  ;;  %12207 = vmatmul.mubr.msk.f32.gmra.mxu0 %vm1185_vm1, %v1085_v17  ;;  %v2082_v42 = vadd.f32 %v15885_v41, %v16219_v23  ;;  %v1090_v41 = vld [vmem:[%s21536_s0 + $0x570] sm:$0xff] }
 0x234   :  { %v16296_v28 = vmax.f32 %v3341_v15, %v3406_v26  ;;  %v3405_v27 = vmax.f32 %v2387_v19, 0.0  ;;  %v2402_v21 = vadd.f32 %v12064_v35, %v16219_v23  ;;  %12209 = vmatprep.mubr.msk.f32.mxu0 %vm1185_vm1, %v1086_v37  ;;  %v3342_v26 = vmax.f32 %v2072_v36, 0.0 }
 0x235   :  { %v2396_v33 = vpop.f32.mrf.mxu0  ;;  %v2097_v36 = vadd.f32 %v16219_v23, %v15916_v39  ;;  %v1091_v39 = vld [vmem:[%s21536_s0 + $0x578] sm:$0xff] }
 0x236   :  { %v16308_v0 = vmax.f32 %v3340_v40, %v3405_v27  ;;  %v3408_v17 = vmax.f32 %v2402_v21, 0.0  ;;  %v2397_v15 = vadd.f32 %v16219_v23, %v2396_v33  ;;  %v3345_v40 = vmax.f32 %v2087_v32, 0.0 }
 0x237   :  { %v12067_v37 = vpop.f32.mrf.mxu0  ;;  %12210 = vmatmul.mubr.msk.f32.gmra.mxu0 %vm1185_vm1, %v1087_v62  ;;  %v2092_v32 = vadd.f32 %v15897_v50, %v16219_v23  ;;  %v3347_v50 = vmax.f32 %v2097_v36, 0.0  ;;  %v1093_v36 = vld [vmem:[%s21536_s0 + $0x588] sm:$0xff] }
 0x238   :  { %v16314_v19 = vmax.f32 %v3343_v46, %v3408_v17  ;;  %v3407_v44 = vmax.f32 %v2397_v15, 0.0  ;;  %v2412_v35 = vadd.f32 %v12067_v37, %v16219_v23  ;;  %12212 = vmatprep.mubr.msk.f32.mxu0 %vm1185_vm1, %v1088_v30  ;;  %v3344_v46 = vmax.f32 %v2082_v42, 0.0 }
 0x239   :  { %v2406_v27 = vpop.f32.mrf.mxu0  ;;  %v2107_v42 = vadd.f32 %v16219_v23, %v15928_v48 }
 0x23a   :  { %v16326_v21 = vmax.f32 %v3342_v26, %v3407_v44  ;;  %v3410_v62 = vmax.f32 %v2412_v35, 0.0  ;;  %v2407_v33 = vadd.f32 %v16219_v23, %v2406_v27  ;;  %v1092_v44 = vld [vmem:[%s21536_s0 + $0x580] sm:$0xff]  ;;  %v2102_v27 = vadd.f32 %v15909_v45, %v16219_v23  ;;  %v1094_v45 = vld [vmem:[%s21536_s0 + $0x590] sm:$0xff] }
 0x23b   :  { %v12070_v30 = vpop.f32.mrf.mxu0  ;;  %12213 = vmatmul.mubr.msk.f32.gmra.mxu0 %vm1185_vm1, %v1089_v24 }
 0x23c   :  { %v16332_v17 = vmax.f32 %v3345_v40, %v3410_v62  ;;  %v3409_v15 = vmax.f32 %v2407_v33, 0.0  ;;  %v2422_v37 = vadd.f32 %v12070_v30, %v16219_v23  ;;  %12215 = vmatprep.mubr.msk.f32.mxu0 %vm1185_vm1, %v1090_v41  ;;  %v3346_v62 = vmax.f32 %v2092_v32, 0.0 }
 0x23d   :  { %v2416_v26 = vpop.f32.mrf.mxu0  ;;  %v2117_v32 = vadd.f32 %v16219_v23, %v15940_v43  ;;  %v1095_v43 = vld [vmem:[%s21536_s0 + $0x598] sm:$0xff] }
 0x23e   :  { %v16344_v35 = vmax.f32 %v3344_v46, %v3409_v15  ;;  %v3412_v24 = vmax.f32 %v2422_v37, 0.0  ;;  %v2417_v40 = vadd.f32 %v16219_v23, %v2416_v26  ;;  %v3349_v46 = vmax.f32 %v2107_v42, 0.0 }
 0x23f   :  { %v12073_v41 = vpop.f32.mrf.mxu0  ;;  %12216 = vmatmul.mubr.msk.f32.gmra.mxu0 %vm1185_vm1, %v1091_v39  ;;  %v2112_v42 = vadd.f32 %v15921_v54, %v16219_v23  ;;  %v3351_v54 = vmax.f32 %v2117_v32, 0.0  ;;  %v1097_v32 = vld [vmem:[%s21536_s0 + $0x5a8] sm:$0xff] }
 0x240   :  { %v16350_v33 = vmax.f32 %v3347_v50, %v3412_v24  ;;  %v3411_v48 = vmax.f32 %v2417_v40, 0.0  ;;  %v2432_v30 = vadd.f32 %v12073_v41, %v16219_v23  ;;  %12218 = vmatprep.mubr.msk.f32.mxu0 %vm1185_vm1, %v1092_v44  ;;  %v3348_v50 = vmax.f32 %v2102_v27, 0.0 }
 0x241   :  { %v2426_v15 = vpop.f32.mrf.mxu0  ;;  %v2127_v27 = vadd.f32 %v16219_v23, %v15952_v52 }
 0x242   :  { %v16362_v37 = vmax.f32 %v3346_v62, %v3411_v48  ;;  %v3414_v39 = vmax.f32 %v2432_v30, 0.0  ;;  %v2427_v26 = vadd.f32 %v16219_v23, %v2426_v15  ;;  %v1096_v48 = vld [vmem:[%s21536_s0 + $0x5a0] sm:$0xff]  ;;  %v2122_v15 = vadd.f32 %v15933_v49, %v16219_v23  ;;  %v1098_v49 = vld [vmem:[%s21536_s0 + $0x5b0] sm:$0xff] }
 0x243   :  { %v12076_v44 = vpop.f32.mrf.mxu0  ;;  %12219 = vmatmul.mubr.msk.f32.gmra.mxu0 %vm1185_vm1, %v1093_v36 }
 0x244   :  { %v16368_v24 = vmax.f32 %v3349_v46, %v3414_v39  ;;  %v3413_v40 = vmax.f32 %v2427_v26, 0.0  ;;  %v2442_v41 = vadd.f32 %v12076_v44, %v16219_v23  ;;  %12221 = vmatprep.mubr.msk.f32.mxu0 %vm1185_vm1, %v1094_v45  ;;  %v3350_v39 = vmax.f32 %v2112_v42, 0.0 }
 0x245   :  { %v2436_v62 = vpop.f32.mrf.mxu0  ;;  %v2137_v42 = vadd.f32 %v16219_v23, %v15964_v47  ;;  %v1099_v47 = vld [vmem:[%s21536_s0 + $0x5b8] sm:$0xff] }
 0x246   :  { %v16380_v30 = vmax.f32 %v3348_v50, %v3413_v40  ;;  %v3416_v36 = vmax.f32 %v2442_v41, 0.0  ;;  %v2437_v46 = vadd.f32 %v16219_v23, %v2436_v62  ;;  %v3353_v50 = vmax.f32 %v2127_v27, 0.0 }
 0x247   :  { %v12079_v45 = vpop.f32.mrf.mxu0  ;;  %12222 = vmatmul.mubr.msk.f32.gmra.mxu0 %vm1185_vm1, %v1095_v43  ;;  %v2132_v27 = vadd.f32 %v15945_v58, %v16219_v23  ;;  %v3355_v58 = vmax.f32 %v2137_v42, 0.0  ;;  %v1101_v42 = vld [vmem:[%s21536_s0 + $0x5c8] sm:$0xff] }
 0x248   :  { %v16386_v26 = vmax.f32 %v3351_v54, %v3416_v36  ;;  %v3415_v52 = vmax.f32 %v2437_v46, 0.0  ;;  %v2452_v44 = vadd.f32 %v12079_v45, %v16219_v23  ;;  %12224 = vmatprep.mubr.msk.f32.mxu0 %vm1185_vm1, %v1096_v48  ;;  %v3352_v54 = vmax.f32 %v2122_v15, 0.0 }
 0x249   :  { %v2446_v40 = vpop.f32.mrf.mxu0  ;;  %v2147_v15 = vadd.f32 %v16219_v23, %v15976_v56 }
 0x24a   :  { %v16398_v41 = vmax.f32 %v3350_v39, %v3415_v52  ;;  %v3418_v43 = vmax.f32 %v2452_v44, 0.0  ;;  %v2447_v62 = vadd.f32 %v16219_v23, %v2446_v40  ;;  %v1100_v52 = vld [vmem:[%s21536_s0 + $0x5c0] sm:$0xff]  ;;  %v2142_v40 = vadd.f32 %v15957_v53, %v16219_v23  ;;  %v1102_v53 = vld [vmem:[%s21536_s0 + $0x5d0] sm:$0xff] }
 0x24b   :  { %v12082_v48 = vpop.f32.mrf.mxu0  ;;  %12225 = vmatmul.mubr.msk.f32.gmra.mxu0 %vm1185_vm1, %v1097_v32 }
 0x24c   :  { %v16404_v36 = vmax.f32 %v3353_v50, %v3418_v43  ;;  %v3417_v46 = vmax.f32 %v2447_v62, 0.0  ;;  %v2462_v45 = vadd.f32 %v12082_v48, %v16219_v23  ;;  %12227 = vmatprep.mubr.msk.f32.mxu0 %vm1185_vm1, %v1098_v49  ;;  %v3354_v43 = vmax.f32 %v2132_v27, 0.0 }
 0x24d   :  { %v2456_v39 = vpop.f32.mrf.mxu0  ;;  %v2157_v27 = vadd.f32 %v16219_v23, %v15988_v51  ;;  %v1103_v51 = vld [vmem:[%s21536_s0 + $0x5d8] sm:$0xff] }
 0x24e   :  { %v16416_v44 = vmax.f32 %v3352_v54, %v3417_v46  ;;  %v3420_v32 = vmax.f32 %v2462_v45, 0.0  ;;  %v2457_v50 = vadd.f32 %v16219_v23, %v2456_v39  ;;  %v3357_v54 = vmax.f32 %v2147_v15, 0.0 }
 0x24f   :  { %v12085_v49 = vpop.f32.mrf.mxu0  ;;  %12228 = vmatmul.mubr.msk.f32.gmra.mxu0 %vm1185_vm1, %v1099_v47  ;;  %v2152_v15 = vadd.f32 %v15969_v34, %v16219_v23  ;;  %v3359_v34 = vmax.f32 %v2157_v27, 0.0  ;;  %v1105_v27 = vld [vmem:[%s21536_s0 + $0x5e8] sm:$0xff] }
 0x250   :  { %v16422_v62 = vmax.f32 %v3355_v58, %v3420_v32  ;;  %v3419_v56 = vmax.f32 %v2457_v50, 0.0  ;;  %v2472_v48 = vadd.f32 %v12085_v49, %v16219_v23  ;;  %12230 = vmatprep.mubr.msk.f32.mxu0 %vm1185_vm1, %v1100_v52  ;;  %v3356_v58 = vmax.f32 %v2142_v40, 0.0 }
 0x251   :  { %v2466_v46 = vpop.f32.mrf.mxu0  ;;  %v2167_v40 = vadd.f32 %v16219_v23, %v16000_v60 }
 0x252   :  { %v16434_v45 = vmax.f32 %v3354_v43, %v3419_v56  ;;  %v3422_v47 = vmax.f32 %v2472_v48, 0.0  ;;  %v2467_v39 = vadd.f32 %v16219_v23, %v2466_v46  ;;  %v1104_v56 = vld [vmem:[%s21536_s0 + $0x5e0] sm:$0xff]  ;;  %v2162_v46 = vadd.f32 %v15981_v57, %v16219_v23  ;;  %v1106_v57 = vld [vmem:[%s21536_s0 + $0x5f0] sm:$0xff] }
 0x253   :  { %v12088_v52 = vpop.f32.mrf.mxu0  ;;  %12231 = vmatmul.mubr.msk.f32.gmra.mxu0 %vm1185_vm1, %v1101_v42 }
 0x254   :  { %v16440_v32 = vmax.f32 %v3357_v54, %v3422_v47  ;;  %v3421_v50 = vmax.f32 %v2467_v39, 0.0  ;;  %v2482_v49 = vadd.f32 %v12088_v52, %v16219_v23  ;;  %12233 = vmatprep.mubr.msk.f32.mxu0 %vm1185_vm1, %v1102_v53  ;;  %v3358_v47 = vmax.f32 %v2152_v15, 0.0 }
 0x255   :  { %v2476_v43 = vpop.f32.mrf.mxu0  ;;  %v2177_v15 = vadd.f32 %v16219_v23, %v16012_v55  ;;  %v1107_v55 = vld [vmem:[%s21536_s0 + $0x5f8] sm:$0xff] }
 0x256   :  { %v16452_v48 = vmax.f32 %v3356_v58, %v3421_v50  ;;  %v3424_v42 = vmax.f32 %v2482_v49, 0.0  ;;  %v2477_v54 = vadd.f32 %v16219_v23, %v2476_v43  ;;  %v3361_v58 = vmax.f32 %v2167_v40, 0.0 }
 0x257   :  { %v12091_v53 = vpop.f32.mrf.mxu0  ;;  %12234 = vmatmul.mubr.msk.f32.gmra.mxu0 %vm1185_vm1, %v1103_v51  ;;  %v2172_v40 = vadd.f32 %v15993_v2, %v16219_v23  ;;  %v3363_v2 = vmax.f32 %v2177_v15, 0.0  ;;  %v1109_v15 = vld [vmem:[%s21536_s0 + $0x608] sm:$0xff] }
 0x258   :  { %v16458_v39 = vmax.f32 %v3359_v34, %v3424_v42  ;;  %v3423_v60 = vmax.f32 %v2477_v54, 0.0  ;;  %v2492_v52 = vadd.f32 %v12091_v53, %v16219_v23  ;;  %12236 = vmatprep.mubr.msk.f32.mxu0 %vm1185_vm1, %v1104_v56  ;;  %v3360_v34 = vmax.f32 %v2162_v46, 0.0 }
 0x259   :  { %v2486_v50 = vpop.f32.mrf.mxu0  ;;  %v2187_v46 = vadd.f32 %v16219_v23, %v16024_v38 }
 0x25a   :  { %21555 = vst [vmem:[#allocation425_spill] sm:$0xff] %v16458_v39  ;;  %v16470_v49 = vmax.f32 %v3358_v47, %v3423_v60  ;;  %v3426_v51 = vmax.f32 %v2492_v52, 0.0  ;;  %v2487_v43 = vadd.f32 %v16219_v23, %v2486_v50  ;;  %v1108_v60 = vld [vmem:[%s21536_s0 + $0x600] sm:$0xff]  ;;  %v2182_v50 = vadd.f32 %v16005_v61, %v16219_v23  ;;  %v1110_v61 = vld [vmem:[%s21536_s0 + $0x610] sm:$0xff] }
 0x25b   :  { %v12094_v56 = vpop.f32.mrf.mxu0  ;;  %12237 = vmatmul.mubr.msk.f32.gmra.mxu0 %vm1185_vm1, %v1105_v27 }
 0x25c   :  { %21556 = vst [vmem:[#allocation426_spill] sm:$0xff] %v16470_v49  ;;  %v16476_v42 = vmax.f32 %v3361_v58, %v3426_v51  ;;  %v3425_v54 = vmax.f32 %v2487_v43, 0.0  ;;  %v2502_v53 = vadd.f32 %v12094_v56, %v16219_v23  ;;  %12239 = vmatprep.mubr.msk.f32.mxu0 %vm1185_vm1, %v1106_v57  ;;  %v3362_v51 = vmax.f32 %v2172_v40, 0.0 }
 0x25d   :  { %v2496_v47 = vpop.f32.mrf.mxu0  ;;  %v2197_v40 = vadd.f32 %v16219_v23, %v16036_v59  ;;  %v1111_v59 = vld [vmem:[%s21536_s0 + $0x618] sm:$0xff]  ;;  %v21105_v49 = vmov 0.0  }
 0x25e   :  { %21557 = vst [vmem:[#allocation427_spill] sm:$0xff] %v16476_v42  ;;  %v16488_v52 = vmax.f32 %v3360_v34, %v3425_v54  ;;  %v3428_v27 = vmax.f32 %v2502_v53, 0.0  ;;  %v2497_v58 = vadd.f32 %v16219_v23, %v2496_v47  ;;  %v3365_v34 = vmax.f32 %v2187_v46, 0.0  ;;  %12344 = vmatprep.subr.mxu1 %v21105_v49  ;;  %12360 = vmatprep.mubr.msk.f32.mxu1 %vm13307_vm2, %v21105_v49 }
 0x25f   :  { %v12097_v57 = vpop.f32.mrf.mxu0  ;;  %12240 = vmatmul.mubr.msk.f32.gmra.mxu0 %vm1185_vm1, %v1107_v55  ;;  %v2192_v46 = vadd.f32 %v16017_v6, %v16219_v23  ;;  %v3367_v6 = vmax.f32 %v2197_v40, 0.0  ;;  %v1113_v40 = vld [vmem:[%s21536_s0 + $0x628] sm:$0xff] }
 0x260   :  { %21558 = vst [vmem:[#allocation428_spill] sm:$0xff] %v16488_v52  ;;  %v16494_v43 = vmax.f32 %v3363_v2, %v3428_v27  ;;  %v3427_v38 = vmax.f32 %v2497_v58, 0.0  ;;  %v2512_v56 = vadd.f32 %v12097_v57, %v16219_v23  ;;  %12242 = vmatprep.mubr.msk.f32.mxu0 %vm1185_vm1, %v1108_v60  ;;  %v3364_v2 = vmax.f32 %v2182_v50, 0.0 }
 0x261   :  { %v2506_v54 = vpop.f32.mrf.mxu0  ;;  %v2207_v50 = vadd.f32 %v16219_v23, %v16048_v4 }
 0x262   :  { %21559 = vst [vmem:[#allocation429_spill] sm:$0xff] %v16494_v43  ;;  %v16506_v53 = vmax.f32 %v3362_v51, %v3427_v38  ;;  %v3430_v55 = vmax.f32 %v2512_v56, 0.0  ;;  %v2507_v47 = vadd.f32 %v16219_v23, %v2506_v54  ;;  %v1112_v38 = vld [vmem:[%s21536_s0 + $0x620] sm:$0xff]  ;;  %v2202_v54 = vadd.f32 %v16029_v1, %v16219_v23  ;;  %v1114_v1 = vld [vmem:[%s21536_s0 + $0x630] sm:$0xff] }
 0x263   :  { %v12100_v60 = vpop.f32.mrf.mxu0  ;;  %12243 = vmatmul.mubr.msk.f32.gmra.mxu0 %vm1185_vm1, %v1109_v15 }
 0x264   :  { %21560 = vst [vmem:[#allocation430_spill] sm:$0xff] %v16506_v53  ;;  %v16512_v27 = vmax.f32 %v3365_v34, %v3430_v55  ;;  %v3429_v58 = vmax.f32 %v2507_v47, 0.0  ;;  %v2522_v57 = vadd.f32 %v12100_v60, %v16219_v23  ;;  %12245 = vmatprep.mubr.msk.f32.mxu0 %vm1185_vm1, %v1110_v61  ;;  %v3366_v55 = vmax.f32 %v2192_v46, 0.0 }
 0x265   :  { %v2516_v51 = vpop.f32.mrf.mxu0  ;;  %v2217_v46 = vadd.f32 %v16219_v23, %v16060_v63  ;;  %v1115_v63 = vld [vmem:[%s21536_s0 + $0x638] sm:$0xff] }
 0x266   :  { %21561 = vst [vmem:[#allocation431_spill] sm:$0xff] %v16512_v27  ;;  %v16524_v56 = vmax.f32 %v3364_v2, %v3429_v58  ;;  %v3432_v15 = vmax.f32 %v2522_v57, 0.0  ;;  %v2517_v34 = vadd.f32 %v16219_v23, %v2516_v51  ;;  %v3369_v2 = vmax.f32 %v2207_v50, 0.0 }
 0x267   :  { %v12103_v61 = vpop.f32.mrf.mxu0  ;;  %12246 = vmatmul.mubr.msk.f32.gmra.mxu0 %vm1185_vm1, %v1111_v59  ;;  %v2212_v50 = vadd.f32 %v16041_v10, %v16219_v23  ;;  %v3371_v10 = vmax.f32 %v2217_v46, 0.0  ;;  %v1117_v46 = vld [vmem:[%s21536_s0 + $0x648] sm:$0xff] }
 0x268   :  { %21562 = vst [vmem:[#allocation432_spill] sm:$0xff] %v16524_v56  ;;  %v16530_v47 = vmax.f32 %v3367_v6, %v3432_v15  ;;  %v3431_v4 = vmax.f32 %v2517_v34, 0.0  ;;  %v2532_v60 = vadd.f32 %v12103_v61, %v16219_v23  ;;  %12248 = vmatprep.mubr.msk.f32.mxu0 %vm1185_vm1, %v1112_v38  ;;  %v3368_v6 = vmax.f32 %v2202_v54, 0.0 }
 0x269   :  { %v2526_v58 = vpop.f32.mrf.mxu0  ;;  %v2227_v54 = vadd.f32 %v16219_v23, %v16072_v8 }
 0x26a   :  { %21563 = vst [vmem:[#allocation433_spill] sm:$0xff] %v16530_v47  ;;  %v16542_v57 = vmax.f32 %v3366_v55, %v3431_v4  ;;  %v3434_v59 = vmax.f32 %v2532_v60, 0.0  ;;  %v2527_v51 = vadd.f32 %v16219_v23, %v2526_v58  ;;  %v1116_v4 = vld [vmem:[%s21536_s0 + $0x640] sm:$0xff]  ;;  %v2222_v58 = vadd.f32 %v16053_v5, %v16219_v23  ;;  %v1118_v5 = vld [vmem:[%s21536_s0 + $0x650] sm:$0xff] }
 0x26b   :  { %v12106_v38 = vpop.f32.mrf.mxu0  ;;  %12249 = vmatmul.mubr.msk.f32.gmra.mxu0 %vm1185_vm1, %v1113_v40  ;;  %v1174_v47 = vld [vmem:[%s21536_s0 + $0x810] sm:$0xff] }
 0x26c   :  { %21564 = vst [vmem:[#allocation434_spill] sm:$0xff] %v16542_v57  ;;  %v16548_v15 = vmax.f32 %v3369_v2, %v3434_v59  ;;  %v3433_v34 = vmax.f32 %v2527_v51, 0.0  ;;  %v2542_v61 = vadd.f32 %v12106_v38, %v16219_v23  ;;  %12251 = vmatprep.mubr.msk.f32.mxu0 %vm1185_vm1, %v1114_v1  ;;  %v3370_v59 = vmax.f32 %v2212_v50, 0.0 }
 0x26d   :  { %v2536_v55 = vpop.f32.mrf.mxu0  ;;  %v2237_v50 = vadd.f32 %v16219_v23, %v16084_v3  ;;  %v1119_v3 = vld [vmem:[%s21536_s0 + $0x658] sm:$0xff] }
 0x26e   :  { %21565 = vst [vmem:[#allocation435_spill] sm:$0xff] %v16548_v15  ;;  %v16560_v60 = vmax.f32 %v3368_v6, %v3433_v34  ;;  %v3436_v40 = vmax.f32 %v2542_v61, 0.0  ;;  %v2537_v2 = vadd.f32 %v16219_v23, %v2536_v55  ;;  %v3373_v6 = vmax.f32 %v2227_v54, 0.0  ;;  %v1172_v15 = vld [vmem:[%s21536_s0 + $0x800] sm:$0xff] }
 0x26f   :  { %v12109_v1 = vpop.f32.mrf.mxu0  ;;  %12252 = vmatmul.mubr.msk.f32.gmra.mxu0 %vm1185_vm1, %v1115_v63  ;;  %v2232_v54 = vadd.f32 %v16065_v14, %v16219_v23  ;;  %v3375_v14 = vmax.f32 %v2237_v50, 0.0  ;;  %v1121_v50 = vld [vmem:[%s21536_s0 + $0x668] sm:$0xff] }
 0x270   :  { %21566 = vst [vmem:[#allocation436_spill] sm:$0xff] %v16560_v60  ;;  %v16566_v51 = vmax.f32 %v3371_v10, %v3436_v40  ;;  %v3435_v8 = vmax.f32 %v2537_v2, 0.0  ;;  %v2552_v38 = vadd.f32 %v12109_v1, %v16219_v23  ;;  %12254 = vmatprep.mubr.msk.f32.mxu0 %vm1185_vm1, %v1116_v4  ;;  %v3372_v10 = vmax.f32 %v2222_v58, 0.0 }
 0x271   :  { %v2546_v34 = vpop.f32.mrf.mxu0  ;;  %v2247_v58 = vadd.f32 %v16219_v23, %v16096_v12 }
 0x272   :  { %21567 = vst [vmem:[#allocation437_spill] sm:$0xff] %v16566_v51  ;;  %v16578_v61 = vmax.f32 %v3370_v59, %v3435_v8  ;;  %v3438_v63 = vmax.f32 %v2552_v38, 0.0  ;;  %v2547_v55 = vadd.f32 %v16219_v23, %v2546_v34  ;;  %v1120_v8 = vld [vmem:[%s21536_s0 + $0x660] sm:$0xff]  ;;  %v2242_v34 = vadd.f32 %v16077_v9, %v16219_v23  ;;  %v1122_v9 = vld [vmem:[%s21536_s0 + $0x670] sm:$0xff] }
 0x273   :  { %v12112_v4 = vpop.f32.mrf.mxu0  ;;  %12255 = vmatmul.mubr.msk.f32.gmra.mxu0 %vm1185_vm1, %v1117_v46  ;;  %v1170_v51 = vld [vmem:[%s21536_s0 + $0x7f0] sm:$0xff] }
 0x274   :  { %21568 = vst [vmem:[#allocation438_spill] sm:$0xff] %v16578_v61  ;;  %v16584_v40 = vmax.f32 %v3373_v6, %v3438_v63  ;;  %v3437_v2 = vmax.f32 %v2547_v55, 0.0  ;;  %v2562_v1 = vadd.f32 %v12112_v4, %v16219_v23  ;;  %12257 = vmatprep.mubr.msk.f32.mxu0 %vm1185_vm1, %v1118_v5  ;;  %v3374_v63 = vmax.f32 %v2232_v54, 0.0 }
 0x275   :  { %v2556_v59 = vpop.f32.mrf.mxu0  ;;  %v2257_v54 = vadd.f32 %v16219_v23, %v16108_v7  ;;  %v1123_v7 = vld [vmem:[%s21536_s0 + $0x678] sm:$0xff] }
 0x276   :  { %21569 = vst [vmem:[#allocation439_spill] sm:$0xff] %v16584_v40  ;;  %v16596_v38 = vmax.f32 %v3372_v10, %v3437_v2  ;;  %v3440_v46 = vmax.f32 %v2562_v1, 0.0  ;;  %v2557_v6 = vadd.f32 %v16219_v23, %v2556_v59  ;;  %v3377_v10 = vmax.f32 %v2247_v58, 0.0  ;;  %v1168_v40 = vld [vmem:[%s21536_s0 + $0x7e0] sm:$0xff] }
 0x277   :  { %v12115_v5 = vpop.f32.mrf.mxu0  ;;  %12258 = vmatmul.mubr.msk.f32.gmra.mxu0 %vm1185_vm1, %v1119_v3  ;;  %v2252_v58 = vadd.f32 %v16089_v18, %v16219_v23  ;;  %v3379_v18 = vmax.f32 %v2257_v54, 0.0  ;;  %v1125_v54 = vld [vmem:[%s21536_s0 + $0x688] sm:$0xff] }
 0x278   :  { %21570 = vst [vmem:[#allocation440_spill] sm:$0xff] %v16596_v38  ;;  %v16602_v55 = vmax.f32 %v3375_v14, %v3440_v46  ;;  %v3439_v12 = vmax.f32 %v2557_v6, 0.0  ;;  %v2572_v4 = vadd.f32 %v12115_v5, %v16219_v23  ;;  %12260 = vmatprep.mubr.msk.f32.mxu0 %vm1185_vm1, %v1120_v8  ;;  %v3376_v14 = vmax.f32 %v2242_v34, 0.0 }
 0x279   :  { %v2566_v2 = vpop.f32.mrf.mxu0  ;;  %v2267_v34 = vadd.f32 %v16219_v23, %v16120_v16 }
 0x27a   :  { %21571 = vst [vmem:[#allocation441_spill] sm:$0xff] %v16602_v55  ;;  %v16614_v1 = vmax.f32 %v3374_v63, %v3439_v12  ;;  %v3442_v3 = vmax.f32 %v2572_v4, 0.0  ;;  %v2567_v59 = vadd.f32 %v16219_v23, %v2566_v2  ;;  %v1124_v12 = vld [vmem:[%s21536_s0 + $0x680] sm:$0xff]  ;;  %v2262_v2 = vadd.f32 %v16101_v13, %v16219_v23  ;;  %v1126_v13 = vld [vmem:[%s21536_s0 + $0x690] sm:$0xff] }
 0x27b   :  { %v12118_v8 = vpop.f32.mrf.mxu0  ;;  %12261 = vmatmul.mubr.msk.f32.gmra.mxu0 %vm1185_vm1, %v1121_v50  ;;  %v1166_v55 = vld [vmem:[%s21536_s0 + $0x7d0] sm:$0xff] }
 0x27c   :  { %21572 = vst [vmem:[#allocation442_spill] sm:$0xff] %v16614_v1  ;;  %v16620_v46 = vmax.f32 %v3377_v10, %v3442_v3  ;;  %v3441_v6 = vmax.f32 %v2567_v59, 0.0  ;;  %v2582_v5 = vadd.f32 %v12118_v8, %v16219_v23  ;;  %12263 = vmatprep.mubr.msk.f32.mxu0 %vm1185_vm1, %v1122_v9  ;;  %v3378_v3 = vmax.f32 %v2252_v58, 0.0 }
 0x27d   :  { %v2576_v63 = vpop.f32.mrf.mxu0  ;;  %v2277_v58 = vadd.f32 %v16219_v23, %v16132_v11  ;;  %v1127_v11 = vld [vmem:[%s21536_s0 + $0x698] sm:$0xff] }
 0x27e   :  { %21573 = vst [vmem:[#allocation443_spill] sm:$0xff] %v16620_v46  ;;  %v16632_v4 = vmax.f32 %v3376_v14, %v3441_v6  ;;  %v3444_v50 = vmax.f32 %v2582_v5, 0.0  ;;  %v2577_v10 = vadd.f32 %v16219_v23, %v2576_v63  ;;  %v3381_v14 = vmax.f32 %v2267_v34, 0.0  ;;  %v1164_v46 = vld [vmem:[%s21536_s0 + $0x7c0] sm:$0xff] }
 0x27f   :  { %v12121_v9 = vpop.f32.mrf.mxu0  ;;  %12264 = vmatmul.mubr.msk.f32.gmra.mxu0 %vm1185_vm1, %v1123_v7  ;;  %v2272_v34 = vadd.f32 %v16113_v22, %v16219_v23  ;;  %v3383_v22 = vmax.f32 %v2277_v58, 0.0  ;;  %v1129_v58 = vld [vmem:[%s21536_s0 + $0x6a8] sm:$0xff] }
 0x280   :  { %21574 = vst [vmem:[#allocation444_spill] sm:$0xff] %v16632_v4  ;;  %v16638_v59 = vmax.f32 %v3379_v18, %v3444_v50  ;;  %v3443_v16 = vmax.f32 %v2577_v10, 0.0  ;;  %v2592_v8 = vadd.f32 %v12121_v9, %v16219_v23  ;;  %12266 = vmatprep.mubr.msk.f32.mxu0 %vm1185_vm1, %v1124_v12  ;;  %v3380_v18 = vmax.f32 %v2262_v2, 0.0 }
 0x281   :  { %v2586_v6 = vpop.f32.mrf.mxu0  ;;  %v2287_v2 = vadd.f32 %v16219_v23, %v16144_v20 }
 0x282   :  { %21575 = vst [vmem:[#allocation445_spill] sm:$0xff] %v16638_v59  ;;  %v16650_v5 = vmax.f32 %v3378_v3, %v3443_v16  ;;  %v3446_v7 = vmax.f32 %v2592_v8, 0.0  ;;  %v2587_v63 = vadd.f32 %v16219_v23, %v2586_v6  ;;  %v1128_v16 = vld [vmem:[%s21536_s0 + $0x6a0] sm:$0xff]  ;;  %v21579_v6 = vld [vmem:[#allocation408_spill] sm:$0xff] }
 0x283   :  { %v12124_v12 = vpop.f32.mrf.mxu0  ;;  %12267 = vmatmul.mubr.msk.f32.gmra.mxu0 %vm1185_vm1, %v1125_v54  ;;  %v1162_v59 = vld [vmem:[%s21536_s0 + $0x7b0] sm:$0xff] }
 0x284   :  { %21576 = vst [vmem:[#allocation446_spill] sm:$0xff] %v16650_v5  ;;  %v16656_v50 = vmax.f32 %v3381_v14, %v3446_v7  ;;  %v3445_v10 = vmax.f32 %v2587_v63, 0.0  ;;  %v2602_v9 = vadd.f32 %v12124_v12, %v16219_v23  ;;  %12269 = vmatprep.mubr.msk.f32.mxu0 %vm1185_vm1, %v1126_v13  ;;  %v2282_v13 = vadd.f32 %v21579_v6, %v16219_v23  ;;  %v21583_v6 = vld [vmem:[#allocation409_spill] sm:$0xff] }
 0x285   :  { %v2596_v3 = vpop.f32.mrf.mxu0  ;;  %v3382_v63 = vmax.f32 %v2272_v34, 0.0 }
 0x286   :  { %21577 = vst [vmem:[#allocation447_spill] sm:$0xff] %v16656_v50  ;;  %v16668_v8 = vmax.f32 %v3380_v18, %v3445_v10  ;;  %v3448_v54 = vmax.f32 %v2602_v9, 0.0  ;;  %v2597_v14 = vadd.f32 %v16219_v23, %v2596_v3  ;;  %v3385_v18 = vmax.f32 %v2287_v2, 0.0  ;;  %v1130_v9 = vld [vmem:[%s21536_s0 + $0x6b0] sm:$0xff]  ;;  %v21581_v3 = vld [vmem:[#allocation411_spill] sm:$0xff] }
 0x287   :  { %v12127_v7 = vpop.f32.mrf.mxu0  ;;  %12270 = vmatmul.mubr.msk.f32.gmra.mxu0 %vm1185_vm1, %v1127_v11  ;;  %v2297_v34 = vadd.f32 %v16219_v23, %v21581_v3  ;;  %v2292_v2 = vadd.f32 %v21583_v6, %v16219_v23 }
 0x288   :  { %21578 = vst [vmem:[#allocation448_spill] sm:$0xff] %v16668_v8  ;;  %v16674_v12 = vmax.f32 %v3383_v22, %v3448_v54  ;;  %v3447_v20 = vmax.f32 %v2597_v14, 0.0  ;;  %v2612_v50 = vadd.f32 %v12127_v7, %v16219_v23  ;;  %12272 = vmatprep.mubr.msk.f32.mxu0 %vm1185_vm1, %v1128_v16  ;;  %v3384_v14 = vmax.f32 %v2282_v13, 0.0 }
 0x289   :  { %v2606_v10 = vpop.f32.mrf.mxu0  ;;  %v3386_v6 = vmax.f32 %v2292_v2, 0.0 }
 0x28a   :  { %21580 = vst [vmem:[#allocation408_spill] sm:$0xff] %v16674_v12  ;;  %v16686_v11 = vmax.f32 %v3382_v63, %v3447_v20  ;;  %v3450_v22 = vmax.f32 %v2612_v50, 0.0  ;;  %v2607_v54 = vadd.f32 %v16219_v23, %v2606_v10  ;;  %v1131_v50 = vld [vmem:[%s21536_s0 + $0x6b8] sm:$0xff]  ;;  %v3387_v10 = vmax.f32 %v2297_v34, 0.0 }
 0x28b   :  { %v12130_v16 = vpop.f32.mrf.mxu0  ;;  %12273 = vmatmul.mubr.msk.f32.gmra.mxu0 %vm1185_vm1, %v1129_v58  ;;  %v21585_v63 = vld [vmem:[#allocation413_spill] sm:$0xff]  ;;  %v1132_v58 = vld [vmem:[%s21536_s0 + $0x6c0] sm:$0xff] }
 0x28c   :  { %21582 = vst [vmem:[#allocation411_spill] sm:$0xff] %v16686_v11  ;;  %v16692_v7 = vmax.f32 %v3385_v18, %v3450_v22  ;;  %v3449_v12 = vmax.f32 %v2607_v54, 0.0  ;;  %v2622_v8 = vadd.f32 %v12130_v16, %v16219_v23  ;;  %12275 = vmatprep.mubr.msk.f32.mxu0 %vm1185_vm1, %v1130_v9  ;;  %v2307_v13 = vadd.f32 %v16219_v23, %v21585_v63  ;;  %v21587_v9 = vld [vmem:[#allocation410_spill] sm:$0xff] }
 0x28d   :  { %v2616_v20 = vpop.f32.mrf.mxu0  ;;  %v2302_v54 = vadd.f32 %v21587_v9, %v16219_v23  ;;  %v21591_v9 = vld [vmem:[#allocation412_spill] sm:$0xff] }
 0x28e   :  { %21584 = vst [vmem:[#allocation409_spill] sm:$0xff] %v16692_v7  ;;  %v16704_v18 = vmax.f32 %v3384_v14, %v3449_v12  ;;  %v3452_v3 = vmax.f32 %v2622_v8, 0.0  ;;  %v2617_v22 = vadd.f32 %v16219_v23, %v2616_v20  ;;  %v1133_v8 = vld [vmem:[%s21536_s0 + $0x6c8] sm:$0xff]  ;;  %v3389_v12 = vmax.f32 %v2307_v13, 0.0  ;;  %v1134_v14 = vld [vmem:[%s21536_s0 + $0x6d0] sm:$0xff] }
 0x28f   :  { %v12133_v16 = vpop.f32.mrf.mxu0  ;;  %12276 = vmatmul.mubr.msk.f32.gmra.mxu0 %vm1185_vm1, %v1131_v50  ;;  %v21589_v20 = vld [vmem:[#allocation415_spill] sm:$0xff]  ;;  %v2312_v13 = vadd.f32 %v21591_v9, %v16219_v23 }
 0x290   :  { %21586 = vst [vmem:[#allocation413_spill] sm:$0xff] %v16704_v18  ;;  %v16710_v7 = vmax.f32 %v3387_v10, %v3452_v3  ;;  %v3451_v63 = vmax.f32 %v2617_v22, 0.0  ;;  %v2632_v11 = vadd.f32 %v12133_v16, %v16219_v23  ;;  %12278 = vmatprep.mubr.msk.f32.mxu0 %vm1185_vm1, %v1132_v58  ;;  %v2317_v2 = vadd.f32 %v16219_v23, %v21589_v20 }
 0x291   :  { %v2626_v34 = vpop.f32.mrf.mxu0  ;;  %v3388_v22 = vmax.f32 %v2302_v54, 0.0  ;;  %v3390_v9 = vmax.f32 %v2312_v13, 0.0 }
 0x292   :  { %21588 = vst [vmem:[#allocation410_spill] sm:$0xff] %v16710_v7  ;;  %v16722_v50 = vmax.f32 %v3386_v6, %v3451_v63  ;;  %v3454_v10 = vmax.f32 %v2632_v11, 0.0  ;;  %v2627_v3 = vadd.f32 %v16219_v23, %v2626_v34  ;;  %v1135_v11 = vld [vmem:[%s21536_s0 + $0x6d8] sm:$0xff]  ;;  %v3391_v34 = vmax.f32 %v2317_v2, 0.0 }
 0x293   :  { %v12136_v58 = vpop.f32.mrf.mxu0  ;;  %12279 = vmatmul.mubr.msk.f32.gmra.mxu0 %vm1185_vm1, %v1133_v8  ;;  %v21593_v6 = vld [vmem:[#allocation417_spill] sm:$0xff]  ;;  %v1136_v8 = vld [vmem:[%s21536_s0 + $0x6e0] sm:$0xff] }
 0x294   :  { %21590 = vst [vmem:[#allocation415_spill] sm:$0xff] %v16722_v50  ;;  %v16728_v16 = vmax.f32 %v3389_v12, %v3454_v10  ;;  %v3453_v7 = vmax.f32 %v2627_v3, 0.0  ;;  %v2642_v18 = vadd.f32 %v12136_v58, %v16219_v23  ;;  %12281 = vmatprep.mubr.msk.f32.mxu0 %vm1185_vm1, %v1134_v14  ;;  %v2327_v54 = vadd.f32 %v16219_v23, %v21593_v6  ;;  %v21595_v14 = vld [vmem:[#allocation414_spill] sm:$0xff] }
 0x295   :  { %v2636_v63 = vpop.f32.mrf.mxu0  ;;  %v2322_v3 = vadd.f32 %v21595_v14, %v16219_v23  ;;  %v21599_v14 = vld [vmem:[#allocation416_spill] sm:$0xff] }
 0x296   :  { %21592 = vst [vmem:[#allocation412_spill] sm:$0xff] %v16728_v16  ;;  %v16740_v12 = vmax.f32 %v3388_v22, %v3453_v7  ;;  %v3456_v20 = vmax.f32 %v2642_v18, 0.0  ;;  %v2637_v10 = vadd.f32 %v16219_v23, %v2636_v63  ;;  %v1137_v7 = vld [vmem:[%s21536_s0 + $0x6e8] sm:$0xff]  ;;  %v3393_v18 = vmax.f32 %v2327_v54, 0.0  ;;  %v1138_v22 = vld [vmem:[%s21536_s0 + $0x6f0] sm:$0xff] }
 0x297   :  { %v12139_v58 = vpop.f32.mrf.mxu0  ;;  %12282 = vmatmul.mubr.msk.f32.gmra.mxu0 %vm1185_vm1, %v1135_v11  ;;  %v21597_v63 = vld [vmem:[#allocation419_spill] sm:$0xff]  ;;  %v2332_v54 = vadd.f32 %v21599_v14, %v16219_v23 }
 0x298   :  { %21594 = vst [vmem:[#allocation417_spill] sm:$0xff] %v16740_v12  ;;  %v16746_v16 = vmax.f32 %v3391_v34, %v3456_v20  ;;  %v3455_v6 = vmax.f32 %v2637_v10, 0.0  ;;  %v2652_v50 = vadd.f32 %v12139_v58, %v16219_v23  ;;  %12284 = vmatprep.mubr.msk.f32.mxu0 %vm1185_vm1, %v1136_v8  ;;  %v2337_v13 = vadd.f32 %v16219_v23, %v21597_v63 }
 0x299   :  { %v2646_v2 = vpop.f32.mrf.mxu0  ;;  %v3392_v10 = vmax.f32 %v2322_v3, 0.0  ;;  %v3394_v14 = vmax.f32 %v2332_v54, 0.0 }
 0x29a   :  { %21596 = vst [vmem:[#allocation414_spill] sm:$0xff] %v16746_v16  ;;  %v16758_v11 = vmax.f32 %v3390_v9, %v3455_v6  ;;  %v3458_v34 = vmax.f32 %v2652_v50, 0.0  ;;  %v2647_v20 = vadd.f32 %v16219_v23, %v2646_v2  ;;  %v1139_v50 = vld [vmem:[%s21536_s0 + $0x6f8] sm:$0xff]  ;;  %v3395_v2 = vmax.f32 %v2337_v13, 0.0 }
 0x29b   :  { %v12142_v8 = vpop.f32.mrf.mxu0  ;;  %12285 = vmatmul.mubr.msk.f32.gmra.mxu0 %vm1185_vm1, %v1137_v7  ;;  %v21601_v9 = vld [vmem:[#allocation421_spill] sm:$0xff]  ;;  %v1140_v7 = vld [vmem:[%s21536_s0 + $0x700] sm:$0xff] }
 0x29c   :  { %21598 = vst [vmem:[#allocation419_spill] sm:$0xff] %v16758_v11  ;;  %v16764_v58 = vmax.f32 %v3393_v18, %v3458_v34  ;;  %v3457_v16 = vmax.f32 %v2647_v20, 0.0  ;;  %v2662_v12 = vadd.f32 %v12142_v8, %v16219_v23  ;;  %12287 = vmatprep.mubr.msk.f32.mxu0 %vm1185_vm1, %v1138_v22  ;;  %v2347_v3 = vadd.f32 %v16219_v23, %v21601_v9  ;;  %v21603_v22 = vld [vmem:[#allocation418_spill] sm:$0xff] }
 0x29d   :  { %v2656_v6 = vpop.f32.mrf.mxu0  ;;  %v2342_v20 = vadd.f32 %v21603_v22, %v16219_v23  ;;  %v21607_v22 = vld [vmem:[#allocation420_spill] sm:$0xff] }
 0x29e   :  { %21600 = vst [vmem:[#allocation416_spill] sm:$0xff] %v16764_v58  ;;  %v16776_v18 = vmax.f32 %v3392_v10, %v3457_v16  ;;  %v3460_v63 = vmax.f32 %v2662_v12, 0.0  ;;  %v2657_v34 = vadd.f32 %v16219_v23, %v2656_v6  ;;  %v1141_v16 = vld [vmem:[%s21536_s0 + $0x708] sm:$0xff]  ;;  %v3397_v12 = vmax.f32 %v2347_v3, 0.0  ;;  %v1142_v10 = vld [vmem:[%s21536_s0 + $0x710] sm:$0xff]  ;;  %v21605_v6 = vld [vmem:[#allocation422_spill] sm:$0xff] }
 0x29f   :  { %v12145_v8 = vpop.f32.mrf.mxu0  ;;  %12288 = vmatmul.mubr.msk.f32.gmra.mxu0 %vm1185_vm1, %v1139_v50  ;;  %v2357_v54 = vadd.f32 %v16219_v23, %v21605_v6  ;;  %v2352_v3 = vadd.f32 %v21607_v22, %v16219_v23 }
 0x2a0   :  { %21602 = vst [vmem:[#allocation421_spill] sm:$0xff] %v16776_v18  ;;  %v16782_v58 = vmax.f32 %v3395_v2, %v3460_v63  ;;  %v3459_v9 = vmax.f32 %v2657_v34, 0.0  ;;  %v2672_v11 = vadd.f32 %v12145_v8, %v16219_v23  ;;  %12290 = vmatprep.mubr.msk.f32.mxu0 %vm1185_vm1, %v1140_v7  ;;  %v3396_v34 = vmax.f32 %v2342_v20, 0.0  ;;  %v16805_v18 = vld [vmem:[%s21550_s27] ss:$0 sm:$0xff] }
 0x2a1   :  { %v2666_v13 = vpop.f32.mrf.mxu0 }
 0x2a2   :  { %21604 = vst [vmem:[#allocation418_spill] sm:$0xff] %v16782_v58  ;;  %v16794_v50 = vmax.f32 %v3394_v14, %v3459_v9  ;;  %v3462_v2 = vmax.f32 %v2672_v11, 0.0  ;;  %v2667_v63 = vadd.f32 %v16219_v23, %v2666_v13  ;;  %v1143_v11 = vld [vmem:[%s21536_s0 + $0x718] sm:$0xff]  ;;  %v1144_v23 = vld [vmem:[%s21536_s0 + $0x720] sm:$0xff]  ;;  %v3399_v9 = vmax.f32 %v2357_v54, 0.0 }
 0x2a3   :  { %v12148_v7 = vpop.f32.mrf.mxu0  ;;  %12291 = vmatmul.mubr.msk.f32.gmra.mxu0 %vm1185_vm1, %v1141_v16 }
 0x2a4   :  { %21606 = vst [vmem:[#allocation422_spill] sm:$0xff] %v16794_v50  ;;  %v16800_v8 = vmax.f32 %v3397_v12, %v3462_v2  ;;  %v3461_v58 = vmax.f32 %v2667_v63, 0.0  ;;  %v2682_v14 = vadd.f32 %v16805_v18, %v12148_v7  ;;  %12293 = vmatprep.mubr.msk.f32.mxu0 %vm1185_vm1, %v1142_v10  ;;  %v3398_v10 = vmax.f32 %v2352_v3, 0.0  ;;  %v1145_v7 = vld [vmem:[%s21536_s0 + $0x728] sm:$0xff]  ;;  %v1147_v3 = vld [vmem:[%s21536_s0 + $0x738] sm:$0xff]  ;;  %v1160_v50 = vld [vmem:[%s21536_s0 + $0x7a0] sm:$0xff] }
 0x2a5   :  { %v2676_v20 = vpop.f32.mrf.mxu0 }
 0x2a6   :  { %21608 = vst [vmem:[#allocation420_spill] sm:$0xff] %v16800_v8  ;;  %v16815_v16 = vmax.f32 %v3396_v34, %v3461_v58  ;;  %v3464_v12 = vmax.f32 %v2682_v14, 0.0  ;;  %v2677_v13 = vadd.f32 %v16805_v18, %v2676_v20  ;;  %v1146_v58 = vld [vmem:[%s21536_s0 + $0x730] sm:$0xff] }
 0x2a7   :  { %v16818_v6 = vpop.f32.mrf.mxu0  ;;  %12294 = vmatmul.mubr.msk.f32.gmra.mxu0 %vm1185_vm1, %v1143_v11  ;;  %v1148_v11 = vld [vmem:[%s21536_s0 + $0x740] sm:$0xff] }
 0x2a8   :  { %21609 = vst [vmem:[#allocation449_spill] sm:$0xff] %v16815_v16  ;;  %v16821_v2 = vmax.f32 %v3399_v9, %v3464_v12  ;;  %v3463_v63 = vmax.f32 %v2677_v13, 0.0  ;;  %12296 = vmatprep.mubr.msk.f32.mxu0 %vm1185_vm1, %v1144_v23  ;;  %v1149_v23 = vld [vmem:[%s21536_s0 + $0x748] sm:$0xff]  ;;  %v1150_v12 = vld [vmem:[%s21536_s0 + $0x750] sm:$0xff] }
 0x2a9   :  { %v16827_v54 = vpop.f32.mrf.mxu0  ;;  %v1158_v16 = vld [vmem:[%s21536_s0 + $0x790] sm:$0xff] }
 0x2aa   :  { %21610 = vst [vmem:[#allocation450_spill] sm:$0xff] %v16821_v2  ;;  %v16832_v34 = vmax.f32 %v3398_v10, %v3463_v63  ;;  %v1151_v10 = vld [vmem:[%s21536_s0 + $0x758] sm:$0xff] }
 0x2ab   :  { %v16834_v22 = vpop.f32.mrf.mxu0  ;;  %12297 = vmatmul.mubr.msk.f32.gmra.mxu0 %vm1185_vm1, %v1145_v7  ;;  %v1152_v7 = vld [vmem:[%s21536_s0 + $0x760] sm:$0xff] }
 0x2ac   :  { %21611 = vst [vmem:[#allocation451_spill] sm:$0xff] %v16832_v34  ;;  %12299 = vmatprep.mubr.msk.f32.mxu0 %vm1185_vm1, %v1146_v58  ;;  %v1156_v34 = vld [vmem:[%s21536_s0 + $0x780] sm:$0xff] }
 0x2ad   :  { %v16841_v14 = vpop.f32.mrf.mxu0 }
 0x2af   :  { %v16846_v20 = vpop.f32.mrf.mxu0  ;;  %12300 = vmatmul.mubr.msk.f32.gmra.mxu0 %vm1185_vm1, %v1147_v3  ;;  %v1153_v3 = vld [vmem:[%s21536_s0 + $0x768] sm:$0xff] }
 0x2b0   :  { %12302 = vmatprep.mubr.msk.f32.mxu0 %vm1185_vm1, %v1148_v11 }
 0x2b1   :  { %v16853_v9 = vpop.f32.mrf.mxu0 }
 0x2b3   :  { %v16858_v13 = vpop.f32.mrf.mxu0  ;;  %12303 = vmatmul.mubr.msk.f32.gmra.mxu0 %vm1185_vm1, %v1149_v23  ;;  %v1154_v23 = vld [vmem:[%s21536_s0 + $0x770] sm:$0xff] }
 0x2b4   :  { %12305 = vmatprep.mubr.msk.f32.mxu0 %vm1185_vm1, %v1150_v12 }
 0x2b5   :  { %v16865_v63 = vpop.f32.mrf.mxu0 }
 0x2b7   :  { %v16870_v58 = vpop.f32.mrf.mxu0  ;;  %12306 = vmatmul.mubr.msk.f32.gmra.mxu0 %vm1185_vm1, %v1151_v10  ;;  %v1155_v10 = vld [vmem:[%s21536_s0 + $0x778] sm:$0xff] }
 0x2b8   :  { %12308 = vmatprep.mubr.msk.f32.mxu0 %vm1185_vm1, %v1152_v7 }
 0x2b9   :  { %v16877_v11 = vpop.f32.mrf.mxu0 }
 0x2bb   :  { %v16882_v12 = vpop.f32.mrf.mxu0  ;;  %12309 = vmatmul.mubr.msk.f32.gmra.mxu0 %vm1185_vm1, %v1153_v3  ;;  %v1157_v3 = vld [vmem:[%s21536_s0 + $0x788] sm:$0xff] }
 0x2bc   :  { %12311 = vmatprep.mubr.msk.f32.mxu0 %vm1185_vm1, %v1154_v23 }
 0x2bd   :  { %v16889_v7 = vpop.f32.mrf.mxu0 }
 0x2bf   :  { %v16894_v2 = vpop.f32.mrf.mxu0  ;;  %12312 = vmatmul.mubr.msk.f32.gmra.mxu0 %vm1185_vm1, %v1155_v10 }
 0x2c0   :  { %12314 = vmatprep.mubr.msk.f32.mxu0 %vm1185_vm1, %v1156_v34  ;;  %v1159_v34 = vld [vmem:[%s21536_s0 + $0x798] sm:$0xff] }
 0x2c1   :  { %v16901_v23 = vpop.f32.mrf.mxu0 }
 0x2c3   :  { %v16906_v8 = vpop.f32.mrf.mxu0  ;;  %12315 = vmatmul.mubr.msk.f32.gmra.mxu0 %vm1185_vm1, %v1157_v3 }
 0x2c4   :  { %12317 = vmatprep.mubr.msk.f32.mxu0 %vm1185_vm1, %v1158_v16  ;;  %v1161_v16 = vld [vmem:[%s21536_s0 + $0x7a8] sm:$0xff] }
 0x2c5   :  { %v16913_v10 = vpop.f32.mrf.mxu0 }
 0x2c7   :  { %v16918_v5 = vpop.f32.mrf.mxu0  ;;  %12318 = vmatmul.mubr.msk.f32.gmra.mxu0 %vm1185_vm1, %v1159_v34 }
 0x2c8   :  { %12320 = vmatprep.mubr.msk.f32.mxu0 %vm1185_vm1, %v1160_v50  ;;  %v1163_v50 = vld [vmem:[%s21536_s0 + $0x7b8] sm:$0xff] }
 0x2c9   :  { %v16925_v3 = vpop.f32.mrf.mxu0 }
 0x2cb   :  { %v16930_v4 = vpop.f32.mrf.mxu0  ;;  %12321 = vmatmul.mubr.msk.f32.gmra.mxu0 %vm1185_vm1, %v1161_v16 }
 0x2cc   :  { %12323 = vmatprep.mubr.msk.f32.mxu0 %vm1185_vm1, %v1162_v59  ;;  %v1165_v59 = vld [vmem:[%s21536_s0 + $0x7c8] sm:$0xff] }
 0x2cd   :  { %v16937_v34 = vpop.f32.mrf.mxu0 }
 0x2cf   :  { %v16942_v1 = vpop.f32.mrf.mxu0  ;;  %12324 = vmatmul.mubr.msk.f32.gmra.mxu0 %vm1185_vm1, %v1163_v50 }
 0x2d0   :  { %12326 = vmatprep.mubr.msk.f32.mxu0 %vm1185_vm1, %v1164_v46  ;;  %v1167_v46 = vld [vmem:[%s21536_s0 + $0x7d8] sm:$0xff] }
 0x2d1   :  { %v16949_v16 = vpop.f32.mrf.mxu0 }
 0x2d3   :  { %v16954_v38 = vpop.f32.mrf.mxu0  ;;  %12327 = vmatmul.mubr.msk.f32.gmra.mxu0 %vm1185_vm1, %v1165_v59 }
 0x2d4   :  { %12329 = vmatprep.mubr.msk.f32.mxu0 %vm1185_vm1, %v1166_v55  ;;  %v1169_v55 = vld [vmem:[%s21536_s0 + $0x7e8] sm:$0xff] }
 0x2d5   :  { %v16961_v50 = vpop.f32.mrf.mxu0 }
 0x2d7   :  { %v16966_v61 = vpop.f32.mrf.mxu0  ;;  %12330 = vmatmul.mubr.msk.f32.gmra.mxu0 %vm1185_vm1, %v1167_v46 }
 0x2d8   :  { %12332 = vmatprep.mubr.msk.f32.mxu0 %vm1185_vm1, %v1168_v40  ;;  %v1171_v40 = vld [vmem:[%s21536_s0 + $0x7f8] sm:$0xff] }
 0x2d9   :  { %v16973_v59 = vpop.f32.mrf.mxu0 }
 0x2db   :  { %v16978_v60 = vpop.f32.mrf.mxu0  ;;  %12333 = vmatmul.mubr.msk.f32.gmra.mxu0 %vm1185_vm1, %v1169_v55 }
 0x2dc   :  { %21612 = vst [vmem:[#allocation452_spill] sm:$0xff] %v16978_v60  ;;  %12335 = vmatprep.mubr.msk.f32.mxu0 %vm1185_vm1, %v1170_v51  ;;  %v1173_v51 = vld [vmem:[%s21536_s0 + $0x808] sm:$0xff] }
 0x2dd   :  { %v16985_v46 = vpop.f32.mrf.mxu0 }
 0x2df   :  { %v16990_v57 = vpop.f32.mrf.mxu0  ;;  %12336 = vmatmul.mubr.msk.f32.gmra.mxu0 %vm1185_vm1, %v1171_v40 }
 0x2e0   :  { %21613 = vst [vmem:[#allocation453_spill] sm:$0xff] %v16990_v57  ;;  %12338 = vmatprep.mubr.msk.f32.mxu0 %vm1185_vm1, %v1172_v15  ;;  %v1175_v15 = vld [vmem:[%s21536_s0 + $0x818] sm:$0xff] }
 0x2e1   :  { %v16997_v55 = vpop.f32.mrf.mxu0 }
 0x2e2   :  { %21614 = vst [vmem:[#allocation454_spill] sm:$0xff] %v16997_v55 }
 0x2e3   :  { %v17002_v56 = vpop.f32.mrf.mxu0  ;;  %12339 = vmatmul.mubr.msk.f32.gmra.mxu0 %vm1185_vm1, %v1173_v51 }
 0x2e4   :  { %21615 = vst [vmem:[#allocation455_spill] sm:$0xff] %v17002_v56  ;;  %12341 = vmatprep.mubr.msk.f32.mxu0 %vm1185_vm1, %v1174_v47 }
 0x2e5   :  { %v17009_v40 = vpop.f32.mrf.mxu0 }
 0x2e6   :  { %21616 = vst [vmem:[#allocation456_spill] sm:$0xff] %v17009_v40 }
 0x2e7   :  { %v17011_v27 = vpop.f32.mrf.mxu0  ;;  %12342 = vmatmul.mubr.msk.f32.gmra.mxu0 %vm1185_vm1, %v1175_v15 }
 0x2e8   :  { %21617 = vst [vmem:[#allocation457_spill] sm:$0xff] %v17011_v27 }
 0x2e9   :  { %v17014_v53 = vpop.f32.mrf.mxu0 }
 0x2ea   :  { %21618 = vst [vmem:[#allocation458_spill] sm:$0xff] %v17014_v53 }
 0x2eb   :  { %v17016_v43 = vpop.f32.mrf.mxu0 }
 0x2ec   :  { %21619 = vst [vmem:[#allocation459_spill] sm:$0xff] %v17016_v43 }
 0x2ed   :  { %v17018_v52 = vpop.f32.mrf.mxu0 }
 0x2ee   :  { %21620 = vst [vmem:[#allocation460_spill] sm:$0xff] %v17018_v52 }
 0x2ef   :  { %v17020_v56 = vpop.f32.mrf.mxu0 }
 0x2f0   :  { %21621 = vst [vmem:[#allocation461_spill] sm:$0xff] %v17020_v56 }
 0x2f1   :  { %v17022_v51 = vpop.f32.mrf.mxu0 }
 0x2f2   :  { %21622 = vst [vmem:[#allocation462_spill] sm:$0xff] %v17022_v51 }
 0x2f3   :  { %v17024_v47 = vpop.f32.mrf.mxu0 }
 0x2f4   :  { %21623 = vst [vmem:[#allocation463_spill] sm:$0xff] %v17024_v47 }
 0x2f5   :  { %v17026_v57 = vpop.f32.mrf.mxu0 }
 0x2f6   :  { %21624 = vst [vmem:[#allocation464_spill] sm:$0xff] %v17026_v57 }
 0x2f7   :  { %v17028_v42 = vpop.f32.mrf.mxu0 }
 0x2f8   :  { %21625 = vst [vmem:[#allocation465_spill] sm:$0xff] %v17028_v42 }
 0x2f9   :  { %v17030_v40 = vpop.f32.mrf.mxu0 }
 0x2fa   :  { %21626 = vst [vmem:[#allocation466_spill] sm:$0xff] %v17030_v40 }
 0x2fb   :  { %v17032_v27 = vpop.f32.mrf.mxu0 }
 0x2fc   :  { %21627 = vst [vmem:[#allocation467_spill] sm:$0xff] %v17032_v27 }
 0x2fd   :  { %v17034_v15 = vpop.f32.mrf.mxu0 }
 0x2fe   :  { %21628 = vst [vmem:[#allocation468_spill] sm:$0xff] %v17034_v15 }
 0x2ff   :  { %v17036_v53 = vpop.f32.mrf.mxu0 }
 0x300   :  { %21629 = vst [vmem:[#allocation469_spill] sm:$0xff] %v17036_v53 }
 0x301   :  { %v17038_v43 = vpop.f32.mrf.mxu0 }
 0x302   :  { %21630 = vst [vmem:[#allocation470_spill] sm:$0xff] %v17038_v43 }
 0x303   :  { %v17040_v52 = vpop.f32.mrf.mxu0 }
 0x304   :  { %21631 = vst [vmem:[#allocation471_spill] sm:$0xff] %v17040_v52 }
 0x305   :  { %v17042_v56 = vpop.f32.mrf.mxu0 }
 0x306   :  { %21632 = vst [vmem:[#allocation472_spill] sm:$0xff] %v17042_v56 }
 0x307   :  { %v17044_v51 = vpop.f32.mrf.mxu0 }
 0x308   :  { %21633 = vst [vmem:[#allocation473_spill] sm:$0xff] %v17044_v51 }
 0x309   :  { %v17046_v47 = vpop.f32.mrf.mxu0 }
 0x30a   :  { %21634 = vst [vmem:[#allocation474_spill] sm:$0xff] %v17046_v47 }
 0x30b   :  { %v17048_v57 = vpop.f32.mrf.mxu0 }
 0x30c   :  { %21635 = vst [vmem:[#allocation475_spill] sm:$0xff] %v17048_v57 }
 0x30d   :  { %v17050_v42 = vpop.f32.mrf.mxu0 }
 0x30e   :  { %21636 = vst [vmem:[#allocation476_spill] sm:$0xff] %v17050_v42 }
 0x30f   :  { %v17052_v40 = vpop.f32.mrf.mxu0 }
 0x310   :  { %21637 = vst [vmem:[#allocation477_spill] sm:$0xff] %v17052_v40 }
 0x311   :  { %v17054_v27 = vpop.f32.mrf.mxu0 }
 0x312   :  { %21638 = vst [vmem:[#allocation478_spill] sm:$0xff] %v17054_v27 }
 0x313   :  { %v17056_v15 = vpop.f32.mrf.mxu0 }
 0x314   :  { %21639 = vst [vmem:[#allocation479_spill] sm:$0xff] %v17056_v15  ;;  %v2687_v15 = vadd.f32 %v16805_v18, %v16827_v54  ;;  %v2692_v54 = vadd.f32 %v16805_v18, %v16818_v6 }
 0x315   :  { %v17058_v53 = vpop.f32.mrf.mxu0 }
 0x316   :  { %21640 = vst [vmem:[#allocation480_spill] sm:$0xff] %v17058_v53 }
 0x317   :  { %v17060_v43 = vpop.f32.mrf.mxu0 }
 0x318   :  { %21641 = vst [vmem:[#allocation481_spill] sm:$0xff] %v17060_v43 }
 0x319   :  { %v17062_v52 = vpop.f32.mrf.mxu0 }
 0x31a   :  { %21642 = vst [vmem:[#allocation482_spill] sm:$0xff] %v17062_v52  ;;  %v3465_v52 = vmax.f32 %v2687_v15, 0.0  ;;  %v4547_v15 = vld [vmem:[%s21650_s29 + $0x30] sm:$0xff] }
 0x31b   :  { %v17064_v56 = vpop.f32.mrf.mxu0 }
 0x31c   :  { %21643 = vst [vmem:[#allocation483_spill] sm:$0xff] %v17064_v56  ;;  %v2697_v56 = vadd.f32 %v16805_v18, %v16841_v14  ;;  %v2707_v14 = vadd.f32 %v16805_v18, %v16853_v9  ;;  %v4546_v9 = vld [vmem:[%s21650_s29 + $0x28] sm:$0xff] }
 0x31d   :  { %v17066_v51 = vpop.f32.mrf.mxu0 }
 0x31e   :  { %21644 = vst [vmem:[#allocation484_spill] sm:$0xff] %v17066_v51 }
 0x31f   :  { %v17068_v47 = vpop.f32.mrf.mxu0 }
 0x320   :  { %21645 = vst [vmem:[#allocation485_spill] sm:$0xff] %v17068_v47 }
 0x321   :  { %v17070_v57 = vpop.f32.mrf.mxu0 }
 0x322   :  { %21646 = vst [vmem:[#allocation486_spill] sm:$0xff] %v17070_v57  ;;  %v21652_v57 = vld [vmem:[#allocation423_spill] sm:$0xff] }
 0x323   :  { %v17072_v42 = vpop.f32.mrf.mxu0 }
 0x324   :  { %21647 = vst [vmem:[#allocation487_spill] sm:$0xff] %v17072_v42  ;;  %v4548_v42 = vld [vmem:[%s21650_s29 + $0x38] sm:$0xff] }
 0x325   :  { %v17074_v40 = vpop.f32.mrf.mxu0  ;;  %12345 = vmatpush3.msra.mxu1 %v4548_v42  ;;  %v2702_v42 = vadd.f32 %v16805_v18, %v16834_v22  ;;  %v4545_v22 = vld [vmem:[%s21650_s29 + $0x20] sm:$0xff] }
 0x326   :  { %21648 = vst [vmem:[#allocation488_spill] sm:$0xff] %v17074_v40  ;;  %12346 = vmatprep.subr.mxu1 %v21105_v49 }
 0x327   :  { %v12247_v53 = vpop.f32.mrf.mxu0  ;;  %12347 = vmatpush3.msra.mxu1 %v4547_v15 }
 0x328   :  { %v3012_v43 = vadd.f32 %v16805_v18, %v12247_v53  ;;  %12348 = vmatprep.subr.mxu1 %v21105_v49 }
 0x329   :  { %v17079_v27 = vpop.f32.mrf.mxu0  ;;  %12349 = vmatpush3.msra.mxu1 %v4546_v9 }
 0x32a   :  { %21649 = vst [vmem:[#allocation489_spill] sm:$0xff] %v17079_v27  ;;  %v3530_v51 = vmax.f32 %v3012_v43, 0.0  ;;  %v3467_v27 = vmax.f32 %v2697_v56, 0.0  ;;  %12350 = vmatprep.subr.mxu1 %v21105_v49 }
 0x32b   :  { %v12250_v47 = vpop.f32.mrf.mxu0  ;;  %12351 = vmatpush3.msra.mxu1 %v4545_v22 }
 0x32c   :  { %v17089_v40 = vmax.f32 %v3465_v52, %v3530_v51  ;;  %v3022_v53 = vadd.f32 %v16805_v18, %v12250_v47  ;;  %v3466_v47 = vmax.f32 %v2692_v54, 0.0  ;;  %12352 = vmatprep.subr.mxu1 %v21105_v49 }
 0x32d   :  { %v3016_v43 = vpop.f32.mrf.mxu0 }
 0x32e   :  { %21651 = vst [vmem:[#allocation490_spill] sm:$0xff] %v17089_v40  ;;  %v3532_v6 = vmax.f32 %v3022_v53, 0.0  ;;  %v3017_v52 = vadd.f32 %v16805_v18, %v3016_v43  ;;  %v3469_v53 = vmax.f32 %v2707_v14, 0.0  ;;  %v2717_v43 = vadd.f32 %v16805_v18, %v16865_v63  ;;  %v4544_v14 = vld [vmem:[%s21650_s29 + $0x18] sm:$0xff] }
 0x32f   :  { %v12253_v51 = vpop.f32.mrf.mxu0  ;;  %v3468_v63 = vmax.f32 %v2702_v42, 0.0  ;;  %12353 = vmatpush3.msra.mxu1 %v4544_v14  ;;  %v2727_v42 = vadd.f32 %v16805_v18, %v16877_v11  ;;  %v2722_v11 = vadd.f32 %v16805_v18, %v16858_v13  ;;  %v2737_v13 = vadd.f32 %v16805_v18, %v16889_v7 }
 0x330   :  { %v3662_v39 = vmax.f32 %v3467_v27, %v3532_v6  ;;  %v3531_v56 = vmax.f32 %v3017_v52, 0.0  ;;  %v3032_v55 = vadd.f32 %v16805_v18, %v12253_v51  ;;  %v21653_v27 = vld [vmem:[#allocation424_spill] sm:$0xff]  ;;  %v2712_v52 = vadd.f32 %v16805_v18, %v16846_v20  ;;  %12354 = vmatprep.subr.mxu1 %v21105_v49 }
 0x331   :  { %v3026_v15 = vpop.f32.mrf.mxu0  ;;  %v2732_v7 = vadd.f32 %v16805_v18, %v16870_v58  ;;  %v2747_v58 = vadd.f32 %v16805_v18, %v16901_v23 }
 0x332   :  { %v3661_v60 = vmax.f32 %v3466_v47, %v3531_v56  ;;  %v3534_v40 = vmax.f32 %v3032_v55, 0.0  ;;  %v3027_v54 = vadd.f32 %v16805_v18, %v3026_v15  ;;  %v17116_v6 = vmax.f32 %v21653_v27, %v3662_v39 }
 0x333   :  { %v12256_v51 = vpop.f32.mrf.mxu0  ;;  %v3471_v56 = vmax.f32 %v2717_v43, 0.0 }
 0x334   :  { %v3664_v9 = vmax.f32 %v3469_v53, %v3534_v40  ;;  %v3533_v47 = vmax.f32 %v3027_v54, 0.0  ;;  %v3042_v55 = vadd.f32 %v16805_v18, %v12256_v51  ;;  %3849 = vrot.lane.b32.xlu1 %v17116_v6, %s13306_s2  ;;  %v17128_v39 = vmax.f32 %v16273_v29, %v3661_v60  ;;  %v4543_v40 = vld [vmem:[%s21650_s29 + $0x10] sm:$0xff]  ;;  %v4542_v54 = vld [vmem:[%s21650_s29 + $0x8] sm:$0xff] }
 0x335   :  { %v3036_v20 = vpop.f32.mrf.mxu0  ;;  %12355 = vmatpush3.msra.mxu1 %v4543_v40  ;;  %v3470_v60 = vmax.f32 %v2712_v52, 0.0  ;;  %v3473_v52 = vmax.f32 %v2727_v42, 0.0  ;;  %v3472_v42 = vmax.f32 %v2722_v11, 0.0 }
 0x336   :  { %v3663_v53 = vmax.f32 %v3468_v63, %v3533_v47  ;;  %v3536_v15 = vmax.f32 %v3042_v55, 0.0  ;;  %v3037_v22 = vadd.f32 %v16805_v18, %v3036_v20  ;;  %3847 = vrot.lane.b32.xlu0 %v17128_v39, %s13306_s2  ;;  %v17140_v29 = vmax.f32 %v16278_v31, %v3664_v9  ;;  %12356 = vmatprep.subr.mxu1 %v21105_v49  ;;  %v4541_v9 = vld [vmem:[%s21650_s29] sm:$0xff]  ;;  %s13308_s29 = smov 48  }
 0x337   :  { %v12259_v43 = vpop.f32.mrf.mxu0  ;;  %12357 = vmatpush3.msra.mxu1 %v4542_v54 }
 0x338   :  { %v3666_v27 = vmax.f32 %v3471_v56, %v3536_v15  ;;  %v3535_v14 = vmax.f32 %v3037_v22, 0.0  ;;  %v3052_v63 = vadd.f32 %v16805_v18, %v12259_v43  ;;  %3853 = vrot.lane.b32.xlu1 %v17140_v29, %s13306_s2  ;;  %v17152_v31 = vmax.f32 %v16290_v25, %v3663_v53  ;;  %12358 = vmatprep.subr.mxu1 %v21105_v49 }
 0x339   :  { %v3046_v51 = vpop.f32.mrf.mxu0  ;;  %12359 = vmatpush3.msra.mxu1 %v4541_v9  ;;  %v3475_v22 = vmax.f32 %v2737_v13, 0.0  ;;  %v2757_v9 = vadd.f32 %v16805_v18, %v16913_v10 }
 0x33a   :  { %v3665_v47 = vmax.f32 %v3470_v60, %v3535_v14  ;;  %v3538_v55 = vmax.f32 %v3052_v63, 0.0  ;;  %v3047_v56 = vadd.f32 %v16805_v18, %v3046_v51  ;;  %3851 = vrot.lane.b32.xlu0 %v17152_v31, %s13306_s2  ;;  %v17164_v25 = vmax.f32 %v16296_v28, %v3666_v27  ;;  %12531 = vmatprep.subr.mxu1 %v21105_v49 }
 0x33b   :  { %v12262_v20 = vpop.f32.mrf.mxu0  ;;  %v3474_v14 = vmax.f32 %v2732_v7, 0.0  ;;  %v3477_v51 = vmax.f32 %v2747_v58, 0.0 }
 0x33c   :  { %v3668_v40 = vmax.f32 %v3473_v52, %v3538_v55  ;;  %v3537_v53 = vmax.f32 %v3047_v56, 0.0  ;;  %v3062_v15 = vadd.f32 %v16805_v18, %v12262_v20  ;;  %3857 = vrot.lane.b32.xlu1 %v17164_v25, %s13306_s2  ;;  %v17175_v28 = vmax.f32 %v16308_v0, %v3665_v47 }
 0x33d   :  { %v3056_v60 = vpop.f32.mrf.mxu0  ;;  %v2742_v0 = vadd.f32 %v16805_v18, %v16882_v12 }
 0x33e   :  { %v17180_v11 = vmax.f32 %v16314_v19, %v3668_v40  ;;  %v3667_v43 = vmax.f32 %v3472_v42, %v3537_v53  ;;  %v3540_v54 = vmax.f32 %v3062_v15, 0.0  ;;  %v3057_v27 = vadd.f32 %v16805_v18, %v3056_v60  ;;  %3855 = vrot.lane.b32.xlu0 %v17175_v28, %s13306_s2 }
 0x33f   :  { %v12265_v63 = vpop.f32.mrf.mxu0  ;;  %v3476_v7 = vmax.f32 %v2742_v0, 0.0  ;;  %v3479_v15 = vmax.f32 %v2757_v9, 0.0 }
 0x340   :  { %v3670_v52 = vmax.f32 %v3475_v22, %v3540_v54  ;;  %v3539_v13 = vmax.f32 %v3057_v27, 0.0  ;;  %v3072_v23 = vadd.f32 %v16805_v18, %v12265_v63  ;;  %4196 = vrot.lane.b32.xlu1 %v17180_v11, %s13308_s29  ;;  %v17191_v19 = vmax.f32 %v16326_v21, %v3667_v43 }
 0x341   :  { %v3066_v47 = vpop.f32.mrf.mxu0  ;;  %v2752_v21 = vadd.f32 %v16805_v18, %v16894_v2  ;;  %v2767_v22 = vadd.f32 %v16805_v18, %v16925_v3  ;;  %v2762_v27 = vadd.f32 %v16805_v18, %v16906_v8 }
 0x342   :  { %v17196_v55 = vmax.f32 %v16332_v17, %v3670_v52  ;;  %v3669_v12 = vmax.f32 %v3474_v14, %v3539_v13  ;;  %v3542_v56 = vmax.f32 %v3072_v23, 0.0  ;;  %v3067_v42 = vadd.f32 %v16805_v18, %v3066_v47  ;;  %4026 = vrot.lane.b32.xlu0 %v17180_v11, %s13309_s5 }
 0x343   :  { %v12268_v20 = vpop.f32.mrf.mxu0  ;;  %v3478_v54 = vmax.f32 %v2752_v21, 0.0  ;;  %v3481_v52 = vmax.f32 %v2767_v22, 0.0  ;;  %v2777_v13 = vadd.f32 %v16805_v18, %v16937_v34  ;;  %v3480_v47 = vmax.f32 %v2762_v27, 0.0 }
 0x344   :  { %v17204_v40 = vmax.f32 %v16344_v35, %v3669_v12  ;;  %v3672_v10 = vmax.f32 %v3477_v51, %v3542_v56  ;;  %v3541_v53 = vmax.f32 %v3067_v42, 0.0  ;;  %v3082_v17 = vadd.f32 %v16805_v18, %v12268_v20  ;;  %3861 = vrot.lane.b32.xlu1 %v17180_v11, %s13306_s2 }
 0x345   :  { %v3076_v58 = vpop.f32.mrf.mxu0  ;;  %v2772_v12 = vadd.f32 %v16805_v18, %v16918_v5  ;;  %v3483_v21 = vmax.f32 %v2777_v13, 0.0  ;;  %v2787_v20 = vadd.f32 %v16805_v18, %v16949_v16  ;;  %v2782_v22 = vadd.f32 %v16805_v18, %v16930_v4 }
 0x346   :  { %v17212_v60 = vmax.f32 %v16350_v33, %v3672_v10  ;;  %v3671_v2 = vmax.f32 %v3476_v7, %v3541_v53  ;;  %v3544_v43 = vmax.f32 %v3082_v17, 0.0  ;;  %v3077_v35 = vadd.f32 %v16805_v18, %v3076_v58  ;;  %4024 = vrot.lane.b32.xlu0 %v17191_v19, %s13309_s5 }
 0x347   :  { %v12271_v14 = vpop.f32.mrf.mxu0 }
 0x348   :  { %v17220_v0 = vmax.f32 %v16362_v37, %v3671_v2  ;;  %v3674_v3 = vmax.f32 %v3479_v15, %v3544_v43  ;;  %v3543_v63 = vmax.f32 %v3077_v35, 0.0  ;;  %v3092_v33 = vadd.f32 %v16805_v18, %v12271_v14  ;;  %3865 = vrot.lane.b32.xlu1 %v17196_v55, %s13306_s2 }
 0x349   :  { %v3086_v23 = vpop.f32.mrf.mxu0  ;;  %v3482_v15 = vmax.f32 %v2772_v12, 0.0  ;;  %v3485_v35 = vmax.f32 %v2787_v20, 0.0 }
 0x34a   :  { %v17228_v51 = vmax.f32 %v16368_v24, %v3674_v3  ;;  %v3673_v8 = vmax.f32 %v3478_v54, %v3543_v63  ;;  %v3546_v9 = vmax.f32 %v3092_v33, 0.0  ;;  %v3087_v37 = vadd.f32 %v16805_v18, %v3086_v23  ;;  %3859 = vrot.lane.b32.xlu0 %v17191_v19, %s13306_s2 }
 0x34b   :  { %v12274_v56 = vpop.f32.mrf.mxu0  ;;  %v2797_v54 = vadd.f32 %v16805_v18, %v16961_v50  ;;  %v3484_v63 = vmax.f32 %v2782_v22, 0.0  ;;  %v2792_v33 = vadd.f32 %v16805_v18, %v16942_v1  ;;  %v2812_v22 = vadd.f32 %v16805_v18, %v16966_v61 }
 0x34c   :  { %v17236_v42 = vmax.f32 %v16380_v30, %v3673_v8  ;;  %v3676_v34 = vmax.f32 %v3481_v52, %v3546_v9  ;;  %v3545_v7 = vmax.f32 %v3087_v37, 0.0  ;;  %v3102_v24 = vadd.f32 %v16805_v18, %v12274_v56  ;;  %4198 = vrot.lane.b32.xlu1 %v17204_v40, %s13308_s29 }
 0x34d   :  { %v3096_v10 = vpop.f32.mrf.mxu0  ;;  %v3487_v8 = vmax.f32 %v2797_v54, 0.0  ;;  %v2807_v9 = vadd.f32 %v16805_v18, %v16973_v59  ;;  %v3486_v56 = vmax.f32 %v2792_v33, 0.0  ;;  %v21660_v33 = vld [vmem:[#allocation452_spill] sm:$0xff] }
 0x34e   :  { %v17244_v53 = vmax.f32 %v16386_v26, %v3676_v34  ;;  %v3675_v5 = vmax.f32 %v3480_v47, %v3545_v7  ;;  %v3548_v17 = vmax.f32 %v3102_v24, 0.0  ;;  %v3097_v30 = vadd.f32 %v16805_v18, %v3096_v10  ;;  %4200 = vrot.lane.b32.xlu0 %v17196_v55, %s13308_s29 }
 0x34f   :  { %v12277_v58 = vpop.f32.mrf.mxu0  ;;  %v2802_v34 = vadd.f32 %v16805_v18, %v16954_v38  ;;  %v3489_v20 = vmax.f32 %v2807_v9, 0.0  ;;  %v2817_v10 = vadd.f32 %v16805_v18, %v16985_v46 }
 0x350   :  { %v17252_v2 = vmax.f32 %v16398_v41, %v3675_v5  ;;  %v3678_v16 = vmax.f32 %v3483_v21, %v3548_v17  ;;  %v3547_v43 = vmax.f32 %v3097_v30, 0.0  ;;  %v3112_v26 = vadd.f32 %v16805_v18, %v12277_v58  ;;  %4028 = vrot.lane.b32.xlu1 %v17204_v40, %s13309_s5 }
 0x351   :  { %v3106_v27 = vpop.f32.mrf.mxu0 }
 0x352   :  { %v17260_v14 = vmax.f32 %v16404_v36, %v3678_v16  ;;  %v3677_v4 = vmax.f32 %v3482_v15, %v3547_v43  ;;  %v3550_v3 = vmax.f32 %v3112_v26, 0.0  ;;  %v3107_v41 = vadd.f32 %v16805_v18, %v3106_v27  ;;  %4030 = vrot.lane.b32.xlu0 %v17196_v55, %s13309_s5 }
 0x353   :  { %v12280_v52 = vpop.f32.mrf.mxu0  ;;  %v3488_v15 = vmax.f32 %v2802_v34, 0.0  ;;  %v3491_v26 = vmax.f32 %v2817_v10, 0.0  ;;  %v21663_v34 = vld [vmem:[#allocation427_spill] sm:$0xff]  ;;  %v21664_v10 = vld [vmem:[#allocation453_spill] sm:$0xff] }
 0x354   :  { %21654 = vst [vmem:[#allocation423_spill] sm:$0xff] %v17260_v14  ;;  %v17268_v13 = vmax.f32 %v16416_v44, %v3677_v4  ;;  %v3680_v50 = vmax.f32 %v3485_v35, %v3550_v3  ;;  %v3549_v23 = vmax.f32 %v3107_v41, 0.0  ;;  %v3122_v36 = vadd.f32 %v16805_v18, %v12280_v52  ;;  %3869 = vrot.lane.b32.xlu1 %v17212_v60, %s13306_s2  ;;  %v21658_v35 = vld [vmem:[#allocation454_spill] sm:$0xff]  ;;  %v21659_v4 = vld [vmem:[#allocation425_spill] sm:$0xff] }
 0x355   :  { %v3116_v37 = vpop.f32.mrf.mxu0  ;;  %v2827_v54 = vadd.f32 %v16805_v18, %v21658_v35  ;;  %v2822_v52 = vadd.f32 %v16805_v18, %v21660_v33  ;;  %v21667_v35 = vld [vmem:[#allocation429_spill] sm:$0xff] }
 0x356   :  { %21655 = vst [vmem:[#allocation424_spill] sm:$0xff] %v17268_v13  ;;  %v17276_v47 = vmax.f32 %v16422_v62, %v3680_v50  ;;  %v3679_v1 = vmax.f32 %v3484_v63, %v3549_v23  ;;  %v3552_v12 = vmax.f32 %v3122_v36, 0.0  ;;  %v3117_v44 = vadd.f32 %v16805_v18, %v3116_v37  ;;  %3863 = vrot.lane.b32.xlu0 %v17204_v40, %s13306_s2  ;;  %v21661_v23 = vld [vmem:[#allocation426_spill] sm:$0xff] }
 0x357   :  { %v12283_v7 = vpop.f32.mrf.mxu0  ;;  %v3490_v63 = vmax.f32 %v2812_v22, 0.0 }
 0x358   :  { %21656 = vst [vmem:[#allocation491_spill] sm:$0xff] %v17276_v47  ;;  %v17284_v24 = vmax.f32 %v16434_v45, %v3679_v1  ;;  %v3682_v59 = vmax.f32 %v3487_v8, %v3552_v12  ;;  %v3551_v21 = vmax.f32 %v3117_v44, 0.0  ;;  %v3132_v62 = vadd.f32 %v16805_v18, %v12283_v7  ;;  %4202 = vrot.lane.b32.xlu1 %v17220_v0, %s13308_s29  ;;  %v21662_v12 = vld [vmem:[#allocation456_spill] sm:$0xff] }
 0x359   :  { %v3126_v5 = vpop.f32.mrf.mxu0  ;;  %v3493_v1 = vmax.f32 %v2827_v54, 0.0  ;;  %v2837_v44 = vadd.f32 %v16805_v18, %v21662_v12 }
 0x35a   :  { %v17292_v17 = vmax.f32 %v16440_v32, %v3682_v59  ;;  %v3681_v38 = vmax.f32 %v3486_v56, %v3551_v21  ;;  %v3554_v30 = vmax.f32 %v3132_v62, 0.0  ;;  %v3127_v45 = vadd.f32 %v16805_v18, %v3126_v5  ;;  %4204 = vrot.lane.b32.xlu0 %v17212_v60, %s13308_s29 }
 0x35b   :  { %v12286_v58 = vpop.f32.mrf.mxu0  ;;  %v2832_v5 = vadd.f32 %v16805_v18, %v21664_v10  ;;  %v21672_v10 = vld [vmem:[#allocation457_spill] sm:$0xff] }
 0x35c   :  { %21657 = vst [vmem:[#allocation492_spill] sm:$0xff] %v17292_v17  ;;  %v17300_v16 = vmax.f32 %v16452_v48, %v3681_v38  ;;  %v3684_v46 = vmax.f32 %v3489_v20, %v3554_v30  ;;  %v3553_v43 = vmax.f32 %v3127_v45, 0.0  ;;  %v3142_v32 = vadd.f32 %v16805_v18, %v12286_v58  ;;  %4032 = vrot.lane.b32.xlu1 %v17220_v0, %s13309_s5  ;;  %v21665_v30 = vld [vmem:[#allocation428_spill] sm:$0xff] }
 0x35d   :  { %v3136_v27 = vpop.f32.mrf.mxu0  ;;  %v3492_v20 = vmax.f32 %v2822_v52, 0.0  ;;  %v21669_v52 = vld [vmem:[#allocation430_spill] sm:$0xff] }
 0x35e   :  { %v17308_v3 = vmax.f32 %v21659_v4, %v3684_v46  ;;  %v3683_v61 = vmax.f32 %v3488_v15, %v3553_v43  ;;  %v3556_v41 = vmax.f32 %v3142_v32, 0.0  ;;  %v3137_v48 = vadd.f32 %v16805_v18, %v3136_v27  ;;  %4034 = vrot.lane.b32.xlu0 %v17212_v60, %s13309_s5  ;;  %v21666_v43 = vld [vmem:[#allocation458_spill] sm:$0xff] }
 0x35f   :  { %v12289_v50 = vpop.f32.mrf.mxu0  ;;  %v3495_v46 = vmax.f32 %v2837_v44, 0.0  ;;  %v2847_v32 = vadd.f32 %v16805_v18, %v21666_v43 }
 0x360   :  { %v17316_v36 = vmax.f32 %v21661_v23, %v3683_v61  ;;  %v3686_v8 = vmax.f32 %v3491_v26, %v3556_v41  ;;  %v3555_v9 = vmax.f32 %v3137_v48, 0.0  ;;  %v3152_v37 = vadd.f32 %v16805_v18, %v12289_v50  ;;  %3873 = vrot.lane.b32.xlu1 %v17228_v51, %s13306_s2  ;;  %v21668_v48 = vld [vmem:[#allocation455_spill] sm:$0xff] }
 0x361   :  { %v3146_v56 = vpop.f32.mrf.mxu0  ;;  %v3494_v41 = vmax.f32 %v2832_v5, 0.0  ;;  %v2852_v5 = vadd.f32 %v16805_v18, %v21672_v10 }
 0x362   :  { %v17324_v7 = vmax.f32 %v21663_v34, %v3686_v8  ;;  %v3685_v59 = vmax.f32 %v3490_v63, %v3555_v9  ;;  %v3558_v21 = vmax.f32 %v3152_v37, 0.0  ;;  %v3147_v62 = vadd.f32 %v16805_v18, %v3146_v56  ;;  %3867 = vrot.lane.b32.xlu0 %v17220_v0, %s13306_s2  ;;  %v21671_v56 = vld [vmem:[#allocation431_spill] sm:$0xff] }
 0x363   :  { %v12292_v38 = vpop.f32.mrf.mxu0  ;;  %v2842_v63 = vadd.f32 %v16805_v18, %v21668_v48  ;;  %v3497_v37 = vmax.f32 %v2847_v32, 0.0  ;;  %v21674_v32 = vld [vmem:[#allocation462_spill] sm:$0xff] }
 0x364   :  { %v17332_v45 = vmax.f32 %v21665_v30, %v3685_v59  ;;  %v3688_v15 = vmax.f32 %v3493_v1, %v3558_v21  ;;  %v3557_v22 = vmax.f32 %v3147_v62, 0.0  ;;  %v3162_v58 = vadd.f32 %v16805_v18, %v12292_v38  ;;  %4206 = vrot.lane.b32.xlu1 %v17236_v42, %s13308_s29  ;;  %v21670_v1 = vld [vmem:[#allocation460_spill] sm:$0xff] }
 0x365   :  { %v3156_v26 = vpop.f32.mrf.mxu0  ;;  %v2857_v12 = vadd.f32 %v16805_v18, %v21670_v1  ;;  %v21673_v30 = vld [vmem:[#allocation432_spill] sm:$0xff] }
 0x366   :  { %v17340_v54 = vmax.f32 %v21667_v35, %v3688_v15  ;;  %v3687_v27 = vmax.f32 %v3492_v20, %v3557_v22  ;;  %v3560_v4 = vmax.f32 %v3162_v58, 0.0  ;;  %v3157_v61 = vadd.f32 %v16805_v18, %v3156_v26  ;;  %4208 = vrot.lane.b32.xlu0 %v17228_v51, %s13308_s29 }
 0x367   :  { %v12295_v33 = vpop.f32.mrf.mxu0  ;;  %v3496_v20 = vmax.f32 %v2842_v63, 0.0  ;;  %v3499_v43 = vmax.f32 %v2857_v12, 0.0  ;;  %v2867_v26 = vadd.f32 %v16805_v18, %v21674_v32  ;;  %v3498_v63 = vmax.f32 %v2852_v5, 0.0 }
 0x368   :  { %v17348_v50 = vmax.f32 %v21669_v52, %v3687_v27  ;;  %v3690_v23 = vmax.f32 %v3495_v46, %v3560_v4  ;;  %v3559_v8 = vmax.f32 %v3157_v61, 0.0  ;;  %v3172_v9 = vadd.f32 %v16805_v18, %v12295_v33  ;;  %4036 = vrot.lane.b32.xlu1 %v17236_v42, %s13309_s5  ;;  %v21675_v27 = vld [vmem:[#allocation433_spill] sm:$0xff]  ;;  %v21676_v33 = vld [vmem:[#allocation459_spill] sm:$0xff] }
 0x369   :  { %v3166_v44 = vpop.f32.mrf.mxu0  ;;  %v2862_v52 = vadd.f32 %v16805_v18, %v21676_v33  ;;  %v21683_v33 = vld [vmem:[#allocation437_spill] sm:$0xff] }
 0x36a   :  { %v17356_v34 = vmax.f32 %v21671_v56, %v3690_v23  ;;  %v3689_v59 = vmax.f32 %v3494_v41, %v3559_v8  ;;  %v3562_v21 = vmax.f32 %v3172_v9, 0.0  ;;  %v3167_v62 = vadd.f32 %v16805_v18, %v3166_v44  ;;  %4038 = vrot.lane.b32.xlu0 %v17228_v51, %s13309_s5  ;;  %v21677_v8 = vld [vmem:[#allocation434_spill] sm:$0xff]  ;;  %v21678_v56 = vld [vmem:[#allocation464_spill] sm:$0xff] }
 0x36b   :  { %v12298_v38 = vpop.f32.mrf.mxu0  ;;  %v3501_v44 = vmax.f32 %v2867_v26, 0.0 }
 0x36c   :  { %v17364_v15 = vmax.f32 %v21673_v30, %v3689_v59  ;;  %v3692_v22 = vmax.f32 %v3497_v37, %v3562_v21  ;;  %v3561_v58 = vmax.f32 %v3167_v62, 0.0  ;;  %v3182_v46 = vadd.f32 %v16805_v18, %v12298_v38  ;;  %3877 = vrot.lane.b32.xlu1 %v17244_v53, %s13306_s2  ;;  %v21679_v62 = vld [vmem:[#allocation435_spill] sm:$0xff] }
 0x36d   :  { %v3176_v35 = vpop.f32.mrf.mxu0  ;;  %v2877_v59 = vadd.f32 %v16805_v18, %v21678_v56  ;;  %v3500_v30 = vmax.f32 %v2862_v52, 0.0 }
 0x36e   :  { %v17372_v4 = vmax.f32 %v21675_v27, %v3692_v22  ;;  %v3691_v61 = vmax.f32 %v3496_v20, %v3561_v58  ;;  %v3564_v41 = vmax.f32 %v3182_v46, 0.0  ;;  %v3177_v48 = vadd.f32 %v16805_v18, %v3176_v35  ;;  %3871 = vrot.lane.b32.xlu0 %v17236_v42, %s13306_s2  ;;  %v21680_v22 = vld [vmem:[#allocation461_spill] sm:$0xff] }
 0x36f   :  { %v12301_v23 = vpop.f32.mrf.mxu0  ;;  %v2872_v58 = vadd.f32 %v16805_v18, %v21680_v22 }
 0x370   :  { %v17380_v9 = vmax.f32 %v21677_v8, %v3691_v61  ;;  %v3694_v37 = vmax.f32 %v3499_v43, %v3564_v41  ;;  %v3563_v1 = vmax.f32 %v3177_v48, 0.0  ;;  %v3192_v12 = vadd.f32 %v16805_v18, %v12301_v23  ;;  %4210 = vrot.lane.b32.xlu1 %v17252_v2, %s13308_s29  ;;  %v21681_v43 = vld [vmem:[#allocation436_spill] sm:$0xff]  ;;  %v21682_v41 = vld [vmem:[#allocation466_spill] sm:$0xff] }
 0x371   :  { %v3186_v21 = vpop.f32.mrf.mxu0  ;;  %v3503_v61 = vmax.f32 %v2877_v59, 0.0  ;;  %v2887_v48 = vadd.f32 %v16805_v18, %v21682_v41  ;;  %v21685_v59 = vld [vmem:[#allocation438_spill] sm:$0xff]  ;;  %v21688_v41 = vld [vmem:[#allocation465_spill] sm:$0xff] }
 0x372   :  { %v17388_v20 = vmax.f32 %v21679_v62, %v3694_v37  ;;  %v3693_v10 = vmax.f32 %v3498_v63, %v3563_v1  ;;  %v3566_v5 = vmax.f32 %v3192_v12, 0.0  ;;  %v3187_v38 = vadd.f32 %v16805_v18, %v3186_v21  ;;  %4212 = vrot.lane.b32.xlu0 %v17244_v53, %s13308_s29  ;;  %v21684_v12 = vld [vmem:[#allocation463_spill] sm:$0xff] }
 0x373   :  { %v12304_v46 = vpop.f32.mrf.mxu0  ;;  %v3502_v1 = vmax.f32 %v2872_v58, 0.0  ;;  %v21687_v58 = vld [vmem:[#allocation439_spill] sm:$0xff] }
 0x374   :  { %v17396_v32 = vmax.f32 %v21681_v43, %v3693_v10  ;;  %v3696_v26 = vmax.f32 %v3501_v44, %v3566_v5  ;;  %v3565_v35 = vmax.f32 %v3187_v38, 0.0  ;;  %v3202_v27 = vadd.f32 %v16805_v18, %v12304_v46  ;;  %4040 = vrot.lane.b32.xlu1 %v17252_v2, %s13309_s5 }
 0x375   :  { %v3196_v63 = vpop.f32.mrf.mxu0  ;;  %v2882_v44 = vadd.f32 %v16805_v18, %v21684_v12  ;;  %v3505_v38 = vmax.f32 %v2887_v48, 0.0  ;;  %v21689_v48 = vld [vmem:[#allocation440_spill] sm:$0xff] }
 0x376   :  { %v17404_v52 = vmax.f32 %v21683_v33, %v3696_v26  ;;  %v3695_v23 = vmax.f32 %v3500_v30, %v3565_v35  ;;  %v3568_v8 = vmax.f32 %v3202_v27, 0.0  ;;  %v3197_v37 = vadd.f32 %v16805_v18, %v3196_v63  ;;  %4042 = vrot.lane.b32.xlu0 %v17244_v53, %s13309_s5  ;;  %v21686_v30 = vld [vmem:[#allocation468_spill] sm:$0xff] }
 0x377   :  { %v12307_v56 = vpop.f32.mrf.mxu0  ;;  %v2897_v22 = vadd.f32 %v16805_v18, %v21686_v30  ;;  %v2892_v63 = vadd.f32 %v16805_v18, %v21688_v41 }
 0x378   :  { %v17412_v21 = vmax.f32 %v21685_v59, %v3695_v23  ;;  %v3698_v62 = vmax.f32 %v3503_v61, %v3568_v8  ;;  %v3567_v10 = vmax.f32 %v3197_v37, 0.0  ;;  %v3212_v5 = vadd.f32 %v16805_v18, %v12307_v56  ;;  %3881 = vrot.lane.b32.xlu1 %v17260_v14, %s13306_s2  ;;  %v21690_v56 = vld [vmem:[#allocation470_spill] sm:$0xff] }
 0x379   :  { %v3206_v46 = vpop.f32.mrf.mxu0  ;;  %v3504_v61 = vmax.f32 %v2882_v44, 0.0  ;;  %v2907_v59 = vadd.f32 %v16805_v18, %v21690_v56  ;;  %v21691_v44 = vld [vmem:[#allocation441_spill] sm:$0xff] }
 0x37a   :  { %v17420_v43 = vmax.f32 %v21687_v58, %v3698_v62  ;;  %v3697_v26 = vmax.f32 %v3502_v1, %v3567_v10  ;;  %v3570_v35 = vmax.f32 %v3212_v5, 0.0  ;;  %v3207_v27 = vadd.f32 %v16805_v18, %v3206_v46  ;;  %3875 = vrot.lane.b32.xlu0 %v17252_v2, %s13306_s2  ;;  %v21692_v58 = vld [vmem:[#allocation467_spill] sm:$0xff] }
 0x37b   :  { %v12310_v33 = vpop.f32.mrf.mxu0  ;;  %v3507_v1 = vmax.f32 %v2897_v22, 0.0  ;;  %v21693_v22 = vld [vmem:[#allocation442_spill] sm:$0xff] }
 0x37c   :  { %v17428_v23 = vmax.f32 %v21689_v48, %v3697_v26  ;;  %v3700_v8 = vmax.f32 %v3505_v38, %v3570_v35  ;;  %v3569_v37 = vmax.f32 %v3207_v27, 0.0  ;;  %v3222_v12 = vadd.f32 %v16805_v18, %v12310_v33  ;;  %4214 = vrot.lane.b32.xlu1 %v17268_v13, %s13308_s29 }
 0x37d   :  { %v3216_v62 = vpop.f32.mrf.mxu0  ;;  %v3506_v38 = vmax.f32 %v2892_v63, 0.0  ;;  %v2902_v26 = vadd.f32 %v16805_v18, %v21692_v58  ;;  %v3509_v63 = vmax.f32 %v2907_v59, 0.0  ;;  %v21697_v59 = vld [vmem:[#allocation444_spill] sm:$0xff] }
 0x37e   :  { %v17436_v10 = vmax.f32 %v21691_v44, %v3700_v8  ;;  %v3699_v5 = vmax.f32 %v3504_v61, %v3569_v37  ;;  %v3572_v30 = vmax.f32 %v3222_v12, 0.0  ;;  %v3217_v46 = vadd.f32 %v16805_v18, %v3216_v62  ;;  %4216 = vrot.lane.b32.xlu0 %v17260_v14, %s13308_s29  ;;  %v17449_v61 = vld [vmem:[%s21550_s27] ss:$0 sm:$0xff]  ;;  %v21694_v8 = vld [vmem:[#allocation472_spill] sm:$0xff]  ;;  %v21695_v12 = vld [vmem:[#allocation443_spill] sm:$0xff] }
 0x37f   :  { %v12313_v35 = vpop.f32.mrf.mxu0  ;;  %v2917_v18 = vadd.f32 %v17449_v61, %v21694_v8 }
 0x380   :  { %v17444_v27 = vmax.f32 %v21693_v22, %v3699_v5  ;;  %v3702_v41 = vmax.f32 %v3507_v1, %v3572_v30  ;;  %v3571_v33 = vmax.f32 %v3217_v46, 0.0  ;;  %v3232_v48 = vadd.f32 %v17449_v61, %v12313_v35  ;;  %4044 = vrot.lane.b32.xlu1 %v17268_v13, %s13309_s5  ;;  %v21696_v30 = vld [vmem:[#allocation469_spill] sm:$0xff] }
 0x381   :  { %v3226_v37 = vpop.f32.mrf.mxu0  ;;  %v3508_v5 = vmax.f32 %v2902_v26, 0.0  ;;  %v2912_v46 = vadd.f32 %v17449_v61, %v21696_v30  ;;  %v21699_v26 = vld [vmem:[#allocation445_spill] sm:$0xff] }
 0x382   :  { %v17457_v56 = vmax.f32 %v21695_v12, %v3702_v41  ;;  %v3701_v1 = vmax.f32 %v3506_v38, %v3571_v33  ;;  %v3574_v62 = vmax.f32 %v3232_v48, 0.0  ;;  %v3227_v44 = vadd.f32 %v17449_v61, %v3226_v37  ;;  %4046 = vrot.lane.b32.xlu0 %v17260_v14, %s13309_s5  ;;  %v21698_v33 = vld [vmem:[#allocation474_spill] sm:$0xff] }
 0x383   :  { %v12316_v58 = vpop.f32.mrf.mxu0  ;;  %v3511_v38 = vmax.f32 %v2917_v18, 0.0  ;;  %v2927_v48 = vadd.f32 %v17449_v61, %v21698_v33  ;;  %v21701_v18 = vld [vmem:[#allocation446_spill] sm:$0xff] }
 0x384   :  { %v17465_v35 = vmax.f32 %v21697_v59, %v3701_v1  ;;  %v3704_v22 = vmax.f32 %v3509_v63, %v3574_v62  ;;  %v3573_v8 = vmax.f32 %v3227_v44, 0.0  ;;  %v3242_v41 = vadd.f32 %v17449_v61, %v12316_v58  ;;  %3885 = vrot.lane.b32.xlu1 %v17276_v47, %s13306_s2  ;;  %v21700_v62 = vld [vmem:[#allocation471_spill] sm:$0xff] }
 0x385   :  { %v3236_v37 = vpop.f32.mrf.mxu0  ;;  %v3510_v63 = vmax.f32 %v2912_v46, 0.0  ;;  %v2922_v44 = vadd.f32 %v17449_v61, %v21700_v62  ;;  %v21704_v46 = vld [vmem:[#allocation447_spill] sm:$0xff] }
 0x386   :  { %v17473_v12 = vmax.f32 %v21699_v26, %v3704_v22  ;;  %v3703_v30 = vmax.f32 %v3508_v5, %v3573_v8  ;;  %v3576_v49 = vmax.f32 %v3242_v41, 0.0  ;;  %v3237_v1 = vadd.f32 %v17449_v61, %v3236_v37  ;;  %3879 = vrot.lane.b32.xlu0 %v17268_v13, %s13306_s2  ;;  %v21703_v8 = vld [vmem:[#allocation476_spill] sm:$0xff] }
 0x387   :  { %v12319_v58 = vpop.f32.mrf.mxu0  ;;  %v3513_v5 = vmax.f32 %v2927_v48, 0.0  ;;  %v2937_v41 = vadd.f32 %v17449_v61, %v21703_v8  ;;  %v21707_v48 = vld [vmem:[#allocation448_spill] sm:$0xff] }
 0x388   :  { %v17481_v59 = vmax.f32 %v21701_v18, %v3703_v30  ;;  %v3706_v33 = vmax.f32 %v3511_v38, %v3576_v49  ;;  %v3575_v14 = vmax.f32 %v3237_v1, 0.0  ;;  %v3252_v22 = vadd.f32 %v17449_v61, %v12319_v58  ;;  %4218 = vrot.lane.b32.xlu1 %v17284_v24, %s13308_s29  ;;  %v21706_v38 = vld [vmem:[#allocation473_spill] sm:$0xff] }
 0x389   :  { %v3246_v37 = vpop.f32.mrf.mxu0  ;;  %v3512_v49 = vmax.f32 %v2922_v44, 0.0  ;;  %v2932_v1 = vadd.f32 %v17449_v61, %v21706_v38  ;;  %v21710_v44 = vld [vmem:[#allocation408_spill] sm:$0xff] }
 0x38a   :  { %21702 = vst [vmem:[#allocation454_spill] sm:$0xff] %v17481_v59  ;;  %v17489_v26 = vmax.f32 %v21704_v46, %v3706_v33  ;;  %v3705_v62 = vmax.f32 %v3510_v63, %v3575_v14  ;;  %v3578_v13 = vmax.f32 %v3252_v22, 0.0  ;;  %v3247_v30 = vadd.f32 %v17449_v61, %v3246_v37  ;;  %4220 = vrot.lane.b32.xlu0 %v17276_v47, %s13308_s29  ;;  %v21709_v63 = vld [vmem:[#allocation478_spill] sm:$0xff] }
 0x38b   :  { %v12322_v58 = vpop.f32.mrf.mxu0  ;;  %v3515_v14 = vmax.f32 %v2937_v41, 0.0  ;;  %v2947_v22 = vadd.f32 %v17449_v61, %v21709_v63  ;;  %v21712_v41 = vld [vmem:[#allocation411_spill] sm:$0xff] }
 0x38c   :  { %21705 = vst [vmem:[#allocation425_spill] sm:$0xff] %v17489_v26  ;;  %v17497_v18 = vmax.f32 %v21707_v48, %v3705_v62  ;;  %v3708_v8 = vmax.f32 %v3513_v5, %v3578_v13  ;;  %v3577_v59 = vmax.f32 %v3247_v30, 0.0  ;;  %v3262_v33 = vadd.f32 %v17449_v61, %v12322_v58  ;;  %4048 = vrot.lane.b32.xlu1 %v17284_v24, %s13309_s5  ;;  %v21711_v5 = vld [vmem:[#allocation475_spill] sm:$0xff] }
 0x38d   :  { %v3256_v37 = vpop.f32.mrf.mxu0  ;;  %v3514_v13 = vmax.f32 %v2932_v1, 0.0  ;;  %v2942_v30 = vadd.f32 %v17449_v61, %v21711_v5  ;;  %v21715_v1 = vld [vmem:[#allocation409_spill] sm:$0xff] }
 0x38e   :  { %21708 = vst [vmem:[#allocation452_spill] sm:$0xff] %v17497_v18  ;;  %v17505_v46 = vmax.f32 %v21710_v44, %v3708_v8  ;;  %v3707_v38 = vmax.f32 %v3512_v49, %v3577_v59  ;;  %v3580_v26 = vmax.f32 %v3262_v33, 0.0  ;;  %v3257_v62 = vadd.f32 %v17449_v61, %v3256_v37  ;;  %4050 = vrot.lane.b32.xlu0 %v17276_v47, %s13309_s5  ;;  %v21714_v49 = vld [vmem:[#allocation480_spill] sm:$0xff] }
 0x38f   :  { %v12325_v58 = vpop.f32.mrf.mxu0  ;;  %v3517_v59 = vmax.f32 %v2947_v22, 0.0  ;;  %v2957_v33 = vadd.f32 %v17449_v61, %v21714_v49  ;;  %v21718_v22 = vld [vmem:[#allocation413_spill] sm:$0xff] }
 0x390   :  { %v17513_v48 = vmax.f32 %v21712_v41, %v3707_v38  ;;  %v3710_v63 = vmax.f32 %v3515_v14, %v3580_v26  ;;  %v3579_v18 = vmax.f32 %v3257_v62, 0.0  ;;  %v3272_v8 = vadd.f32 %v17449_v61, %v12325_v58  ;;  %3889 = vrot.lane.b32.xlu1 %v17292_v17, %s13306_s2  ;;  %v21717_v14 = vld [vmem:[#allocation477_spill] sm:$0xff] }
 0x391   :  { %v3266_v37 = vpop.f32.mrf.mxu0  ;;  %v3516_v26 = vmax.f32 %v2942_v30, 0.0  ;;  %v2952_v62 = vadd.f32 %v17449_v61, %v21717_v14  ;;  %v21721_v30 = vld [vmem:[#allocation410_spill] sm:$0xff] }
 0x392   :  { %21713 = vst [vmem:[#allocation426_spill] sm:$0xff] %v17513_v48  ;;  %v17521_v44 = vmax.f32 %v21715_v1, %v3710_v63  ;;  %v3709_v5 = vmax.f32 %v3514_v13, %v3579_v18  ;;  %v3582_v47 = vmax.f32 %v3272_v8, 0.0  ;;  %v3267_v38 = vadd.f32 %v17449_v61, %v3266_v37  ;;  %3883 = vrot.lane.b32.xlu0 %v17284_v24, %s13306_s2  ;;  %v21720_v13 = vld [vmem:[#allocation482_spill] sm:$0xff] }
 0x393   :  { %v12328_v58 = vpop.f32.mrf.mxu0  ;;  %v3519_v18 = vmax.f32 %v2957_v33, 0.0  ;;  %v2967_v8 = vadd.f32 %v17449_v61, %v21720_v13  ;;  %v21724_v33 = vld [vmem:[#allocation415_spill] sm:$0xff] }
 0x394   :  { %21716 = vst [vmem:[#allocation456_spill] sm:$0xff] %v17521_v44  ;;  %v17529_v41 = vmax.f32 %v21718_v22, %v3709_v5  ;;  %v3712_v49 = vmax.f32 %v3517_v59, %v3582_v47  ;;  %v3581_v48 = vmax.f32 %v3267_v38, 0.0  ;;  %v3282_v63 = vadd.f32 %v17449_v61, %v12328_v58  ;;  %4222 = vrot.lane.b32.xlu1 %v17300_v16, %s13308_s29  ;;  %v21723_v59 = vld [vmem:[#allocation479_spill] sm:$0xff] }
 0x395   :  { %v3276_v37 = vpop.f32.mrf.mxu0  ;;  %v3518_v47 = vmax.f32 %v2952_v62, 0.0  ;;  %v2962_v38 = vadd.f32 %v17449_v61, %v21723_v59  ;;  %v21727_v62 = vld [vmem:[#allocation412_spill] sm:$0xff] }
 0x396   :  { %21719 = vst [vmem:[#allocation427_spill] sm:$0xff] %v17529_v41  ;;  %v17537_v1 = vmax.f32 %v21721_v30, %v3712_v49  ;;  %v3711_v14 = vmax.f32 %v3516_v26, %v3581_v48  ;;  %v3584_v44 = vmax.f32 %v3282_v63, 0.0  ;;  %v3277_v5 = vadd.f32 %v17449_v61, %v3276_v37  ;;  %4224 = vrot.lane.b32.xlu0 %v17292_v17, %s13308_s29  ;;  %v21726_v26 = vld [vmem:[#allocation484_spill] sm:$0xff] }
 0x397   :  { %v12331_v58 = vpop.f32.mrf.mxu0  ;;  %v3521_v48 = vmax.f32 %v2967_v8, 0.0  ;;  %v2977_v63 = vadd.f32 %v17449_v61, %v21726_v26  ;;  %v21730_v8 = vld [vmem:[#allocation417_spill] sm:$0xff] }
 0x398   :  { %21722 = vst [vmem:[#allocation453_spill] sm:$0xff] %v17537_v1  ;;  %v17545_v22 = vmax.f32 %v21724_v33, %v3711_v14  ;;  %v3714_v13 = vmax.f32 %v3519_v18, %v3584_v44  ;;  %v3583_v41 = vmax.f32 %v3277_v5, 0.0  ;;  %v3292_v49 = vadd.f32 %v17449_v61, %v12331_v58  ;;  %4052 = vrot.lane.b32.xlu1 %v17300_v16, %s13309_s5  ;;  %v21729_v18 = vld [vmem:[#allocation481_spill] sm:$0xff] }
 0x399   :  { %v3286_v37 = vpop.f32.mrf.mxu0  ;;  %v3520_v44 = vmax.f32 %v2962_v38, 0.0  ;;  %v2972_v5 = vadd.f32 %v17449_v61, %v21729_v18  ;;  %v21733_v38 = vld [vmem:[#allocation414_spill] sm:$0xff] }
 0x39a   :  { %21725 = vst [vmem:[#allocation428_spill] sm:$0xff] %v17545_v22  ;;  %v17553_v30 = vmax.f32 %v21727_v62, %v3714_v13  ;;  %v3713_v59 = vmax.f32 %v3518_v47, %v3583_v41  ;;  %v3586_v1 = vmax.f32 %v3292_v49, 0.0  ;;  %v3287_v14 = vadd.f32 %v17449_v61, %v3286_v37  ;;  %4054 = vrot.lane.b32.xlu0 %v17292_v17, %s13309_s5  ;;  %v21732_v47 = vld [vmem:[#allocation486_spill] sm:$0xff] }
 0x39b   :  { %v12334_v58 = vpop.f32.mrf.mxu0  ;;  %v3523_v41 = vmax.f32 %v2977_v63, 0.0  ;;  %v2987_v49 = vadd.f32 %v17449_v61, %v21732_v47  ;;  %v21736_v63 = vld [vmem:[#allocation419_spill] sm:$0xff] }
 0x39c   :  { %21728 = vst [vmem:[#allocation458_spill] sm:$0xff] %v17553_v30  ;;  %v17561_v33 = vmax.f32 %v21730_v8, %v3713_v59  ;;  %v3716_v26 = vmax.f32 %v3521_v48, %v3586_v1  ;;  %v3585_v22 = vmax.f32 %v3287_v14, 0.0  ;;  %v3302_v13 = vadd.f32 %v17449_v61, %v12334_v58  ;;  %3893 = vrot.lane.b32.xlu1 %v17308_v3, %s13306_s2  ;;  %v21735_v48 = vld [vmem:[#allocation483_spill] sm:$0xff] }
 0x39d   :  { %v3296_v37 = vpop.f32.mrf.mxu0  ;;  %v3522_v1 = vmax.f32 %v2972_v5, 0.0  ;;  %v2982_v14 = vadd.f32 %v17449_v61, %v21735_v48  ;;  %v21739_v5 = vld [vmem:[#allocation416_spill] sm:$0xff] }
 0x39e   :  { %21731 = vst [vmem:[#allocation429_spill] sm:$0xff] %v17561_v33  ;;  %v17569_v62 = vmax.f32 %v21733_v38, %v3716_v26  ;;  %v3715_v18 = vmax.f32 %v3520_v44, %v3585_v22  ;;  %v3588_v30 = vmax.f32 %v3302_v13, 0.0  ;;  %v3297_v59 = vadd.f32 %v17449_v61, %v3296_v37  ;;  %3887 = vrot.lane.b32.xlu0 %v17300_v16, %s13306_s2  ;;  %v21738_v44 = vld [vmem:[#allocation488_spill] sm:$0xff] }
 0x39f   :  { %v12337_v58 = vpop.f32.mrf.mxu0  ;;  %v3525_v22 = vmax.f32 %v2987_v49, 0.0  ;;  %v2997_v13 = vadd.f32 %v17449_v61, %v21738_v44  ;;  %v21742_v49 = vld [vmem:[#allocation421_spill] sm:$0xff] }
 0x3a0   :  { %21734 = vst [vmem:[#allocation455_spill] sm:$0xff] %v17569_v62  ;;  %v17577_v8 = vmax.f32 %v21736_v63, %v3715_v18  ;;  %v3718_v47 = vmax.f32 %v3523_v41, %v3588_v30  ;;  %v3587_v33 = vmax.f32 %v3297_v59, 0.0  ;;  %v3312_v26 = vadd.f32 %v17449_v61, %v12337_v58  ;;  %4226 = vrot.lane.b32.xlu1 %v17316_v36, %s13308_s29  ;;  %v21741_v41 = vld [vmem:[#allocation485_spill] sm:$0xff] }
 0x3a1   :  { %v3306_v37 = vpop.f32.mrf.mxu0  ;;  %v3524_v30 = vmax.f32 %v2982_v14, 0.0  ;;  %v2992_v59 = vadd.f32 %v17449_v61, %v21741_v41  ;;  %v21745_v14 = vld [vmem:[#allocation418_spill] sm:$0xff] }
 0x3a2   :  { %21737 = vst [vmem:[#allocation430_spill] sm:$0xff] %v17577_v8  ;;  %v17585_v38 = vmax.f32 %v21739_v5, %v3718_v47  ;;  %v3717_v48 = vmax.f32 %v3522_v1, %v3587_v33  ;;  %v3590_v62 = vmax.f32 %v3312_v26, 0.0  ;;  %v3307_v18 = vadd.f32 %v17449_v61, %v3306_v37  ;;  %4228 = vrot.lane.b32.xlu0 %v17308_v3, %s13308_s29  ;;  %v21744_v1 = vld [vmem:[#allocation489_spill] sm:$0xff] }
 0x3a3   :  { %v12340_v58 = vpop.f32.mrf.mxu0  ;;  %v3527_v33 = vmax.f32 %v2997_v13, 0.0  ;;  %v3007_v26 = vadd.f32 %v17449_v61, %v21744_v1 }
 0x3a4   :  { %21740 = vst [vmem:[#allocation460_spill] sm:$0xff] %v17585_v38  ;;  %v17593_v63 = vmax.f32 %v21742_v49, %v3717_v48  ;;  %v3720_v44 = vmax.f32 %v3525_v22, %v3590_v62  ;;  %v3589_v8 = vmax.f32 %v3307_v18, 0.0  ;;  %v3322_v47 = vadd.f32 %v17449_v61, %v12340_v58  ;;  %4056 = vrot.lane.b32.xlu1 %v17316_v36, %s13309_s5  ;;  %v21747_v18 = vld [vmem:[#allocation487_spill] sm:$0xff]  ;;  %v21748_v49 = vld [vmem:[#allocation422_spill] sm:$0xff] }
 0x3a5   :  { %v3316_v37 = vpop.f32.mrf.mxu0  ;;  %v3526_v22 = vmax.f32 %v2992_v59, 0.0  ;;  %v3002_v58 = vadd.f32 %v17449_v61, %v21747_v18 }
 0x3a6   :  { %21743 = vst [vmem:[#allocation431_spill] sm:$0xff] %v17593_v63  ;;  %v17601_v5 = vmax.f32 %v21745_v14, %v3720_v44  ;;  %v3719_v41 = vmax.f32 %v3524_v30, %v3589_v8  ;;  %v3592_v38 = vmax.f32 %v3322_v47, 0.0  ;;  %v3317_v48 = vadd.f32 %v17449_v61, %v3316_v37  ;;  %4058 = vrot.lane.b32.xlu0 %v17308_v3, %s13309_s5  ;;  %v3850_v62 = vpop.permute.xlu1 %3849  ;;  %v21749_v37 = vld [vmem:[#allocation420_spill] sm:$0xff] }
 0x3a7   :  { %v12343_v13 = vpop.f32.mrf.mxu0  ;;  %v3529_v30 = vmax.f32 %v3007_v26, 0.0 }
 0x3a8   :  { %21746 = vst [vmem:[#allocation457_spill] sm:$0xff] %v17601_v5  ;;  %v17609_v63 = vmax.f32 %v21748_v49, %v3719_v41  ;;  %v3722_v1 = vmax.f32 %v3527_v33, %v3592_v38  ;;  %v3591_v17 = vmax.f32 %v3317_v48, 0.0  ;;  %v3332_v44 = vadd.f32 %v17449_v61, %v12343_v13  ;;  %v3848_v8 = vpop.permute.xlu0 %3847  ;;  %3897 = vrot.lane.b32.xlu1 %v17324_v7, %s13306_s2  ;;  %v21750_v41 = vld [vmem:[#allocation449_spill] sm:$0xff] }
 0x3a9   :  { %v3326_v47 = vpop.f32.mrf.mxu0  ;;  %v3528_v33 = vmax.f32 %v3002_v58, 0.0  ;;  %v21752_v58 = vld [vmem:[#allocation451_spill] sm:$0xff] }
 0x3aa   :  { %v17615_v14 = vmax.f32 %v21749_v37, %v3722_v1  ;;  %v3721_v59 = vmax.f32 %v3526_v22, %v3591_v17  ;;  %v3594_v5 = vmax.f32 %v3332_v44, 0.0  ;;  %v3327_v18 = vadd.f32 %v17449_v61, %v3326_v47  ;;  %3891 = vrot.lane.b32.xlu0 %v17316_v36, %s13306_s2  ;;  %v3854_v38 = vpop.permute.xlu1 %3853  ;;  %v21751_v17 = vld [vmem:[#allocation450_spill] sm:$0xff] }
 0x3ac   :  { %v17621_v48 = vmax.f32 %v21750_v41, %v3721_v59  ;;  %v17623_v13 = vmax.f32 %v3529_v30, %v3594_v5  ;;  %v3593_v49 = vmax.f32 %v3327_v18, 0.0  ;;  %v3852_v26 = vpop.permute.xlu0 %3851  ;;  %4230 = vrot.lane.b32.xlu1 %v17332_v45, %s13308_s29  ;;  %v21753_v59 = vld [vmem:[#allocation490_spill] sm:$0xff] }
 0x3ad   :  { %v21754_v18 = vmax.f32 %v21652_v57, %v21753_v59  ;;  %v4369_v59 = vsel %vm4367_vm3, %v17128_v39, %v3850_v62  ;;  %v4370_v39 = vsel %vm4367_vm3, %v17116_v6, %v3852_v26  ;;  %v4371_v26 = vsel %vm4367_vm3, %v17152_v31, %v3854_v38 }
 0x3ae   :  { %v3789_v22 = vmax.f32 %v21751_v17, %v17623_v13  ;;  %v3723_v1 = vmax.f32 %v3528_v33, %v3593_v49  ;;  %4232 = vrot.lane.b32.xlu0 %v17324_v7, %s13308_s29  ;;  %v17631_v61 = vpop.permute.xlu1 %3857 }
 0x3af   :  { %v4368_v33 = vsel %vm4367_vm3, %v21754_v18, %v3848_v8  ;;  %v21755_v8 = vmov 0.0  }
 0x3b0   :  { %v17634_v44 = vmax.f32 %v21752_v58, %v3723_v1  ;;  %v3856_v47 = vpop.permute.xlu0 %3855  ;;  %4060 = vrot.lane.b32.xlu1 %v17332_v45, %s13309_s5 }
 0x3b1   :  { %v4372_v31 = vsel %vm4367_vm3, %v17140_v29, %v3856_v47  ;;  %v4373_v47 = vsel %vm4367_vm3, %v17175_v28, %v17631_v61 }
 0x3b2   :  { %4062 = vrot.lane.b32.xlu0 %v17324_v7, %s13309_s5  ;;  %v4197_v5 = vpop.permute.xlu1 %4196 }
 0x3b4   :  { %v4027_v30 = vpop.permute.xlu0 %4026  ;;  %3901 = vrot.lane.b32.xlu1 %v17340_v54, %s13306_s2 }
 0x3b5   :  { %v4427_v18 = vsel %vm4425_vm5, %v4369_v59, %v4027_v30 }
 0x3b6   :  { %3895 = vrot.lane.b32.xlu0 %v17332_v45, %s13306_s2  ;;  %v17644_v37 = vpop.permute.xlu1 %3861 }
 0x3b8   :  { %v4025_v41 = vpop.permute.xlu0 %4024  ;;  %4234 = vrot.lane.b32.xlu1 %v17348_v50, %s13308_s29 }
 0x3b9   :  { %v4426_v49 = vsel %vm4425_vm5, %v4368_v33, %v4025_v41 }
 0x3ba   :  { %4236 = vrot.lane.b32.xlu0 %v17340_v54, %s13308_s29  ;;  %v17655_v1 = vpop.permute.xlu1 %3865  ;;  %v4484_v58 = vsel %vm4483_vm4, %v4426_v49, %v4197_v5 }
 0x3bb   :  { %12361 = vmatmul.mubr.msk.f32.vlgmr.msra.gmra.mxu1 %vm4556_vm6, %v4484_v58 }
 0x3bc   :  { %v3860_v57 = vpop.permute.xlu0 %3859  ;;  %4064 = vrot.lane.b32.xlu1 %v17348_v50, %s13309_s5  ;;  %12363 = vmatprep.mubr.msk.f32.mxu1 %vm13307_vm2, %v21755_v8 }
 0x3bd   :  { %v4374_v28 = vsel %vm4367_vm3, %v17164_v25, %v3860_v57  ;;  %v4375_v57 = vsel %vm4367_vm3, %v17191_v19, %v17644_v37 }
 0x3be   :  { %4066 = vrot.lane.b32.xlu0 %v17340_v54, %s13309_s5  ;;  %v4199_v33 = vpop.permute.xlu1 %4198 }
 0x3bf   :  { %v4485_v5 = vsel %vm4483_vm4, %v4427_v18, %v4199_v33 }
 0x3c0   :  { %v4201_v41 = vpop.permute.xlu0 %4200  ;;  %3905 = vrot.lane.b32.xlu1 %v17356_v34, %s13306_s2  ;;  %12364 = vmatmul.mubr.msk.f32.gmra.mxu1 %vm4556_vm6, %v4485_v5 }
 0x3c1   :  { %12366 = vmatprep.mubr.msk.f32.mxu1 %vm13307_vm2, %v21755_v8 }
 0x3c2   :  { %3899 = vrot.lane.b32.xlu0 %v17348_v50, %s13306_s2  ;;  %v4029_v62 = vpop.permute.xlu1 %4028 }
 0x3c3   :  { %v4428_v30 = vsel %vm4425_vm5, %v4370_v39, %v4029_v62 }
 0x3c4   :  { %v4031_v49 = vpop.permute.xlu0 %4030  ;;  %4238 = vrot.lane.b32.xlu1 %v17364_v15, %s13308_s29  ;;  %v4486_v58 = vsel %vm4483_vm4, %v4428_v30, %v4201_v41 }
 0x3c5   :  { %12367 = vmatmul.mubr.msk.f32.gmra.mxu1 %vm4556_vm6, %v4486_v58  ;;  %v4429_v18 = vsel %vm4425_vm5, %v4371_v26, %v4031_v49 }
 0x3c6   :  { %4240 = vrot.lane.b32.xlu0 %v17356_v34, %s13308_s29  ;;  %v17685_v59 = vpop.permute.xlu1 %3869  ;;  %12369 = vmatprep.mubr.msk.f32.mxu1 %vm13307_vm2, %v21755_v8 }
 0x3c8   :  { %v3864_v6 = vpop.permute.xlu0 %3863  ;;  %4068 = vrot.lane.b32.xlu1 %v17364_v15, %s13309_s5 }
 0x3c9   :  { %v4376_v19 = vsel %vm4367_vm3, %v17180_v11, %v3864_v6  ;;  %v4377_v6 = vsel %vm4367_vm3, %v17204_v40, %v17655_v1 }
 0x3ca   :  { %4070 = vrot.lane.b32.xlu0 %v17356_v34, %s13309_s5  ;;  %v4203_v33 = vpop.permute.xlu1 %4202 }
 0x3cb   :  { %v4487_v5 = vsel %vm4483_vm4, %v4429_v18, %v4203_v33 }
 0x3cc   :  { %v4205_v41 = vpop.permute.xlu0 %4204  ;;  %3909 = vrot.lane.b32.xlu1 %v17372_v4, %s13306_s2  ;;  %12370 = vmatmul.mubr.msk.f32.gmra.mxu1 %vm4556_vm6, %v4487_v5 }
 0x3cd   :  { %12372 = vmatprep.mubr.msk.f32.mxu1 %vm13307_vm2, %v21755_v8 }
 0x3ce   :  { %3903 = vrot.lane.b32.xlu0 %v17364_v15, %s13306_s2  ;;  %v4033_v38 = vpop.permute.xlu1 %4032 }
 0x3cf   :  { %v4430_v39 = vsel %vm4425_vm5, %v4372_v31, %v4033_v38 }
 0x3d0   :  { %v4035_v62 = vpop.permute.xlu0 %4034  ;;  %4242 = vrot.lane.b32.xlu1 %v17380_v9, %s13308_s29  ;;  %v4488_v30 = vsel %vm4483_vm4, %v4430_v39, %v4205_v41 }
 0x3d1   :  { %12373 = vmatmul.mubr.msk.f32.gmra.mxu1 %vm4556_vm6, %v4488_v30  ;;  %v4431_v58 = vsel %vm4425_vm5, %v4373_v47, %v4035_v62 }
 0x3d2   :  { %4244 = vrot.lane.b32.xlu0 %v17372_v4, %s13308_s29  ;;  %v17713_v49 = vpop.permute.xlu1 %3873  ;;  %12375 = vmatprep.mubr.msk.f32.mxu1 %vm13307_vm2, %v21755_v8 }
 0x3d4   :  { %v3868_v29 = vpop.permute.xlu0 %3867  ;;  %4072 = vrot.lane.b32.xlu1 %v17380_v9, %s13309_s5 }
 0x3d5   :  { %v4378_v40 = vsel %vm4367_vm3, %v17196_v55, %v3868_v29  ;;  %v4379_v29 = vsel %vm4367_vm3, %v17220_v0, %v17685_v59 }
 0x3d6   :  { %4074 = vrot.lane.b32.xlu0 %v17372_v4, %s13309_s5  ;;  %v4207_v26 = vpop.permute.xlu1 %4206 }
 0x3d7   :  { %v4489_v18 = vsel %vm4483_vm4, %v4431_v58, %v4207_v26 }
 0x3d8   :  { %v4209_v33 = vpop.permute.xlu0 %4208  ;;  %3913 = vrot.lane.b32.xlu1 %v17388_v20, %s13306_s2  ;;  %12376 = vmatmul.mubr.msk.f32.gmra.mxu1 %vm4556_vm6, %v4489_v18 }
 0x3d9   :  { %12378 = vmatprep.mubr.msk.f32.mxu1 %vm13307_vm2, %v21755_v8 }
 0x3da   :  { %3907 = vrot.lane.b32.xlu0 %v17380_v9, %s13306_s2  ;;  %v4037_v61 = vpop.permute.xlu1 %4036 }
 0x3db   :  { %v4432_v5 = vsel %vm4425_vm5, %v4374_v28, %v4037_v61 }
 0x3dc   :  { %v4039_v41 = vpop.permute.xlu0 %4038  ;;  %4246 = vrot.lane.b32.xlu1 %v17396_v32, %s13308_s29  ;;  %v4490_v31 = vsel %vm4483_vm4, %v4432_v5, %v4209_v33 }
 0x3dd   :  { %12379 = vmatmul.mubr.msk.f32.gmra.mxu1 %vm4556_vm6, %v4490_v31  ;;  %v4433_v39 = vsel %vm4425_vm5, %v4375_v57, %v4039_v41 }
 0x3de   :  { %4248 = vrot.lane.b32.xlu0 %v17388_v20, %s13308_s29  ;;  %v17742_v38 = vpop.permute.xlu1 %3877  ;;  %12381 = vmatprep.mubr.msk.f32.mxu1 %vm13307_vm2, %v21755_v8 }
 0x3e0   :  { %v3872_v25 = vpop.permute.xlu0 %3871  ;;  %4076 = vrot.lane.b32.xlu1 %v17396_v32, %s13309_s5 }
 0x3e1   :  { %v4380_v0 = vsel %vm4367_vm3, %v17212_v60, %v3872_v25  ;;  %v4381_v25 = vsel %vm4367_vm3, %v17236_v42, %v17713_v49 }
 0x3e2   :  { %4078 = vrot.lane.b32.xlu0 %v17388_v20, %s13309_s5  ;;  %v4211_v62 = vpop.permute.xlu1 %4210 }
 0x3e3   :  { %v4491_v30 = vsel %vm4483_vm4, %v4433_v39, %v4211_v62 }
 0x3e4   :  { %v4213_v47 = vpop.permute.xlu0 %4212  ;;  %3917 = vrot.lane.b32.xlu1 %v17404_v52, %s13306_s2  ;;  %12382 = vmatmul.mubr.msk.f32.gmra.mxu1 %vm4556_vm6, %v4491_v30 }
 0x3e5   :  { %12384 = vmatprep.mubr.msk.f32.mxu1 %vm13307_vm2, %v21755_v8 }
 0x3e6   :  { %3911 = vrot.lane.b32.xlu0 %v17396_v32, %s13306_s2  ;;  %v4041_v37 = vpop.permute.xlu1 %4040 }
 0x3e7   :  { %v4434_v58 = vsel %vm4425_vm5, %v4376_v19, %v4041_v37 }
 0x3e8   :  { %v4043_v26 = vpop.permute.xlu0 %4042  ;;  %4250 = vrot.lane.b32.xlu1 %v17412_v21, %s13308_s29  ;;  %v4492_v18 = vsel %vm4483_vm4, %v4434_v58, %v4213_v47 }
 0x3e9   :  { %12385 = vmatmul.mubr.msk.f32.gmra.mxu1 %vm4556_vm6, %v4492_v18  ;;  %v4435_v28 = vsel %vm4425_vm5, %v4377_v6, %v4043_v26 }
 0x3ea   :  { %4252 = vrot.lane.b32.xlu0 %v17404_v52, %s13308_s29  ;;  %v17771_v33 = vpop.permute.xlu1 %3881  ;;  %12387 = vmatprep.mubr.msk.f32.mxu1 %vm13307_vm2, %v21755_v8 }
 0x3ec   :  { %v3876_v11 = vpop.permute.xlu0 %3875  ;;  %4080 = vrot.lane.b32.xlu1 %v17412_v21, %s13309_s5 }
 0x3ed   :  { %v4382_v42 = vsel %vm4367_vm3, %v17228_v51, %v3876_v11 }
 0x3ee   :  { %4082 = vrot.lane.b32.xlu0 %v17404_v52, %s13309_s5  ;;  %v4215_v61 = vpop.permute.xlu1 %4214 }
 0x3ef   :  { %v4493_v5 = vsel %vm4483_vm4, %v4435_v28, %v4215_v61 }
 0x3f0   :  { %v4217_v41 = vpop.permute.xlu0 %4216  ;;  %3921 = vrot.lane.b32.xlu1 %v17420_v43, %s13306_s2  ;;  %12388 = vmatmul.mubr.msk.f32.gmra.mxu1 %vm4556_vm6, %v4493_v5 }
 0x3f1   :  { %12390 = vmatprep.mubr.msk.f32.mxu1 %vm13307_vm2, %v21755_v8 }
 0x3f2   :  { %3915 = vrot.lane.b32.xlu0 %v17412_v21, %s13306_s2  ;;  %v4045_v1 = vpop.permute.xlu1 %4044 }
 0x3f3   :  { %v4436_v31 = vsel %vm4425_vm5, %v4378_v40, %v4045_v1  ;;  %v5795_v40 = vld [vmem:[%s21756_s25 + $0x78] sm:$0xff] }
 0x3f4   :  { %v4047_v57 = vpop.permute.xlu0 %4046  ;;  %4254 = vrot.lane.b32.xlu1 %v17428_v23, %s13308_s29  ;;  %v4494_v39 = vsel %vm4483_vm4, %v4436_v31, %v4217_v41  ;;  %12532 = vmatpush3.msra.mxu1 %v5795_v40 }
 0x3f5   :  { %12391 = vmatmul.mubr.msk.f32.gmra.mxu1 %vm4556_vm6, %v4494_v39  ;;  %v4437_v30 = vsel %vm4425_vm5, %v4379_v29, %v4047_v57  ;;  %12533 = vmatprep.subr.mxu1 %v21755_v8  ;;  %v4383_v39 = vsel %vm4367_vm3, %v17252_v2, %v17742_v38 }
 0x3f6   :  { %4256 = vrot.lane.b32.xlu0 %v17420_v43, %s13308_s29  ;;  %v17800_v62 = vpop.permute.xlu1 %3885  ;;  %12393 = vmatprep.mubr.msk.f32.mxu1 %vm13307_vm2, %v21755_v8 }
 0x3f8   :  { %v3880_v55 = vpop.permute.xlu0 %3879  ;;  %4084 = vrot.lane.b32.xlu1 %v17428_v23, %s13309_s5 }
 0x3f9   :  { %v4384_v2 = vsel %vm4367_vm3, %v17244_v53, %v3880_v55 }
 0x3fa   :  { %4086 = vrot.lane.b32.xlu0 %v17420_v43, %s13309_s5  ;;  %v4219_v47 = vpop.permute.xlu1 %4218 }
 0x3fb   :  { %v4495_v19 = vsel %vm4483_vm4, %v4437_v30, %v4219_v47 }
 0x3fc   :  { %v4221_v37 = vpop.permute.xlu0 %4220  ;;  %3925 = vrot.lane.b32.xlu1 %v17436_v10, %s13306_s2  ;;  %12394 = vmatmul.mubr.msk.f32.gmra.mxu1 %vm4556_vm6, %v4495_v19 }
 0x3fd   :  { %12396 = vmatprep.mubr.msk.f32.mxu1 %vm13307_vm2, %v21755_v8 }
 0x3fe   :  { %3919 = vrot.lane.b32.xlu0 %v17428_v23, %s13306_s2  ;;  %v4049_v59 = vpop.permute.xlu1 %4048 }
 0x3ff   :  { %v4438_v58 = vsel %vm4425_vm5, %v4380_v0, %v4049_v59 }
 0x400   :  { %v4051_v26 = vpop.permute.xlu0 %4050  ;;  %4258 = vrot.lane.b32.xlu1 %v17444_v27, %s13308_s29  ;;  %v4496_v18 = vsel %vm4483_vm4, %v4438_v58, %v4221_v37  ;;  %v5794_v37 = vld [vmem:[%s21756_s25 + $0x70] sm:$0xff]  ;;  %v21757_v58 = vld [vmem:[#allocation454_spill] sm:$0xff] }
 0x401   :  { %12397 = vmatmul.mubr.msk.f32.gmra.mxu1 %vm4556_vm6, %v4496_v18  ;;  %v4439_v28 = vsel %vm4425_vm5, %v4381_v25, %v4051_v26  ;;  %v21758_v18 = vld [vmem:[#allocation424_spill] sm:$0xff] }
 0x402   :  { %4260 = vrot.lane.b32.xlu0 %v17436_v10, %s13308_s29  ;;  %v17829_v6 = vpop.permute.xlu1 %3889  ;;  %12399 = vmatprep.mubr.msk.f32.mxu1 %vm13307_vm2, %v21755_v8  ;;  %v4385_v25 = vsel %vm4367_vm3, %v21758_v18, %v17771_v33  ;;  %v21763_v18 = vld [vmem:[#allocation426_spill] sm:$0xff] }
 0x403   :  { %12534 = vmatpush3.msra.mxu1 %v5794_v37 }
 0x404   :  { %v3884_v60 = vpop.permute.xlu0 %3883  ;;  %4088 = vrot.lane.b32.xlu1 %v17444_v27, %s13309_s5  ;;  %12535 = vmatprep.subr.mxu1 %v21755_v8 }
 0x406   :  { %4090 = vrot.lane.b32.xlu0 %v17436_v10, %s13309_s5  ;;  %v4223_v61 = vpop.permute.xlu1 %4222 }
 0x407   :  { %v4497_v5 = vsel %vm4483_vm4, %v4439_v28, %v4223_v61 }
 0x408   :  { %v4225_v41 = vpop.permute.xlu0 %4224  ;;  %3929 = vrot.lane.b32.xlu1 %v17457_v56, %s13306_s2  ;;  %12400 = vmatmul.mubr.msk.f32.gmra.mxu1 %vm4556_vm6, %v4497_v5 }
 0x409   :  { %12402 = vmatprep.mubr.msk.f32.mxu1 %vm13307_vm2, %v21755_v8 }
 0x40a   :  { %3923 = vrot.lane.b32.xlu0 %v17444_v27, %s13306_s2  ;;  %v4053_v49 = vpop.permute.xlu1 %4052 }
 0x40b   :  { %v4440_v1 = vsel %vm4425_vm5, %v4382_v42, %v4053_v49  ;;  %v21759_v42 = vld [vmem:[#allocation425_spill] sm:$0xff]  ;;  %v21760_v49 = vld [vmem:[#allocation423_spill] sm:$0xff] }
 0x40c   :  { %v4055_v31 = vpop.permute.xlu0 %4054  ;;  %4262 = vrot.lane.b32.xlu1 %v17465_v35, %s13308_s29  ;;  %v4498_v57 = vsel %vm4483_vm4, %v4440_v1, %v4225_v41  ;;  %v4386_v33 = vsel %vm4367_vm3, %v21760_v49, %v3884_v60 }
 0x40d   :  { %12403 = vmatmul.mubr.msk.f32.gmra.mxu1 %vm4556_vm6, %v4498_v57  ;;  %v4441_v29 = vsel %vm4425_vm5, %v4383_v39, %v4055_v31  ;;  %v5793_v31 = vld [vmem:[%s21756_s25 + $0x68] sm:$0xff] }
 0x40e   :  { %4264 = vrot.lane.b32.xlu0 %v17457_v56, %s13308_s29  ;;  %v17862_v51 = vpop.permute.xlu1 %3893  ;;  %12405 = vmatprep.mubr.msk.f32.mxu1 %vm13307_vm2, %v21755_v8  ;;  %v21761_v39 = vld [vmem:[#allocation452_spill] sm:$0xff] }
 0x40f   :  { %12536 = vmatpush3.msra.mxu1 %v5793_v31  ;;  %v21765_v31 = vld [vmem:[#allocation492_spill] sm:$0xff] }
 0x410   :  { %v3888_v11 = vpop.permute.xlu0 %3887  ;;  %4092 = vrot.lane.b32.xlu1 %v17465_v35, %s13309_s5  ;;  %12537 = vmatprep.subr.mxu1 %v21755_v8 }
 0x412   :  { %4094 = vrot.lane.b32.xlu0 %v17457_v56, %s13309_s5  ;;  %v4227_v30 = vpop.permute.xlu1 %4226 }
 0x413   :  { %v4499_v47 = vsel %vm4483_vm4, %v4441_v29, %v4227_v30 }
 0x414   :  { %v4229_v19 = vpop.permute.xlu0 %4228  ;;  %3933 = vrot.lane.b32.xlu1 %v17473_v12, %s13306_s2  ;;  %12406 = vmatmul.mubr.msk.f32.gmra.mxu1 %vm4556_vm6, %v4499_v47  ;;  %v4387_v47 = vsel %vm4367_vm3, %v17284_v24, %v17800_v62 }
 0x415   :  { %12408 = vmatprep.mubr.msk.f32.mxu1 %vm13307_vm2, %v21755_v8 }
 0x416   :  { %3927 = vrot.lane.b32.xlu0 %v17465_v35, %s13306_s2  ;;  %v4057_v38 = vpop.permute.xlu1 %4056 }
 0x417   :  { %v4442_v0 = vsel %vm4425_vm5, %v4384_v2, %v4057_v38 }
 0x418   :  { %v4059_v59 = vpop.permute.xlu0 %4058  ;;  %4266 = vrot.lane.b32.xlu1 %v21757_v58, %s13308_s29  ;;  %v4500_v26 = vsel %vm4483_vm4, %v4442_v0, %v4229_v19  ;;  %v21762_v0 = vld [vmem:[#allocation491_spill] sm:$0xff] }
 0x419   :  { %12409 = vmatmul.mubr.msk.f32.gmra.mxu1 %vm4556_vm6, %v4500_v26  ;;  %v4443_v28 = vsel %vm4425_vm5, %v4385_v25, %v4059_v59  ;;  %v4388_v24 = vsel %vm4367_vm3, %v21762_v0, %v3888_v11 }
 0x41a   :  { %4268 = vrot.lane.b32.xlu0 %v17473_v12, %s13308_s29  ;;  %v17895_v53 = vpop.permute.xlu1 %3897  ;;  %12411 = vmatprep.mubr.msk.f32.mxu1 %vm13307_vm2, %v21755_v8 }
 0x41c   :  { %v3892_v55 = vpop.permute.xlu0 %3891  ;;  %4096 = vrot.lane.b32.xlu1 %v21757_v58, %s13309_s5 }
 0x41e   :  { %4098 = vrot.lane.b32.xlu0 %v17473_v12, %s13309_s5  ;;  %v4231_v61 = vpop.permute.xlu1 %4230 }
 0x41f   :  { %v4501_v5 = vsel %vm4483_vm4, %v4443_v28, %v4231_v61  ;;  %v5792_v28 = vld [vmem:[%s21756_s25 + $0x60] sm:$0xff] }
 0x420   :  { %v4233_v41 = vpop.permute.xlu0 %4232  ;;  %3937 = vrot.lane.b32.xlu1 %v21759_v42, %s13306_s2  ;;  %12412 = vmatmul.mubr.msk.f32.gmra.mxu1 %vm4556_vm6, %v4501_v5  ;;  %v4389_v5 = vsel %vm4367_vm3, %v17300_v16, %v17829_v6  ;;  %v4390_v16 = vsel %vm4367_vm3, %v21765_v31, %v3892_v55  ;;  %v5791_v55 = vld [vmem:[%s21756_s25 + $0x58] sm:$0xff] }
 0x421   :  { %12414 = vmatprep.mubr.msk.f32.mxu1 %vm13307_vm2, %v21755_v8  ;;  %12538 = vmatpush3.msra.mxu1 %v5792_v28 }
 0x422   :  { %3931 = vrot.lane.b32.xlu0 %v21757_v58, %s13306_s2  ;;  %v4061_v40 = vpop.permute.xlu1 %4060  ;;  %12539 = vmatprep.subr.mxu1 %v21755_v8 }
 0x423   :  { %v4444_v1 = vsel %vm4425_vm5, %v4386_v33, %v4061_v40  ;;  %12540 = vmatpush3.msra.mxu1 %v5791_v55  ;;  %v21770_v55 = vld [vmem:[#allocation429_spill] sm:$0xff] }
 0x424   :  { %v4063_v57 = vpop.permute.xlu0 %4062  ;;  %4270 = vrot.lane.b32.xlu1 %v21761_v39, %s13308_s29  ;;  %v4502_v29 = vsel %vm4483_vm4, %v4444_v1, %v4233_v41  ;;  %v21764_v1 = vld [vmem:[#allocation456_spill] sm:$0xff]  ;;  %12541 = vmatprep.subr.mxu1 %v21755_v8 }
 0x425   :  { %12415 = vmatmul.mubr.msk.f32.gmra.mxu1 %vm4556_vm6, %v4502_v29  ;;  %v4445_v19 = vsel %vm4425_vm5, %v4387_v47, %v4063_v57  ;;  %v21766_v47 = vld [vmem:[#allocation427_spill] sm:$0xff] }
 0x426   :  { %4272 = vrot.lane.b32.xlu0 %v21759_v42, %s13308_s29  ;;  %v17928_v60 = vpop.permute.xlu1 %3901  ;;  %12417 = vmatprep.mubr.msk.f32.mxu1 %vm13307_vm2, %v21755_v8 }
 0x428   :  { %v3896_v30 = vpop.permute.xlu0 %3895  ;;  %4100 = vrot.lane.b32.xlu1 %v21761_v39, %s13309_s5 }
 0x42a   :  { %4102 = vrot.lane.b32.xlu0 %v21759_v42, %s13309_s5  ;;  %v4235_v2 = vpop.permute.xlu1 %4234 }
 0x42b   :  { %v4503_v38 = vsel %vm4483_vm4, %v4445_v19, %v4235_v2 }
 0x42c   :  { %v4237_v37 = vpop.permute.xlu0 %4236  ;;  %3941 = vrot.lane.b32.xlu1 %v17505_v46, %s13306_s2  ;;  %12418 = vmatmul.mubr.msk.f32.gmra.mxu1 %vm4556_vm6, %v4503_v38 }
 0x42d   :  { %12420 = vmatprep.mubr.msk.f32.mxu1 %vm13307_vm2, %v21755_v8 }
 0x42e   :  { %3935 = vrot.lane.b32.xlu0 %v21761_v39, %s13306_s2  ;;  %v4065_v62 = vpop.permute.xlu1 %4064 }
 0x42f   :  { %v4446_v59 = vsel %vm4425_vm5, %v4388_v24, %v4065_v62 }
 0x430   :  { %v4067_v26 = vpop.permute.xlu0 %4066  ;;  %4274 = vrot.lane.b32.xlu1 %v21763_v18, %s13308_s29  ;;  %v4504_v25 = vsel %vm4483_vm4, %v4446_v59, %v4237_v37  ;;  %v4391_v37 = vsel %vm4367_vm3, %v17316_v36, %v17862_v51  ;;  %v4392_v36 = vsel %vm4367_vm3, %v17308_v3, %v3896_v30  ;;  %v4393_v30 = vsel %vm4367_vm3, %v17332_v45, %v17895_v53 }
 0x431   :  { %12421 = vmatmul.mubr.msk.f32.gmra.mxu1 %vm4556_vm6, %v4504_v25  ;;  %v4447_v41 = vsel %vm4425_vm5, %v4389_v5, %v4067_v26  ;;  %v21767_v26 = vld [vmem:[#allocation453_spill] sm:$0xff]  ;;  %v21768_v5 = vld [vmem:[#allocation428_spill] sm:$0xff] }
 0x432   :  { %4276 = vrot.lane.b32.xlu0 %v17505_v46, %s13308_s29  ;;  %v17960_v11 = vpop.permute.xlu1 %3905  ;;  %12423 = vmatprep.mubr.msk.f32.mxu1 %vm13307_vm2, %v21755_v8 }
 0x434   :  { %v3900_v61 = vpop.permute.xlu0 %3899  ;;  %4104 = vrot.lane.b32.xlu1 %v21763_v18, %s13309_s5 }
 0x435   :  { %v4394_v45 = vsel %vm4367_vm3, %v17324_v7, %v3900_v61 }
 0x436   :  { %4106 = vrot.lane.b32.xlu0 %v17505_v46, %s13309_s5  ;;  %v4239_v49 = vpop.permute.xlu1 %4238 }
 0x437   :  { %v4505_v33 = vsel %vm4483_vm4, %v4447_v41, %v4239_v49 }
 0x438   :  { %v4241_v40 = vpop.permute.xlu0 %4240  ;;  %3945 = vrot.lane.b32.xlu1 %v21764_v1, %s13306_s2  ;;  %12424 = vmatmul.mubr.msk.f32.gmra.mxu1 %vm4556_vm6, %v4505_v33 }
 0x439   :  { %12426 = vmatprep.mubr.msk.f32.mxu1 %vm13307_vm2, %v21755_v8 }
 0x43a   :  { %3939 = vrot.lane.b32.xlu0 %v21763_v18, %s13306_s2  ;;  %v4069_v6 = vpop.permute.xlu1 %4068 }
 0x43b   :  { %v4448_v57 = vsel %vm4425_vm5, %v4390_v16, %v4069_v6  ;;  %v21769_v6 = vld [vmem:[#allocation458_spill] sm:$0xff] }
 0x43c   :  { %v4071_v29 = vpop.permute.xlu0 %4070  ;;  %4278 = vrot.lane.b32.xlu1 %v21766_v47, %s13308_s29  ;;  %v4506_v19 = vsel %vm4483_vm4, %v4448_v57, %v4241_v40  ;;  %v5790_v57 = vld [vmem:[%s21756_s25 + $0x50] sm:$0xff] }
 0x43d   :  { %12427 = vmatmul.mubr.msk.f32.gmra.mxu1 %vm4556_vm6, %v4506_v19  ;;  %v4449_v0 = vsel %vm4425_vm5, %v4391_v37, %v4071_v29 }
 0x43e   :  { %4280 = vrot.lane.b32.xlu0 %v21764_v1, %s13308_s29  ;;  %v17990_v2 = vpop.permute.xlu1 %3909  ;;  %12429 = vmatprep.mubr.msk.f32.mxu1 %vm13307_vm2, %v21755_v8 }
 0x43f   :  { %12542 = vmatpush3.msra.mxu1 %v5790_v57 }
 0x440   :  { %v17997_v38 = vpop.permute.xlu0 %3903  ;;  %4108 = vrot.lane.b32.xlu1 %v21766_v47, %s13309_s5  ;;  %12543 = vmatprep.subr.mxu1 %v21755_v8 }
 0x442   :  { %4110 = vrot.lane.b32.xlu0 %v21764_v1, %s13309_s5  ;;  %v4243_v24 = vpop.permute.xlu1 %4242 }
 0x443   :  { %v4507_v62 = vsel %vm4483_vm4, %v4449_v0, %v4243_v24  ;;  %v4395_v0 = vsel %vm4367_vm3, %v17348_v50, %v17928_v60  ;;  %v4396_v50 = vsel %vm4367_vm3, %v17340_v54, %v17997_v38 }
 0x444   :  { %v4245_v59 = vpop.permute.xlu0 %4244  ;;  %3949 = vrot.lane.b32.xlu1 %v21767_v26, %s13306_s2  ;;  %12430 = vmatmul.mubr.msk.f32.gmra.mxu1 %vm4556_vm6, %v4507_v62 }
 0x445   :  { %12432 = vmatprep.mubr.msk.f32.mxu1 %vm13307_vm2, %v21755_v8 }
 0x446   :  { %3943 = vrot.lane.b32.xlu0 %v21766_v47, %s13306_s2  ;;  %v4073_v51 = vpop.permute.xlu1 %4072 }
 0x447   :  { %v4450_v25 = vsel %vm4425_vm5, %v4392_v36, %v4073_v51  ;;  %v21771_v51 = vld [vmem:[#allocation455_spill] sm:$0xff] }
 0x448   :  { %v4075_v28 = vpop.permute.xlu0 %4074  ;;  %4282 = vrot.lane.b32.xlu1 %v21768_v5, %s13308_s29  ;;  %v4508_v41 = vsel %vm4483_vm4, %v4450_v25, %v4245_v59  ;;  %v5789_v25 = vld [vmem:[%s21756_s25 + $0x48] sm:$0xff] }
 0x449   :  { %12433 = vmatmul.mubr.msk.f32.gmra.mxu1 %vm4556_vm6, %v4508_v41  ;;  %v4451_v33 = vsel %vm4425_vm5, %v4393_v30, %v4075_v28  ;;  %v21772_v30 = vld [vmem:[#allocation430_spill] sm:$0xff] }
 0x44a   :  { %4284 = vrot.lane.b32.xlu0 %v21767_v26, %s13308_s29  ;;  %v18025_v49 = vpop.permute.xlu1 %3913  ;;  %12435 = vmatprep.mubr.msk.f32.mxu1 %vm13307_vm2, %v21755_v8 }
 0x44b   :  { %12544 = vmatpush3.msra.mxu1 %v5789_v25 }
 0x44c   :  { %v18029_v3 = vpop.permute.xlu0 %3907  ;;  %4112 = vrot.lane.b32.xlu1 %v21768_v5, %s13309_s5  ;;  %12545 = vmatprep.subr.mxu1 %v21755_v8 }
 0x44e   :  { %4114 = vrot.lane.b32.xlu0 %v21767_v26, %s13309_s5  ;;  %v4247_v40 = vpop.permute.xlu1 %4246 }
 0x44f   :  { %v4509_v31 = vsel %vm4483_vm4, %v4451_v33, %v4247_v40  ;;  %v4397_v40 = vsel %vm4367_vm3, %v17364_v15, %v17960_v11  ;;  %v5788_v15 = vld [vmem:[%s21756_s25 + $0x40] sm:$0xff]  ;;  %v4398_v11 = vsel %vm4367_vm3, %v17356_v34, %v18029_v3 }
 0x450   :  { %v4249_v16 = vpop.permute.xlu0 %4248  ;;  %3953 = vrot.lane.b32.xlu1 %v21769_v6, %s13306_s2  ;;  %12436 = vmatmul.mubr.msk.f32.gmra.mxu1 %vm4556_vm6, %v4509_v31 }
 0x451   :  { %12438 = vmatprep.mubr.msk.f32.mxu1 %vm13307_vm2, %v21755_v8  ;;  %12546 = vmatpush3.msra.mxu1 %v5788_v15 }
 0x452   :  { %3947 = vrot.lane.b32.xlu0 %v21768_v5, %s13306_s2  ;;  %v4077_v53 = vpop.permute.xlu1 %4076  ;;  %12547 = vmatprep.subr.mxu1 %v21755_v8 }
 0x453   :  { %v4452_v29 = vsel %vm4425_vm5, %v4394_v45, %v4077_v53  ;;  %v21773_v53 = vld [vmem:[#allocation431_spill] sm:$0xff] }
 0x454   :  { %v4079_v19 = vpop.permute.xlu0 %4078  ;;  %4286 = vrot.lane.b32.xlu1 %v21770_v55, %s13308_s29  ;;  %v4510_v37 = vsel %vm4483_vm4, %v4452_v29, %v4249_v16 }
 0x455   :  { %12439 = vmatmul.mubr.msk.f32.gmra.mxu1 %vm4556_vm6, %v4510_v37  ;;  %v4453_v24 = vsel %vm4425_vm5, %v4395_v0, %v4079_v19 }
 0x456   :  { %4288 = vrot.lane.b32.xlu0 %v21769_v6, %s13308_s29  ;;  %v18060_v7 = vpop.permute.xlu1 %3917  ;;  %12441 = vmatprep.mubr.msk.f32.mxu1 %vm13307_vm2, %v21755_v8 }
 0x458   :  { %v3912_v61 = vpop.permute.xlu0 %3911  ;;  %4116 = vrot.lane.b32.xlu1 %v21770_v55, %s13309_s5 }
 0x45a   :  { %4118 = vrot.lane.b32.xlu0 %v21769_v6, %s13309_s5  ;;  %v4251_v62 = vpop.permute.xlu1 %4250 }
 0x45b   :  { %v4511_v59 = vsel %vm4483_vm4, %v4453_v24, %v4251_v62  ;;  %v21774_v24 = vld [vmem:[#allocation460_spill] sm:$0xff]  ;;  %v4399_v62 = vsel %vm4367_vm3, %v17380_v9, %v17990_v2  ;;  %v4400_v9 = vsel %vm4367_vm3, %v17372_v4, %v3912_v61  ;;  %v21775_v2 = vld [vmem:[#allocation457_spill] sm:$0xff] }
 0x45c   :  { %v4253_v36 = vpop.permute.xlu0 %4252  ;;  %3957 = vrot.lane.b32.xlu1 %v21771_v51, %s13306_s2  ;;  %12442 = vmatmul.mubr.msk.f32.gmra.mxu1 %vm4556_vm6, %v4511_v59 }
 0x45d   :  { %12444 = vmatprep.mubr.msk.f32.mxu1 %vm13307_vm2, %v21755_v8 }
 0x45e   :  { %3951 = vrot.lane.b32.xlu0 %v21770_v55, %s13306_s2  ;;  %v4081_v60 = vpop.permute.xlu1 %4080 }
 0x45f   :  { %v4454_v28 = vsel %vm4425_vm5, %v4396_v50, %v4081_v60 }
 0x460   :  { %v4083_v41 = vpop.permute.xlu0 %4082  ;;  %4290 = vrot.lane.b32.xlu1 %v21772_v30, %s13308_s29  ;;  %v4512_v33 = vsel %vm4483_vm4, %v4454_v28, %v4253_v36 }
 0x461   :  { %12445 = vmatmul.mubr.msk.f32.gmra.mxu1 %vm4556_vm6, %v4512_v33  ;;  %v4455_v31 = vsel %vm4425_vm5, %v4397_v40, %v4083_v41  ;;  %v5787_v41 = vld [vmem:[%s21756_s25 + $0x38] sm:$0xff] }
 0x462   :  { %4292 = vrot.lane.b32.xlu0 %v21771_v51, %s13308_s29  ;;  %v18094_v54 = vpop.permute.xlu1 %3921  ;;  %12447 = vmatprep.mubr.msk.f32.mxu1 %vm13307_vm2, %v21755_v8 }
 0x463   :  { %12548 = vmatpush3.msra.mxu1 %v5787_v41 }
 0x464   :  { %v18098_v38 = vpop.permute.xlu0 %3915  ;;  %4120 = vrot.lane.b32.xlu1 %v21772_v30, %s13309_s5  ;;  %12549 = vmatprep.subr.mxu1 %v21755_v8 }
 0x466   :  { %4122 = vrot.lane.b32.xlu0 %v21771_v51, %s13309_s5  ;;  %v4255_v16 = vpop.permute.xlu1 %4254 }
 0x467   :  { %v4513_v57 = vsel %vm4483_vm4, %v4455_v31, %v4255_v16  ;;  %v4401_v31 = vsel %vm4367_vm3, %v17396_v32, %v18025_v49  ;;  %v4402_v32 = vsel %vm4367_vm3, %v17388_v20, %v18098_v38 }
 0x468   :  { %v4257_v45 = vpop.permute.xlu0 %4256  ;;  %4294 = vrot.lane.b32.xlu1 %v21773_v53, %s13308_s29  ;;  %12448 = vmatmul.mubr.msk.f32.gmra.mxu1 %vm4556_vm6, %v4513_v57 }
 0x469   :  { %12450 = vmatprep.mubr.msk.f32.mxu1 %vm13307_vm2, %v21755_v8 }
 0x46a   :  { %3955 = vrot.lane.b32.xlu0 %v21772_v30, %s13306_s2  ;;  %v4085_v29 = vpop.permute.xlu1 %4084 }
 0x46b   :  { %v4456_v19 = vsel %vm4425_vm5, %v4398_v11, %v4085_v29 }
 0x46c   :  { %v4087_v37 = vpop.permute.xlu0 %4086  ;;  %4124 = vrot.lane.b32.xlu1 %v21773_v53, %s13309_s5  ;;  %v4514_v0 = vsel %vm4483_vm4, %v4456_v19, %v4257_v45  ;;  %v18195_v19 = vld [vmem:[%s21776_s28] ss:$0 sm:$0xff] }
 0x46d   :  { %12451 = vmatmul.mubr.msk.f32.gmra.mxu1 %vm4556_vm6, %v4514_v0  ;;  %v4457_v59 = vsel %vm4425_vm5, %v4399_v62, %v4087_v37 }
 0x46e   :  { %4296 = vrot.lane.b32.xlu0 %v21774_v24, %s13308_s29  ;;  %v18130_v34 = vpop.permute.xlu1 %3925  ;;  %12453 = vmatprep.mubr.msk.f32.mxu1 %vm13307_vm2, %v21755_v8 }
 0x470   :  { %v18134_v3 = vpop.permute.xlu0 %3919  ;;  %4298 = vrot.lane.b32.xlu1 %v17609_v63, %s13308_s29 }
 0x472   :  { %4126 = vrot.lane.b32.xlu0 %v21774_v24, %s13309_s5  ;;  %v4259_v36 = vpop.permute.xlu1 %4258 }
 0x473   :  { %v4515_v25 = vsel %vm4483_vm4, %v4457_v59, %v4259_v36 }
 0x474   :  { %v4261_v50 = vpop.permute.xlu0 %4260  ;;  %4128 = vrot.lane.b32.xlu1 %v17609_v63, %s13309_s5  ;;  %12454 = vmatmul.mubr.msk.f32.gmra.mxu1 %vm4556_vm6, %v4515_v25 }
 0x475   :  { %12456 = vmatprep.mubr.msk.f32.mxu1 %vm13307_vm2, %v21755_v8 }
 0x476   :  { %4300 = vrot.lane.b32.xlu0 %v21775_v2, %s13308_s29  ;;  %v4089_v60 = vpop.permute.xlu1 %4088 }
 0x477   :  { %v4458_v28 = vsel %vm4425_vm5, %v4400_v9, %v4089_v60 }
 0x478   :  { %v4091_v33 = vpop.permute.xlu0 %4090  ;;  %4302 = vrot.lane.b32.xlu1 %v17621_v48, %s13308_s29  ;;  %v4516_v63 = vsel %vm4483_vm4, %v4458_v28, %v4261_v50 }
 0x479   :  { %12457 = vmatmul.mubr.msk.f32.gmra.mxu1 %vm4556_vm6, %v4516_v63  ;;  %v4459_v57 = vsel %vm4425_vm5, %v4401_v31, %v4091_v33 }
 0x47a   :  { %4130 = vrot.lane.b32.xlu0 %v21775_v2, %s13309_s5  ;;  %v18165_v4 = vpop.permute.xlu1 %3929  ;;  %12459 = vmatprep.mubr.msk.f32.mxu1 %vm13307_vm2, %v21755_v8 }
 0x47b   :  { %v18169_v61 = vpop.f32.mrf.mxu1 }
 0x47c   :  { %v18171_v40 = vpop.permute.xlu0 %3923  ;;  %4132 = vrot.lane.b32.xlu1 %v17621_v48, %s13309_s5 }
 0x47d   :  { %v12362_v16 = vpop.f32.mrf.mxu1 }
 0x47e   :  { %4304 = vrot.lane.b32.xlu0 %v17615_v14, %s13308_s29  ;;  %v4263_v45 = vpop.permute.xlu1 %4262 }
 0x47f   :  { %v4517_v15 = vsel %vm4483_vm4, %v4459_v57, %v4263_v45  ;;  %v4405_v45 = vsel %vm4367_vm3, %v17428_v23, %v18094_v54 }
 0x480   :  { %v4265_v11 = vpop.permute.xlu0 %4264  ;;  %4306 = vrot.lane.b32.xlu1 %v17634_v44, %s13308_s29  ;;  %v4799_v29 = vpop.f32.mrf.mxu1  ;;  %12460 = vmatmul.mubr.msk.f32.gmra.mxu1 %vm4556_vm6, %v4517_v15 }
 0x481   :  { %12462 = vmatprep.mubr.msk.f32.mxu1 %vm13307_vm2, %v21755_v8  ;;  %v18199_v0 = vadd.f32 %v18195_v19, %v4799_v29 }
 0x482   :  { %4134 = vrot.lane.b32.xlu0 %v17615_v14, %s13309_s5  ;;  %v4093_v48 = vpop.permute.xlu1 %4092  ;;  %v12365_v49 = vpop.f32.mrf.mxu1 }
 0x483   :  { %v4460_v37 = vsel %vm4425_vm5, %v4402_v32, %v4093_v48  ;;  %v5079_v36 = vmax.f32 %v18199_v0, 0.0  ;;  %v4406_v49 = vsel %vm4367_vm3, %v17420_v43, %v18171_v40  ;;  %v4407_v43 = vsel %vm4367_vm3, %v17444_v27, %v18130_v34  ;;  %v5783_v27 = vld [vmem:[%s21756_s25 + $0x18] sm:$0xff] }
 0x484   :  { %v4095_v24 = vpop.permute.xlu0 %4094  ;;  %4136 = vrot.lane.b32.xlu1 %v17634_v44, %s13309_s5  ;;  %v4518_v20 = vsel %vm4483_vm4, %v4460_v37, %v4265_v11  ;;  %v5786_v44 = vld [vmem:[%s21756_s25 + $0x30] sm:$0xff] }
 0x485   :  { %v4804_v38 = vpop.f32.mrf.mxu1  ;;  %12463 = vmatmul.mubr.msk.f32.gmra.mxu1 %vm4556_vm6, %v4518_v20 }
 0x486   :  { %v18206_v14 = vadd.f32 %v18195_v19, %v4804_v38  ;;  %3959 = vrot.lane.b32.xlu0 %v21773_v53, %s13306_s2  ;;  %v18210_v62 = vpop.permute.xlu1 %3933  ;;  %12465 = vmatprep.mubr.msk.f32.mxu1 %vm13307_vm2, %v21755_v8  ;;  %v4403_v53 = vsel %vm4367_vm3, %v17412_v21, %v18060_v7  ;;  %v4404_v7 = vsel %vm4367_vm3, %v17404_v52, %v18134_v3  ;;  %v5785_v52 = vld [vmem:[%s21756_s25 + $0x28] sm:$0xff] }
 0x487   :  { %v12368_v59 = vpop.f32.mrf.mxu1  ;;  %12550 = vmatpush3.msra.mxu1 %v5786_v44  ;;  %v4461_v9 = vsel %vm4425_vm5, %v4403_v53, %v4095_v24 }
 0x488   :  { %v5080_v25 = vmax.f32 %v18206_v14, 0.0  ;;  %v3928_v50 = vpop.permute.xlu0 %3927  ;;  %12551 = vmatprep.subr.mxu1 %v21755_v8 }
 0x489   :  { %12552 = vmatpush3.msra.mxu1 %v5785_v52  ;;  %v4408_v34 = vsel %vm4367_vm3, %v17436_v10, %v3928_v50  ;;  %v5781_v50 = vld [vmem:[%s21756_s25 + $0x8] sm:$0xff] }
 0x48a   :  { %v12719_v2 = vpack.i.bf16 %v5080_v25, %v5079_v36  ;;  %4308 = vrot.lane.b32.xlu0 %v3789_v22, %s13308_s29  ;;  %v4267_v60 = vpop.permute.xlu1 %4266  ;;  %12553 = vmatprep.subr.mxu1 %v21755_v8 }
 0x48b   :  { %v4519_v28 = vsel %vm4483_vm4, %v4461_v9, %v4267_v60  ;;  %v5784_v60 = vld [vmem:[%s21756_s25 + $0x20] sm:$0xff] }
 0x48c   :  { %v4269_v41 = vpop.permute.xlu0 %4268  ;;  %12466 = vmatmul.mubr.msk.f32.gmra.mxu1 %vm4556_vm6, %v4519_v28  ;;  %12720 = vrot.lane.b32.xlu1 %v12719_v2, %s13309_s5  ;;  %v18235_v21 = vpop.f32.mrf.mxu1 }
 0x48d   :  { %12468 = vmatprep.mubr.msk.f32.mxu1 %vm13307_vm2, %v21755_v8  ;;  %12554 = vmatpush3.msra.mxu1 %v5784_v60 }
 0x48e   :  { %v4097_v33 = vpop.permute.xlu1 %4096  ;;  %v12371_v13 = vpop.f32.mrf.mxu1  ;;  %12555 = vmatprep.subr.mxu1 %v21755_v8 }
 0x48f   :  { %v4462_v17 = vsel %vm4425_vm5, %v4404_v7, %v4097_v33  ;;  %12556 = vmatpush3.msra.mxu1 %v5783_v27 }
 0x490   :  { %v4099_v22 = vpop.permute.xlu0 %4098  ;;  %v4520_v63 = vsel %vm4483_vm4, %v4462_v17, %v4269_v41  ;;  %v5782_v17 = vld [vmem:[%s21756_s25 + $0x10] sm:$0xff]  ;;  %12557 = vmatprep.subr.mxu1 %v21755_v8 }
 0x491   :  { %v4814_v31 = vpop.f32.mrf.mxu1  ;;  %12469 = vmatmul.mubr.msk.f32.gmra.mxu1 %vm4556_vm6, %v4520_v63  ;;  %v4463_v15 = vsel %vm4425_vm5, %v4405_v45, %v4099_v22 }
 0x492   :  { %v18245_v16 = vpop.permute.xlu1 %3937  ;;  %12471 = vmatprep.mubr.msk.f32.mxu1 %vm13307_vm2, %v21755_v8  ;;  %v18310_v52 = vadd.f32 %v18195_v19, %v4814_v31  ;;  %12558 = vmatpush3.msra.mxu1 %v5782_v17 }
 0x493   :  { %v12374_v57 = vpop.f32.mrf.mxu1  ;;  %12559 = vmatprep.subr.mxu1 %v21755_v8 }
 0x494   :  { %v18252_v3 = vpop.permute.xlu0 %3931  ;;  %12560 = vmatpush3.msra.mxu1 %v5781_v50 }
 0x495   :  { %12561 = vmatprep.subr.mxu1 %v21755_v8 }
 0x496   :  { %v4271_v11 = vpop.permute.xlu1 %4270 }
 0x497   :  { %v4521_v29 = vsel %vm4483_vm4, %v4463_v15, %v4271_v11 }
 0x498   :  { %v4273_v32 = vpop.permute.xlu0 %4272  ;;  %v18260_v48 = vpop.f32.mrf.mxu1  ;;  %12472 = vmatmul.mubr.msk.f32.gmra.mxu1 %vm4556_vm6, %v4521_v29  ;;  %v5780_v29 = vld [vmem:[%s21756_s25] sm:$0xff]  ;;  %s13310_s25 = smov 64  }
 0x499   :  { %12474 = vmatprep.mubr.msk.f32.mxu1 %vm13307_vm2, %v21755_v8  ;;  %12562 = vmatpush3.msra.mxu1 %v5780_v29 }
 0x49a   :  { %v4101_v23 = vpop.permute.xlu1 %4100  ;;  %v12377_v54 = vpop.f32.mrf.mxu1 }
 0x49b   :  { %v4464_v37 = vsel %vm4425_vm5, %v4406_v49, %v4101_v23  ;;  %v4409_v54 = vsel %vm4367_vm3, %v17465_v35, %v18165_v4 }
 0x49c   :  { %v4103_v24 = vpop.permute.xlu0 %4102  ;;  %v4522_v20 = vsel %vm4483_vm4, %v4464_v37, %v4273_v32  ;;  %v18323_v32 = vadd.f32 %v18195_v19, %v18235_v21  ;;  %v5082_v37 = vmax.f32 %v18310_v52, 0.0 }
 0x49d   :  { %v18270_v38 = vpop.f32.mrf.mxu1  ;;  %12475 = vmatmul.mubr.msk.f32.gmra.mxu1 %vm4556_vm6, %v4522_v20  ;;  %v4465_v40 = vsel %vm4425_vm5, %v4407_v43, %v4103_v24 }
 0x49e   :  { %v18273_v59 = vpop.permute.xlu1 %3941  ;;  %12477 = vmatprep.mubr.msk.f32.mxu1 %vm13307_vm2, %v21755_v8  ;;  %v5081_v43 = vmax.f32 %v18323_v32, 0.0 }
 0x49f   :  { %v12380_v44 = vpop.f32.mrf.mxu1 }
 0x4a0   :  { %v18277_v53 = vpop.permute.xlu0 %3935 }
 0x4a2   :  { %v4275_v9 = vpop.permute.xlu1 %4274 }
 0x4a3   :  { %v4523_v2 = vsel %vm4483_vm4, %v4465_v40, %v4275_v9  ;;  %v12734_v9 = vpack.i.bf16 %v5082_v37, %v5081_v43 }
 0x4a4   :  { %v4277_v28 = vpop.permute.xlu0 %4276  ;;  %v4829_v41 = vpop.f32.mrf.mxu1  ;;  %12478 = vmatmul.mubr.msk.f32.gmra.mxu1 %vm4556_vm6, %v4523_v2  ;;  %v4410_v2 = vsel %vm4367_vm3, %v17457_v56, %v18252_v3  ;;  %v18366_v56 = vadd.f32 %v18195_v19, %v18270_v38  ;;  %v4411_v38 = vsel %vm4367_vm3, %v21757_v58, %v18210_v62 }
 0x4a5   :  { %12480 = vmatprep.mubr.msk.f32.mxu1 %vm13307_vm2, %v21755_v8  ;;  %v18301_v22 = vadd.f32 %v18195_v19, %v4829_v41 }
 0x4a6   :  { %v4105_v7 = vpop.permute.xlu1 %4104  ;;  %v12383_v33 = vpop.f32.mrf.mxu1 }
 0x4a7   :  { %v4466_v13 = vsel %vm4425_vm5, %v4408_v34, %v4105_v7  ;;  %v5085_v31 = vmax.f32 %v18301_v22, 0.0 }
 0x4a8   :  { %v4107_v63 = vpop.permute.xlu0 %4106  ;;  %v4524_v57 = vsel %vm4483_vm4, %v4466_v13, %v4277_v28 }
 0x4a9   :  { %v4834_v10 = vpop.f32.mrf.mxu1  ;;  %12481 = vmatmul.mubr.msk.f32.gmra.mxu1 %vm4556_vm6, %v4524_v57  ;;  %v4467_v24 = vsel %vm4425_vm5, %v4409_v54, %v4107_v63  ;;  %v18376_v57 = vadd.f32 %v18195_v19, %v18260_v48 }
 0x4aa   :  { %v4835_v45 = vadd.f32 %v18195_v19, %v4834_v10  ;;  %v18313_v15 = vpop.permute.xlu1 %3945  ;;  %12483 = vmatprep.mubr.msk.f32.mxu1 %vm13307_vm2, %v21755_v8 }
 0x4ab   :  { %v12386_v11 = vpop.f32.mrf.mxu1 }
 0x4ac   :  { %v18326_v49 = vmax.f32 %v4835_v45, 0.0  ;;  %v18328_v23 = vpop.permute.xlu0 %3939  ;;  %v5084_v45 = vmax.f32 %v18366_v56, 0.0 }
 0x4ae   :  { %v4279_v20 = vpop.permute.xlu1 %4278  ;;  %v18339_v21 = vpack.i.bf16 %v18326_v49, %v5085_v31 }
 0x4af   :  { %v4525_v44 = vsel %vm4483_vm4, %v4467_v24, %v4279_v20  ;;  %v5083_v24 = vmax.f32 %v18376_v57, 0.0 }
 0x4b0   :  { %v4281_v40 = vpop.permute.xlu0 %4280  ;;  %12484 = vmatmul.mubr.msk.f32.gmra.mxu1 %vm4556_vm6, %v4525_v44  ;;  %12725 = vrot.lane.b32.xlu0 %v18339_v21, %s13310_s25  ;;  %v4839_v35 = vpop.f32.mrf.mxu1 }
 0x4b1   :  { %v4840_v4 = vadd.f32 %v18195_v19, %v4839_v35  ;;  %12486 = vmatprep.mubr.msk.f32.mxu1 %vm13307_vm2, %v21755_v8  ;;  %v12749_v44 = vpack.i.bf16 %v5084_v45, %v5083_v24 }
 0x4b2   :  { %v4109_v60 = vpop.permute.xlu1 %4108  ;;  %v12389_v28 = vpop.f32.mrf.mxu1 }
 0x4b3   :  { %v18356_v41 = vmax.f32 %v4840_v4, 0.0  ;;  %v4468_v27 = vsel %vm4425_vm5, %v4410_v2, %v4109_v60 }
 0x4b4   :  { %v4111_v34 = vpop.permute.xlu0 %4110  ;;  %12735 = vrot.lane.b32.xlu0 %v12734_v9, %s13309_s5  ;;  %v4526_v7 = vsel %vm4483_vm4, %v4468_v27, %v4281_v40  ;;  %v4412_v40 = vsel %vm4367_vm3, %v17473_v12, %v18277_v53 }
 0x4b5   :  { %v4844_v33 = vpop.f32.mrf.mxu1  ;;  %12487 = vmatmul.mubr.msk.f32.gmra.mxu1 %vm4556_vm6, %v4526_v7  ;;  %v12729_v13 = vpack.i.bf16 %v18356_v41, %v18326_v49  ;;  %v4469_v11 = vsel %vm4425_vm5, %v4411_v38, %v4111_v34 }
 0x4b6   :  { %v4845_v3 = vadd.f32 %v18195_v19, %v4844_v33  ;;  %v18369_v17 = vpop.permute.xlu1 %3949  ;;  %12489 = vmatprep.mubr.msk.f32.mxu1 %vm13307_vm2, %v21755_v8 }
 0x4b7   :  { %12730 = vrot.lane.b32.xlu1 %v12729_v13, %s13311_s4  ;;  %v12392_v63 = vpop.f32.mrf.mxu1 }
 0x4b8   :  { %v18378_v10 = vmax.f32 %v4845_v3, 0.0  ;;  %v18380_v50 = vpop.permute.xlu0 %3943  ;;  %v4413_v3 = vsel %vm4367_vm3, %v21761_v39, %v18245_v16  ;;  %v4414_v39 = vsel %vm4367_vm3, %v21759_v42, %v18328_v23 }
 0x4ba   :  { %v4283_v29 = vpop.permute.xlu1 %4282  ;;  %v18389_v54 = vpack.i.bf16 %v18378_v10, %v18356_v41 }
 0x4bb   :  { %v4527_v48 = vsel %vm4483_vm4, %v4469_v11, %v4283_v29 }
 0x4bc   :  { %v4285_v20 = vpop.permute.xlu0 %4284  ;;  %12490 = vmatmul.mubr.msk.f32.gmra.mxu1 %vm4556_vm6, %v4527_v48  ;;  %12740 = vrot.lane.b32.xlu1 %v18389_v54, %s13310_s25  ;;  %v4849_v58 = vpop.f32.mrf.mxu1 }
 0x4bd   :  { %v4850_v62 = vadd.f32 %v18195_v19, %v4849_v58  ;;  %12492 = vmatprep.mubr.msk.f32.mxu1 %vm13307_vm2, %v21755_v8 }
 0x4be   :  { %v4113_v35 = vpop.permute.xlu1 %4112  ;;  %v12395_v4 = vpop.f32.mrf.mxu1 }
 0x4bf   :  { %v18406_v9 = vmax.f32 %v4850_v62, 0.0  ;;  %v4470_v2 = vsel %vm4425_vm5, %v4412_v40, %v4113_v35 }
 0x4c0   :  { %v4115_v60 = vpop.permute.xlu0 %4114  ;;  %12750 = vrot.lane.b32.xlu1 %v12749_v44, %s13309_s5  ;;  %v4528_v28 = vsel %vm4483_vm4, %v4470_v2, %v4285_v20 }
 0x4c1   :  { %v4854_v27 = vpop.f32.mrf.mxu1  ;;  %12493 = vmatmul.mubr.msk.f32.gmra.mxu1 %vm4556_vm6, %v4528_v28  ;;  %v12744_v34 = vpack.i.bf16 %v18406_v9, %v18378_v10  ;;  %v4471_v63 = vsel %vm4425_vm5, %v4413_v3, %v4115_v60 }
 0x4c2   :  { %v4855_v7 = vadd.f32 %v18195_v19, %v4854_v27  ;;  %v18415_v12 = vpop.permute.xlu1 %3953  ;;  %12495 = vmatprep.mubr.msk.f32.mxu1 %vm13307_vm2, %v21755_v8 }
 0x4c3   :  { %12745 = vrot.lane.b32.xlu0 %v12744_v34, %s13311_s4  ;;  %v12398_v53 = vpop.f32.mrf.mxu1  ;;  %v4415_v34 = vsel %vm4367_vm3, %v21763_v18, %v18273_v59  ;;  %v4416_v18 = vsel %vm4367_vm3, %v17505_v46, %v18380_v50 }
 0x4c4   :  { %v18420_v33 = vmax.f32 %v4855_v7, 0.0  ;;  %v18422_v13 = vpop.permute.xlu0 %3947 }
 0x4c6   :  { %v4287_v38 = vpop.permute.xlu1 %4286  ;;  %v18430_v11 = vpack.i.bf16 %v18420_v33, %v18406_v9 }
 0x4c7   :  { %v4529_v29 = vsel %vm4483_vm4, %v4471_v63, %v4287_v38 }
 0x4c8   :  { %v4289_v48 = vpop.permute.xlu0 %4288  ;;  %12496 = vmatmul.mubr.msk.f32.gmra.mxu1 %vm4556_vm6, %v4529_v29  ;;  %12755 = vrot.lane.b32.xlu0 %v18430_v11, %s13310_s25  ;;  %v4859_v20 = vpop.f32.mrf.mxu1 }
 0x4c9   :  { %v4860_v58 = vadd.f32 %v18195_v19, %v4859_v20  ;;  %12498 = vmatprep.mubr.msk.f32.mxu1 %vm13307_vm2, %v21755_v8 }
 0x4ca   :  { %v4117_v16 = vpop.permute.xlu1 %4116  ;;  %v12401_v62 = vpop.f32.mrf.mxu1 }
 0x4cb   :  { %v18442_v44 = vmax.f32 %v4860_v58, 0.0  ;;  %v4472_v40 = vsel %vm4425_vm5, %v4414_v39, %v4117_v16  ;;  %v4417_v16 = vsel %vm4367_vm3, %v21766_v47, %v18313_v15 }
 0x4cc   :  { %v4119_v35 = vpop.permute.xlu0 %4118  ;;  %12765 = vrot.lane.b32.xlu0 %v18339_v21, %s13309_s5  ;;  %v4530_v4 = vsel %vm4483_vm4, %v4472_v40, %v4289_v48 }
 0x4cd   :  { %v4864_v2 = vpop.f32.mrf.mxu1  ;;  %12499 = vmatmul.mubr.msk.f32.gmra.mxu1 %vm4556_vm6, %v4530_v4  ;;  %v12759_v60 = vpack.i.bf16 %v18442_v44, %v18420_v33  ;;  %v4473_v7 = vsel %vm4425_vm5, %v4415_v34, %v4119_v35 }
 0x4ce   :  { %v4865_v42 = vadd.f32 %v18195_v19, %v4864_v2  ;;  %v18452_v23 = vpop.permute.xlu1 %3957  ;;  %12501 = vmatprep.mubr.msk.f32.mxu1 %vm13307_vm2, %v21755_v8 }
 0x4cf   :  { %12760 = vrot.lane.b32.xlu1 %v12759_v60, %s13311_s4  ;;  %v12404_v28 = vpop.f32.mrf.mxu1 }
 0x4d0   :  { %v18457_v27 = vmax.f32 %v4865_v42, 0.0  ;;  %v3952_v21 = vpop.permute.xlu0 %3951  ;;  %v4418_v42 = vsel %vm4367_vm3, %v21764_v1, %v18422_v13 }
 0x4d2   :  { %v4291_v53 = vpop.permute.xlu1 %4290  ;;  %v18465_v3 = vpack.i.bf16 %v18457_v27, %v18442_v44 }
 0x4d3   :  { %v4531_v63 = vsel %vm4483_vm4, %v4473_v7, %v4291_v53 }
 0x4d4   :  { %v4293_v38 = vpop.permute.xlu0 %4292  ;;  %12502 = vmatmul.mubr.msk.f32.gmra.mxu1 %vm4556_vm6, %v4531_v63  ;;  %12770 = vrot.lane.b32.xlu1 %v18465_v3, %s13310_s25  ;;  %v4869_v29 = vpop.f32.mrf.mxu1 }
 0x4d5   :  { %v4870_v48 = vadd.f32 %v18195_v19, %v4869_v29  ;;  %12504 = vmatprep.mubr.msk.f32.mxu1 %vm13307_vm2, %v21755_v8 }
 0x4d6   :  { %v4121_v59 = vpop.permute.xlu1 %4120  ;;  %v12407_v20 = vpop.f32.mrf.mxu1 }
 0x4d7   :  { %v18477_v58 = vmax.f32 %v4870_v48, 0.0  ;;  %v4474_v39 = vsel %vm4425_vm5, %v4416_v18, %v4121_v59  ;;  %v4419_v18 = vsel %vm4367_vm3, %v21768_v5, %v18369_v17 }
 0x4d8   :  { %v4123_v62 = vpop.permute.xlu0 %4122  ;;  %12780 = vrot.lane.b32.xlu1 %v18389_v54, %s13309_s5  ;;  %v4532_v40 = vsel %vm4483_vm4, %v4474_v39, %v4293_v38 }
 0x4d9   :  { %v4475_v35 = vsel %vm4425_vm5, %v4417_v16, %v4123_v62  ;;  %v4874_v4 = vpop.f32.mrf.mxu1  ;;  %12505 = vmatmul.mubr.msk.f32.gmra.mxu1 %vm4556_vm6, %v4532_v40  ;;  %v12774_v46 = vpack.i.bf16 %v18477_v58, %v18457_v27  ;;  %v4420_v62 = vsel %vm4367_vm3, %v21767_v26, %v3952_v21 }
 0x4da   :  { %v4875_v50 = vadd.f32 %v18195_v19, %v4874_v4  ;;  %v4295_v2 = vpop.permute.xlu1 %4294  ;;  %12507 = vmatprep.mubr.msk.f32.mxu1 %vm13307_vm2, %v21755_v8 }
 0x4db   :  { %v4533_v47 = vsel %vm4483_vm4, %v4475_v35, %v4295_v2  ;;  %12775 = vrot.lane.b32.xlu0 %v12774_v46, %s13311_s4  ;;  %v12410_v15 = vpop.f32.mrf.mxu1  ;;  %v4421_v2 = vsel %vm4367_vm3, %v21770_v55, %v18415_v12 }
 0x4dc   :  { %v18495_v54 = vmax.f32 %v4875_v50, 0.0  ;;  %v3956_v60 = vpop.permute.xlu0 %3955 }
 0x4dd   :  { %12508 = vmatmul.mubr.msk.f32.gmra.mxu1 %vm4556_vm6, %v4533_v47 }
 0x4de   :  { %v4125_v28 = vpop.permute.xlu1 %4124  ;;  %v18503_v34 = vpack.i.bf16 %v18495_v54, %v18477_v58  ;;  %12510 = vmatprep.mubr.msk.f32.mxu1 %vm13307_vm2, %v21755_v8 }
 0x4df   :  { %v4476_v7 = vsel %vm4425_vm5, %v4418_v42, %v4125_v28 }
 0x4e0   :  { %v4297_v53 = vpop.permute.xlu0 %4296  ;;  %12785 = vrot.lane.b32.xlu0 %v18503_v34, %s13310_s25  ;;  %v4879_v63 = vpop.f32.mrf.mxu1 }
 0x4e1   :  { %v4534_v38 = vsel %vm4483_vm4, %v4476_v7, %v4297_v53  ;;  %v4880_v29 = vadd.f32 %v18195_v19, %v4879_v63  ;;  %v4422_v7 = vsel %vm4367_vm3, %v21769_v6, %v3956_v60 }
 0x4e2   :  { %v4299_v1 = vpop.permute.xlu1 %4298  ;;  %v12413_v13 = vpop.f32.mrf.mxu1  ;;  %12511 = vmatmul.mubr.msk.f32.gmra.mxu1 %vm4556_vm6, %v4534_v38 }
 0x4e3   :  { %v18513_v48 = vmax.f32 %v4880_v29, 0.0  ;;  %12513 = vmatprep.mubr.msk.f32.mxu1 %vm13307_vm2, %v21755_v8 }
 0x4e4   :  { %v4127_v59 = vpop.permute.xlu0 %4126  ;;  %12795 = vrot.lane.b32.xlu0 %v18430_v11, %s13309_s5 }
 0x4e5   :  { %v4477_v20 = vsel %vm4425_vm5, %v4419_v18, %v4127_v59  ;;  %v4884_v39 = vpop.f32.mrf.mxu1  ;;  %v12789_v16 = vpack.i.bf16 %v18513_v48, %v18495_v54 }
 0x4e6   :  { %v4885_v40 = vadd.f32 %v18195_v19, %v4884_v39  ;;  %v4129_v35 = vpop.permute.xlu1 %4128  ;;  %v4535_v4 = vsel %vm4483_vm4, %v4477_v20, %v4299_v1 }
 0x4e7   :  { %v4478_v5 = vsel %vm4425_vm5, %v4420_v62, %v4129_v35  ;;  %12514 = vmatmul.mubr.msk.f32.gmra.mxu1 %vm4556_vm6, %v4535_v4  ;;  %12790 = vrot.lane.b32.xlu1 %v12789_v16, %s13311_s4  ;;  %v12416_v17 = vpop.f32.mrf.mxu1 }
 0x4e8   :  { %v18532_v11 = vmax.f32 %v4885_v40, 0.0  ;;  %v4301_v46 = vpop.permute.xlu0 %4300  ;;  %12516 = vmatprep.mubr.msk.f32.mxu1 %vm13307_vm2, %v21755_v8 }
 0x4e9   :  { %v4536_v26 = vsel %vm4483_vm4, %v4478_v5, %v4301_v46 }
 0x4ea   :  { %v4303_v21 = vpop.permute.xlu1 %4302  ;;  %v12799_v50 = vpack.i.bf16 %v18532_v11, %v18513_v48 }
 0x4eb   :  { %12517 = vmatmul.mubr.msk.f32.gmra.mxu1 %vm4556_vm6, %v4536_v26 }
 0x4ec   :  { %v4131_v47 = vpop.permute.xlu0 %4130  ;;  %12800 = vrot.lane.b32.xlu1 %v12799_v50, %s13310_s25  ;;  %v4889_v15 = vpop.f32.mrf.mxu1  ;;  %12519 = vmatprep.mubr.msk.f32.mxu1 %vm13307_vm2, %v21755_v8 }
 0x4ed   :  { %v4479_v42 = vsel %vm4425_vm5, %v4421_v2, %v4131_v47  ;;  %v4890_v28 = vadd.f32 %v18195_v19, %v4889_v15 }
 0x4ee   :  { %v4133_v53 = vpop.permute.xlu1 %4132  ;;  %v12419_v63 = vpop.f32.mrf.mxu1  ;;  %v4537_v38 = vsel %vm4483_vm4, %v4479_v42, %v4303_v21 }
 0x4ef   :  { %v18551_v29 = vmax.f32 %v4890_v28, 0.0  ;;  %v4480_v55 = vsel %vm4425_vm5, %v4422_v7, %v4133_v53  ;;  %12520 = vmatmul.mubr.msk.f32.gmra.mxu1 %vm4556_vm6, %v4537_v38 }
 0x4f0   :  { %v4305_v12 = vpop.permute.xlu0 %4304  ;;  %12810 = vrot.lane.b32.xlu1 %v18465_v3, %s13309_s5  ;;  %12522 = vmatprep.mubr.msk.f32.mxu1 %vm13307_vm2, %v21755_v8  ;;  %v4423_v3 = vsel %vm4367_vm3, %v21772_v30, %v18452_v23 }
 0x4f1   :  { %v4538_v1 = vsel %vm4483_vm4, %v4480_v55, %v4305_v12  ;;  %v4894_v6 = vpop.f32.mrf.mxu1  ;;  %v12804_v60 = vpack.i.bf16 %v18551_v29, %v18532_v11 }
 0x4f2   :  { %v4895_v13 = vadd.f32 %v18195_v19, %v4894_v6  ;;  %v4307_v39 = vpop.permute.xlu1 %4306 }
 0x4f3   :  { %12523 = vmatmul.mubr.msk.f32.gmra.mxu1 %vm4556_vm6, %v4538_v1  ;;  %12805 = vrot.lane.b32.xlu0 %v12804_v60, %s13311_s4  ;;  %v12422_v18 = vpop.f32.mrf.mxu1 }
 0x4f4   :  { %v18568_v59 = vmax.f32 %v4895_v13, 0.0  ;;  %v4135_v20 = vpop.permute.xlu0 %4134  ;;  %12525 = vmatprep.mubr.msk.f32.mxu1 %vm13307_vm2, %v21755_v8 }
 0x4f5   :  { %v4481_v16 = vsel %vm4425_vm5, %v4423_v3, %v4135_v20 }
 0x4f6   :  { %v4539_v62 = vsel %vm4483_vm4, %v4481_v16, %v4307_v39  ;;  %v12814_v40 = vpack.i.bf16 %v18568_v59, %v18551_v29  ;;  %v4137_v17 = vpop.permute.xlu1 %4136 }
 0x4f7   :  { %12526 = vmatmul.mubr.msk.f32.gmra.mxu1 %vm4556_vm6, %v4539_v62 }
 0x4f8   :  { %v3960_v35 = vpop.permute.xlu0 %3959  ;;  %12815 = vrot.lane.b32.xlu0 %v12814_v40, %s13310_s25  ;;  %v4899_v30 = vpop.f32.mrf.mxu1  ;;  %12528 = vmatprep.mubr.msk.f32.mxu1 %vm13307_vm2, %v21755_v8 }
 0x4f9   :  { %v4424_v23 = vsel %vm4367_vm3, %v21771_v51, %v3960_v35  ;;  %v4900_v4 = vadd.f32 %v18195_v19, %v4899_v30 }
 0x4fa   :  { %v12425_v5 = vpop.f32.mrf.mxu1  ;;  %v4482_v21 = vsel %vm4425_vm5, %v4424_v23, %v4137_v17 }
 0x4fb   :  { %v18583_v46 = vmax.f32 %v4900_v4, 0.0 }
 0x4fc   :  { %v4309_v26 = vpop.permute.xlu0 %4308  ;;  %12825 = vrot.lane.b32.xlu0 %v18503_v34, %s13309_s5 }
 0x4fd   :  { %v4540_v2 = vsel %vm4483_vm4, %v4482_v21, %v4309_v26  ;;  %v4904_v47 = vpop.f32.mrf.mxu1  ;;  %v12819_v15 = vpack.i.bf16 %v18583_v46, %v18568_v59 }
 0x4fe   :  { %v4905_v51 = vadd.f32 %v18195_v19, %v4904_v47  ;;  %12529 = vmatmul.mubr.msk.f32.gmra.mxu1 %vm4556_vm6, %v4540_v2  ;;  %v12721_v47 = vpop.permute.xlu1 %12720 }
 0x4ff   :  { %12820 = vrot.lane.b32.xlu1 %v12819_v15, %s13311_s4  ;;  %v12428_v42 = vpop.f32.mrf.mxu1  ;;  %12563 = vmatprep.mubr.msk.f32.mxu1 %vm13307_vm2, %v21755_v8 }
 0x500   :  { %v18596_v28 = vmax.f32 %v4905_v51, 0.0  ;;  %v4795_v51 = vadd.f32 %v18195_v19, %v18169_v61 }
 0x502   :  { %v12829_v34 = vpack.i.bf16 %v18596_v28, %v18583_v46 }
 0x504   :  { %12830 = vrot.lane.b32.xlu1 %v12829_v34, %s13310_s25  ;;  %v4909_v7 = vpop.f32.mrf.mxu1 }
 0x505   :  { %v4910_v53 = vadd.f32 %v18195_v19, %v4909_v7 }
 0x506   :  { %v12431_v63 = vpop.f32.mrf.mxu1 }
 0x507   :  { %v18602_v38 = vmax.f32 %v4910_v53, 0.0  ;;  %v12722_v53 = vunpack.i.l.bf16 %v12721_v47 }
 0x508   :  { %12840 = vrot.lane.b32.xlu1 %v12799_v50, %s13309_s5 }
 0x509   :  { %v4914_v55 = vpop.f32.mrf.mxu1  ;;  %v12834_v12 = vpack.i.bf16 %v18602_v38, %v18596_v28 }
 0x50a   :  { %v4915_v1 = vadd.f32 %v18195_v19, %v4914_v55  ;;  %v5078_v55 = vmax.f32 %v4795_v51, 0.0 }
 0x50b   :  { %12835 = vrot.lane.b32.xlu0 %v12834_v12, %s13311_s4  ;;  %v12434_v6 = vpop.f32.mrf.mxu1 }
 0x50c   :  { %v18609_v60 = vmax.f32 %v4915_v1, 0.0  ;;  %v5632_v61 = vsel %vm4425_vm5, %v5078_v55, %v12722_v53 }
 0x50e   :  { %v12844_v13 = vpack.i.bf16 %v18609_v60, %v18602_v38 }
 0x510   :  { %12845 = vrot.lane.b32.xlu0 %v12844_v13, %s13310_s25  ;;  %v4919_v18 = vpop.f32.mrf.mxu1 }
 0x511   :  { %v4920_v3 = vadd.f32 %v18195_v19, %v4919_v18  ;;  %v12723_v18 = vunpack.i.h.bf16 %v12721_v47 }
 0x512   :  { %v12437_v50 = vpop.f32.mrf.mxu1 }
 0x513   :  { %v18615_v20 = vmax.f32 %v4920_v3, 0.0 }
 0x514   :  { %12855 = vrot.lane.b32.xlu0 %v12814_v40, %s13309_s5 }
 0x515   :  { %v4924_v39 = vpop.f32.mrf.mxu1  ;;  %v12849_v16 = vpack.i.bf16 %v18615_v20, %v18609_v60 }
 0x516   :  { %v4925_v62 = vadd.f32 %v18195_v19, %v4924_v39 }
 0x517   :  { %12850 = vrot.lane.b32.xlu1 %v12849_v16, %s13311_s4  ;;  %v12440_v35 = vpop.f32.mrf.mxu1 }
 0x518   :  { %v18622_v30 = vmax.f32 %v4925_v62, 0.0 }
 0x51a   :  { %v18626_v23 = vpack.i.bf16 %v18622_v30, %v18615_v20 }
 0x51c   :  { %12860 = vrot.lane.b32.xlu1 %v18626_v23, %s13310_s25  ;;  %v4929_v4 = vpop.f32.mrf.mxu1 }
 0x51d   :  { %v4930_v40 = vadd.f32 %v18195_v19, %v4929_v4 }
 0x51e   :  { %v12443_v5 = vpop.f32.mrf.mxu1 }
 0x51f   :  { %v18631_v17 = vmax.f32 %v4930_v40, 0.0 }
 0x520   :  { %12870 = vrot.lane.b32.xlu1 %v12829_v34, %s13309_s5 }
 0x521   :  { %v4934_v26 = vpop.f32.mrf.mxu1  ;;  %v12864_v21 = vpack.i.bf16 %v18631_v17, %v18622_v30 }
 0x522   :  { %v4935_v2 = vadd.f32 %v18195_v19, %v4934_v26  ;;  %v12726_v7 = vpop.permute.xlu0 %12725  ;;  %v5633_v26 = vsel %vm4425_vm5, %v5079_v36, %v12723_v18 }
 0x523   :  { %12865 = vrot.lane.b32.xlu0 %v12864_v21, %s13311_s4  ;;  %v12446_v15 = vpop.f32.mrf.mxu1  ;;  %v12727_v63 = vunpack.i.l.bf16 %v12726_v7  ;;  %v12728_v39 = vunpack.i.h.bf16 %v12726_v7 }
 0x524   :  { %v18640_v42 = vmax.f32 %v4935_v2, 0.0 }
 0x525   :  { %v5681_v16 = vsel %vm4556_vm6, %v5632_v61, %v12727_v63 }
 0x526   :  { %v18644_v34 = vpack.i.bf16 %v18640_v42, %v18631_v17  ;;  %v12736_v2 = vpop.permute.xlu0 %12735 }
 0x527   :  { %v12737_v0 = vunpack.i.l.bf16 %v12736_v2 }
 0x528   :  { %12875 = vrot.lane.b32.xlu0 %v18644_v34, %s13310_s25  ;;  %v4939_v12 = vpop.f32.mrf.mxu1 }
 0x529   :  { %v4940_v1 = vadd.f32 %v18195_v19, %v4939_v12  ;;  %v12731_v6 = vpop.permute.xlu1 %12730 }
 0x52a   :  { %v12732_v3 = vunpack.i.l.bf16 %v12731_v6  ;;  %v12449_v50 = vpop.f32.mrf.mxu1  ;;  %v12733_v35 = vunpack.i.h.bf16 %v12731_v6  ;;  %v5634_v6 = vsel %vm4425_vm5, %v5080_v25, %v12737_v0 }
 0x52b   :  { %v18651_v62 = vmax.f32 %v4940_v1, 0.0  ;;  %v12738_v1 = vunpack.i.h.bf16 %v12736_v2 }
 0x52c   :  { %v5731_v4 = vsel %vm5730_vm7, %v5681_v16, %v12732_v3  ;;  %12885 = vrot.lane.b32.xlu0 %v12844_v13, %s13309_s5  ;;  %v5682_v13 = vsel %vm4556_vm6, %v5633_v26, %v12728_v39 }
 0x52d   :  { %v4944_v40 = vpop.f32.mrf.mxu1  ;;  %12564 = vmatmul.mubr.f32.vlgmr.msra.gmra.mxu1 %v5731_v4  ;;  %v12879_v5 = vpack.i.bf16 %v18651_v62, %v18640_v42  ;;  %v5732_v7 = vsel %vm5730_vm7, %v5682_v13, %v12733_v35  ;;  %v5635_v25 = vsel %vm4425_vm5, %v5081_v43, %v12738_v1 }
 0x52e   :  { %v4945_v21 = vadd.f32 %v18195_v19, %v4944_v40  ;;  %12566 = vmatprep.mubr.msk.f32.mxu1 %vm13307_vm2, %v21755_v8  ;;  %v12741_v51 = vpop.permute.xlu1 %12740 }
 0x52f   :  { %12880 = vrot.lane.b32.xlu1 %v12879_v5, %s13311_s4  ;;  %v12452_v47 = vpop.f32.mrf.mxu1  ;;  %v12742_v53 = vunpack.i.l.bf16 %v12741_v51  ;;  %v12743_v3 = vunpack.i.h.bf16 %v12741_v51 }
 0x530   :  { %v18665_v15 = vmax.f32 %v4945_v21, 0.0 }
 0x531   :  { %12567 = vmatmul.mubr.f32.gmra.mxu1 %v5732_v7  ;;  %v5683_v39 = vsel %vm4556_vm6, %v5634_v6, %v12742_v53  ;;  %v5684_v26 = vsel %vm4556_vm6, %v5635_v25, %v12743_v3 }
 0x532   :  { %v18670_v36 = vpack.i.bf16 %v18665_v15, %v18651_v62  ;;  %12569 = vmatprep.mubr.msk.f32.mxu1 %vm13307_vm2, %v21755_v8  ;;  %v12751_v5 = vpop.permute.xlu1 %12750 }
 0x533   :  { %v12752_v32 = vunpack.i.l.bf16 %v12751_v5  ;;  %v12753_v53 = vunpack.i.h.bf16 %v12751_v5 }
 0x534   :  { %12890 = vrot.lane.b32.xlu1 %v18670_v36, %s13310_s25  ;;  %v4949_v63 = vpop.f32.mrf.mxu1 }
 0x535   :  { %v4950_v55 = vadd.f32 %v18195_v19, %v4949_v63  ;;  %v12746_v12 = vpop.permute.xlu0 %12745  ;;  %v5636_v63 = vsel %vm4425_vm5, %v5082_v37, %v12752_v32  ;;  %v5637_v37 = vsel %vm4425_vm5, %v5083_v24, %v12753_v53 }
 0x536   :  { %v12747_v18 = vunpack.i.l.bf16 %v12746_v12  ;;  %v12455_v61 = vpop.f32.mrf.mxu1  ;;  %v12748_v16 = vunpack.i.h.bf16 %v12746_v12 }
 0x537   :  { %v18680_v50 = vmax.f32 %v4950_v55, 0.0 }
 0x538   :  { %12900 = vrot.lane.b32.xlu1 %v18626_v23, %s13309_s5  ;;  %v5733_v35 = vsel %vm5730_vm7, %v5683_v39, %v12747_v18  ;;  %v5734_v47 = vsel %vm5730_vm7, %v5684_v26, %v12748_v16 }
 0x539   :  { %v4954_v4 = vpop.f32.mrf.mxu1  ;;  %12570 = vmatmul.mubr.f32.gmra.mxu1 %v5733_v35  ;;  %v12894_v14 = vpack.i.bf16 %v18680_v50, %v18665_v15 }
 0x53a   :  { %v4955_v40 = vadd.f32 %v18195_v19, %v4954_v4  ;;  %12572 = vmatprep.mubr.msk.f32.mxu1 %vm13307_vm2, %v21755_v8  ;;  %v12756_v2 = vpop.permute.xlu0 %12755 }
 0x53b   :  { %12895 = vrot.lane.b32.xlu0 %v12894_v14, %s13311_s4  ;;  %v12458_v23 = vpop.f32.mrf.mxu1  ;;  %v12757_v13 = vunpack.i.l.bf16 %v12756_v2  ;;  %v12758_v1 = vunpack.i.h.bf16 %v12756_v2 }
 0x53c   :  { %v18696_v21 = vmax.f32 %v4955_v40, 0.0 }
 0x53d   :  { %12573 = vmatmul.mubr.f32.gmra.mxu1 %v5734_v47  ;;  %v5685_v18 = vsel %vm4556_vm6, %v5636_v63, %v12757_v13  ;;  %v5686_v4 = vsel %vm4556_vm6, %v5637_v37, %v12758_v1 }
 0x53e   :  { %v18701_v43 = vpack.i.bf16 %v18696_v21, %v18680_v50  ;;  %12575 = vmatprep.mubr.msk.f32.mxu1 %vm13307_vm2, %v21755_v8  ;;  %v12766_v35 = vpop.permute.xlu0 %12765 }
 0x53f   :  { %v12767_v57 = vunpack.i.l.bf16 %v12766_v35  ;;  %v12768_v47 = vunpack.i.h.bf16 %v12766_v35 }
 0x540   :  { %12905 = vrot.lane.b32.xlu0 %v18701_v43, %s13310_s25  ;;  %v4959_v51 = vpop.f32.mrf.mxu1 }
 0x541   :  { %v4960_v7 = vadd.f32 %v18195_v19, %v4959_v51  ;;  %v12761_v0 = vpop.permute.xlu1 %12760  ;;  %v5638_v32 = vsel %vm4425_vm5, %v5084_v45, %v12767_v57  ;;  %v5639_v45 = vsel %vm4425_vm5, %v5085_v31, %v12768_v47 }
 0x542   :  { %v12762_v55 = vunpack.i.l.bf16 %v12761_v0  ;;  %v12461_v12 = vpop.f32.mrf.mxu1  ;;  %v12763_v61 = vunpack.i.h.bf16 %v12761_v0 }
 0x543   :  { %v18711_v6 = vmax.f32 %v4960_v7, 0.0 }
 0x544   :  { %12915 = vrot.lane.b32.xlu0 %v18644_v34, %s13309_s5  ;;  %v5735_v3 = vsel %vm5730_vm7, %v5685_v18, %v12762_v55  ;;  %v5736_v40 = vsel %vm5730_vm7, %v5686_v4, %v12763_v61 }
 0x545   :  { %v4964_v39 = vpop.f32.mrf.mxu1  ;;  %12576 = vmatmul.mubr.f32.gmra.mxu1 %v5735_v3  ;;  %v12909_v52 = vpack.i.bf16 %v18711_v6, %v18696_v21 }
 0x546   :  { %v4965_v16 = vadd.f32 %v18195_v19, %v4964_v39  ;;  %12578 = vmatprep.mubr.msk.f32.mxu1 %vm13307_vm2, %v21755_v8  ;;  %v12771_v25 = vpop.permute.xlu1 %12770 }
 0x547   :  { %12910 = vrot.lane.b32.xlu1 %v12909_v52, %s13311_s4  ;;  %v12464_v34 = vpop.f32.mrf.mxu1  ;;  %v12772_v5 = vunpack.i.l.bf16 %v12771_v25  ;;  %v12773_v7 = vunpack.i.h.bf16 %v12771_v25 }
 0x548   :  { %v18727_v14 = vmax.f32 %v4965_v16, 0.0  ;;  %v18772_v16 = vld [vmem:[%s21776_s28] ss:$0 sm:$0xff] }
 0x549   :  { %12579 = vmatmul.mubr.f32.gmra.mxu1 %v5736_v40  ;;  %v5687_v53 = vsel %vm4556_vm6, %v5638_v32, %v12772_v5  ;;  %v5688_v61 = vsel %vm4556_vm6, %v5639_v45, %v12773_v7 }
 0x54a   :  { %v18732_v24 = vpack.i.bf16 %v18727_v14, %v18711_v6  ;;  %12581 = vmatprep.mubr.msk.f32.mxu1 %vm13307_vm2, %v21755_v8  ;;  %v12781_v18 = vpop.permute.xlu1 %12780 }
 0x54b   :  { %v12782_v22 = vunpack.i.l.bf16 %v12781_v18  ;;  %v12783_v4 = vunpack.i.h.bf16 %v12781_v18 }
 0x54c   :  { %12920 = vrot.lane.b32.xlu1 %v18732_v24, %s13310_s25  ;;  %v4969_v23 = vpop.f32.mrf.mxu1 }
 0x54d   :  { %v4970_v26 = vadd.f32 %v18195_v19, %v4969_v23  ;;  %v12776_v2 = vpop.permute.xlu0 %12775  ;;  %v5640_v25 = vsel %vm4425_vm5, %v18326_v49, %v12782_v22  ;;  %v5641_v49 = vsel %vm4425_vm5, %v18356_v41, %v12783_v4 }
 0x54e   :  { %v12777_v13 = vunpack.i.l.bf16 %v12776_v2  ;;  %v12467_v51 = vpop.f32.mrf.mxu1  ;;  %v12778_v63 = vunpack.i.h.bf16 %v12776_v2 }
 0x54f   :  { %v18742_v0 = vmax.f32 %v4970_v26, 0.0 }
 0x550   :  { %12930 = vrot.lane.b32.xlu1 %v18670_v36, %s13309_s5  ;;  %v5737_v55 = vsel %vm5730_vm7, %v5687_v53, %v12777_v13  ;;  %v5738_v52 = vsel %vm5730_vm7, %v5688_v61, %v12778_v63 }
 0x551   :  { %v4974_v12 = vpop.f32.mrf.mxu1  ;;  %12582 = vmatmul.mubr.f32.gmra.mxu1 %v5737_v55  ;;  %v12924_v56 = vpack.i.bf16 %v18742_v0, %v18727_v14 }
 0x552   :  { %v4975_v1 = vadd.f32 %v18195_v19, %v4974_v12  ;;  %12584 = vmatprep.mubr.msk.f32.mxu1 %vm13307_vm2, %v21755_v8  ;;  %v12786_v39 = vpop.permute.xlu0 %12785 }
 0x553   :  { %12925 = vrot.lane.b32.xlu0 %v12924_v56, %s13311_s4  ;;  %v12470_v36 = vpop.f32.mrf.mxu1  ;;  %v12787_v19 = vunpack.i.l.bf16 %v12786_v39  ;;  %v12788_v5 = vunpack.i.h.bf16 %v12786_v39 }
 0x554   :  { %v18758_v3 = vmax.f32 %v4975_v1, 0.0 }
 0x555   :  { %12585 = vmatmul.mubr.f32.gmra.mxu1 %v5738_v52  ;;  %v5689_v26 = vsel %vm4556_vm6, %v5640_v25, %v12787_v19 }
 0x556   :  { %v18763_v31 = vpack.i.bf16 %v18758_v3, %v18742_v0  ;;  %12587 = vmatprep.mubr.msk.f32.mxu1 %vm13307_vm2, %v21755_v8  ;;  %v12796_v7 = vpop.permute.xlu0 %12795 }
 0x557   :  { %v12797_v56 = vunpack.i.l.bf16 %v12796_v7  ;;  %v12798_v61 = vunpack.i.h.bf16 %v12796_v7 }
 0x558   :  { %12935 = vrot.lane.b32.xlu0 %v18763_v31, %s13310_s25  ;;  %v4979_v37 = vpop.f32.mrf.mxu1 }
 0x559   :  { %v4980_v35 = vadd.f32 %v18772_v16, %v4979_v37  ;;  %v12791_v34 = vpop.permute.xlu1 %12790  ;;  %v5642_v39 = vsel %vm4425_vm5, %v18378_v10, %v12797_v56  ;;  %v5643_v10 = vsel %vm4425_vm5, %v18406_v9, %v12798_v61 }
 0x55a   :  { %v12792_v40 = vunpack.i.l.bf16 %v12791_v34  ;;  %v12473_v57 = vpop.f32.mrf.mxu1  ;;  %v12793_v2 = vunpack.i.h.bf16 %v12791_v34 }
 0x55b   :  { %v18777_v23 = vmax.f32 %v4980_v35, 0.0 }
 0x55c   :  { %12945 = vrot.lane.b32.xlu0 %v18701_v43, %s13309_s5  ;;  %v5739_v47 = vsel %vm5730_vm7, %v5689_v26, %v12792_v40  ;;  %v5690_v43 = vsel %vm4556_vm6, %v5641_v49, %v12788_v5 }
 0x55d   :  { %v4984_v32 = vpop.f32.mrf.mxu1  ;;  %12588 = vmatmul.mubr.f32.gmra.mxu1 %v5739_v47  ;;  %v12939_v13 = vpack.i.bf16 %v18777_v23, %v18758_v3  ;;  %v5740_v12 = vsel %vm5730_vm7, %v5690_v43, %v12793_v2 }
 0x55e   :  { %v4985_v51 = vadd.f32 %v18772_v16, %v4984_v32  ;;  %12590 = vmatprep.mubr.msk.f32.mxu1 %vm13307_vm2, %v21755_v8  ;;  %v12801_v55 = vpop.permute.xlu1 %12800 }
 0x55f   :  { %12940 = vrot.lane.b32.xlu1 %v12939_v13, %s13311_s4  ;;  %v12476_v53 = vpop.f32.mrf.mxu1  ;;  %v12802_v45 = vunpack.i.l.bf16 %v12801_v55  ;;  %v12803_v19 = vunpack.i.h.bf16 %v12801_v55 }
 0x560   :  { %v18792_v63 = vmax.f32 %v4985_v51, 0.0 }
 0x561   :  { %12591 = vmatmul.mubr.f32.gmra.mxu1 %v5740_v12  ;;  %v5691_v35 = vsel %vm4556_vm6, %v5642_v39, %v12802_v45 }
 0x562   :  { %v18797_v41 = vpack.i.bf16 %v18792_v63, %v18777_v23  ;;  %12593 = vmatprep.mubr.msk.f32.mxu1 %vm13307_vm2, %v21755_v8  ;;  %v12811_v5 = vpop.permute.xlu1 %12810 }
 0x563   :  { %v12812_v13 = vunpack.i.l.bf16 %v12811_v5  ;;  %v12813_v43 = vunpack.i.h.bf16 %v12811_v5 }
 0x564   :  { %12950 = vrot.lane.b32.xlu1 %v18797_v41, %s13310_s25  ;;  %v4989_v1 = vpop.f32.mrf.mxu1 }
 0x565   :  { %v4990_v18 = vadd.f32 %v18772_v16, %v4989_v1  ;;  %v12806_v36 = vpop.permute.xlu0 %12805  ;;  %v5644_v55 = vsel %vm4425_vm5, %v18420_v33, %v12812_v13  ;;  %v5645_v33 = vsel %vm4425_vm5, %v18442_v44, %v12813_v43 }
 0x566   :  { %v12807_v52 = vunpack.i.l.bf16 %v12806_v36  ;;  %v12479_v22 = vpop.f32.mrf.mxu1  ;;  %v12808_v34 = vunpack.i.h.bf16 %v12806_v36 }
 0x567   :  { %v18806_v37 = vmax.f32 %v4990_v18, 0.0 }
 0x568   :  { %12960 = vrot.lane.b32.xlu1 %v18732_v24, %s13309_s5  ;;  %v5741_v4 = vsel %vm5730_vm7, %v5691_v35, %v12807_v52  ;;  %v5692_v24 = vsel %vm4556_vm6, %v5643_v10, %v12803_v19 }
 0x569   :  { %v4994_v25 = vpop.f32.mrf.mxu1  ;;  %12594 = vmatmul.mubr.f32.gmra.mxu1 %v5741_v4  ;;  %v12954_v40 = vpack.i.bf16 %v18806_v37, %v18792_v63  ;;  %v5742_v32 = vsel %vm5730_vm7, %v5692_v24, %v12808_v34 }
 0x56a   :  { %v4995_v57 = vadd.f32 %v18772_v16, %v4994_v25  ;;  %12596 = vmatprep.mubr.msk.f32.mxu1 %vm13307_vm2, %v21755_v8  ;;  %v12816_v47 = vpop.permute.xlu0 %12815 }
 0x56b   :  { %12955 = vrot.lane.b32.xlu0 %v12954_v40, %s13311_s4  ;;  %v12482_v26 = vpop.f32.mrf.mxu1  ;;  %v12817_v49 = vunpack.i.l.bf16 %v12816_v47  ;;  %v12818_v45 = vunpack.i.h.bf16 %v12816_v47 }
 0x56c   :  { %v18821_v2 = vmax.f32 %v4995_v57, 0.0 }
 0x56d   :  { %12597 = vmatmul.mubr.f32.gmra.mxu1 %v5742_v32  ;;  %v5693_v18 = vsel %vm4556_vm6, %v5644_v55, %v12817_v49 }
 0x56e   :  { %v18826_v9 = vpack.i.bf16 %v18821_v2, %v18806_v37  ;;  %12599 = vmatprep.mubr.msk.f32.mxu1 %vm13307_vm2, %v21755_v8  ;;  %v12826_v19 = vpop.permute.xlu0 %12825 }
 0x56f   :  { %v12827_v40 = vunpack.i.l.bf16 %v12826_v19  ;;  %v12828_v24 = vunpack.i.h.bf16 %v12826_v19 }
 0x570   :  { %12965 = vrot.lane.b32.xlu0 %v18826_v9, %s13310_s25  ;;  %v4999_v51 = vpop.f32.mrf.mxu1 }
 0x571   :  { %v5000_v7 = vadd.f32 %v18772_v16, %v4999_v51  ;;  %v12821_v53 = vpop.permute.xlu1 %12820  ;;  %v5646_v47 = vsel %vm4425_vm5, %v18457_v27, %v12827_v40  ;;  %v5647_v27 = vsel %vm4425_vm5, %v18477_v58, %v12828_v24 }
 0x572   :  { %v12822_v12 = vunpack.i.l.bf16 %v12821_v53  ;;  %v12485_v56 = vpop.f32.mrf.mxu1  ;;  %v12823_v36 = vunpack.i.h.bf16 %v12821_v53 }
 0x573   :  { %v18835_v1 = vmax.f32 %v5000_v7, 0.0 }
 0x574   :  { %12975 = vrot.lane.b32.xlu0 %v18763_v31, %s13309_s5  ;;  %v5743_v61 = vsel %vm5730_vm7, %v5693_v18, %v12822_v12  ;;  %v5694_v31 = vsel %vm4556_vm6, %v5645_v33, %v12818_v45 }
 0x575   :  { %v5004_v39 = vpop.f32.mrf.mxu1  ;;  %12600 = vmatmul.mubr.f32.gmra.mxu1 %v5743_v61  ;;  %v12969_v52 = vpack.i.bf16 %v18835_v1, %v18821_v2  ;;  %v5744_v25 = vsel %vm5730_vm7, %v5694_v31, %v12823_v36 }
 0x576   :  { %v5005_v22 = vadd.f32 %v18772_v16, %v5004_v39  ;;  %12602 = vmatprep.mubr.msk.f32.mxu1 %vm13307_vm2, %v21755_v8  ;;  %v12831_v4 = vpop.permute.xlu1 %12830 }
 0x577   :  { %12970 = vrot.lane.b32.xlu1 %v12969_v52, %s13311_s4  ;;  %v12488_v35 = vpop.f32.mrf.mxu1  ;;  %v12832_v10 = vunpack.i.l.bf16 %v12831_v4  ;;  %v12833_v49 = vunpack.i.h.bf16 %v12831_v4 }
 0x578   :  { %v18850_v34 = vmax.f32 %v5005_v22, 0.0 }
 0x579   :  { %12603 = vmatmul.mubr.f32.gmra.mxu1 %v5744_v25  ;;  %v5695_v7 = vsel %vm4556_vm6, %v5646_v47, %v12832_v10 }
 0x57a   :  { %v18855_v44 = vpack.i.bf16 %v18850_v34, %v18835_v1  ;;  %12605 = vmatprep.mubr.msk.f32.mxu1 %vm13307_vm2, %v21755_v8  ;;  %v12841_v45 = vpop.permute.xlu1 %12840 }
 0x57b   :  { %v12842_v52 = vunpack.i.l.bf16 %v12841_v45  ;;  %v12843_v31 = vunpack.i.h.bf16 %v12841_v45 }
 0x57c   :  { %12980 = vrot.lane.b32.xlu1 %v18855_v44, %s13310_s25  ;;  %v5009_v57 = vpop.f32.mrf.mxu1 }
 0x57d   :  { %v5010_v5 = vadd.f32 %v18772_v16, %v5009_v57  ;;  %v12836_v26 = vpop.permute.xlu0 %12835  ;;  %v5648_v4 = vsel %vm4425_vm5, %v18495_v54, %v12842_v52  ;;  %v5649_v54 = vsel %vm4425_vm5, %v18513_v48, %v12843_v31 }
 0x57e   :  { %v12837_v32 = vunpack.i.l.bf16 %v12836_v26  ;;  %v12491_v13 = vpop.f32.mrf.mxu1  ;;  %v12838_v53 = vunpack.i.h.bf16 %v12836_v26 }
 0x57f   :  { %v18864_v51 = vmax.f32 %v5010_v5, 0.0 }
 0x580   :  { %12990 = vrot.lane.b32.xlu1 %v18797_v41, %s13309_s5  ;;  %v5745_v43 = vsel %vm5730_vm7, %v5695_v7, %v12837_v32  ;;  %v5696_v41 = vsel %vm4556_vm6, %v5647_v27, %v12833_v49 }
 0x581   :  { %v5014_v55 = vpop.f32.mrf.mxu1  ;;  %12606 = vmatmul.mubr.f32.gmra.mxu1 %v5745_v43  ;;  %v12984_v12 = vpack.i.bf16 %v18864_v51, %v18850_v34  ;;  %v5746_v39 = vsel %vm5730_vm7, %v5696_v41, %v12838_v53 }
 0x582   :  { %v5015_v56 = vadd.f32 %v18772_v16, %v5014_v55  ;;  %12608 = vmatprep.mubr.msk.f32.mxu1 %vm13307_vm2, %v21755_v8  ;;  %v12846_v61 = vpop.permute.xlu0 %12845 }
 0x583   :  { %12985 = vrot.lane.b32.xlu0 %v12984_v12, %s13311_s4  ;;  %v12494_v18 = vpop.f32.mrf.mxu1  ;;  %v12847_v33 = vunpack.i.l.bf16 %v12846_v61  ;;  %v12848_v10 = vunpack.i.h.bf16 %v12846_v61 }
 0x584   :  { %v18879_v36 = vmax.f32 %v5015_v56, 0.0 }
 0x585   :  { %12609 = vmatmul.mubr.f32.gmra.mxu1 %v5746_v39  ;;  %v5697_v5 = vsel %vm4556_vm6, %v5648_v4, %v12847_v33 }
 0x586   :  { %v18884_v58 = vpack.i.bf16 %v18879_v36, %v18864_v51  ;;  %12611 = vmatprep.mubr.msk.f32.mxu1 %vm13307_vm2, %v21755_v8  ;;  %v12856_v49 = vpop.permute.xlu0 %12855 }
 0x587   :  { %v12857_v12 = vunpack.i.l.bf16 %v12856_v49  ;;  %v12858_v41 = vunpack.i.h.bf16 %v12856_v49 }
 0x588   :  { %12995 = vrot.lane.b32.xlu0 %v18884_v58, %s13310_s25  ;;  %v5019_v22 = vpop.f32.mrf.mxu1 }
 0x589   :  { %v5020_v19 = vadd.f32 %v18772_v16, %v5019_v22  ;;  %v12851_v35 = vpop.permute.xlu1 %12850  ;;  %v5650_v61 = vsel %vm4425_vm5, %v18532_v11, %v12857_v12  ;;  %v5651_v11 = vsel %vm4425_vm5, %v18551_v29, %v12858_v41 }
 0x58a   :  { %v12852_v25 = vunpack.i.l.bf16 %v12851_v35  ;;  %v12497_v40 = vpop.f32.mrf.mxu1  ;;  %v12853_v26 = vunpack.i.h.bf16 %v12851_v35 }
 0x58b   :  { %v18893_v57 = vmax.f32 %v5020_v19, 0.0 }
 0x58c   :  { %13005 = vrot.lane.b32.xlu0 %v18826_v9, %s13309_s5  ;;  %v5747_v24 = vsel %vm5730_vm7, %v5697_v5, %v12852_v25  ;;  %v5698_v9 = vsel %vm4556_vm6, %v5649_v54, %v12848_v10 }
 0x58d   :  { %v5024_v47 = vpop.f32.mrf.mxu1  ;;  %12612 = vmatmul.mubr.f32.gmra.mxu1 %v5747_v24  ;;  %v12999_v32 = vpack.i.bf16 %v18893_v57, %v18879_v36  ;;  %v5748_v55 = vsel %vm5730_vm7, %v5698_v9, %v12853_v26 }
 0x58e   :  { %v5025_v13 = vadd.f32 %v18772_v16, %v5024_v47  ;;  %12614 = vmatprep.mubr.msk.f32.mxu1 %vm13307_vm2, %v21755_v8  ;;  %v12861_v43 = vpop.permute.xlu1 %12860 }
 0x58f   :  { %13000 = vrot.lane.b32.xlu1 %v12999_v32, %s13311_s4  ;;  %v12500_v7 = vpop.f32.mrf.mxu1  ;;  %v12862_v27 = vunpack.i.l.bf16 %v12861_v43  ;;  %v12863_v33 = vunpack.i.h.bf16 %v12861_v43 }
 0x590   :  { %v18908_v53 = vmax.f32 %v5025_v13, 0.0 }
 0x591   :  { %12615 = vmatmul.mubr.f32.gmra.mxu1 %v5748_v55  ;;  %v5699_v19 = vsel %vm4556_vm6, %v5650_v61, %v12862_v27 }
 0x592   :  { %v18913_v48 = vpack.i.bf16 %v18908_v53, %v18893_v57  ;;  %12617 = vmatprep.mubr.msk.f32.mxu1 %vm13307_vm2, %v21755_v8  ;;  %v12871_v10 = vpop.permute.xlu1 %12870 }
 0x593   :  { %v12872_v54 = vunpack.i.l.bf16 %v12871_v10  ;;  %v12873_v55 = vunpack.i.h.bf16 %v12871_v10 }
 0x594   :  { %13010 = vrot.lane.b32.xlu1 %v18913_v48, %s13310_s25  ;;  %v5029_v56 = vpop.f32.mrf.mxu1 }
 0x595   :  { %v5030_v45 = vadd.f32 %v18772_v16, %v5029_v56  ;;  %v12866_v18 = vpop.permute.xlu0 %12865  ;;  %v5652_v12 = vsel %vm4425_vm5, %v18568_v59, %v12872_v54 }
 0x596   :  { %v12867_v39 = vunpack.i.l.bf16 %v12866_v18  ;;  %v12503_v52 = vpop.f32.mrf.mxu1  ;;  %v12868_v35 = vunpack.i.h.bf16 %v12866_v18 }
 0x597   :  { %v18922_v22 = vmax.f32 %v5030_v45, 0.0 }
 0x598   :  { %13020 = vrot.lane.b32.xlu1 %v18855_v44, %s13309_s5  ;;  %v5749_v31 = vsel %vm5730_vm7, %v5699_v19, %v12867_v39  ;;  %v5700_v44 = vsel %vm4556_vm6, %v5651_v11, %v12863_v33  ;;  %v5653_v19 = vsel %vm4425_vm5, %v18583_v46, %v12873_v55 }
 0x599   :  { %v5034_v4 = vpop.f32.mrf.mxu1  ;;  %12618 = vmatmul.mubr.f32.gmra.mxu1 %v5749_v31  ;;  %v13014_v25 = vpack.i.bf16 %v18922_v22, %v18908_v53  ;;  %v5750_v47 = vsel %vm5730_vm7, %v5700_v44, %v12868_v35 }
 0x59a   :  { %v5035_v40 = vadd.f32 %v18772_v16, %v5034_v4  ;;  %12620 = vmatprep.mubr.msk.f32.mxu1 %vm13307_vm2, %v21755_v8  ;;  %v12876_v24 = vpop.permute.xlu0 %12875 }
 0x59b   :  { %13015 = vrot.lane.b32.xlu0 %v13014_v25, %s13311_s4  ;;  %v12506_v5 = vpop.f32.mrf.mxu1  ;;  %v12877_v49 = vunpack.i.l.bf16 %v12876_v24  ;;  %v12878_v18 = vunpack.i.h.bf16 %v12876_v24 }
 0x59c   :  { %v18937_v26 = vmax.f32 %v5035_v40, 0.0 }
 0x59d   :  { %v5039_v32 = vpop.f32.mrf.mxu1  ;;  %12621 = vmatmul.mubr.f32.gmra.mxu1 %v5750_v47  ;;  %v5701_v61 = vsel %vm4556_vm6, %v5652_v12, %v12877_v49  ;;  %v5702_v25 = vsel %vm4556_vm6, %v5653_v19, %v12878_v18 }
 0x59e   :  { %v5040_v29 = vadd.f32 %v18772_v16, %v5039_v32  ;;  %v18943_v13 = vpack.i.bf16 %v18937_v26, %v18922_v22  ;;  %12623 = vmatprep.mubr.msk.f32.mxu1 %vm13307_vm2, %v21755_v8  ;;  %v12886_v35 = vpop.permute.xlu0 %12885 }
 0x59f   :  { %v12509_v7 = vpop.f32.mrf.mxu1  ;;  %v12887_v5 = vunpack.i.l.bf16 %v12886_v35  ;;  %v12888_v49 = vunpack.i.h.bf16 %v12886_v35 }
 0x5a0   :  { %v18947_v9 = vmax.f32 %v5040_v29, 0.0  ;;  %13025 = vrot.lane.b32.xlu0 %v18943_v13, %s13310_s25 }
 0x5a1   :  { %v12881_v43 = vpop.permute.xlu1 %12880  ;;  %v5654_v7 = vsel %vm4425_vm5, %v18596_v28, %v12887_v5 }
 0x5a2   :  { %v13029_v27 = vpack.i.bf16 %v18947_v9, %v18937_v26  ;;  %v12882_v56 = vunpack.i.l.bf16 %v12881_v43  ;;  %v5044_v45 = vpop.f32.mrf.mxu1  ;;  %v12883_v39 = vunpack.i.h.bf16 %v12881_v43 }
 0x5a3   :  { %v5045_v41 = vadd.f32 %v18772_v16, %v5044_v45 }
 0x5a4   :  { %13035 = vrot.lane.b32.xlu0 %v18884_v58, %s13309_s5  ;;  %13030 = vrot.lane.b32.xlu1 %v13029_v27, %s13311_s4  ;;  %v12512_v52 = vpop.f32.mrf.mxu1  ;;  %v5751_v33 = vsel %vm5730_vm7, %v5701_v61, %v12882_v56  ;;  %v5752_v40 = vsel %vm5730_vm7, %v5702_v25, %v12883_v39  ;;  %v5655_v39 = vsel %vm4425_vm5, %v18602_v38, %v12888_v49 }
 0x5a5   :  { %v5128_v59 = vmax.f32 %v5045_v41, 0.0  ;;  %12624 = vmatmul.mubr.f32.gmra.mxu1 %v5751_v33 }
 0x5a6   :  { %12626 = vmatprep.mubr.msk.f32.mxu1 %vm13307_vm2, %v21755_v8  ;;  %v12891_v58 = vpop.permute.xlu1 %12890 }
 0x5a7   :  { %v13039_v31 = vpack.i.bf16 %v5128_v59, %v18947_v9  ;;  %v5049_v4 = vpop.f32.mrf.mxu1  ;;  %v12892_v44 = vunpack.i.l.bf16 %v12891_v58  ;;  %v12893_v12 = vunpack.i.h.bf16 %v12891_v58 }
 0x5a8   :  { %v5050_v11 = vadd.f32 %v18772_v16, %v5049_v4 }
 0x5a9   :  { %12627 = vmatmul.mubr.f32.gmra.mxu1 %v5752_v40  ;;  %13040 = vrot.lane.b32.xlu1 %v13039_v31, %s13310_s25  ;;  %v12515_v10 = vpop.f32.mrf.mxu1  ;;  %v5703_v56 = vsel %vm4556_vm6, %v5654_v7, %v12892_v44 }
 0x5aa   :  { %v5129_v46 = vmax.f32 %v5050_v11, 0.0  ;;  %12629 = vmatprep.mubr.msk.f32.mxu1 %vm13307_vm2, %v21755_v8  ;;  %v12901_v52 = vpop.permute.xlu1 %12900 }
 0x5ab   :  { %v5054_v24 = vpop.f32.mrf.mxu1  ;;  %v12902_v58 = vunpack.i.l.bf16 %v12901_v52 }
 0x5ac   :  { %v13044_v47 = vpack.i.bf16 %v5129_v46, %v5128_v59  ;;  %v5055_v32 = vadd.f32 %v18772_v16, %v5054_v24  ;;  %v5704_v59 = vsel %vm4556_vm6, %v5655_v39, %v12893_v12  ;;  %v12903_v24 = vunpack.i.h.bf16 %v12901_v52 }
 0x5ad   :  { %v12896_v54 = vpop.permute.xlu0 %12895  ;;  %13050 = vrot.lane.b32.xlu1 %v18913_v48, %s13309_s5  ;;  %v12518_v29 = vpop.f32.mrf.mxu1 }
 0x5ae   :  { %v5130_v43 = vmax.f32 %v5055_v32, 0.0  ;;  %v12897_v55 = vunpack.i.l.bf16 %v12896_v54  ;;  %13045 = vrot.lane.b32.xlu0 %v13044_v47, %s13311_s4  ;;  %v12898_v18 = vunpack.i.h.bf16 %v12896_v54  ;;  %v5656_v47 = vsel %vm4425_vm5, %v18609_v60, %v12902_v58 }
 0x5af   :  { %v5059_v27 = vpop.f32.mrf.mxu1 }
 0x5b0   :  { %v13054_v45 = vpack.i.bf16 %v5130_v43, %v5129_v46  ;;  %v5060_v41 = vadd.f32 %v18772_v16, %v5059_v27  ;;  %v5753_v61 = vsel %vm5730_vm7, %v5703_v56, %v12897_v55  ;;  %v5754_v4 = vsel %vm5730_vm7, %v5704_v59, %v12898_v18 }
 0x5b1   :  { %v12521_v48 = vpop.f32.mrf.mxu1  ;;  %12630 = vmatmul.mubr.f32.gmra.mxu1 %v5753_v61 }
 0x5b2   :  { %v5131_v28 = vmax.f32 %v5060_v41, 0.0  ;;  %13055 = vrot.lane.b32.xlu0 %v13054_v45, %s13310_s25  ;;  %12632 = vmatprep.mubr.msk.f32.mxu1 %vm13307_vm2, %v21755_v8  ;;  %v12906_v35 = vpop.permute.xlu0 %12905 }
 0x5b3   :  { %v5064_v33 = vpop.f32.mrf.mxu1  ;;  %v12907_v11 = vunpack.i.l.bf16 %v12906_v35 }
 0x5b4   :  { %v13059_v19 = vpack.i.bf16 %v5131_v28, %v5130_v43  ;;  %v5065_v31 = vadd.f32 %v18772_v16, %v5064_v33  ;;  %v5657_v43 = vsel %vm4425_vm5, %v18615_v20, %v12903_v24 }
 0x5b5   :  { %v12524_v25 = vpop.f32.mrf.mxu1  ;;  %12633 = vmatmul.mubr.f32.gmra.mxu1 %v5754_v4  ;;  %v5705_v54 = vsel %vm4556_vm6, %v5656_v47, %v12907_v11 }
 0x5b6   :  { %v5132_v38 = vmax.f32 %v5065_v31, 0.0  ;;  %13065 = vrot.lane.b32.xlu0 %v18943_v13, %s13309_s5  ;;  %13060 = vrot.lane.b32.xlu1 %v13059_v19, %s13311_s4  ;;  %v12908_v13 = vunpack.i.h.bf16 %v12906_v35  ;;  %v12916_v55 = vpop.permute.xlu0 %12915 }
 0x5b7   :  { %v5069_v40 = vpop.f32.mrf.mxu1  ;;  %12635 = vmatprep.mubr.msk.f32.mxu1 %vm13307_vm2, %v21755_v8  ;;  %v12917_v20 = vunpack.i.l.bf16 %v12916_v55  ;;  %v12918_v61 = vunpack.i.h.bf16 %v12916_v55 }
 0x5b8   :  { %v13069_v10 = vpack.i.bf16 %v5132_v38, %v5131_v28  ;;  %v5070_v5 = vadd.f32 %v18772_v16, %v5069_v40  ;;  %v5706_v27 = vsel %vm4556_vm6, %v5657_v43, %v12908_v13 }
 0x5b9   :  { %v12911_v46 = vpop.permute.xlu1 %12910  ;;  %v12527_v44 = vpop.f32.mrf.mxu1  ;;  %v5658_v48 = vsel %vm4425_vm5, %v18622_v30, %v12917_v20  ;;  %v5659_v19 = vsel %vm4425_vm5, %v18631_v17, %v12918_v61 }
 0x5ba   :  { %v12912_v32 = vunpack.i.l.bf16 %v12911_v46  ;;  %5577 = vrot.lane.b32.xlu0 %v5132_v38, %s13311_s4  ;;  %13070 = vrot.lane.b32.xlu1 %v13069_v10, %s13310_s25  ;;  %v5133_v29 = vmax.f32 %v5070_v5, 0.0  ;;  %v12913_v49 = vunpack.i.h.bf16 %v12911_v46 }
 0x5bc   :  { %v5755_v7 = vsel %vm5730_vm7, %v5705_v54, %v12912_v32  ;;  %v5756_v18 = vsel %vm5730_vm7, %v5706_v27, %v12913_v49 }
 0x5bd   :  { %12636 = vmatmul.mubr.f32.gmra.mxu1 %v5755_v7 }
 0x5be   :  { %5280 = vrot.lane.b32.xlu0 %v18947_v9, %s13309_s5  ;;  %5579 = vrot.lane.b32.xlu1 %v5133_v29, %s13311_s4  ;;  %v5074_v60 = vpop.f32.mrf.mxu1  ;;  %v12921_v56 = vpop.permute.xlu1 %12920 }
 0x5bf   :  { %v5075_v12 = vadd.f32 %v18772_v16, %v5074_v60  ;;  %12638 = vmatprep.mubr.msk.f32.mxu1 %vm13307_vm2, %v21755_v8  ;;  %v12922_v9 = vunpack.i.l.bf16 %v12921_v56  ;;  %v12923_v28 = vunpack.i.h.bf16 %v12921_v56 }
 0x5c0   :  { %v12530_v45 = vpop.f32.mrf.mxu1 }
 0x5c1   :  { %v5134_v41 = vmax.f32 %v5075_v12, 0.0  ;;  %12639 = vmatmul.mubr.f32.gmra.mxu1 %v5756_v18  ;;  %v5707_v52 = vsel %vm4556_vm6, %v5658_v48, %v12922_v9  ;;  %v5708_v31 = vsel %vm4556_vm6, %v5659_v19, %v12923_v28  ;;  %v19056_v28 = vld [vmem:[%s21777_s30] ss:$0 sm:$0xff] }
 0x5c2   :  { %5433 = vrot.lane.b32.xlu1 %v5133_v29, %s13310_s25  ;;  %12641 = vmatprep.mubr.msk.f32.mxu1 %vm13307_vm2, %v21755_v8  ;;  %v12931_v35 = vpop.permute.xlu1 %12930 }
 0x5c3   :  { %5581 = vrot.lane.b32.xlu0 %v5134_v41, %s13311_s4  ;;  %v12932_v25 = vunpack.i.l.bf16 %v12931_v35  ;;  %v12933_v11 = vunpack.i.h.bf16 %v12931_v35 }
 0x5c5   :  { %v12926_v16 = vpop.permute.xlu0 %12925  ;;  %v5660_v17 = vsel %vm4425_vm5, %v18640_v42, %v12932_v25  ;;  %v5661_v24 = vsel %vm4425_vm5, %v18651_v62, %v12933_v11 }
 0x5c6   :  { %v12927_v39 = vunpack.i.l.bf16 %v12926_v16  ;;  %v12928_v33 = vunpack.i.h.bf16 %v12926_v16 }
 0x5c8   :  { %v5757_v59 = vsel %vm5730_vm7, %v5707_v52, %v12927_v39  ;;  %v5758_v30 = vsel %vm5730_vm7, %v5708_v31, %v12928_v33 }
 0x5c9   :  { %12642 = vmatmul.mubr.f32.gmra.mxu1 %v5757_v59 }
 0x5ca   :  { %12644 = vmatprep.mubr.msk.f32.mxu1 %vm13307_vm2, %v21755_v8  ;;  %v12936_v4 = vpop.permute.xlu0 %12935 }
 0x5cb   :  { %v12937_v58 = vunpack.i.l.bf16 %v12936_v4  ;;  %v12938_v10 = vunpack.i.h.bf16 %v12936_v4 }
 0x5cd   :  { %12645 = vmatmul.mubr.f32.gmra.mxu1 %v5758_v30  ;;  %v5709_v5 = vsel %vm4556_vm6, %v5660_v17, %v12937_v58  ;;  %v5710_v32 = vsel %vm4556_vm6, %v5661_v24, %v12938_v10 }
 0x5ce   :  { %12647 = vmatprep.mubr.msk.f32.mxu1 %vm13307_vm2, %v21755_v8  ;;  %v12946_v47 = vpop.permute.xlu0 %12945 }
 0x5cf   :  { %v12947_v54 = vunpack.i.l.bf16 %v12946_v47  ;;  %v12948_v7 = vunpack.i.h.bf16 %v12946_v47 }
 0x5d1   :  { %v12941_v38 = vpop.permute.xlu1 %12940  ;;  %v5662_v62 = vsel %vm4425_vm5, %v18665_v15, %v12947_v54  ;;  %v5663_v56 = vsel %vm4425_vm5, %v18680_v50, %v12948_v7 }
 0x5d2   :  { %v12942_v40 = vunpack.i.l.bf16 %v12941_v38  ;;  %v12943_v46 = vunpack.i.h.bf16 %v12941_v38 }
 0x5d4   :  { %v5759_v44 = vsel %vm5730_vm7, %v5709_v5, %v12942_v40  ;;  %v5760_v42 = vsel %vm5730_vm7, %v5710_v32, %v12943_v46 }
 0x5d5   :  { %12648 = vmatmul.mubr.f32.gmra.mxu1 %v5759_v44 }
 0x5d6   :  { %12650 = vmatprep.mubr.msk.f32.mxu1 %vm13307_vm2, %v21755_v8  ;;  %v12951_v13 = vpop.permute.xlu1 %12950 }
 0x5d7   :  { %v12952_v29 = vunpack.i.l.bf16 %v12951_v13  ;;  %v12953_v60 = vunpack.i.h.bf16 %v12951_v13 }
 0x5d9   :  { %12651 = vmatmul.mubr.f32.gmra.mxu1 %v5760_v42  ;;  %v5711_v55 = vsel %vm4556_vm6, %v5662_v62, %v12952_v29  ;;  %v5712_v18 = vsel %vm4556_vm6, %v5663_v56, %v12953_v60 }
 0x5da   :  { %12653 = vmatprep.mubr.msk.f32.mxu1 %vm13307_vm2, %v21755_v8  ;;  %v12961_v45 = vpop.permute.xlu1 %12960 }
 0x5db   :  { %v12962_v20 = vunpack.i.l.bf16 %v12961_v45  ;;  %v12963_v61 = vunpack.i.h.bf16 %v12961_v45 }
 0x5dd   :  { %v12956_v49 = vpop.permute.xlu0 %12955  ;;  %v5664_v50 = vsel %vm4425_vm5, %v18696_v21, %v12962_v20  ;;  %v5665_v35 = vsel %vm4425_vm5, %v18711_v6, %v12963_v61 }
 0x5de   :  { %v12957_v43 = vunpack.i.l.bf16 %v12956_v49  ;;  %v12958_v12 = vunpack.i.h.bf16 %v12956_v49 }
 0x5e0   :  { %v5761_v27 = vsel %vm5730_vm7, %v5711_v55, %v12957_v43  ;;  %v5762_v15 = vsel %vm5730_vm7, %v5712_v18, %v12958_v12 }
 0x5e1   :  { %12654 = vmatmul.mubr.f32.gmra.mxu1 %v5761_v27 }
 0x5e2   :  { %12656 = vmatprep.mubr.msk.f32.mxu1 %vm13307_vm2, %v21755_v8  ;;  %v12966_v41 = vpop.permute.xlu0 %12965 }
 0x5e3   :  { %v12967_v9 = vunpack.i.l.bf16 %v12966_v41  ;;  %v12968_v39 = vunpack.i.h.bf16 %v12966_v41 }
 0x5e5   :  { %12657 = vmatmul.mubr.f32.gmra.mxu1 %v5762_v15  ;;  %v5713_v52 = vsel %vm4556_vm6, %v5664_v50, %v12967_v9  ;;  %v5714_v30 = vsel %vm4556_vm6, %v5665_v35, %v12968_v39 }
 0x5e6   :  { %12659 = vmatprep.mubr.msk.f32.mxu1 %vm13307_vm2, %v21755_v8  ;;  %v12976_v21 = vpop.permute.xlu0 %12975 }
 0x5e7   :  { %v12977_v17 = vunpack.i.l.bf16 %v12976_v21  ;;  %v12978_v44 = vunpack.i.h.bf16 %v12976_v21 }
 0x5e9   :  { %v12971_v16 = vpop.permute.xlu1 %12970  ;;  %v5666_v24 = vsel %vm4425_vm5, %v18727_v14, %v12977_v17  ;;  %v5667_v49 = vsel %vm4425_vm5, %v18742_v0, %v12978_v44 }
 0x5ea   :  { %v12972_v48 = vunpack.i.l.bf16 %v12971_v16  ;;  %v12973_v33 = vunpack.i.h.bf16 %v12971_v16 }
 0x5ec   :  { %v5763_v59 = vsel %vm5730_vm7, %v5713_v52, %v12972_v48  ;;  %v5764_v38 = vsel %vm5730_vm7, %v5714_v30, %v12973_v33 }
 0x5ed   :  { %v5869_v19 = vpop.f32.mrf.mxu1  ;;  %12660 = vmatmul.mubr.f32.gmra.mxu1 %v5763_v59 }
 0x5ee   :  { %v5870_v31 = vadd.f32 %v19056_v28, %v5869_v19  ;;  %12662 = vmatprep.mubr.msk.f32.mxu1 %vm13307_vm2, %v21755_v8  ;;  %v12981_v58 = vpop.permute.xlu1 %12980 }
 0x5ef   :  { %v12565_v4 = vpop.f32.mrf.mxu1  ;;  %v12982_v40 = vunpack.i.l.bf16 %v12981_v58  ;;  %v12983_v32 = vunpack.i.h.bf16 %v12981_v58 }
 0x5f0   :  { %v6089_v25 = vmax.f32 %v5870_v31, 0.0 }
 0x5f1   :  { %v5874_v11 = vpop.f32.mrf.mxu1  ;;  %12663 = vmatmul.mubr.f32.gmra.mxu1 %v5764_v38  ;;  %v5715_v13 = vsel %vm4556_vm6, %v5666_v24, %v12982_v40  ;;  %v5716_v43 = vsel %vm4556_vm6, %v5667_v49, %v12983_v32 }
 0x5f2   :  { %6114 = vst.msk [vmem:[#allocation3] sm:$0xff] %vm4556_vm6, %v6089_v25  ;;  %v5875_v6 = vadd.f32 %v19056_v28, %v5874_v11  ;;  %12665 = vmatprep.mubr.msk.f32.mxu1 %vm13307_vm2, %v21755_v8  ;;  %v12991_v14 = vpop.permute.xlu1 %12990 }
 0x5f3   :  { %v12568_v10 = vpop.f32.mrf.mxu1  ;;  %v12992_v56 = vunpack.i.l.bf16 %v12991_v14  ;;  %v12993_v20 = vunpack.i.h.bf16 %v12991_v14 }
 0x5f4   :  { %v6090_v5 = vmax.f32 %v5875_v6, 0.0 }
 0x5f5   :  { %v12986_v46 = vpop.permute.xlu0 %12985  ;;  %v5668_v9 = vsel %vm4425_vm5, %v18758_v3, %v12992_v56  ;;  %v5669_v33 = vsel %vm4425_vm5, %v18777_v23, %v12993_v20 }
 0x5f6   :  { %v12987_v47 = vunpack.i.l.bf16 %v12986_v46  ;;  %6116 = vrot.lane.b32.xlu1 %v6090_v5, %s13310_s25  ;;  %v12988_v42 = vunpack.i.h.bf16 %v12986_v46 }
 0x5f8   :  { %v5765_v54 = vsel %vm5730_vm7, %v5715_v13, %v12987_v47  ;;  %v5766_v12 = vsel %vm5730_vm7, %v5716_v43, %v12988_v42 }
 0x5f9   :  { %v5879_v29 = vpop.f32.mrf.mxu1  ;;  %12666 = vmatmul.mubr.f32.gmra.mxu1 %v5765_v54 }
 0x5fa   :  { %v5880_v7 = vadd.f32 %v19056_v28, %v5879_v29  ;;  %12668 = vmatprep.mubr.msk.f32.mxu1 %vm13307_vm2, %v21755_v8  ;;  %v12996_v55 = vpop.permute.xlu0 %12995 }
 0x5fb   :  { %v12571_v62 = vpop.f32.mrf.mxu1  ;;  %v12997_v45 = vunpack.i.l.bf16 %v12996_v55  ;;  %v12998_v61 = vunpack.i.h.bf16 %v12996_v55 }
 0x5fc   :  { %v6091_v60 = vmax.f32 %v5880_v7, 0.0 }
 0x5fd   :  { %v5884_v27 = vpop.f32.mrf.mxu1  ;;  %12669 = vmatmul.mubr.f32.gmra.mxu1 %v5766_v12  ;;  %v5717_v50 = vsel %vm4556_vm6, %v5668_v9, %v12997_v45  ;;  %v5718_v35 = vsel %vm4556_vm6, %v5669_v33, %v12998_v61 }
 0x5fe   :  { %6121 = vst.msk [vmem:[#allocation3 + $0x8] sm:$0xff] %vm4556_vm6, %v6091_v60  ;;  %v5885_v0 = vadd.f32 %v19056_v28, %v5884_v27  ;;  %12671 = vmatprep.mubr.msk.f32.mxu1 %vm13307_vm2, %v21755_v8  ;;  %v13006_v3 = vpop.permute.xlu0 %13005 }
 0x5ff   :  { %v12574_v18 = vpop.f32.mrf.mxu1  ;;  %v13007_v25 = vunpack.i.l.bf16 %v13006_v3  ;;  %v13008_v11 = vunpack.i.h.bf16 %v13006_v3 }
 0x600   :  { %v6092_v41 = vmax.f32 %v5885_v0, 0.0 }
 0x601   :  { %v13001_v15 = vpop.permute.xlu1 %13000  ;;  %v5670_v17 = vsel %vm4425_vm5, %v18792_v63, %v13007_v25  ;;  %v5671_v47 = vsel %vm4425_vm5, %v18806_v37, %v13008_v11 }
 0x602   :  { %v13002_v16 = vunpack.i.l.bf16 %v13001_v15  ;;  %6123 = vrot.lane.b32.xlu0 %v6092_v41, %s13310_s25  ;;  %v13003_v48 = vunpack.i.h.bf16 %v13001_v15 }
 0x604   :  { %v5767_v39 = vsel %vm5730_vm7, %v5717_v50, %v13002_v16  ;;  %v5768_v4 = vsel %vm5730_vm7, %v5718_v35, %v13003_v48 }
 0x605   :  { %v5889_v52 = vpop.f32.mrf.mxu1  ;;  %12672 = vmatmul.mubr.f32.gmra.mxu1 %v5767_v39 }
 0x606   :  { %v5890_v59 = vadd.f32 %v19056_v28, %v5889_v52  ;;  %12674 = vmatprep.mubr.msk.f32.mxu1 %vm13307_vm2, %v21755_v8  ;;  %v13011_v21 = vpop.permute.xlu1 %13010 }
 0x607   :  { %v12577_v19 = vpop.f32.mrf.mxu1  ;;  %v13012_v23 = vunpack.i.l.bf16 %v13011_v21  ;;  %v13013_v40 = vunpack.i.h.bf16 %v13011_v21 }
 0x608   :  { %v6093_v31 = vmax.f32 %v5890_v59, 0.0 }
 0x609   :  { %v5894_v30 = vpop.f32.mrf.mxu1  ;;  %12675 = vmatmul.mubr.f32.gmra.mxu1 %v5768_v4  ;;  %v5719_v10 = vsel %vm4556_vm6, %v5670_v17, %v13012_v23  ;;  %v5720_v63 = vsel %vm4556_vm6, %v5671_v47, %v13013_v40 }
 0x60a   :  { %6127 = vst.msk [vmem:[#allocation3 + $0x10] sm:$0xff] %vm4556_vm6, %v6093_v31  ;;  %12677 = vmatprep.mubr.msk.f32.mxu1 %vm13307_vm2, %v21755_v8  ;;  %v13021_v5 = vpop.permute.xlu1 %13020 }
 0x60b   :  { %v12580_v58 = vpop.f32.mrf.mxu1  ;;  %v13022_v13 = vunpack.i.l.bf16 %v13021_v5  ;;  %v13023_v37 = vunpack.i.h.bf16 %v13021_v5 }
 0x60d   :  { %v13016_v38 = vpop.permute.xlu0 %13015  ;;  %v5672_v62 = vsel %vm4425_vm5, %v18821_v2, %v13022_v13  ;;  %v5673_v18 = vsel %vm4425_vm5, %v18835_v1, %v13023_v37 }
 0x60e   :  { %v13017_v6 = vunpack.i.l.bf16 %v13016_v38  ;;  %v13018_v46 = vunpack.i.h.bf16 %v13016_v38 }
 0x610   :  { %v5769_v44 = vsel %vm5730_vm7, %v5719_v10, %v13017_v6  ;;  %v5770_v29 = vsel %vm5730_vm7, %v5720_v63, %v13018_v46 }
 0x611   :  { %v5898_v24 = vpop.f32.mrf.mxu1  ;;  %12678 = vmatmul.mubr.f32.gmra.mxu1 %v5769_v44 }
 0x612   :  { %v13026_v32 = vpop.permute.xlu0 %13025  ;;  %12680 = vmatprep.mubr.msk.f32.mxu1 %vm13307_vm2, %v21755_v8 }
 0x613   :  { %v12583_v42 = vpop.f32.mrf.mxu1  ;;  %v13027_v54 = vunpack.i.l.bf16 %v13026_v32  ;;  %v13028_v55 = vunpack.i.h.bf16 %v13026_v32 }
 0x615   :  { %v5902_v49 = vpop.f32.mrf.mxu1  ;;  %12681 = vmatmul.mubr.f32.gmra.mxu1 %v5770_v29  ;;  %v5721_v27 = vsel %vm4556_vm6, %v5672_v62, %v13027_v54  ;;  %v5722_v2 = vsel %vm4556_vm6, %v5673_v18, %v13028_v55 }
 0x616   :  { %v5903_v7 = vadd.f32 %v19056_v28, %v5902_v49  ;;  %v13031_v14 = vpop.permute.xlu1 %13030  ;;  %12683 = vmatprep.mubr.msk.f32.mxu1 %vm13307_vm2, %v21755_v8  ;;  %v13036_v45 = vpop.permute.xlu0 %13035 }
 0x617   :  { %v13032_v43 = vunpack.i.l.bf16 %v13031_v14  ;;  %v12586_v60 = vpop.f32.mrf.mxu1  ;;  %v13033_v56 = vunpack.i.h.bf16 %v13031_v14  ;;  %v13037_v15 = vunpack.i.l.bf16 %v13036_v45  ;;  %v13038_v39 = vunpack.i.h.bf16 %v13036_v45 }
 0x618   :  { %v6094_v12 = vmax.f32 %v5903_v7, 0.0 }
 0x619   :  { %v5771_v0 = vsel %vm5730_vm7, %v5721_v27, %v13032_v43  ;;  %v5772_v9 = vsel %vm5730_vm7, %v5722_v2, %v13033_v56  ;;  %v5674_v52 = vsel %vm4425_vm5, %v18850_v34, %v13037_v15  ;;  %v5675_v34 = vsel %vm4425_vm5, %v18864_v51, %v13038_v39 }
 0x61a   :  { %12684 = vmatmul.mubr.f32.gmra.mxu1 %v5771_v0  ;;  %6129 = vrot.lane.b32.xlu1 %v6094_v12, %s13310_s25 }
 0x61b   :  { %v13041_v41 = vpop.permute.xlu1 %13040  ;;  %12686 = vmatprep.mubr.msk.f32.mxu1 %vm13307_vm2, %v21755_v8 }
 0x61c   :  { %v13042_v16 = vunpack.i.l.bf16 %v13041_v41  ;;  %v13043_v3 = vunpack.i.h.bf16 %v13041_v41 }
 0x61d   :  { %v5907_v20 = vpop.f32.mrf.mxu1 }
 0x61e   :  { %v5908_v61 = vadd.f32 %v19056_v28, %v5907_v20  ;;  %12687 = vmatmul.mubr.f32.gmra.mxu1 %v5772_v9  ;;  %v5723_v31 = vsel %vm4556_vm6, %v5674_v52, %v13042_v16  ;;  %v5724_v11 = vsel %vm4556_vm6, %v5675_v34, %v13043_v3 }
 0x61f   :  { %v12589_v50 = vpop.f32.mrf.mxu1  ;;  %12689 = vmatprep.mubr.msk.f32.mxu1 %vm13307_vm2, %v21755_v8  ;;  %v13051_v19 = vpop.permute.xlu1 %13050 }
 0x620   :  { %v6095_v48 = vmax.f32 %v5908_v61, 0.0  ;;  %v13046_v1 = vpop.permute.xlu0 %13045  ;;  %v13052_v58 = vunpack.i.l.bf16 %v13051_v19  ;;  %v13053_v10 = vunpack.i.h.bf16 %v13051_v19 }
 0x621   :  { %v13047_v33 = vunpack.i.l.bf16 %v13046_v1  ;;  %v5912_v59 = vpop.f32.mrf.mxu1  ;;  %v13048_v21 = vunpack.i.h.bf16 %v13046_v1 }
 0x622   :  { %6133 = vst.msk [vmem:[#allocation3 + $0x18] sm:$0xff] %vm4556_vm6, %v6095_v48  ;;  %v5913_v35 = vadd.f32 %v19056_v28, %v5912_v59  ;;  %v5676_v5 = vsel %vm4425_vm5, %v18879_v36, %v13052_v58  ;;  %v5677_v36 = vsel %vm4425_vm5, %v18893_v57, %v13053_v10 }
 0x623   :  { %v12592_v4 = vpop.f32.mrf.mxu1  ;;  %v5773_v30 = vsel %vm5730_vm7, %v5723_v31, %v13047_v33  ;;  %v5774_v17 = vsel %vm5730_vm7, %v5724_v11, %v13048_v21 }
 0x624   :  { %v6096_v25 = vmax.f32 %v5913_v35, 0.0  ;;  %12690 = vmatmul.mubr.f32.gmra.mxu1 %v5773_v30  ;;  %v13056_v23 = vpop.permute.xlu0 %13055 }
 0x625   :  { %12692 = vmatprep.mubr.msk.f32.mxu1 %vm13307_vm2, %v21755_v8  ;;  %v13057_v38 = vunpack.i.l.bf16 %v13056_v23  ;;  %v13058_v44 = vunpack.i.h.bf16 %v13056_v23 }
 0x626   :  { %6135 = vrot.lane.b32.xlu0 %v6096_v25, %s13310_s25 }
 0x627   :  { %v5725_v47 = vsel %vm4556_vm6, %v5676_v5, %v13057_v38  ;;  %v5726_v62 = vsel %vm4556_vm6, %v5677_v36, %v13058_v44 }
 0x628   :  { %12693 = vmatmul.mubr.f32.gmra.mxu1 %v5774_v17  ;;  %v13066_v6 = vpop.permute.xlu0 %13065  ;;  %v13061_v40 = vpop.permute.xlu1 %13060 }
 0x629   :  { %v13062_v46 = vunpack.i.l.bf16 %v13061_v40  ;;  %v5917_v51 = vpop.f32.mrf.mxu1  ;;  %12695 = vmatprep.mubr.msk.f32.mxu1 %vm13307_vm2, %v21755_v8  ;;  %v13067_v32 = vunpack.i.l.bf16 %v13066_v6  ;;  %v13063_v13 = vunpack.i.h.bf16 %v13061_v40  ;;  %v13068_v43 = vunpack.i.h.bf16 %v13066_v6 }
 0x62a   :  { %v5918_v24 = vadd.f32 %v19056_v28, %v5917_v51 }
 0x62b   :  { %v12595_v42 = vpop.f32.mrf.mxu1  ;;  %v5775_v63 = vsel %vm5730_vm7, %v5725_v47, %v13062_v46  ;;  %v5678_v60 = vsel %vm4425_vm5, %v18908_v53, %v13067_v32  ;;  %v5776_v12 = vsel %vm5730_vm7, %v5726_v62, %v13063_v13  ;;  %v5679_v18 = vsel %vm4425_vm5, %v18922_v22, %v13068_v43 }
 0x62c   :  { %v6097_v54 = vmax.f32 %v5918_v24, 0.0  ;;  %12696 = vmatmul.mubr.f32.gmra.mxu1 %v5775_v63  ;;  %v5578_v29 = vpop.permute.xlu0 %5577  ;;  %v13071_v49 = vpop.permute.xlu1 %13070 }
 0x62d   :  { %v13072_v7 = vunpack.i.l.bf16 %v13071_v49  ;;  %v5922_v14 = vpop.f32.mrf.mxu1  ;;  %12698 = vmatprep.mubr.msk.f32.mxu1 %vm13307_vm2, %v21755_v8  ;;  %v13073_v27 = vunpack.i.h.bf16 %v13071_v49 }
 0x62e   :  { %6139 = vst.msk [vmem:[#allocation3 + $0x20] sm:$0xff] %vm4556_vm6, %v6097_v54  ;;  %v5923_v37 = vadd.f32 %v19056_v28, %v5922_v14 }
 0x62f   :  { %v12598_v55 = vpop.f32.mrf.mxu1  ;;  %v5727_v0 = vsel %vm4556_vm6, %v5678_v60, %v13072_v7  ;;  %v5728_v41 = vsel %vm4556_vm6, %v5679_v18, %v13073_v27 }
 0x630   :  { %v6098_v57 = vmax.f32 %v5923_v37, 0.0  ;;  %12699 = vmatmul.mubr.f32.gmra.mxu1 %v5776_v12  ;;  %v5580_v56 = vpop.permute.xlu1 %5579  ;;  %v5281_v45 = vpop.permute.xlu0 %5280  ;;  %v5777_v53 = vsel %vm5730_vm7, %v5727_v0, %v5578_v29 }
 0x631   :  { %12701 = vmatprep.mubr.msk.f32.mxu1 %vm13307_vm2, %v21755_v8  ;;  %v5680_v20 = vsel %vm4425_vm5, %v18937_v26, %v5281_v45  ;;  %v5778_v9 = vsel %vm5730_vm7, %v5728_v41, %v5580_v56 }
 0x632   :  { %6141 = vrot.lane.b32.xlu1 %v6098_v57, %s13310_s25 }
 0x634   :  { %12702 = vmatmul.mubr.f32.gmra.mxu1 %v5777_v53  ;;  %v5434_v2 = vpop.permute.xlu1 %5433 }
 0x635   :  { %v5927_v15 = vpop.f32.mrf.mxu1  ;;  %12704 = vmatprep.mubr.msk.f32.mxu1 %vm13307_vm2, %v21755_v8  ;;  %v5729_v61 = vsel %vm4556_vm6, %v5680_v20, %v5434_v2  ;;  %v5582_v50 = vpop.permute.xlu0 %5581 }
 0x636   :  { %v5779_v48 = vsel %vm5730_vm7, %v5729_v61, %v5582_v50 }
 0x637   :  { %v12601_v16 = vpop.f32.mrf.mxu1 }
 0x638   :  { %12705 = vmatmul.mubr.f32.gmra.mxu1 %v5778_v9 }
 0x639   :  { %v5931_v22 = vpop.f32.mrf.mxu1  ;;  %12707 = vmatprep.mubr.msk.f32.mxu1 %vm13307_vm2, %v21755_v8 }
 0x63b   :  { %v12604_v1 = vpop.f32.mrf.mxu1 }
 0x63c   :  { %12708 = vmatmul.mubr.f32.gmra.mxu1 %v5779_v48 }
 0x641   :  { %v5935_v39 = vpop.f32.mrf.mxu1 }
 0x642   :  { %v5936_v52 = vadd.f32 %v19056_v28, %v5935_v39 }
 0x643   :  { %v12607_v33 = vpop.f32.mrf.mxu1 }
 0x644   :  { %v6099_v26 = vmax.f32 %v5936_v52, 0.0 }
 0x645   :  { %v5940_v59 = vpop.f32.mrf.mxu1 }
 0x646   :  { %6145 = vst.msk [vmem:[#allocation3 + $0x28] sm:$0xff] %vm4556_vm6, %v6099_v26  ;;  %v5941_v3 = vadd.f32 %v19056_v28, %v5940_v59 }
 0x647   :  { %v12610_v19 = vpop.f32.mrf.mxu1 }
 0x648   :  { %v6100_v35 = vmax.f32 %v5941_v3, 0.0 }
 0x64a   :  { %6147 = vrot.lane.b32.xlu0 %v6100_v35, %s13310_s25 }
 0x64d   :  { %v5945_v31 = vpop.f32.mrf.mxu1 }
 0x64e   :  { %v5946_v8 = vadd.f32 %v19056_v28, %v5945_v31 }
 0x64f   :  { %v12613_v21 = vpop.f32.mrf.mxu1 }
 0x650   :  { %v6101_v4 = vmax.f32 %v5946_v8, 0.0 }
 0x651   :  { %v5950_v30 = vpop.f32.mrf.mxu1 }
 0x652   :  { %6151 = vst.msk [vmem:[#allocation3 + $0x30] sm:$0xff] %vm4556_vm6, %v6101_v4  ;;  %v5951_v25 = vadd.f32 %v19056_v28, %v5950_v30 }
 0x653   :  { %v12616_v23 = vpop.f32.mrf.mxu1 }
 0x654   :  { %v6102_v34 = vmax.f32 %v5951_v25, 0.0 }
 0x656   :  { %6153 = vrot.lane.b32.xlu1 %v6102_v34, %s13310_s25 }
 0x659   :  { %v5955_v58 = vpop.f32.mrf.mxu1 }
 0x65a   :  { %v5956_v38 = vadd.f32 %v19056_v28, %v5955_v58 }
 0x65b   :  { %v12619_v11 = vpop.f32.mrf.mxu1 }
 0x65c   :  { %v6103_v17 = vmax.f32 %v5956_v38, 0.0 }
 0x65d   :  { %v5960_v6 = vpop.f32.mrf.mxu1 }
 0x65e   :  { %6157 = vst.msk [vmem:[#allocation3 + $0x38] sm:$0xff] %vm4556_vm6, %v6103_v17 }
 0x65f   :  { %v12622_v40 = vpop.f32.mrf.mxu1 }
 0x665   :  { %v5964_v10 = vpop.f32.mrf.mxu1 }
 0x667   :  { %v12625_v5 = vpop.f32.mrf.mxu1 }
 0x668   :  { %v6117_v46 = vpop.permute.xlu1 %6116 }
 0x669   :  { %6120 = vst.msk [vmem:[#allocation3] sm:$0xff] %vm6119_vm8, %v6117_v46  ;;  %v5968_v51 = vpop.f32.mrf.mxu1 }
 0x66a   :  { %v5969_v44 = vadd.f32 %v19056_v28, %v5968_v51 }
 0x66b   :  { %v12628_v24 = vpop.f32.mrf.mxu1 }
 0x66c   :  { %v6104_v47 = vmax.f32 %v5969_v44, 0.0 }
 0x66e   :  { %6159 = vrot.lane.b32.xlu0 %v6104_v47, %s13310_s25 }
 0x671   :  { %v5973_v32 = vpop.f32.mrf.mxu1 }
 0x672   :  { %v5974_v13 = vadd.f32 %v19056_v28, %v5973_v32 }
 0x673   :  { %v12631_v42 = vpop.f32.mrf.mxu1 }
 0x674   :  { %v6105_v63 = vmax.f32 %v5974_v13, 0.0  ;;  %v6124_v54 = vpop.permute.xlu0 %6123 }
 0x675   :  { %6126 = vst.msk [vmem:[#allocation3 + $0x8] sm:$0xff] %vm6119_vm8, %v6124_v54  ;;  %v5978_v29 = vpop.f32.mrf.mxu1 }
 0x676   :  { %6163 = vst.msk [vmem:[#allocation3 + $0x40] sm:$0xff] %vm4556_vm6, %v6105_v63  ;;  %v5979_v49 = vadd.f32 %v19056_v28, %v5978_v29 }
 0x677   :  { %v12634_v36 = vpop.f32.mrf.mxu1 }
 0x678   :  { %v6106_v7 = vmax.f32 %v5979_v49, 0.0 }
 0x67a   :  { %6165 = vrot.lane.b32.xlu1 %v6106_v7, %s13310_s25 }
 0x67d   :  { %v5983_v14 = vpop.f32.mrf.mxu1 }
 0x67e   :  { %v5984_v37 = vadd.f32 %v19056_v28, %v5983_v14 }
 0x67f   :  { %v12637_v62 = vpop.f32.mrf.mxu1 }
 0x680   :  { %v6107_v43 = vmax.f32 %v5984_v37, 0.0 }
 0x681   :  { %v5988_v60 = vpop.f32.mrf.mxu1 }
 0x682   :  { %6169 = vst.msk [vmem:[#allocation3 + $0x48] sm:$0xff] %vm4556_vm6, %v6107_v43  ;;  %v5989_v55 = vadd.f32 %v19056_v28, %v5988_v60 }
 0x683   :  { %v12640_v12 = vpop.f32.mrf.mxu1 }
 0x684   :  { %v6108_v27 = vmax.f32 %v5989_v55, 0.0 }
 0x686   :  { %6171 = vrot.lane.b32.xlu0 %v6108_v27, %s13310_s25 }
 0x689   :  { %v5993_v57 = vpop.f32.mrf.mxu1 }
 0x68b   :  { %v12643_v56 = vpop.f32.mrf.mxu1 }
 0x68c   :  { %v6130_v0 = vpop.permute.xlu1 %6129 }
 0x68d   :  { %6132 = vst.msk [vmem:[#allocation3 + $0x10] sm:$0xff] %vm6119_vm8, %v6130_v0  ;;  %v5997_v45 = vpop.f32.mrf.mxu1  ;;  %v21778_v0 = vld [vmem:[#allocation38_spill] sm:$0xff] }
 0x68e   :  { %v21779_v45 = vld [vmem:[#allocation36_spill] sm:$0xff] }
 0x68f   :  { %v12646_v18 = vpop.f32.mrf.mxu1 }
 0x690   :  { %v10977_v18 = vcombine.high %v21779_v45, %v21778_v0 }
 0x695   :  { %v6001_v53 = vpop.f32.mrf.mxu1 }
 0x696   :  { %v6002_v41 = vadd.f32 %v19056_v28, %v6001_v53  ;;  %v10976_v53 = vcombine.low %v21779_v45, %v21778_v0 }
 0x697   :  { %v12649_v2 = vpop.f32.mrf.mxu1 }
 0x698   :  { %v6109_v15 = vmax.f32 %v6002_v41, 0.0  ;;  %v6136_v20 = vpop.permute.xlu0 %6135  ;;  %v21780_v41 = vld [vmem:[#allocation34_spill] sm:$0xff]  ;;  %v21781_v2 = vld [vmem:[#allocation32_spill] sm:$0xff] }
 0x699   :  { %6138 = vst.msk [vmem:[#allocation3 + $0x18] sm:$0xff] %vm6119_vm8, %v6136_v20  ;;  %v6006_v9 = vpop.f32.mrf.mxu1 }
 0x69a   :  { %6175 = vst.msk [vmem:[#allocation3 + $0x50] sm:$0xff] %vm4556_vm6, %v6109_v15  ;;  %v6007_v16 = vadd.f32 %v19056_v28, %v6006_v9  ;;  %v10973_v15 = vcombine.high %v21781_v2, %v21780_v41 }
 0x69b   :  { %v12652_v61 = vpop.f32.mrf.mxu1 }
 0x69c   :  { %v6110_v50 = vmax.f32 %v6007_v16, 0.0 }
 0x69e   :  { %6177 = vrot.lane.b32.xlu1 %v6110_v50, %s13310_s25 }
 0x6a1   :  { %v6011_v22 = vpop.f32.mrf.mxu1 }
 0x6a2   :  { %v6012_v48 = vadd.f32 %v19056_v28, %v6011_v22 }
 0x6a3   :  { %v12655_v1 = vpop.f32.mrf.mxu1 }
 0x6a4   :  { %v6111_v39 = vmax.f32 %v6012_v48, 0.0  ;;  %v6142_v52 = vpop.permute.xlu1 %6141 }
 0x6a5   :  { %6144 = vst.msk [vmem:[#allocation3 + $0x20] sm:$0xff] %vm6119_vm8, %v6142_v52  ;;  %v6016_v33 = vpop.f32.mrf.mxu1 }
 0x6a6   :  { %6181 = vst.msk [vmem:[#allocation3 + $0x58] sm:$0xff] %vm4556_vm6, %v6111_v39  ;;  %v6017_v26 = vadd.f32 %v19056_v28, %v6016_v33 }
 0x6a7   :  { %v12658_v59 = vpop.f32.mrf.mxu1 }
 0x6a8   :  { %v6112_v3 = vmax.f32 %v6017_v26, 0.0 }
 0x6aa   :  { %6183 = vrot.lane.b32.xlu0 %v6112_v3, %s13310_s25 }
 0x6ad   :  { %v6021_v19 = vpop.f32.mrf.mxu1 }
 0x6ae   :  { %v6022_v35 = vadd.f32 %v19056_v28, %v6021_v19 }
 0x6af   :  { %v12661_v31 = vpop.f32.mrf.mxu1 }
 0x6b0   :  { %v6113_v8 = vmax.f32 %v6022_v35, 0.0 }
 0x6b1   :  { %v6026_v21 = vpop.f32.mrf.mxu1 }
 0x6b2   :  { %6187 = vst.msk [vmem:[#allocation3 + $0x60] sm:$0xff] %vm4556_vm6, %v6113_v8 }
 0x6b3   :  { %v12664_v4 = vpop.f32.mrf.mxu1 }
 0x6b9   :  { %v6030_v30 = vpop.f32.mrf.mxu1 }
 0x6bb   :  { %v12667_v25 = vpop.f32.mrf.mxu1 }
 0x6bc   :  { %v6148_v23 = vpop.permute.xlu0 %6147 }
 0x6bd   :  { %6150 = vst.msk [vmem:[#allocation3 + $0x28] sm:$0xff] %vm6119_vm8, %v6148_v23  ;;  %v6034_v34 = vpop.f32.mrf.mxu1 }
 0x6bf   :  { %v12670_v58 = vpop.f32.mrf.mxu1 }
 0x6c5   :  { %v6038_v38 = vpop.f32.mrf.mxu1 }
 0x6c7   :  { %v12673_v11 = vpop.f32.mrf.mxu1 }
 0x6c8   :  { %v6154_v17 = vpop.permute.xlu1 %6153 }
 0x6c9   :  { %6156 = vst.msk [vmem:[#allocation3 + $0x30] sm:$0xff] %vm6119_vm8, %v6154_v17  ;;  %v6042_v6 = vpop.f32.mrf.mxu1 }
 0x6cb   :  { %v12676_v28 = vpop.f32.mrf.mxu1 }
 0x6d1   :  { %v6046_v40 = vpop.f32.mrf.mxu1 }
 0x6d3   :  { %v12679_v10 = vpop.f32.mrf.mxu1 }
 0x6d5   :  { %v6050_v5 = vpop.f32.mrf.mxu1 }
 0x6d7   :  { %v12682_v46 = vpop.f32.mrf.mxu1 }
 0x6da   :  { %v6054_v51 = vpop.f32.mrf.mxu1 }
 0x6dc   :  { %v12685_v44 = vpop.f32.mrf.mxu1 }
 0x6de   :  { %v6058_v24 = vpop.f32.mrf.mxu1 }
 0x6e0   :  { %v6160_v47 = vpop.permute.xlu0 %6159  ;;  %v12688_v32 = vpop.f32.mrf.mxu1 }
 0x6e1   :  { %6162 = vst.msk [vmem:[#allocation3 + $0x38] sm:$0xff] %vm6119_vm8, %v6160_v47 }
 0x6e4   :  { %v6062_v13 = vpop.f32.mrf.mxu1 }
 0x6e6   :  { %v12691_v42 = vpop.f32.mrf.mxu1 }
 0x6e8   :  { %v6066_v63 = vpop.f32.mrf.mxu1 }
 0x6ea   :  { %v12694_v54 = vpop.f32.mrf.mxu1 }
 0x6ec   :  { %v6166_v29 = vpop.permute.xlu1 %6165  ;;  %v6070_v49 = vpop.f32.mrf.mxu1 }
 0x6ed   :  { %6168 = vst.msk [vmem:[#allocation3 + $0x40] sm:$0xff] %vm6119_vm8, %v6166_v29 }
 0x6ee   :  { %v12697_v36 = vpop.f32.mrf.mxu1 }
 0x6f0   :  { %v6074_v7 = vpop.f32.mrf.mxu1 }
 0x6f2   :  { %v12700_v14 = vpop.f32.mrf.mxu1 }
 0x6f4   :  { %v6078_v37 = vpop.f32.mrf.mxu1 }
 0x6f6   :  { %v12703_v62 = vpop.f32.mrf.mxu1 }
 0x6f8   :  { %v6172_v43 = vpop.permute.xlu0 %6171  ;;  %v6082_v60 = vpop.f32.mrf.mxu1 }
 0x6f9   :  { %6174 = vst.msk [vmem:[#allocation3 + $0x48] sm:$0xff] %vm6119_vm8, %v6172_v43 }
 0x6fa   :  { %v12706_v55 = vpop.f32.mrf.mxu1 }
 0x6fc   :  { %v6086_v12 = vpop.f32.mrf.mxu1 }
 0x6fe   :  { %v12709_v27 = vpop.f32.mrf.mxu1 }
 0x710   :  { %v6178_v57 = vpop.permute.xlu1 %6177 }
 0x711   :  { %6180 = vst.msk [vmem:[#allocation3 + $0x50] sm:$0xff] %vm6119_vm8, %v6178_v57 }
 0x71c   :  { %v6184_v56 = vpop.permute.xlu0 %6183 }
 0x71d   :  { %6186 = vst.msk [vmem:[#allocation3 + $0x58] sm:$0xff] %vm6119_vm8, %v6184_v56 }
 0x71e   :  { %13303 = dma.done.wait [#allocation4], 51200 }
 0x71f   :  { %13304 = vsyncadd [#allocation4], 4294916096  ;;  %8643 = vmatprep.subr.bf16.mxu1 %v10977_v18  ;;  %v10972_v20 = vcombine.low %v21781_v2, %v21780_v41  ;;  %v21782_v9 = vld [vmem:[#allocation30_spill] sm:$0xff]  ;;  %v21783_v16 = vld [vmem:[#allocation28_spill] sm:$0xff]  ;;  %vm10594_vm9 = vcmask 31744   ;;  %vm10603_vm10 = vcmask 39936  }
 0x720   :  { %8644 = vmatpush1.bf16.msra.mxu1 %v10976_v53  ;;  %v10969_v61 = vcombine.high %v21783_v16, %v21782_v9  ;;  %v21784_v50 = vld [vmem:[#allocation166_spill] sm:$0xff]  ;;  %v21785_v22 = vld [vmem:[#allocation164_spill] sm:$0xff]  ;;  %v10968_v26 = vcombine.low %v21783_v16, %v21782_v9  ;;  %vm10605_vm11 = vcmask 48128   ;;  %vm10607_vm12 = vcmask 64512  }
 0x721   :  { %8645 = vmatprep.subr.bf16.mxu1 %v10973_v15  ;;  %v11105_v48 = vcombine.high %v21785_v22, %v21784_v50  ;;  %v11104_v1 = vcombine.low %v21785_v22, %v21784_v50  ;;  %v21786_v39 = vld [vmem:[#allocation162_spill] sm:$0xff]  ;;  %v21787_v52 = vld [vmem:[#allocation160_spill] sm:$0xff] }
 0x722   :  { %v11101_v33 = vcombine.high %v21787_v52, %v21786_v39  ;;  %v21788_v59 = vld [vmem:[#allocation26_spill] sm:$0xff]  ;;  %v21789_v3 = vld [vmem:[#allocation24_spill] sm:$0xff]  ;;  %v11100_v35 = vcombine.low %v21787_v52, %v21786_v39 }
 0x723   :  { %8725 = vmatprep.subr.bf16.mxu0 %v11105_v48  ;;  %v10965_v19 = vcombine.high %v21789_v3, %v21788_v59  ;;  %v6193_v31 = vld [vmem:[#allocation3 + $0x8] sm:$0xff]  ;;  %v21790_v8 = vld [vmem:[#allocation158_spill] sm:$0xff]  ;;  %v10964_v30 = vcombine.low %v21789_v3, %v21788_v59 }
 0x724   :  { %8646 = vmatpush1.bf16.msra.mxu1 %v10972_v20  ;;  %8726 = vmatpush1.bf16.msra.mxu0 %v11104_v1  ;;  %v21791_v21 = vld [vmem:[#allocation156_spill] sm:$0xff]  ;;  %v19244_v25 = vpack.c.bf16 %v6193_v31, %v6193_v31  ;;  %v21792_v23 = vld [vmem:[#allocation22_spill] sm:$0xff] }
 0x725   :  { %8647 = vmatprep.subr.bf16.mxu1 %v10969_v61  ;;  %8727 = vmatprep.subr.bf16.mxu0 %v11101_v33  ;;  %v11097_v4 = vcombine.high %v21791_v21, %v21790_v8  ;;  %v21793_v34 = vld [vmem:[#allocation20_spill] sm:$0xff]  ;;  %v11096_v38 = vcombine.low %v21791_v21, %v21790_v8  ;;  %v21794_v11 = vld [vmem:[#allocation154_spill] sm:$0xff] }
 0x726   :  { %v10961_v58 = vcombine.high %v21793_v34, %v21792_v23  ;;  %v21795_v17 = vld [vmem:[#allocation152_spill] sm:$0xff]  ;;  %8675 = vmatprep.mubr.bf16.mxu1 %v19244_v25  ;;  %v10960_v28 = vcombine.low %v21793_v34, %v21792_v23  ;;  %v21796_v40 = vld [vmem:[#allocation18_spill] sm:$0xff] }
 0x727   :  { %v11093_v6 = vcombine.high %v21795_v17, %v21794_v11  ;;  %v21797_v10 = vld [vmem:[#allocation16_spill] sm:$0xff]  ;;  %v11092_v46 = vcombine.low %v21795_v17, %v21794_v11  ;;  %v21798_v51 = vld [vmem:[#allocation150_spill] sm:$0xff] }
 0x728   :  { %8648 = vmatpush1.bf16.msra.mxu1 %v10968_v26  ;;  %8728 = vmatpush1.bf16.msra.mxu0 %v11100_v35  ;;  %v10957_v5 = vcombine.high %v21797_v10, %v21796_v40  ;;  %v21799_v44 = vld [vmem:[#allocation148_spill] sm:$0xff]  ;;  %v10956_v32 = vcombine.low %v21797_v10, %v21796_v40  ;;  %v21800_v13 = vld [vmem:[#allocation14_spill] sm:$0xff] }
 0x729   :  { %8649 = vmatprep.subr.bf16.mxu1 %v10965_v19  ;;  %8729 = vmatprep.subr.bf16.mxu0 %v11097_v4  ;;  %v11089_v24 = vcombine.high %v21799_v44, %v21798_v51  ;;  %v6197_v47 = vld [vmem:[#allocation3 + $0x28] sm:$0xff]  ;;  %v11088_v54 = vcombine.low %v21799_v44, %v21798_v51  ;;  %v21802_v29 = vld [vmem:[#allocation146_spill] sm:$0xff] }
 0x72a   :  { %v21801_v42 = vld [vmem:[#allocation12_spill] sm:$0xff]  ;;  %v19271_v14 = vpack.c.bf16 %v6197_v47, %v6197_v47  ;;  %v21804_v37 = vld [vmem:[#allocation10_spill] sm:$0xff] }
 0x72b   :  { %v10953_v63 = vcombine.high %v21801_v42, %v21800_v13  ;;  %v21803_v49 = vld [vmem:[#allocation144_spill] sm:$0xff]  ;;  %v10952_v7 = vcombine.low %v21801_v42, %v21800_v13  ;;  %v21806_v55 = vld [vmem:[#allocation142_spill] sm:$0xff] }
 0x72c   :  { %8650 = vmatpush1.bf16.msra.mxu1 %v10964_v30  ;;  %8730 = vmatpush1.bf16.msra.mxu0 %v11096_v38  ;;  %v11085_v36 = vcombine.high %v21803_v49, %v21802_v29  ;;  %v21805_v62 = vld [vmem:[#allocation8_spill] sm:$0xff]  ;;  %v11084_v60 = vcombine.low %v21803_v49, %v21802_v29  ;;  %v21808_v56 = vld [vmem:[#allocation70_spill] sm:$0xff] }
 0x72d   :  { %8651 = vmatprep.subr.bf16.mxu1 %v10961_v58  ;;  %8731 = vmatprep.subr.bf16.mxu0 %v11093_v6  ;;  %v10949_v43 = vcombine.high %v21805_v62, %v21804_v37  ;;  %v21807_v12 = vld [vmem:[#allocation140_spill] sm:$0xff]  ;;  %v10948_v57 = vcombine.low %v21805_v62, %v21804_v37  ;;  %v21810_v53 = vld [vmem:[#allocation138_spill] sm:$0xff] }
 0x72e   :  { %v11081_v27 = vcombine.high %v21807_v12, %v21806_v55  ;;  %8757 = vmatprep.mubr.bf16.mxu0 %v19271_v14  ;;  %v21809_v0 = vld [vmem:[#allocation68_spill] sm:$0xff]  ;;  %v11080_v18 = vcombine.low %v21807_v12, %v21806_v55  ;;  %v21812_v20 = vld [vmem:[#allocation66_spill] sm:$0xff] }
 0x72f   :  { %v11009_v45 = vcombine.high %v21809_v0, %v21808_v56  ;;  %v21811_v41 = vld [vmem:[#allocation136_spill] sm:$0xff]  ;;  %v11008_v15 = vcombine.low %v21809_v0, %v21808_v56  ;;  %v21814_v50 = vld [vmem:[#allocation198_spill] sm:$0xff] }
 0x730   :  { %8652 = vmatpush1.bf16.msra.mxu1 %v10960_v28  ;;  %8732 = vmatpush1.bf16.msra.mxu0 %v11092_v46  ;;  %v11077_v2 = vcombine.high %v21811_v41, %v21810_v53  ;;  %v21813_v9 = vld [vmem:[#allocation64_spill] sm:$0xff]  ;;  %v11076_v61 = vcombine.low %v21811_v41, %v21810_v53  ;;  %v21816_v39 = vld [vmem:[#allocation62_spill] sm:$0xff] }
 0x731   :  { %8653 = vmatprep.subr.bf16.mxu1 %v10957_v5  ;;  %8733 = vmatprep.subr.bf16.mxu0 %v11089_v24  ;;  %v11005_v16 = vcombine.high %v21813_v9, %v21812_v20  ;;  %v21815_v22 = vld [vmem:[#allocation196_spill] sm:$0xff]  ;;  %v11004_v1 = vcombine.low %v21813_v9, %v21812_v20  ;;  %v21818_v59 = vld [vmem:[#allocation194_spill] sm:$0xff] }
 0x732   :  { %v11137_v48 = vcombine.high %v21815_v22, %v21814_v50  ;;  %v21817_v52 = vld [vmem:[#allocation60_spill] sm:$0xff]  ;;  %v11136_v26 = vcombine.low %v21815_v22, %v21814_v50  ;;  %v21820_v31 = vld [vmem:[#allocation58_spill] sm:$0xff] }
 0x733   :  { %v11001_v33 = vcombine.high %v21817_v52, %v21816_v39  ;;  %v21819_v3 = vld [vmem:[#allocation192_spill] sm:$0xff]  ;;  %v11000_v35 = vcombine.low %v21817_v52, %v21816_v39  ;;  %v21822_v30 = vld [vmem:[#allocation190_spill] sm:$0xff] }
 0x734   :  { %8654 = vmatpush1.bf16.msra.mxu1 %v10956_v32  ;;  %8734 = vmatpush1.bf16.msra.mxu0 %v11088_v54  ;;  %v11133_v19 = vcombine.high %v21819_v3, %v21818_v59  ;;  %v21821_v8 = vld [vmem:[#allocation56_spill] sm:$0xff]  ;;  %v11132_v4 = vcombine.low %v21819_v3, %v21818_v59  ;;  %v21824_v38 = vld [vmem:[#allocation54_spill] sm:$0xff] }
 0x735   :  { %8655 = vmatprep.subr.bf16.mxu1 %v10953_v63  ;;  %8735 = vmatprep.subr.bf16.mxu0 %v11085_v36  ;;  %v10997_v21 = vcombine.high %v21821_v8, %v21820_v31  ;;  %v21823_v23 = vld [vmem:[#allocation188_spill] sm:$0xff]  ;;  %v10996_v58 = vcombine.low %v21821_v8, %v21820_v31  ;;  %v21826_v28 = vld [vmem:[#allocation186_spill] sm:$0xff] }
 0x736   :  { %v11129_v34 = vcombine.high %v21823_v23, %v21822_v30  ;;  %v21825_v11 = vld [vmem:[#allocation52_spill] sm:$0xff]  ;;  %v11128_v6 = vcombine.low %v21823_v23, %v21822_v30  ;;  %v21828_v46 = vld [vmem:[#allocation50_spill] sm:$0xff] }
 0x737   :  { %v10993_v17 = vcombine.high %v21825_v11, %v21824_v38  ;;  %v21827_v40 = vld [vmem:[#allocation184_spill] sm:$0xff]  ;;  %v10992_v5 = vcombine.low %v21825_v11, %v21824_v38  ;;  %v21830_v47 = vld [vmem:[#allocation182_spill] sm:$0xff] }
 0x738   :  { %8656 = vmatpush1.bf16.msra.mxu1 %v10952_v7  ;;  %8736 = vmatpush1.bf16.msra.mxu0 %v11084_v60  ;;  %v11125_v10 = vcombine.high %v21827_v40, %v21826_v28  ;;  %v21829_v51 = vld [vmem:[#allocation48_spill] sm:$0xff]  ;;  %v11124_v24 = vcombine.low %v21827_v40, %v21826_v28  ;;  %v21832_v63 = vld [vmem:[#allocation46_spill] sm:$0xff] }
 0x739   :  { %8657 = vmatprep.subr.bf16.mxu1 %v10949_v43  ;;  %8737 = vmatprep.subr.bf16.mxu0 %v11081_v27  ;;  %v10989_v44 = vcombine.high %v21829_v51, %v21828_v46  ;;  %v21831_v32 = vld [vmem:[#allocation180_spill] sm:$0xff]  ;;  %v10988_v42 = vcombine.low %v21829_v51, %v21828_v46  ;;  %v21834_v36 = vld [vmem:[#allocation178_spill] sm:$0xff] }
 0x73a   :  { %v11121_v13 = vcombine.high %v21831_v32, %v21830_v47  ;;  %v21833_v54 = vld [vmem:[#allocation44_spill] sm:$0xff]  ;;  %v11120_v49 = vcombine.low %v21831_v32, %v21830_v47  ;;  %v21836_v43 = vld [vmem:[#allocation42_spill] sm:$0xff] }
 0x73b   :  { %v10985_v29 = vcombine.high %v21833_v54, %v21832_v63  ;;  %v21835_v7 = vld [vmem:[#allocation176_spill] sm:$0xff]  ;;  %v10984_v62 = vcombine.low %v21833_v54, %v21832_v63  ;;  %v6192_v27 = vld [vmem:[#allocation3] sm:$0xff] }
 0x73c   :  { %8658 = vmatpush1.bf16.msra.mxu1 %v10948_v57  ;;  %8738 = vmatpush1.bf16.msra.mxu0 %v11080_v18  ;;  %v11117_v37 = vcombine.high %v21835_v7, %v21834_v36  ;;  %v21837_v60 = vld [vmem:[#allocation40_spill] sm:$0xff]  ;;  %v11116_v12 = vcombine.low %v21835_v7, %v21834_v36  ;;  %v21838_v57 = vld [vmem:[#allocation174_spill] sm:$0xff] }
 0x73d   :  { %8659 = vmatprep.subr.bf16.mxu1 %v11009_v45  ;;  %8739 = vmatprep.subr.bf16.mxu0 %v11077_v2  ;;  %v10981_v55 = vcombine.high %v21837_v60, %v21836_v43  ;;  %v21839_v56 = vld [vmem:[#allocation172_spill] sm:$0xff]  ;;  %v6195_v45 = vld [vmem:[#allocation3 + $0x18] sm:$0xff]  ;;  %v10980_v18 = vcombine.low %v21837_v60, %v21836_v43  ;;  %v6196_v22 = vld [vmem:[#allocation3 + $0x20] sm:$0xff] }
 0x73e   :  { %v11113_v0 = vcombine.high %v21839_v56, %v21838_v57  ;;  %v21840_v53 = vld [vmem:[#allocation102_spill] sm:$0xff]  ;;  %v21841_v41 = vld [vmem:[#allocation100_spill] sm:$0xff]  ;;  %v19367_v31 = vpack.c.bf16 %v6196_v22, %v6196_v22 }
 0x73f   :  { %v11041_v2 = vcombine.high %v21841_v41, %v21840_v53  ;;  %v21842_v20 = vld [vmem:[#allocation170_spill] sm:$0xff]  ;;  %v21843_v9 = vld [vmem:[#allocation168_spill] sm:$0xff]  ;;  %v11040_v50 = vcombine.low %v21841_v41, %v21840_v53 }
 0x740   :  { %8660 = vmatpush2.bf16.msra.mxu1 %v11008_v15  ;;  %8740 = vmatpush1.bf16.msra.mxu0 %v11076_v61  ;;  %v11112_v15 = vcombine.low %v21839_v56, %v21838_v57  ;;  %v19352_v61 = vpack.c.bf16 %v6192_v27, %v6192_v27  ;;  %v21845_v39 = vld [vmem:[#allocation96_spill] sm:$0xff]  ;;  %v21846_v59 = vld [vmem:[#allocation294_spill] sm:$0xff] }
 0x741   :  { %8661 = vmatprep.subr.bf16.mxu1 %v11005_v16  ;;  %8741 = vmatprep.subr.bf16.mxu0 %v11137_v48  ;;  %v11109_v16 = vcombine.high %v21843_v9, %v21842_v20  ;;  %v19356_v48 = vpack.c.bf16 %v6195_v45, %v6195_v45  ;;  %v21847_v3 = vld [vmem:[#allocation292_spill] sm:$0xff]  ;;  %v21848_v8 = vld [vmem:[#allocation94_spill] sm:$0xff] }
 0x742   :  { %v11232_v30 = vcombine.low %v21847_v3, %v21846_v59  ;;  %v21850_v23 = vld [vmem:[#allocation290_spill] sm:$0xff]  ;;  %v21869_v41 = vld [vmem:[#allocation72_spill] sm:$0xff] }
 0x743   :  { %v21866_v56 = vld [vmem:[#allocation274_spill] sm:$0xff] }
 0x744   :  { %8662 = vmatpush2.bf16.msra.mxu1 %v11004_v1  ;;  %8742 = vmatpush2.bf16.msra.mxu0 %v11136_v26  ;;  %v21844_v1 = vld [vmem:[#allocation98_spill] sm:$0xff]  ;;  %v6201_v26 = vld [vmem:[#allocation3 + $0x48] sm:$0xff] }
 0x745   :  { %8663 = vmatprep.subr.bf16.mxu1 %v11001_v33  ;;  %8743 = vmatprep.subr.bf16.mxu0 %v11133_v19  ;;  %v11037_v52 = vcombine.high %v21845_v39, %v21844_v1  ;;  %v11108_v33 = vcombine.low %v21843_v9, %v21842_v20  ;;  %v11233_v19 = vcombine.high %v21847_v3, %v21846_v59  ;;  %v21868_v53 = vld [vmem:[#allocation74_spill] sm:$0xff]  ;;  %v21871_v9 = vld [vmem:[#allocation268_spill] sm:$0xff] }
 0x746   :  { %v19376_v38 = vpack.c.bf16 %v6201_v26, %v6201_v26  ;;  %v21870_v20 = vld [vmem:[#allocation270_spill] sm:$0xff]  ;;  %v21875_v26 = vld [vmem:[#allocation264_spill] sm:$0xff] }
 0x747   :  { %v21872_v22 = vld [vmem:[#allocation134_spill] sm:$0xff] }
 0x748   :  { %8664 = vmatpush2.bf16.msra.mxu1 %v11000_v35  ;;  %8744 = vmatpush2.bf16.msra.mxu0 %v11132_v4  ;;  %v11036_v35 = vcombine.low %v21845_v39, %v21844_v1  ;;  %v21873_v1 = vld [vmem:[#allocation132_spill] sm:$0xff] }
 0x749   :  { %8665 = vmatprep.subr.bf16.mxu1 %v10997_v21  ;;  %8745 = vmatprep.subr.bf16.mxu0 %v11129_v34  ;;  %v21849_v21 = vld [vmem:[#allocation92_spill] sm:$0xff]  ;;  %v11073_v39 = vcombine.high %v21873_v1, %v21872_v22  ;;  %v11072_v3 = vcombine.low %v21873_v1, %v21872_v22 }
 0x74a   :  { %v11033_v4 = vcombine.high %v21849_v21, %v21848_v8  ;;  %v21851_v34 = vld [vmem:[#allocation288_spill] sm:$0xff]  ;;  %v11032_v11 = vcombine.low %v21849_v21, %v21848_v8 }
 0x74b   :  { %v11228_v40 = vcombine.low %v21851_v34, %v21850_v23 }
 0x74c   :  { %8666 = vmatpush2.bf16.msra.mxu1 %v10996_v58  ;;  %8746 = vmatpush2.bf16.msra.mxu0 %v11128_v6  ;;  %v11229_v58 = vcombine.high %v21851_v34, %v21850_v23  ;;  %v21853_v6 = vld [vmem:[#allocation88_spill] sm:$0xff] }
 0x74d   :  { %8667 = vmatprep.subr.bf16.mxu1 %v10993_v17  ;;  %8747 = vmatprep.subr.bf16.mxu0 %v11125_v10  ;;  %v21852_v17 = vld [vmem:[#allocation90_spill] sm:$0xff] }
 0x74e   :  { %v11029_v28 = vcombine.high %v21853_v6, %v21852_v17  ;;  %v21854_v10 = vld [vmem:[#allocation286_spill] sm:$0xff]  ;;  %v11028_v51 = vcombine.low %v21853_v6, %v21852_v17 }
 0x750   :  { %8668 = vmatpush2.bf16.msra.mxu1 %v10992_v5  ;;  %8748 = vmatpush2.bf16.msra.mxu0 %v11124_v24  ;;  %v21855_v5 = vld [vmem:[#allocation284_spill] sm:$0xff] }
 0x751   :  { %8669 = vmatprep.subr.bf16.mxu1 %v10989_v44  ;;  %8749 = vmatprep.subr.bf16.mxu0 %v11121_v13  ;;  %v11225_v46 = vcombine.high %v21855_v5, %v21854_v10  ;;  %v21856_v44 = vld [vmem:[#allocation86_spill] sm:$0xff]  ;;  %v21857_v24 = vld [vmem:[#allocation84_spill] sm:$0xff]  ;;  %v11224_v32 = vcombine.low %v21855_v5, %v21854_v10 }
 0x752   :  { %v11025_v47 = vcombine.high %v21857_v24, %v21856_v44  ;;  %v21858_v13 = vld [vmem:[#allocation282_spill] sm:$0xff]  ;;  %v11024_v54 = vcombine.low %v21857_v24, %v21856_v44 }
 0x754   :  { %8670 = vmatpush2.bf16.msra.mxu1 %v10988_v42  ;;  %8750 = vmatpush2.bf16.msra.mxu0 %v11120_v49  ;;  %v21859_v42 = vld [vmem:[#allocation280_spill] sm:$0xff] }
 0x755   :  { %8671 = vmatprep.subr.bf16.mxu1 %v10985_v29  ;;  %8751 = vmatprep.subr.bf16.mxu0 %v11117_v37  ;;  %v11221_v63 = vcombine.high %v21859_v42, %v21858_v13  ;;  %v21860_v29 = vld [vmem:[#allocation82_spill] sm:$0xff]  ;;  %v21861_v49 = vld [vmem:[#allocation80_spill] sm:$0xff]  ;;  %v11220_v7 = vcombine.low %v21859_v42, %v21858_v13 }
 0x756   :  { %v11021_v36 = vcombine.high %v21861_v49, %v21860_v29  ;;  %v21862_v37 = vld [vmem:[#allocation278_spill] sm:$0xff]  ;;  %v11020_v60 = vcombine.low %v21861_v49, %v21860_v29 }
 0x758   :  { %8672 = vmatpush2.bf16.msra.mxu1 %v10984_v62  ;;  %8752 = vmatpush2.bf16.msra.mxu0 %v11116_v12  ;;  %v21863_v62 = vld [vmem:[#allocation276_spill] sm:$0xff] }
 0x759   :  { %8673 = vmatprep.subr.bf16.mxu1 %v10981_v55  ;;  %8753 = vmatprep.subr.bf16.mxu0 %v11113_v0  ;;  %v11217_v43 = vcombine.high %v21863_v62, %v21862_v37  ;;  %v21864_v55 = vld [vmem:[#allocation78_spill] sm:$0xff]  ;;  %v21865_v12 = vld [vmem:[#allocation76_spill] sm:$0xff]  ;;  %v11216_v57 = vcombine.low %v21863_v62, %v21862_v37 }
 0x75a   :  { %v11017_v27 = vcombine.high %v21865_v12, %v21864_v55  ;;  %v21867_v0 = vld [vmem:[#allocation272_spill] sm:$0xff] }
 0x75b   :  { %v11213_v45 = vcombine.high %v21867_v0, %v21866_v56 }
 0x75c   :  { %8674 = vmatpush2.bf16.msra.mxu1 %v10980_v18  ;;  %8754 = vmatpush2.bf16.msra.mxu0 %v11112_v15  ;;  %v11016_v18 = vcombine.low %v21865_v12, %v21864_v55  ;;  %v11212_v15 = vcombine.low %v21867_v0, %v21866_v56 }
 0x75d   :  { %8684 = vmatprep.subr.bf16.mxu1 %v11041_v2  ;;  %8755 = vmatprep.subr.bf16.mxu0 %v11109_v16  ;;  %v11013_v2 = vcombine.high %v21869_v41, %v21868_v53  ;;  %v11209_v16 = vcombine.high %v21871_v9, %v21870_v20 }
 0x75f   :  { %8676 = vmatmul.mubr.bf16.vlgmr.msra.gmra.mxu1 %v19352_v61 }
 0x760   :  { %8685 = vmatpush1.bf16.msra.mxu1 %v11040_v50  ;;  %8716 = vmatprep.mubr.bf16.mxu1 %v19356_v48  ;;  %v11012_v50 = vcombine.low %v21869_v41, %v21868_v53 }
 0x761   :  { %8686 = vmatprep.subr.bf16.mxu1 %v11037_v52  ;;  %8756 = vmatpush2.bf16.msra.mxu0 %v11108_v33  ;;  %v11208_v52 = vcombine.low %v21871_v9, %v21870_v20  ;;  %v21874_v33 = vld [vmem:[#allocation266_spill] sm:$0xff] }
 0x762   :  { %8807 = vmatprep.subr.bf16.mxu0 %v11233_v19  ;;  %v11205_v59 = vcombine.high %v21875_v26, %v21874_v33  ;;  %v21876_v19 = vld [vmem:[#allocation130_spill] sm:$0xff]  ;;  %v11204_v21 = vcombine.low %v21875_v26, %v21874_v33 }
 0x764   :  { %8687 = vmatpush1.bf16.msra.mxu1 %v11036_v35  ;;  %8758 = vmatmul.mubr.bf16.vlgmr.msra.gmra.mxu0 %v19367_v31  ;;  %v21877_v35 = vld [vmem:[#allocation128_spill] sm:$0xff] }
 0x765   :  { %8688 = vmatprep.subr.bf16.mxu1 %v11033_v4  ;;  %8808 = vmatpush1.bf16.msra.mxu0 %v11232_v30  ;;  %v11069_v8 = vcombine.high %v21877_v35, %v21876_v19  ;;  %v21878_v4 = vld [vmem:[#allocation326_spill] sm:$0xff]  ;;  %v21879_v30 = vld [vmem:[#allocation324_spill] sm:$0xff]  ;;  %v11068_v34 = vcombine.low %v21877_v35, %v21876_v19 }
 0x766   :  { %8809 = vmatprep.subr.bf16.mxu0 %v11229_v58  ;;  %8839 = vmatprep.mubr.bf16.mxu0 %v19376_v38  ;;  %v11265_v23 = vcombine.high %v21879_v30, %v21878_v4  ;;  %v21880_v58 = vld [vmem:[#allocation126_spill] sm:$0xff]  ;;  %v11264_v6 = vcombine.low %v21879_v30, %v21878_v4  ;;  %v21905_v19 = vld [vmem:[#allocation228_spill] sm:$0xff] }
 0x767   :  { %v21906_v4 = vld [vmem:[#allocation298_spill] sm:$0xff]  ;;  %v21907_v30 = vld [vmem:[#allocation296_spill] sm:$0xff] }
 0x768   :  { %8689 = vmatpush1.bf16.msra.mxu1 %v11032_v11  ;;  %v21881_v11 = vld [vmem:[#allocation124_spill] sm:$0xff] }
 0x769   :  { %8690 = vmatprep.subr.bf16.mxu1 %v11029_v28  ;;  %8810 = vmatpush1.bf16.msra.mxu0 %v11228_v40  ;;  %v11065_v17 = vcombine.high %v21881_v11, %v21880_v58  ;;  %v21882_v28 = vld [vmem:[#allocation322_spill] sm:$0xff]  ;;  %v21883_v40 = vld [vmem:[#allocation320_spill] sm:$0xff]  ;;  %v11064_v5 = vcombine.low %v21881_v11, %v21880_v58 }
 0x76a   :  { %8811 = vmatprep.subr.bf16.mxu0 %v11225_v46  ;;  %v11261_v10 = vcombine.high %v21883_v40, %v21882_v28  ;;  %v21884_v46 = vld [vmem:[#allocation122_spill] sm:$0xff]  ;;  %v11260_v24 = vcombine.low %v21883_v40, %v21882_v28  ;;  %v11236_v40 = vcombine.low %v21907_v30, %v21906_v4 }
 0x76c   :  { %8691 = vmatpush1.bf16.msra.mxu1 %v11028_v51  ;;  %v21885_v51 = vld [vmem:[#allocation120_spill] sm:$0xff] }
 0x76d   :  { %8692 = vmatprep.subr.bf16.mxu1 %v11025_v47  ;;  %8812 = vmatpush1.bf16.msra.mxu0 %v11224_v32  ;;  %v11061_v44 = vcombine.high %v21885_v51, %v21884_v46  ;;  %v21886_v47 = vld [vmem:[#allocation318_spill] sm:$0xff]  ;;  %v21887_v32 = vld [vmem:[#allocation316_spill] sm:$0xff]  ;;  %v11060_v42 = vcombine.low %v21885_v51, %v21884_v46 }
 0x76e   :  { %8813 = vmatprep.subr.bf16.mxu0 %v11221_v63  ;;  %v11257_v13 = vcombine.high %v21887_v32, %v21886_v47  ;;  %v21888_v63 = vld [vmem:[#allocation118_spill] sm:$0xff]  ;;  %v11256_v49 = vcombine.low %v21887_v32, %v21886_v47  ;;  %v21911_v46 = vld [vmem:[#allocation404_spill] sm:$0xff] }
 0x76f   :  { %v21912_v47 = vld [vmem:[#allocation222_spill] sm:$0xff]  ;;  %v21913_v32 = vld [vmem:[#allocation220_spill] sm:$0xff] }
 0x770   :  { %8693 = vmatpush1.bf16.msra.mxu1 %v11024_v54  ;;  %v21889_v54 = vld [vmem:[#allocation116_spill] sm:$0xff] }
 0x771   :  { %8694 = vmatprep.subr.bf16.mxu1 %v11021_v36  ;;  %8814 = vmatpush1.bf16.msra.mxu0 %v11220_v7  ;;  %v11057_v29 = vcombine.high %v21889_v54, %v21888_v63  ;;  %v21890_v36 = vld [vmem:[#allocation314_spill] sm:$0xff]  ;;  %v21891_v7 = vld [vmem:[#allocation312_spill] sm:$0xff]  ;;  %v11056_v62 = vcombine.low %v21889_v54, %v21888_v63 }
 0x772   :  { %8815 = vmatprep.subr.bf16.mxu0 %v11217_v43  ;;  %v11253_v37 = vcombine.high %v21891_v7, %v21890_v36  ;;  %v21892_v43 = vld [vmem:[#allocation114_spill] sm:$0xff]  ;;  %v11252_v12 = vcombine.low %v21891_v7, %v21890_v36  ;;  %v21915_v54 = vld [vmem:[#allocation400_spill] sm:$0xff] }
 0x773   :  { %v21914_v63 = vld [vmem:[#allocation402_spill] sm:$0xff]  ;;  %v21917_v7 = vld [vmem:[#allocation216_spill] sm:$0xff] }
 0x774   :  { %8695 = vmatpush1.bf16.msra.mxu1 %v11020_v60  ;;  %v21893_v60 = vld [vmem:[#allocation112_spill] sm:$0xff]  ;;  %v21916_v36 = vld [vmem:[#allocation218_spill] sm:$0xff] }
 0x775   :  { %8696 = vmatprep.subr.bf16.mxu1 %v11017_v27  ;;  %8816 = vmatpush1.bf16.msra.mxu0 %v11216_v57  ;;  %v11053_v55 = vcombine.high %v21893_v60, %v21892_v43  ;;  %v21894_v27 = vld [vmem:[#allocation310_spill] sm:$0xff]  ;;  %v21895_v57 = vld [vmem:[#allocation308_spill] sm:$0xff]  ;;  %v11052_v0 = vcombine.low %v21893_v60, %v21892_v43 }
 0x776   :  { %8817 = vmatprep.subr.bf16.mxu0 %v11213_v45  ;;  %v11249_v56 = vcombine.high %v21895_v57, %v21894_v27  ;;  %v21896_v45 = vld [vmem:[#allocation110_spill] sm:$0xff]  ;;  %v11248_v41 = vcombine.low %v21895_v57, %v21894_v27  ;;  %v21919_v60 = vld [vmem:[#allocation396_spill] sm:$0xff]  ;;  %v11156_v27 = vcombine.low %v21917_v7, %v21916_v36 }
 0x777   :  { %v21918_v43 = vld [vmem:[#allocation398_spill] sm:$0xff] }
 0x778   :  { %8697 = vmatpush1.bf16.msra.mxu1 %v11016_v18  ;;  %v21897_v18 = vld [vmem:[#allocation108_spill] sm:$0xff]  ;;  %v21920_v57 = vld [vmem:[#allocation214_spill] sm:$0xff] }
 0x779   :  { %8698 = vmatprep.subr.bf16.mxu1 %v11013_v2  ;;  %8818 = vmatpush1.bf16.msra.mxu0 %v11212_v15  ;;  %v11049_v53 = vcombine.high %v21897_v18, %v21896_v45  ;;  %v21898_v2 = vld [vmem:[#allocation306_spill] sm:$0xff]  ;;  %v21899_v15 = vld [vmem:[#allocation304_spill] sm:$0xff]  ;;  %v11048_v9 = vcombine.low %v21897_v18, %v21896_v45  ;;  %v11336_v45 = vcombine.low %v21919_v60, %v21918_v43 }
 0x77a   :  { %8819 = vmatprep.subr.bf16.mxu0 %v11209_v16  ;;  %v11245_v20 = vcombine.high %v21899_v15, %v21898_v2  ;;  %v21900_v16 = vld [vmem:[#allocation106_spill] sm:$0xff]  ;;  %v11244_v1 = vcombine.low %v21899_v15, %v21898_v2 }
 0x77b   :  { %v21922_v18 = vld [vmem:[#allocation394_spill] sm:$0xff] }
 0x77c   :  { %8699 = vmatpush1.bf16.msra.mxu1 %v11012_v50  ;;  %v21901_v50 = vld [vmem:[#allocation104_spill] sm:$0xff]  ;;  %v21924_v15 = vld [vmem:[#allocation210_spill] sm:$0xff] }
 0x77d   :  { %8700 = vmatprep.subr.bf16.mxu1 %v11073_v39  ;;  %8820 = vmatpush1.bf16.msra.mxu0 %v11208_v52  ;;  %v11045_v22 = vcombine.high %v21901_v50, %v21900_v16  ;;  %v21902_v39 = vld [vmem:[#allocation302_spill] sm:$0xff]  ;;  %v21903_v52 = vld [vmem:[#allocation300_spill] sm:$0xff]  ;;  %v11044_v26 = vcombine.low %v21901_v50, %v21900_v16 }
 0x77e   :  { %8821 = vmatprep.subr.bf16.mxu0 %v11205_v59  ;;  %v11241_v33 = vcombine.high %v21903_v52, %v21902_v39  ;;  %v6194_v59 = vld [vmem:[#allocation3 + $0x10] sm:$0xff]  ;;  %v6204_v50 = vld [vmem:[#allocation3 + $0x60] sm:$0xff] }
 0x780   :  { %8701 = vmatpush2.bf16.msra.mxu1 %v11072_v3  ;;  %v21904_v3 = vld [vmem:[#allocation230_spill] sm:$0xff] }
 0x781   :  { %8702 = vmatprep.subr.bf16.mxu1 %v11069_v8  ;;  %8822 = vmatpush1.bf16.msra.mxu0 %v11204_v21  ;;  %v11169_v35 = vcombine.high %v21905_v19, %v21904_v3  ;;  %v11240_v8 = vcombine.low %v21903_v52, %v21902_v39  ;;  %v6199_v21 = vld [vmem:[#allocation3 + $0x38] sm:$0xff]  ;;  %v11168_v58 = vcombine.low %v21905_v19, %v21904_v3 }
 0x782   :  { %8823 = vmatprep.subr.bf16.mxu0 %v11265_v23  ;;  %v11237_v23 = vcombine.high %v21907_v30, %v21906_v4  ;;  %v19496_v11 = vpack.c.bf16 %v6199_v21, %v6199_v21  ;;  %v21932_v30 = vld [vmem:[#allocation202_spill] sm:$0xff] }
 0x784   :  { %8703 = vmatpush2.bf16.msra.mxu1 %v11068_v34  ;;  %v19492_v34 = vpack.c.bf16 %v6194_v59, %v6194_v59  ;;  %v21929_v59 = vld [vmem:[#allocation204_spill] sm:$0xff] }
 0x785   :  { %8704 = vmatprep.subr.bf16.mxu1 %v11065_v17  ;;  %8824 = vmatpush2.bf16.msra.mxu0 %v11264_v6  ;;  %v21908_v17 = vld [vmem:[#allocation226_spill] sm:$0xff]  ;;  %v21909_v6 = vld [vmem:[#allocation224_spill] sm:$0xff] }
 0x786   :  { %8825 = vmatprep.subr.bf16.mxu0 %v11261_v10  ;;  %v11165_v28 = vcombine.high %v21909_v6, %v21908_v17  ;;  %v6200_v10 = vld [vmem:[#allocation3 + $0x40] sm:$0xff] }
 0x788   :  { %8705 = vmatpush2.bf16.msra.mxu1 %v11064_v5  ;;  %v21910_v5 = vld [vmem:[#allocation406_spill] sm:$0xff] }
 0x789   :  { %8706 = vmatprep.subr.bf16.mxu1 %v11061_v44  ;;  %8826 = vmatpush2.bf16.msra.mxu0 %v11260_v24  ;;  %v11345_v51 = vcombine.high %v21911_v46, %v21910_v5  ;;  %v11164_v44 = vcombine.low %v21909_v6, %v21908_v17  ;;  %v19507_v24 = vpack.c.bf16 %v6200_v10, %v6200_v10  ;;  %v21934_v6 = vld [vmem:[#allocation31_spill] sm:$0xff] }
 0x78a   :  { %8827 = vmatprep.subr.bf16.mxu0 %v11257_v13  ;;  %v11161_v13 = vcombine.high %v21913_v32, %v21912_v47 }
 0x78c   :  { %8707 = vmatpush2.bf16.msra.mxu1 %v11060_v42  ;;  %v11344_v42 = vcombine.low %v21911_v46, %v21910_v5  ;;  %v21936_v5 = vld [vmem:[#allocation262_spill] sm:$0xff]  ;;  %v21937_v46 = vld [vmem:[#allocation260_spill] sm:$0xff] }
 0x78d   :  { %8708 = vmatprep.subr.bf16.mxu1 %v11057_v29  ;;  %8828 = vmatpush2.bf16.msra.mxu0 %v11256_v49  ;;  %v11341_v29 = vcombine.high %v21915_v54, %v21914_v63  ;;  %v11160_v49 = vcombine.low %v21913_v32, %v21912_v47  ;;  %v21938_v47 = vld [vmem:[#allocation27_spill] sm:$0xff]  ;;  %v21939_v32 = vld [vmem:[#allocation25_spill] sm:$0xff] }
 0x78e   :  { %8829 = vmatprep.subr.bf16.mxu0 %v11253_v37  ;;  %v11157_v37 = vcombine.high %v21917_v7, %v21916_v36  ;;  %v21943_v36 = vld [vmem:[#allocation21_spill] sm:$0xff] }
 0x790   :  { %8709 = vmatpush2.bf16.msra.mxu1 %v11056_v62  ;;  %v11340_v62 = vcombine.low %v21915_v54, %v21914_v63  ;;  %v21941_v63 = vld [vmem:[#allocation256_spill] sm:$0xff] }
 0x791   :  { %8710 = vmatprep.subr.bf16.mxu1 %v11053_v55  ;;  %8830 = vmatpush2.bf16.msra.mxu0 %v11252_v12  ;;  %v11337_v55 = vcombine.high %v21919_v60, %v21918_v43  ;;  %v13312_v12 = vmov 0   ;;  %v21945_v43 = vld [vmem:[#allocation252_spill] sm:$0xff] }
 0x792   :  { %8831 = vmatprep.subr.bf16.mxu0 %v11249_v56  ;;  %v21921_v56 = vld [vmem:[#allocation212_spill] sm:$0xff] }
 0x793   :  { %v11152_v2 = vcombine.low %v21921_v56, %v21920_v57 }
 0x794   :  { %8711 = vmatpush2.bf16.msra.mxu1 %v11052_v0  ;;  %v11153_v0 = vcombine.high %v21921_v56, %v21920_v57  ;;  %v21947_v57 = vld [vmem:[#allocation17_spill] sm:$0xff] }
 0x795   :  { %8712 = vmatprep.subr.bf16.mxu1 %v11049_v53  ;;  %8832 = vmatpush2.bf16.msra.mxu0 %v11248_v41  ;;  %v21923_v53 = vld [vmem:[#allocation392_spill] sm:$0xff] }
 0x796   :  { %8833 = vmatprep.subr.bf16.mxu0 %v11245_v20  ;;  %v11333_v41 = vcombine.high %v21923_v53, %v21922_v18  ;;  %v21925_v20 = vld [vmem:[#allocation208_spill] sm:$0xff]  ;;  %v11332_v16 = vcombine.low %v21923_v53, %v21922_v18 }
 0x797   :  { %v11148_v52 = vcombine.low %v21925_v20, %v21924_v15  ;;  %v21949_v18 = vld [vmem:[#allocation248_spill] sm:$0xff] }
 0x798   :  { %8713 = vmatpush2.bf16.msra.mxu1 %v11048_v9  ;;  %v11149_v9 = vcombine.high %v21925_v20, %v21924_v15  ;;  %v21951_v15 = vld [vmem:[#allocation13_spill] sm:$0xff] }
 0x799   :  { %8714 = vmatprep.subr.bf16.mxu1 %v11045_v22  ;;  %8834 = vmatpush2.bf16.msra.mxu0 %v11244_v1  ;;  %v21926_v22 = vld [vmem:[#allocation39_spill] sm:$0xff]  ;;  %v21927_v1 = vld [vmem:[#allocation37_spill] sm:$0xff] }
 0x79a   :  { %8835 = vmatprep.subr.bf16.mxu0 %v11241_v33  ;;  %v10979_v39 = vcombine.high %v21927_v1, %v21926_v22  ;;  %v19544_v33 = vpack.c.bf16 %v6204_v50, %v6204_v50  ;;  %v10978_v19 = vcombine.low %v21927_v1, %v21926_v22  ;;  %v21953_v50 = vld [vmem:[#allocation244_spill] sm:$0xff] }
 0x79c   :  { %8715 = vmatpush2.bf16.msra.mxu1 %v11044_v26  ;;  %v21928_v26 = vld [vmem:[#allocation206_spill] sm:$0xff] }
 0x79d   :  { %8766 = vmatprep.subr.bf16.mxu1 %v11169_v35  ;;  %8836 = vmatpush2.bf16.msra.mxu0 %v11240_v8  ;;  %v11145_v3 = vcombine.high %v21929_v59, %v21928_v26  ;;  %v21930_v35 = vld [vmem:[#allocation35_spill] sm:$0xff]  ;;  %v21931_v8 = vld [vmem:[#allocation33_spill] sm:$0xff]  ;;  %v11144_v4 = vcombine.low %v21929_v59, %v21928_v26 }
 0x79e   :  { %8837 = vmatprep.subr.bf16.mxu0 %v11237_v23  ;;  %v10975_v21 = vcombine.high %v21931_v8, %v21930_v35  ;;  %v21933_v23 = vld [vmem:[#allocation200_spill] sm:$0xff]  ;;  %v10974_v17 = vcombine.low %v21931_v8, %v21930_v35 }
 0x79f   :  { %8717 = vmatmul.mubr.bf16.vlgmr.msra.gmra.mxu1 %v19492_v34  ;;  %v11140_v10 = vcombine.low %v21933_v23, %v21932_v30 }
 0x7a0   :  { %8767 = vmatpush1.bf16.msra.mxu1 %v11168_v58  ;;  %8798 = vmatprep.mubr.bf16.mxu1 %v19496_v11  ;;  %v11141_v58 = vcombine.high %v21933_v23, %v21932_v30 }
 0x7a1   :  { %8768 = vmatprep.subr.bf16.mxu1 %v11165_v28  ;;  %8838 = vmatpush2.bf16.msra.mxu0 %v11236_v40  ;;  %v21935_v28 = vld [vmem:[#allocation29_spill] sm:$0xff] }
 0x7a2   :  { %8897 = vmatprep.subr.bf16.mxu0 %v11345_v51  ;;  %v10971_v40 = vcombine.high %v21935_v28, %v21934_v6  ;;  %v11201_v51 = vcombine.high %v21937_v46, %v21936_v5 }
 0x7a4   :  { %8769 = vmatpush1.bf16.msra.mxu1 %v11164_v44  ;;  %8840 = vmatmul.mubr.bf16.vlgmr.msra.gmra.mxu0 %v19507_v24  ;;  %v10970_v44 = vcombine.low %v21935_v28, %v21934_v6 }
 0x7a5   :  { %8770 = vmatprep.subr.bf16.mxu1 %v11161_v13  ;;  %8898 = vmatpush1.bf16.msra.mxu0 %v11344_v42  ;;  %v10967_v13 = vcombine.high %v21939_v32, %v21938_v47  ;;  %v21940_v42 = vld [vmem:[#allocation258_spill] sm:$0xff] }
 0x7a6   :  { %8899 = vmatprep.subr.bf16.mxu0 %v11341_v29  ;;  %8921 = vmatprep.mubr.bf16.mxu0 %v13312_v12  ;;  %v11197_v54 = vcombine.high %v21941_v63, %v21940_v42  ;;  %v10966_v29 = vcombine.low %v21939_v32, %v21938_v47 }
 0x7a8   :  { %8771 = vmatpush1.bf16.msra.mxu1 %v11160_v49  ;;  %v21942_v49 = vld [vmem:[#allocation23_spill] sm:$0xff] }
 0x7a9   :  { %8772 = vmatprep.subr.bf16.mxu1 %v11157_v37  ;;  %8900 = vmatpush1.bf16.msra.mxu0 %v11340_v62  ;;  %v10963_v7 = vcombine.high %v21943_v36, %v21942_v49  ;;  %v11196_v37 = vcombine.low %v21941_v63, %v21940_v42  ;;  %v21944_v62 = vld [vmem:[#allocation254_spill] sm:$0xff] }
 0x7aa   :  { %8901 = vmatprep.subr.bf16.mxu0 %v11337_v55  ;;  %v11193_v60 = vcombine.high %v21945_v43, %v21944_v62  ;;  %v10962_v55 = vcombine.low %v21943_v36, %v21942_v49  ;;  %v21969_v49 = vld [vmem:[#allocation356_spill] sm:$0xff] }
 0x7ac   :  { %8773 = vmatpush1.bf16.msra.mxu1 %v11156_v27  ;;  %v21946_v27 = vld [vmem:[#allocation19_spill] sm:$0xff] }
 0x7ad   :  { %8774 = vmatprep.subr.bf16.mxu1 %v11153_v0  ;;  %8902 = vmatpush1.bf16.msra.mxu0 %v11336_v45  ;;  %v10959_v56 = vcombine.high %v21947_v57, %v21946_v27  ;;  %v11192_v0 = vcombine.low %v21945_v43, %v21944_v62  ;;  %v21948_v45 = vld [vmem:[#allocation250_spill] sm:$0xff]  ;;  %v21970_v62 = vld [vmem:[#allocation59_spill] sm:$0xff]  ;;  %v21971_v43 = vld [vmem:[#allocation57_spill] sm:$0xff] }
 0x7ae   :  { %8903 = vmatprep.subr.bf16.mxu0 %v11333_v41  ;;  %v11189_v53 = vcombine.high %v21949_v18, %v21948_v45  ;;  %v10958_v41 = vcombine.low %v21947_v57, %v21946_v27 }
 0x7b0   :  { %8775 = vmatpush1.bf16.msra.mxu1 %v11152_v2  ;;  %v21950_v2 = vld [vmem:[#allocation15_spill] sm:$0xff] }
 0x7b1   :  { %8776 = vmatprep.subr.bf16.mxu1 %v11149_v9  ;;  %8904 = vmatpush1.bf16.msra.mxu0 %v11332_v16  ;;  %v10955_v20 = vcombine.high %v21951_v15, %v21950_v2  ;;  %v11188_v9 = vcombine.low %v21949_v18, %v21948_v45  ;;  %v21952_v16 = vld [vmem:[#allocation246_spill] sm:$0xff]  ;;  %v10954_v1 = vcombine.low %v21951_v15, %v21950_v2 }
 0x7b2   :  { %8930 = vmatprep.subr.bf16.mxu0 %v10979_v39  ;;  %v11185_v22 = vcombine.high %v21953_v50, %v21952_v16  ;;  %v21954_v39 = vld [vmem:[#allocation11_spill] sm:$0xff]  ;;  %v11184_v59 = vcombine.low %v21953_v50, %v21952_v16  ;;  %v10998_v18 = vcombine.low %v21971_v43, %v21970_v62 }
 0x7b4   :  { %8777 = vmatpush1.bf16.msra.mxu1 %v11148_v52  ;;  %11348 = vmatmul.mubr.msk.bf16.vlgmr.msra.gmra.mxu0 %vm4556_vm6, %v19544_v33  ;;  %v21955_v52 = vld [vmem:[#allocation9_spill] sm:$0xff] }
 0x7b5   :  { %8778 = vmatprep.subr.bf16.mxu1 %v11145_v3  ;;  %8931 = vmatpush1.bf16.msra.mxu0 %v10978_v19  ;;  %v10951_v26 = vcombine.high %v21955_v52, %v21954_v39  ;;  %v21956_v3 = vld [vmem:[#allocation242_spill] sm:$0xff]  ;;  %v21957_v19 = vld [vmem:[#allocation240_spill] sm:$0xff]  ;;  %v10950_v8 = vcombine.low %v21955_v52, %v21954_v39 }
 0x7b6   :  { %8932 = vmatprep.subr.bf16.mxu0 %v10975_v21  ;;  %8962 = vmatprep.mubr.bf16.mxu0 %v19244_v25  ;;  %v11200_v25 = vcombine.low %v21937_v46, %v21936_v5  ;;  %v11181_v35 = vcombine.high %v21957_v19, %v21956_v3  ;;  %v21958_v21 = vld [vmem:[#allocation71_spill] sm:$0xff]  ;;  %v11180_v23 = vcombine.low %v21957_v19, %v21956_v3 }
 0x7b8   :  { %8779 = vmatpush1.bf16.msra.mxu1 %v11144_v4  ;;  %v21959_v4 = vld [vmem:[#allocation69_spill] sm:$0xff] }
 0x7b9   :  { %8780 = vmatprep.subr.bf16.mxu1 %v11141_v58  ;;  %8933 = vmatpush1.bf16.msra.mxu0 %v10974_v17  ;;  %v11011_v30 = vcombine.high %v21959_v4, %v21958_v21  ;;  %v21960_v58 = vld [vmem:[#allocation238_spill] sm:$0xff]  ;;  %v21961_v17 = vld [vmem:[#allocation236_spill] sm:$0xff]  ;;  %v11010_v28 = vcombine.low %v21959_v4, %v21958_v21 }
 0x7ba   :  { %8934 = vmatprep.subr.bf16.mxu0 %v10971_v40  ;;  %v11177_v6 = vcombine.high %v21961_v17, %v21960_v58  ;;  %v21962_v40 = vld [vmem:[#allocation67_spill] sm:$0xff]  ;;  %v11176_v46 = vcombine.low %v21961_v17, %v21960_v58 }
 0x7bc   :  { %8781 = vmatpush1.bf16.msra.mxu1 %v11140_v10  ;;  %v21963_v10 = vld [vmem:[#allocation65_spill] sm:$0xff] }
 0x7bd   :  { %8782 = vmatprep.subr.bf16.mxu1 %v11201_v51  ;;  %8935 = vmatpush1.bf16.msra.mxu0 %v10970_v44  ;;  %v11007_v5 = vcombine.high %v21963_v10, %v21962_v40  ;;  %v21964_v51 = vld [vmem:[#allocation234_spill] sm:$0xff]  ;;  %v21965_v44 = vld [vmem:[#allocation232_spill] sm:$0xff]  ;;  %v11006_v32 = vcombine.low %v21963_v10, %v21962_v40 }
 0x7be   :  { %8936 = vmatprep.subr.bf16.mxu0 %v10967_v13  ;;  %v11173_v47 = vcombine.high %v21965_v44, %v21964_v51  ;;  %v21966_v13 = vld [vmem:[#allocation63_spill] sm:$0xff]  ;;  %v11172_v63 = vcombine.low %v21965_v44, %v21964_v51 }
 0x7c0   :  { %8783 = vmatpush2.bf16.msra.mxu1 %v11200_v25  ;;  %v21967_v25 = vld [vmem:[#allocation61_spill] sm:$0xff] }
 0x7c1   :  { %8784 = vmatprep.subr.bf16.mxu1 %v11197_v54  ;;  %8937 = vmatpush1.bf16.msra.mxu0 %v10966_v29  ;;  %v11003_v42 = vcombine.high %v21967_v25, %v21966_v13  ;;  %v6198_v54 = vld [vmem:[#allocation3 + $0x30] sm:$0xff]  ;;  %v21968_v29 = vld [vmem:[#allocation358_spill] sm:$0xff] }
 0x7c2   :  { %8938 = vmatprep.subr.bf16.mxu0 %v10963_v7  ;;  %v11297_v36 = vcombine.high %v21969_v49, %v21968_v29  ;;  %v11002_v7 = vcombine.low %v21967_v25, %v21966_v13  ;;  %v11296_v27 = vcombine.low %v21969_v49, %v21968_v29  ;;  %v21994_v49 = vld [vmem:[#allocation163_spill] sm:$0xff] }
 0x7c4   :  { %8785 = vmatpush2.bf16.msra.mxu1 %v11196_v37  ;;  %v6203_v37 = vld [vmem:[#allocation3 + $0x58] sm:$0xff] }
 0x7c5   :  { %8786 = vmatprep.subr.bf16.mxu1 %v11193_v60  ;;  %8939 = vmatpush1.bf16.msra.mxu0 %v10962_v55  ;;  %v10999_v60 = vcombine.high %v21971_v43, %v21970_v62  ;;  %v19635_v55 = vpack.c.bf16 %v6198_v54, %v6198_v54  ;;  %v19639_v57 = vpack.c.bf16 %v6203_v37, %v6203_v37  ;;  %v21996_v62 = vld [vmem:[#allocation330_spill] sm:$0xff]  ;;  %v21997_v43 = vld [vmem:[#allocation328_spill] sm:$0xff] }
 0x7c6   :  { %8940 = vmatprep.subr.bf16.mxu0 %v10959_v56  ;;  %v21972_v56 = vld [vmem:[#allocation354_spill] sm:$0xff] }
 0x7c8   :  { %8787 = vmatpush2.bf16.msra.mxu1 %v11192_v0  ;;  %v21973_v0 = vld [vmem:[#allocation352_spill] sm:$0xff] }
 0x7c9   :  { %8788 = vmatprep.subr.bf16.mxu1 %v11189_v53  ;;  %8941 = vmatpush1.bf16.msra.mxu0 %v10958_v41  ;;  %v11293_v45 = vcombine.high %v21973_v0, %v21972_v56  ;;  %v21974_v53 = vld [vmem:[#allocation55_spill] sm:$0xff]  ;;  %v21975_v41 = vld [vmem:[#allocation53_spill] sm:$0xff]  ;;  %v11292_v15 = vcombine.low %v21973_v0, %v21972_v56 }
 0x7ca   :  { %8942 = vmatprep.subr.bf16.mxu0 %v10955_v20  ;;  %v10995_v2 = vcombine.high %v21975_v41, %v21974_v53  ;;  %v21976_v20 = vld [vmem:[#allocation350_spill] sm:$0xff]  ;;  %v10994_v50 = vcombine.low %v21975_v41, %v21974_v53  ;;  %v21998_v56 = vld [vmem:[#allocation159_spill] sm:$0xff]  ;;  %v21999_v0 = vld [vmem:[#allocation157_spill] sm:$0xff] }
 0x7cb   :  { %v22001_v53 = vld [vmem:[#allocation388_spill] sm:$0xff] }
 0x7cc   :  { %8789 = vmatpush2.bf16.msra.mxu1 %v11188_v9  ;;  %v21977_v9 = vld [vmem:[#allocation348_spill] sm:$0xff] }
 0x7cd   :  { %8790 = vmatprep.subr.bf16.mxu1 %v11185_v22  ;;  %8943 = vmatpush1.bf16.msra.mxu0 %v10954_v1  ;;  %v11289_v16 = vcombine.high %v21977_v9, %v21976_v20  ;;  %v21978_v22 = vld [vmem:[#allocation51_spill] sm:$0xff]  ;;  %v21979_v1 = vld [vmem:[#allocation49_spill] sm:$0xff]  ;;  %v11288_v52 = vcombine.low %v21977_v9, %v21976_v20 }
 0x7ce   :  { %8944 = vmatprep.subr.bf16.mxu0 %v10951_v26  ;;  %v10991_v39 = vcombine.high %v21979_v1, %v21978_v22  ;;  %v21980_v26 = vld [vmem:[#allocation346_spill] sm:$0xff]  ;;  %v10990_v19 = vcombine.low %v21979_v1, %v21978_v22  ;;  %v22003_v20 = vld [vmem:[#allocation153_spill] sm:$0xff] }
 0x7d0   :  { %8791 = vmatpush2.bf16.msra.mxu1 %v11184_v59  ;;  %v21981_v59 = vld [vmem:[#allocation344_spill] sm:$0xff] }
 0x7d1   :  { %8792 = vmatprep.subr.bf16.mxu1 %v11181_v35  ;;  %8945 = vmatpush1.bf16.msra.mxu0 %v10950_v8  ;;  %v11285_v3 = vcombine.high %v21981_v59, %v21980_v26  ;;  %v21982_v35 = vld [vmem:[#allocation47_spill] sm:$0xff]  ;;  %v21983_v8 = vld [vmem:[#allocation45_spill] sm:$0xff]  ;;  %v11284_v4 = vcombine.low %v21981_v59, %v21980_v26 }
 0x7d2   :  { %8946 = vmatprep.subr.bf16.mxu0 %v11011_v30  ;;  %v10987_v21 = vcombine.high %v21983_v8, %v21982_v35  ;;  %v21984_v30 = vld [vmem:[#allocation342_spill] sm:$0xff]  ;;  %v10986_v17 = vcombine.low %v21983_v8, %v21982_v35 }
 0x7d4   :  { %8793 = vmatpush2.bf16.msra.mxu1 %v11180_v23  ;;  %v21985_v23 = vld [vmem:[#allocation340_spill] sm:$0xff] }
 0x7d5   :  { %8794 = vmatprep.subr.bf16.mxu1 %v11177_v6  ;;  %8947 = vmatpush2.bf16.msra.mxu0 %v11010_v28  ;;  %v11281_v58 = vcombine.high %v21985_v23, %v21984_v30  ;;  %v21986_v6 = vld [vmem:[#allocation43_spill] sm:$0xff]  ;;  %v21987_v28 = vld [vmem:[#allocation41_spill] sm:$0xff]  ;;  %v11280_v10 = vcombine.low %v21985_v23, %v21984_v30 }
 0x7d6   :  { %8948 = vmatprep.subr.bf16.mxu0 %v11007_v5  ;;  %v10983_v40 = vcombine.high %v21987_v28, %v21986_v6  ;;  %v21988_v5 = vld [vmem:[#allocation338_spill] sm:$0xff]  ;;  %v10982_v44 = vcombine.low %v21987_v28, %v21986_v6 }
 0x7d8   :  { %8795 = vmatpush2.bf16.msra.mxu1 %v11176_v46  ;;  %v21989_v46 = vld [vmem:[#allocation336_spill] sm:$0xff] }
 0x7d9   :  { %8796 = vmatprep.subr.bf16.mxu1 %v11173_v47  ;;  %8949 = vmatpush2.bf16.msra.mxu0 %v11006_v32  ;;  %v11277_v51 = vcombine.high %v21989_v46, %v21988_v5  ;;  %v21990_v47 = vld [vmem:[#allocation167_spill] sm:$0xff]  ;;  %v21991_v32 = vld [vmem:[#allocation165_spill] sm:$0xff]  ;;  %v11276_v25 = vcombine.low %v21989_v46, %v21988_v5 }
 0x7da   :  { %8950 = vmatprep.subr.bf16.mxu0 %v11003_v42  ;;  %v11107_v13 = vcombine.high %v21991_v32, %v21990_v47  ;;  %v21992_v42 = vld [vmem:[#allocation334_spill] sm:$0xff]  ;;  %v11106_v29 = vcombine.low %v21991_v32, %v21990_v47 }
 0x7dc   :  { %8797 = vmatpush2.bf16.msra.mxu1 %v11172_v63  ;;  %v21993_v63 = vld [vmem:[#allocation332_spill] sm:$0xff] }
 0x7dd   :  { %8848 = vmatprep.subr.bf16.mxu1 %v11297_v36  ;;  %8951 = vmatpush2.bf16.msra.mxu0 %v11002_v7  ;;  %v11273_v54 = vcombine.high %v21993_v63, %v21992_v42  ;;  %v21995_v36 = vld [vmem:[#allocation161_spill] sm:$0xff]  ;;  %v11272_v37 = vcombine.low %v21993_v63, %v21992_v42 }
 0x7de   :  { %8952 = vmatprep.subr.bf16.mxu0 %v10999_v60  ;;  %v11103_v7 = vcombine.high %v21995_v36, %v21994_v49  ;;  %v11269_v60 = vcombine.high %v21997_v43, %v21996_v62 }
 0x7df   :  { %8799 = vmatmul.mubr.bf16.vlgmr.msra.gmra.mxu1 %v19635_v55 }
 0x7e0   :  { %8849 = vmatpush1.bf16.msra.mxu1 %v11296_v27  ;;  %8880 = vmatprep.mubr.bf16.mxu1 %v19639_v57  ;;  %v11102_v27 = vcombine.low %v21995_v36, %v21994_v49 }
 0x7e1   :  { %8850 = vmatprep.subr.bf16.mxu1 %v11293_v45  ;;  %8953 = vmatpush2.bf16.msra.mxu0 %v10998_v18  ;;  %v11099_v45 = vcombine.high %v21999_v0, %v21998_v56  ;;  %v11268_v18 = vcombine.low %v21997_v43, %v21996_v62 }
 0x7e2   :  { %8954 = vmatprep.subr.bf16.mxu0 %v10995_v2  ;;  %v11098_v2 = vcombine.low %v21999_v0, %v21998_v56 }
 0x7e4   :  { %8851 = vmatpush1.bf16.msra.mxu1 %v11292_v15  ;;  %v22002_v15 = vld [vmem:[#allocation155_spill] sm:$0xff] }
 0x7e5   :  { %8852 = vmatprep.subr.bf16.mxu1 %v11289_v16  ;;  %8955 = vmatpush2.bf16.msra.mxu0 %v10994_v50  ;;  %v11095_v9 = vcombine.high %v22003_v20, %v22002_v15  ;;  %v22004_v16 = vld [vmem:[#allocation386_spill] sm:$0xff]  ;;  %v22005_v50 = vld [vmem:[#allocation384_spill] sm:$0xff]  ;;  %v11094_v1 = vcombine.low %v22003_v20, %v22002_v15 }
 0x7e6   :  { %8956 = vmatprep.subr.bf16.mxu0 %v10991_v39  ;;  %v11325_v22 = vcombine.high %v22005_v50, %v22004_v16  ;;  %v22006_v39 = vld [vmem:[#allocation151_spill] sm:$0xff]  ;;  %v11324_v59 = vcombine.low %v22005_v50, %v22004_v16 }
 0x7e8   :  { %8853 = vmatpush1.bf16.msra.mxu1 %v11288_v52  ;;  %v22007_v52 = vld [vmem:[#allocation149_spill] sm:$0xff] }
 0x7e9   :  { %8854 = vmatprep.subr.bf16.mxu1 %v11285_v3  ;;  %8957 = vmatpush2.bf16.msra.mxu0 %v10990_v19  ;;  %v11091_v26 = vcombine.high %v22007_v52, %v22006_v39  ;;  %v22008_v3 = vld [vmem:[#allocation382_spill] sm:$0xff]  ;;  %v22009_v19 = vld [vmem:[#allocation380_spill] sm:$0xff]  ;;  %v11090_v8 = vcombine.low %v22007_v52, %v22006_v39  ;;  %v22033_v39 = vld [vmem:[#allocation101_spill] sm:$0xff] }
 0x7ea   :  { %8958 = vmatprep.subr.bf16.mxu0 %v10987_v21  ;;  %v11321_v35 = vcombine.high %v22009_v19, %v22008_v3  ;;  %v22010_v21 = vld [vmem:[#allocation147_spill] sm:$0xff]  ;;  %v11320_v23 = vcombine.low %v22009_v19, %v22008_v3  ;;  %v22035_v3 = vld [vmem:[#allocation185_spill] sm:$0xff] }
 0x7ec   :  { %8855 = vmatpush1.bf16.msra.mxu1 %v11284_v4  ;;  %v22011_v4 = vld [vmem:[#allocation145_spill] sm:$0xff] }
 0x7ed   :  { %8856 = vmatprep.subr.bf16.mxu1 %v11281_v58  ;;  %8959 = vmatpush2.bf16.msra.mxu0 %v10986_v17  ;;  %v11087_v30 = vcombine.high %v22011_v4, %v22010_v21  ;;  %v22012_v58 = vld [vmem:[#allocation378_spill] sm:$0xff]  ;;  %v22013_v17 = vld [vmem:[#allocation376_spill] sm:$0xff]  ;;  %v11086_v28 = vcombine.low %v22011_v4, %v22010_v21  ;;  %v22036_v21 = vld [vmem:[#allocation99_spill] sm:$0xff] }
 0x7ee   :  { %8960 = vmatprep.subr.bf16.mxu0 %v10983_v40  ;;  %v11317_v6 = vcombine.high %v22013_v17, %v22012_v58  ;;  %v22014_v40 = vld [vmem:[#allocation143_spill] sm:$0xff]  ;;  %v11316_v46 = vcombine.low %v22013_v17, %v22012_v58  ;;  %v22037_v4 = vld [vmem:[#allocation97_spill] sm:$0xff] }
 0x7ef   :  { %v22038_v58 = vld [vmem:[#allocation183_spill] sm:$0xff]  ;;  %v22039_v17 = vld [vmem:[#allocation181_spill] sm:$0xff] }
 0x7f0   :  { %8857 = vmatpush1.bf16.msra.mxu1 %v11280_v10  ;;  %v22015_v10 = vld [vmem:[#allocation141_spill] sm:$0xff] }
 0x7f1   :  { %8858 = vmatprep.subr.bf16.mxu1 %v11277_v51  ;;  %8961 = vmatpush2.bf16.msra.mxu0 %v10982_v44  ;;  %v11083_v5 = vcombine.high %v22015_v10, %v22014_v40  ;;  %v22016_v51 = vld [vmem:[#allocation374_spill] sm:$0xff]  ;;  %v22017_v44 = vld [vmem:[#allocation372_spill] sm:$0xff]  ;;  %v11082_v32 = vcombine.low %v22015_v10, %v22014_v40  ;;  %v11038_v40 = vcombine.low %v22037_v4, %v22036_v21 }
 0x7f2   :  { %9012 = vmatprep.subr.bf16.mxu0 %v11107_v13  ;;  %v11313_v47 = vcombine.high %v22017_v44, %v22016_v51  ;;  %v22018_v13 = vld [vmem:[#allocation139_spill] sm:$0xff]  ;;  %v11312_v63 = vcombine.low %v22017_v44, %v22016_v51  ;;  %v11122_v44 = vcombine.low %v22039_v17, %v22038_v58 }
 0x7f4   :  { %8859 = vmatpush1.bf16.msra.mxu1 %v11276_v25  ;;  %8963 = vmatmul.mubr.bf16.vlgmr.msra.gmra.mxu0 %v19352_v61  ;;  %v22000_v61 = vld [vmem:[#allocation390_spill] sm:$0xff]  ;;  %v22019_v25 = vld [vmem:[#allocation137_spill] sm:$0xff] }
 0x7f5   :  { %8860 = vmatprep.subr.bf16.mxu1 %v11273_v54  ;;  %9013 = vmatpush1.bf16.msra.mxu0 %v11106_v29  ;;  %v11329_v41 = vcombine.high %v22001_v53, %v22000_v61  ;;  %v11079_v42 = vcombine.high %v22019_v25, %v22018_v13  ;;  %v22020_v54 = vld [vmem:[#allocation370_spill] sm:$0xff]  ;;  %v22021_v29 = vld [vmem:[#allocation368_spill] sm:$0xff]  ;;  %v11078_v36 = vcombine.low %v22019_v25, %v22018_v13 }
 0x7f6   :  { %9014 = vmatprep.subr.bf16.mxu0 %v11103_v7  ;;  %9044 = vmatprep.mubr.bf16.mxu0 %v19271_v14  ;;  %v11328_v14 = vcombine.low %v22001_v53, %v22000_v61  ;;  %v11309_v49 = vcombine.high %v22021_v29, %v22020_v54  ;;  %v22022_v7 = vld [vmem:[#allocation199_spill] sm:$0xff]  ;;  %v11308_v43 = vcombine.low %v22021_v29, %v22020_v54  ;;  %v22045_v29 = vld [vmem:[#allocation89_spill] sm:$0xff] }
 0x7f7   :  { %v22044_v54 = vld [vmem:[#allocation91_spill] sm:$0xff] }
 0x7f8   :  { %8861 = vmatpush1.bf16.msra.mxu1 %v11272_v37  ;;  %v22023_v37 = vld [vmem:[#allocation197_spill] sm:$0xff] }
 0x7f9   :  { %8862 = vmatprep.subr.bf16.mxu1 %v11269_v60  ;;  %9015 = vmatpush1.bf16.msra.mxu0 %v11102_v27  ;;  %v11139_v62 = vcombine.high %v22023_v37, %v22022_v7  ;;  %v22024_v60 = vld [vmem:[#allocation366_spill] sm:$0xff]  ;;  %v22025_v27 = vld [vmem:[#allocation364_spill] sm:$0xff]  ;;  %v11138_v0 = vcombine.low %v22023_v37, %v22022_v7  ;;  %v22046_v37 = vld [vmem:[#allocation175_spill] sm:$0xff] }
 0x7fa   :  { %9016 = vmatprep.subr.bf16.mxu0 %v11099_v45  ;;  %v11305_v56 = vcombine.high %v22025_v27, %v22024_v60  ;;  %v22026_v45 = vld [vmem:[#allocation195_spill] sm:$0xff]  ;;  %v11304_v53 = vcombine.low %v22025_v27, %v22024_v60  ;;  %v11030_v60 = vcombine.low %v22045_v29, %v22044_v54 }
 0x7fc   :  { %8863 = vmatpush1.bf16.msra.mxu1 %v11268_v18  ;;  %v22027_v18 = vld [vmem:[#allocation193_spill] sm:$0xff] }
 0x7fd   :  { %8864 = vmatprep.subr.bf16.mxu1 %v11329_v41  ;;  %9017 = vmatpush1.bf16.msra.mxu0 %v11098_v2  ;;  %v11135_v61 = vcombine.high %v22027_v18, %v22026_v45  ;;  %v22028_v41 = vld [vmem:[#allocation362_spill] sm:$0xff]  ;;  %v22029_v2 = vld [vmem:[#allocation360_spill] sm:$0xff]  ;;  %v11134_v20 = vcombine.low %v22027_v18, %v22026_v45 }
 0x7fe   :  { %9018 = vmatprep.subr.bf16.mxu0 %v11095_v9  ;;  %v11301_v15 = vcombine.high %v22029_v2, %v22028_v41  ;;  %v22030_v9 = vld [vmem:[#allocation191_spill] sm:$0xff]  ;;  %v11300_v50 = vcombine.low %v22029_v2, %v22028_v41  ;;  %v22051_v41 = vld [vmem:[#allocation169_spill] sm:$0xff] }
 0x800   :  { %8865 = vmatpush2.bf16.msra.mxu1 %v11328_v14  ;;  %v22031_v14 = vld [vmem:[#allocation189_spill] sm:$0xff] }
 0x801   :  { %8866 = vmatprep.subr.bf16.mxu1 %v11325_v22  ;;  %9019 = vmatpush1.bf16.msra.mxu0 %v11094_v1  ;;  %v11131_v16 = vcombine.high %v22031_v14, %v22030_v9  ;;  %v6202_v22 = vld [vmem:[#allocation3 + $0x50] sm:$0xff]  ;;  %v22032_v1 = vld [vmem:[#allocation103_spill] sm:$0xff] }
 0x802   :  { %9020 = vmatprep.subr.bf16.mxu0 %v11091_v26  ;;  %v11043_v52 = vcombine.high %v22033_v39, %v22032_v1  ;;  %v11130_v26 = vcombine.low %v22031_v14, %v22030_v9  ;;  %v22053_v9 = vld [vmem:[#allocation81_spill] sm:$0xff] }
 0x804   :  { %8867 = vmatpush2.bf16.msra.mxu1 %v11324_v59  ;;  %v22034_v59 = vld [vmem:[#allocation187_spill] sm:$0xff] }
 0x805   :  { %8868 = vmatprep.subr.bf16.mxu1 %v11321_v35  ;;  %9021 = vmatpush1.bf16.msra.mxu0 %v11090_v8  ;;  %v11127_v19 = vcombine.high %v22035_v3, %v22034_v59  ;;  %v19771_v35 = vpack.c.bf16 %v6202_v22, %v6202_v22  ;;  %v11042_v8 = vcombine.low %v22033_v39, %v22032_v1  ;;  %v22055_v22 = vld [vmem:[#allocation293_spill] sm:$0xff] }
 0x806   :  { %9022 = vmatprep.subr.bf16.mxu0 %v11087_v30  ;;  %v11039_v30 = vcombine.high %v22037_v4, %v22036_v21 }
 0x808   :  { %8869 = vmatpush2.bf16.msra.mxu1 %v11320_v23  ;;  %v11126_v23 = vcombine.low %v22035_v3, %v22034_v59 }
 0x809   :  { %8870 = vmatprep.subr.bf16.mxu1 %v11317_v6  ;;  %9023 = vmatpush1.bf16.msra.mxu0 %v11086_v28  ;;  %v11123_v6 = vcombine.high %v22039_v17, %v22038_v58 }
 0x80a   :  { %9024 = vmatprep.subr.bf16.mxu0 %v11083_v5  ;;  %v22040_v5 = vld [vmem:[#allocation95_spill] sm:$0xff] }
 0x80c   :  { %8871 = vmatpush2.bf16.msra.mxu1 %v11316_v46  ;;  %v22041_v46 = vld [vmem:[#allocation93_spill] sm:$0xff] }
 0x80d   :  { %8872 = vmatprep.subr.bf16.mxu1 %v11313_v47  ;;  %9025 = vmatpush1.bf16.msra.mxu0 %v11082_v32  ;;  %v11035_v51 = vcombine.high %v22041_v46, %v22040_v5  ;;  %v22042_v47 = vld [vmem:[#allocation179_spill] sm:$0xff]  ;;  %v22043_v32 = vld [vmem:[#allocation177_spill] sm:$0xff] }
 0x80e   :  { %9026 = vmatprep.subr.bf16.mxu0 %v11079_v42  ;;  %v11119_v13 = vcombine.high %v22043_v32, %v22042_v47  ;;  %v11034_v42 = vcombine.low %v22041_v46, %v22040_v5 }
 0x810   :  { %8873 = vmatpush2.bf16.msra.mxu1 %v11312_v63 }
 0x811   :  { %8874 = vmatprep.subr.bf16.mxu1 %v11309_v49  ;;  %9027 = vmatpush1.bf16.msra.mxu0 %v11078_v36  ;;  %v11031_v49 = vcombine.high %v22045_v29, %v22044_v54  ;;  %v11118_v36 = vcombine.low %v22043_v32, %v22042_v47  ;;  %v22066_v32 = vld [vmem:[#allocation283_spill] sm:$0xff] }
 0x812   :  { %9028 = vmatprep.subr.bf16.mxu0 %v11139_v62  ;;  %v22047_v62 = vld [vmem:[#allocation173_spill] sm:$0xff] }
 0x813   :  { %v11114_v18 = vcombine.low %v22047_v62, %v22046_v37 }
 0x814   :  { %8875 = vmatpush2.bf16.msra.mxu1 %v11308_v43  ;;  %v11115_v43 = vcombine.high %v22047_v62, %v22046_v37 }
 0x815   :  { %8876 = vmatprep.subr.bf16.mxu1 %v11305_v56  ;;  %9029 = vmatpush2.bf16.msra.mxu0 %v11138_v0  ;;  %v22048_v56 = vld [vmem:[#allocation87_spill] sm:$0xff]  ;;  %v22049_v0 = vld [vmem:[#allocation85_spill] sm:$0xff] }
 0x816   :  { %9030 = vmatprep.subr.bf16.mxu0 %v11135_v61  ;;  %v11027_v45 = vcombine.high %v22049_v0, %v22048_v56 }
 0x818   :  { %8877 = vmatpush2.bf16.msra.mxu1 %v11304_v53  ;;  %v22050_v53 = vld [vmem:[#allocation171_spill] sm:$0xff] }
 0x819   :  { %8878 = vmatprep.subr.bf16.mxu1 %v11301_v15  ;;  %9031 = vmatpush2.bf16.msra.mxu0 %v11134_v20  ;;  %v11111_v2 = vcombine.high %v22051_v41, %v22050_v53  ;;  %v11026_v15 = vcombine.low %v22049_v0, %v22048_v56  ;;  %v22052_v20 = vld [vmem:[#allocation83_spill] sm:$0xff] }
 0x81a   :  { %9032 = vmatprep.subr.bf16.mxu0 %v11131_v16  ;;  %v11023_v14 = vcombine.high %v22053_v9, %v22052_v20  ;;  %v11110_v16 = vcombine.low %v22051_v41, %v22050_v53  ;;  %v11022_v39 = vcombine.low %v22053_v9, %v22052_v20  ;;  %v22074_v0 = vld [vmem:[#allocation275_spill] sm:$0xff]  ;;  %v22077_v41 = vld [vmem:[#allocation121_spill] sm:$0xff] }
 0x81b   :  { %v22076_v53 = vld [vmem:[#allocation123_spill] sm:$0xff]  ;;  %v22079_v9 = vld [vmem:[#allocation269_spill] sm:$0xff] }
 0x81c   :  { %8879 = vmatpush2.bf16.msra.mxu1 %v11300_v50  ;;  %v22054_v50 = vld [vmem:[#allocation295_spill] sm:$0xff] }
 0x81d   :  { %8971 = vmatprep.subr.bf16.mxu1 %v11043_v52  ;;  %9033 = vmatpush2.bf16.msra.mxu0 %v11130_v26  ;;  %v11235_v1 = vcombine.high %v22055_v22, %v22054_v50  ;;  %v22056_v52 = vld [vmem:[#allocation79_spill] sm:$0xff]  ;;  %v22057_v26 = vld [vmem:[#allocation77_spill] sm:$0xff]  ;;  %v11234_v3 = vcombine.low %v22055_v22, %v22054_v50 }
 0x81e   :  { %9034 = vmatprep.subr.bf16.mxu0 %v11127_v19  ;;  %v11019_v59 = vcombine.high %v22057_v26, %v22056_v52  ;;  %v22058_v19 = vld [vmem:[#allocation291_spill] sm:$0xff]  ;;  %v11018_v4 = vcombine.low %v22057_v26, %v22056_v52  ;;  %v22081_v22 = vld [vmem:[#allocation117_spill] sm:$0xff] }
 0x81f   :  { %v19781_v28 = vpop.f32.mrf.mxu1  ;;  %8881 = vmatmul.mubr.bf16.vlgmr.msra.gmra.mxu1 %v19771_v35  ;;  %v22078_v20 = vld [vmem:[#allocation271_spill] sm:$0xff]  ;;  %v22083_v26 = vld [vmem:[#allocation265_spill] sm:$0xff] }
 0x820   :  { %8972 = vmatpush1.bf16.msra.mxu1 %v11042_v8  ;;  %9003 = vmatprep.mubr.bf16.mxu1 %v19356_v48  ;;  %v22059_v8 = vld [vmem:[#allocation289_spill] sm:$0xff]  ;;  %v22080_v50 = vld [vmem:[#allocation119_spill] sm:$0xff] }
 0x821   :  { %v19787_v10 = vpop.f32.mrf.mxu1  ;;  %8973 = vmatprep.subr.bf16.mxu1 %v11039_v30  ;;  %9035 = vmatpush2.bf16.msra.mxu0 %v11126_v23  ;;  %v11231_v21 = vcombine.high %v22059_v8, %v22058_v19  ;;  %v22060_v30 = vld [vmem:[#allocation75_spill] sm:$0xff]  ;;  %v22061_v23 = vld [vmem:[#allocation73_spill] sm:$0xff]  ;;  %v11230_v17 = vcombine.low %v22059_v8, %v22058_v19 }
 0x822   :  { %9036 = vmatprep.subr.bf16.mxu0 %v11123_v6  ;;  %v11015_v58 = vcombine.high %v22061_v23, %v22060_v30  ;;  %v22062_v6 = vld [vmem:[#allocation287_spill] sm:$0xff]  ;;  %v11014_v46 = vcombine.low %v22061_v23, %v22060_v30  ;;  %v22085_v8 = vld [vmem:[#allocation113_spill] sm:$0xff]  ;;  %v6620_v30 = vlaneseq }
 0x823   :  { %v8681_v25 = vpop.f32.mrf.mxu1  ;;  %v22082_v52 = vld [vmem:[#allocation267_spill] sm:$0xff] }
 0x824   :  { %8974 = vmatpush1.bf16.msra.mxu1 %v11038_v40  ;;  %v19797_v48 = vpop.f32.mrf.mxu0  ;;  %v22063_v40 = vld [vmem:[#allocation285_spill] sm:$0xff]  ;;  %v22084_v19 = vld [vmem:[#allocation115_spill] sm:$0xff] }
 0x825   :  { %v8682_v63 = vpop.f32.mrf.mxu1  ;;  %8975 = vmatprep.subr.bf16.mxu1 %v11035_v51  ;;  %9037 = vmatpush2.bf16.msra.mxu0 %v11122_v44  ;;  %v11227_v5 = vcombine.high %v22063_v40, %v22062_v6  ;;  %v22065_v51 = vld [vmem:[#allocation133_spill] sm:$0xff]  ;;  %v11226_v47 = vcombine.low %v22063_v40, %v22062_v6  ;;  %v22086_v23 = vld [vmem:[#allocation327_spill] sm:$0xff]  ;;  %v11054_v6 = vcombine.low %v22085_v8, %v22084_v19 }
 0x826   :  { %v19803_v7 = vpop.f32.mrf.mxu0  ;;  %9038 = vmatprep.subr.bf16.mxu0 %v11119_v13  ;;  %v22067_v13 = vld [vmem:[#allocation281_spill] sm:$0xff]  ;;  %v22088_v40 = vld [vmem:[#allocation111_spill] sm:$0xff] }
 0x827   :  { %v11223_v25 = vcombine.high %v22067_v13, %v22066_v32  ;;  %v22069_v63 = vld [vmem:[#allocation129_spill] sm:$0xff]  ;;  %v11222_v29 = vcombine.low %v22067_v13, %v22066_v32 }
 0x828   :  { %8976 = vmatpush1.bf16.msra.mxu1 %v11034_v42  ;;  %v8763_v27 = vpop.f32.mrf.mxu0  ;;  %v22068_v42 = vld [vmem:[#allocation131_spill] sm:$0xff] }
 0x829   :  { %8977 = vmatprep.subr.bf16.mxu1 %v11031_v49  ;;  %9039 = vmatpush2.bf16.msra.mxu0 %v11118_v36  ;;  %v11071_v54 = vcombine.high %v22069_v63, %v22068_v42  ;;  %v22070_v49 = vld [vmem:[#allocation279_spill] sm:$0xff]  ;;  %v22071_v36 = vld [vmem:[#allocation277_spill] sm:$0xff]  ;;  %v11070_v62 = vcombine.low %v22069_v63, %v22068_v42 }
 0x82a   :  { %v8764_v61 = vpop.f32.mrf.mxu0  ;;  %9040 = vmatprep.subr.bf16.mxu0 %v11115_v43  ;;  %v11219_v37 = vcombine.high %v22071_v36, %v22070_v49  ;;  %v22072_v43 = vld [vmem:[#allocation127_spill] sm:$0xff]  ;;  %v11218_v56 = vcombine.low %v22071_v36, %v22070_v49  ;;  %v22095_v49 = vld [vmem:[#allocation317_spill] sm:$0xff] }
 0x82c   :  { %8978 = vmatpush1.bf16.msra.mxu1 %v11030_v60  ;;  %v22073_v60 = vld [vmem:[#allocation125_spill] sm:$0xff] }
 0x82d   :  { %8979 = vmatprep.subr.bf16.mxu1 %v11027_v45  ;;  %9041 = vmatpush2.bf16.msra.mxu0 %v11114_v18  ;;  %v11067_v27 = vcombine.high %v22073_v60, %v22072_v43  ;;  %v22075_v45 = vld [vmem:[#allocation273_spill] sm:$0xff]  ;;  %v11066_v61 = vcombine.low %v22073_v60, %v22072_v43  ;;  %v22096_v60 = vld [vmem:[#allocation231_spill] sm:$0xff] }
 0x82e   :  { %9042 = vmatprep.subr.bf16.mxu0 %v11111_v2  ;;  %v11215_v18 = vcombine.high %v22075_v45, %v22074_v0  ;;  %v11063_v2 = vcombine.high %v22077_v41, %v22076_v53 }
 0x830   :  { %8980 = vmatpush1.bf16.msra.mxu1 %v11026_v15  ;;  %v11214_v15 = vcombine.low %v22075_v45, %v22074_v0 }
 0x831   :  { %8981 = vmatprep.subr.bf16.mxu1 %v11023_v14  ;;  %9043 = vmatpush2.bf16.msra.mxu0 %v11110_v16  ;;  %v11211_v14 = vcombine.high %v22079_v9, %v22078_v20  ;;  %v11062_v16 = vcombine.low %v22077_v41, %v22076_v53 }
 0x832   :  { %9094 = vmatprep.subr.bf16.mxu0 %v11235_v1  ;;  %v11059_v1 = vcombine.high %v22081_v22, %v22080_v50 }
 0x834   :  { %8982 = vmatpush1.bf16.msra.mxu1 %v11022_v39  ;;  %9045 = vmatmul.mubr.bf16.vlgmr.msra.gmra.mxu0 %v19367_v31  ;;  %v22064_v31 = vld [vmem:[#allocation135_spill] sm:$0xff]  ;;  %v11210_v39 = vcombine.low %v22079_v9, %v22078_v20  ;;  %v22101_v20 = vld [vmem:[#allocation225_spill] sm:$0xff] }
 0x835   :  { %8983 = vmatprep.subr.bf16.mxu1 %v11019_v59  ;;  %9095 = vmatpush1.bf16.msra.mxu0 %v11234_v3  ;;  %v11075_v44 = vcombine.high %v22065_v51, %v22064_v31  ;;  %v11207_v59 = vcombine.high %v22083_v26, %v22082_v52  ;;  %v11058_v3 = vcombine.low %v22081_v22, %v22080_v50  ;;  %v22102_v50 = vld [vmem:[#allocation311_spill] sm:$0xff]  ;;  %v22103_v22 = vld [vmem:[#allocation309_spill] sm:$0xff] }
 0x836   :  { %9096 = vmatprep.subr.bf16.mxu0 %v11231_v21  ;;  %9126 = vmatprep.mubr.bf16.mxu0 %v19376_v38  ;;  %v11074_v38 = vcombine.low %v22065_v51, %v22064_v31  ;;  %v11055_v21 = vcombine.high %v22085_v8, %v22084_v19  ;;  %v19895_v51 = vshrl.u32 %v6620_v30, 7  ;;  %v22104_v19 = vld [vmem:[#allocation223_spill] sm:$0xff] }
 0x838   :  { %8984 = vmatpush1.bf16.msra.mxu1 %v11018_v4  ;;  %v11206_v4 = vcombine.low %v22083_v26, %v22082_v52 }
 0x839   :  { %8985 = vmatprep.subr.bf16.mxu1 %v11015_v58  ;;  %9097 = vmatpush1.bf16.msra.mxu0 %v11230_v17  ;;  %v22087_v58 = vld [vmem:[#allocation325_spill] sm:$0xff] }
 0x83a   :  { %9098 = vmatprep.subr.bf16.mxu0 %v11227_v5  ;;  %v11267_v17 = vcombine.high %v22087_v58, %v22086_v23  ;;  %v22089_v5 = vld [vmem:[#allocation109_spill] sm:$0xff]  ;;  %v11266_v31 = vcombine.low %v22087_v58, %v22086_v23 }
 0x83b   :  { %v11050_v13 = vcombine.low %v22089_v5, %v22088_v40 }
 0x83c   :  { %8986 = vmatpush1.bf16.msra.mxu1 %v11014_v46  ;;  %v11051_v46 = vcombine.high %v22089_v5, %v22088_v40  ;;  %v22108_v5 = vld [vmem:[#allocation219_spill] sm:$0xff] }
 0x83d   :  { %8987 = vmatprep.subr.bf16.mxu1 %v11075_v44  ;;  %9099 = vmatpush1.bf16.msra.mxu0 %v11226_v47  ;;  %v22090_v44 = vld [vmem:[#allocation323_spill] sm:$0xff]  ;;  %v22091_v47 = vld [vmem:[#allocation321_spill] sm:$0xff] }
 0x83e   :  { %9100 = vmatprep.subr.bf16.mxu0 %v11223_v25  ;;  %v11263_v32 = vcombine.high %v22091_v47, %v22090_v44  ;;  %v22092_v25 = vld [vmem:[#allocation107_spill] sm:$0xff]  ;;  %v11262_v63 = vcombine.low %v22091_v47, %v22090_v44 }
 0x83f   :  { %v22110_v47 = vld [vmem:[#allocation303_spill] sm:$0xff] }
 0x840   :  { %8988 = vmatpush2.bf16.msra.mxu1 %v11074_v38  ;;  %v22093_v38 = vld [vmem:[#allocation105_spill] sm:$0xff] }
 0x841   :  { %8989 = vmatprep.subr.bf16.mxu1 %v11071_v54  ;;  %9101 = vmatpush1.bf16.msra.mxu0 %v11222_v29  ;;  %v11047_v42 = vcombine.high %v22093_v38, %v22092_v25  ;;  %v19906_v54 = vsub.s32 0, %v19895_v51  ;;  %v22094_v29 = vld [vmem:[#allocation319_spill] sm:$0xff]  ;;  %v11046_v43 = vcombine.low %v22093_v38, %v22092_v25 }
 0x842   :  { %9102 = vmatprep.subr.bf16.mxu0 %v11219_v37  ;;  %v11259_v36 = vcombine.high %v22095_v49, %v22094_v29  ;;  %v19913_v37 = vld [vmem:[%s20679_s8] sm:$0xf]  ;;  %v11258_v0 = vcombine.low %v22095_v49, %v22094_v29 }
 0x843   :  { %v6623_v45 = vrot.slane %v19913_v37, %v19906_v54  ;;  %v22112_v38 = vld [vmem:[#allocation215_spill] sm:$0xff] }
 0x844   :  { %8990 = vmatpush2.bf16.msra.mxu1 %v11070_v62  ;;  %v19916_v62 = vsub.s32 1, %v19895_v51 }
 0x845   :  { %8991 = vmatprep.subr.bf16.mxu1 %v11067_v27  ;;  %9103 = vmatpush1.bf16.msra.mxu0 %v11218_v56  ;;  %v22097_v27 = vld [vmem:[#allocation229_spill] sm:$0xff] }
 0x846   :  { %9104 = vmatprep.subr.bf16.mxu0 %v11215_v18  ;;  %v11171_v56 = vcombine.high %v22097_v27, %v22096_v60  ;;  %v22098_v18 = vld [vmem:[#allocation315_spill] sm:$0xff]  ;;  %v6627_v41 = vrot.slane %v19913_v37, %v19916_v62 }
 0x848   :  { %8992 = vmatpush2.bf16.msra.mxu1 %v11066_v61  ;;  %v22099_v61 = vld [vmem:[#allocation313_spill] sm:$0xff]  ;;  %v8680_v52 = vadd.f32 %v19787_v10, %v6627_v41 }
 0x849   :  { %8993 = vmatprep.subr.bf16.mxu1 %v11063_v2  ;;  %9105 = vmatpush1.bf16.msra.mxu0 %v11214_v15  ;;  %v11255_v53 = vcombine.high %v22099_v61, %v22098_v18  ;;  %v11170_v2 = vcombine.low %v22097_v27, %v22096_v60  ;;  %v22100_v15 = vld [vmem:[#allocation227_spill] sm:$0xff]  ;;  %v22107_v10 = vld [vmem:[#allocation305_spill] sm:$0xff] }
 0x84a   :  { %9106 = vmatprep.subr.bf16.mxu0 %v11211_v14  ;;  %v11167_v9 = vcombine.high %v22101_v20, %v22100_v15  ;;  %v11254_v14 = vcombine.low %v22099_v61, %v22098_v18  ;;  %v22118_v61 = vld [vmem:[#allocation407_spill] sm:$0xff] }
 0x84c   :  { %8994 = vmatpush2.bf16.msra.mxu1 %v11062_v16  ;;  %v8678_v16 = vadd.f32 %v19781_v28, %v6623_v45  ;;  %v22105_v28 = vld [vmem:[#allocation221_spill] sm:$0xff] }
 0x84d   :  { %8995 = vmatprep.subr.bf16.mxu1 %v11059_v1  ;;  %9107 = vmatpush1.bf16.msra.mxu0 %v11210_v39  ;;  %v11251_v1 = vcombine.high %v22103_v22, %v22102_v50  ;;  %v11163_v8 = vcombine.high %v22105_v28, %v22104_v19 }
 0x84e   :  { %9108 = vmatprep.subr.bf16.mxu0 %v11207_v59  ;;  %v11166_v59 = vcombine.low %v22101_v20, %v22100_v15  ;;  %v22120_v15 = vld [vmem:[#allocation207_spill] sm:$0xff]  ;;  %v22121_v20 = vld [vmem:[#allocation205_spill] sm:$0xff] }
 0x850   :  { %8996 = vmatpush2.bf16.msra.mxu1 %v11058_v3 }
 0x851   :  { %8997 = vmatprep.subr.bf16.mxu1 %v11055_v21  ;;  %9109 = vmatpush1.bf16.msra.mxu0 %v11206_v4  ;;  %v11250_v21 = vcombine.low %v22103_v22, %v22102_v50  ;;  %v22123_v50 = vld [vmem:[#allocation401_spill] sm:$0xff] }
 0x852   :  { %9110 = vmatprep.subr.bf16.mxu0 %v11267_v17 }
 0x854   :  { %8998 = vmatpush2.bf16.msra.mxu1 %v11054_v6 }
 0x855   :  { %8999 = vmatprep.subr.bf16.mxu1 %v11051_v46  ;;  %9111 = vmatpush2.bf16.msra.mxu0 %v11266_v31  ;;  %v22109_v46 = vld [vmem:[#allocation217_spill] sm:$0xff] }
 0x856   :  { %9112 = vmatprep.subr.bf16.mxu0 %v11263_v32  ;;  %v11159_v31 = vcombine.high %v22109_v46, %v22108_v5  ;;  %v22111_v32 = vld [vmem:[#allocation301_spill] sm:$0xff] }
 0x857   :  { %v11242_v29 = vcombine.low %v22111_v32, %v22110_v47 }
 0x858   :  { %9000 = vmatpush2.bf16.msra.mxu1 %v11050_v13  ;;  %v11243_v13 = vcombine.high %v22111_v32, %v22110_v47 }
 0x859   :  { %9001 = vmatprep.subr.bf16.mxu1 %v11047_v42  ;;  %9113 = vmatpush2.bf16.msra.mxu0 %v11262_v63  ;;  %v22113_v42 = vld [vmem:[#allocation213_spill] sm:$0xff] }
 0x85a   :  { %9114 = vmatprep.subr.bf16.mxu0 %v11259_v36  ;;  %v11155_v63 = vcombine.high %v22113_v42, %v22112_v38  ;;  %v22114_v36 = vld [vmem:[#allocation299_spill] sm:$0xff]  ;;  %v11154_v27 = vcombine.low %v22113_v42, %v22112_v38  ;;  %v22135_v38 = vld [vmem:[#allocation253_spill] sm:$0xff] }
 0x85c   :  { %9002 = vmatpush2.bf16.msra.mxu1 %v11046_v43  ;;  %v22115_v43 = vld [vmem:[#allocation297_spill] sm:$0xff] }
 0x85d   :  { %9053 = vmatprep.subr.bf16.mxu1 %v11171_v56  ;;  %9115 = vmatpush2.bf16.msra.mxu0 %v11258_v0  ;;  %v11239_v60 = vcombine.high %v22115_v43, %v22114_v36  ;;  %v22116_v56 = vld [vmem:[#allocation211_spill] sm:$0xff]  ;;  %v22117_v0 = vld [vmem:[#allocation209_spill] sm:$0xff]  ;;  %v11238_v18 = vcombine.low %v22115_v43, %v22114_v36 }
 0x85e   :  { %9116 = vmatprep.subr.bf16.mxu0 %v11255_v53  ;;  %v11151_v45 = vcombine.high %v22117_v0, %v22116_v56  ;;  %v22119_v53 = vld [vmem:[#allocation405_spill] sm:$0xff]  ;;  %v22136_v36 = vld [vmem:[#allocation251_spill] sm:$0xff] }
 0x85f   :  { %v8718_v39 = vpop.f32.mrf.mxu1  ;;  %9004 = vmatmul.mubr.bf16.vlgmr.msra.gmra.mxu1 %v19492_v34  ;;  %v22106_v34 = vld [vmem:[#allocation307_spill] sm:$0xff]  ;;  %v11347_v41 = vcombine.high %v22119_v53, %v22118_v61  ;;  %v22137_v43 = vld [vmem:[#allocation249_spill] sm:$0xff] }
 0x860   :  { %v8719_v26 = vadd.f32 %v8718_v39, %v8678_v16  ;;  %9054 = vmatpush1.bf16.msra.mxu1 %v11170_v2  ;;  %9085 = vmatprep.mubr.bf16.mxu1 %v19496_v11  ;;  %v11247_v30 = vcombine.high %v22107_v10, %v22106_v34  ;;  %v11162_v11 = vcombine.low %v22105_v28, %v22104_v19  ;;  %v22122_v16 = vld [vmem:[#allocation403_spill] sm:$0xff] }
 0x861   :  { %v8720_v3 = vpop.f32.mrf.mxu1  ;;  %9055 = vmatprep.subr.bf16.mxu1 %v11167_v9  ;;  %9117 = vmatpush2.bf16.msra.mxu0 %v11254_v14  ;;  %v11150_v2 = vcombine.low %v22117_v0, %v22116_v56  ;;  %v11147_v9 = vcombine.high %v22121_v20, %v22120_v15  ;;  %v11346_v14 = vcombine.low %v22119_v53, %v22118_v61  ;;  %v22126_v28 = vld [vmem:[#allocation399_spill] sm:$0xff]  ;;  %v13085_v56 = vld [vmem:[%s20680_s9 + $0x54] ss:$8 sps:$4 sm:$0xff]   ;;  %v13083_v61 = vld [vmem:[%s20680_s9 + $0x50] ss:$8 sps:$4 sm:$0xff]  }
 0x862   :  { %v8721_v4 = vadd.f32 %v8720_v3, %v8680_v52  ;;  %9118 = vmatprep.subr.bf16.mxu0 %v11251_v1  ;;  %v19951_v23 = vadd.f32 %v19797_v48, %v8719_v26  ;;  %v11246_v48 = vcombine.low %v22107_v10, %v22106_v34  ;;  %v11343_v22 = vcombine.high %v22123_v50, %v22122_v16  ;;  %v22124_v52 = vld [vmem:[#allocation203_spill] sm:$0xff]  ;;  %v22125_v26 = vld [vmem:[#allocation201_spill] sm:$0xff] }
 0x863   :  { %v8722_v58 = vpop.f32.mrf.mxu1  ;;  %v11146_v1 = vcombine.low %v22121_v20, %v22120_v15  ;;  %v11342_v3 = vcombine.low %v22123_v50, %v22122_v16  ;;  %v22128_v34 = vld [vmem:[#allocation263_spill] sm:$0xff]  ;;  %v22129_v10 = vld [vmem:[#allocation261_spill] sm:$0xff]  ;;  %v11190_v0 = vcombine.low %v22137_v43, %v22136_v36 }
 0x864   :  { %9056 = vmatpush1.bf16.msra.mxu1 %v11166_v59  ;;  %v19955_v17 = vpop.f32.mrf.mxu0  ;;  %v19958_v6 = vadd.f32 %v19803_v7, %v8721_v4  ;;  %v11158_v7 = vcombine.low %v22109_v46, %v22108_v5  ;;  %v11143_v59 = vcombine.high %v22125_v26, %v22124_v52  ;;  %v22131_v5 = vld [vmem:[#allocation393_spill] sm:$0xff]  ;;  %v13088_v53 = vld [vmem:[%s20680_s9 + $0x44] ss:$8 sps:$4 sm:$0xff]  }
 0x865   :  { %v8723_v40 = vpop.f32.mrf.mxu1  ;;  %9057 = vmatprep.subr.bf16.mxu1 %v11163_v8  ;;  %9119 = vmatpush2.bf16.msra.mxu0 %v11250_v21  ;;  %v22127_v8 = vld [vmem:[#allocation397_spill] sm:$0xff]  ;;  %v22142_v50 = vld [vmem:[#allocation239_spill] sm:$0xff] }
 0x866   :  { %v19964_v44 = vpop.f32.mrf.mxu0  ;;  %9120 = vmatprep.subr.bf16.mxu0 %v11247_v30  ;;  %v11339_v21 = vcombine.high %v22127_v8, %v22126_v28  ;;  %v11203_v30 = vcombine.high %v22129_v10, %v22128_v34  ;;  %v11338_v58 = vcombine.low %v22127_v8, %v22126_v28  ;;  %v22130_v40 = vld [vmem:[#allocation395_spill] sm:$0xff]  ;;  %v22141_v15 = vld [vmem:[#allocation241_spill] sm:$0xff] }
 0x867   :  { %v11335_v46 = vcombine.high %v22131_v5, %v22130_v40  ;;  %v11334_v32 = vcombine.low %v22131_v5, %v22130_v40  ;;  %v22145_v28 = vld [vmem:[#allocation233_spill] sm:$0xff]  ;;  %v22148_v5 = vld [vmem:[#allocation355_spill] sm:$0xff] }
 0x868   :  { %9058 = vmatpush1.bf16.msra.mxu1 %v11162_v11  ;;  %v8845_v25 = vpop.f32.mrf.mxu0 }
 0x869   :  { %9059 = vmatprep.subr.bf16.mxu1 %v11159_v31  ;;  %9121 = vmatpush2.bf16.msra.mxu0 %v11246_v48  ;;  %v22132_v31 = vld [vmem:[#allocation259_spill] sm:$0xff]  ;;  %v22133_v48 = vld [vmem:[#allocation257_spill] sm:$0xff] }
 0x86a   :  { %v8846_v49 = vpop.f32.mrf.mxu0  ;;  %9122 = vmatprep.subr.bf16.mxu0 %v11243_v13  ;;  %v11199_v47 = vcombine.high %v22133_v48, %v22132_v31  ;;  %v13079_v13 = vld [vmem:[%s20680_s9 + $0x74] ss:$8 sps:$4 sm:$0xff]   ;;  %v22134_v25 = vld [vmem:[#allocation255_spill] sm:$0xff] }
 0x86b   :  { %v11195_v42 = vcombine.high %v22135_v38, %v22134_v25  ;;  %v11194_v49 = vcombine.low %v22135_v38, %v22134_v25  ;;  %v22150_v25 = vld [vmem:[#allocation351_spill] sm:$0xff]  ;;  %v22151_v38 = vld [vmem:[#allocation349_spill] sm:$0xff] }
 0x86c   :  { %9060 = vmatpush1.bf16.msra.mxu1 %v11158_v7  ;;  %v11198_v7 = vcombine.low %v22133_v48, %v22132_v31  ;;  %v13098_v31 = vld [vmem:[%s20680_s9] ss:$8 sps:$4 sm:$0xff]   ;;  %v13103_v48 = vld [vmem:[%s20680_s9 + $0xf4] ss:$8 sps:$4 sm:$0xff]  }
 0x86d   :  { %9061 = vmatprep.subr.bf16.mxu1 %v11155_v63  ;;  %9123 = vmatpush2.bf16.msra.mxu0 %v11242_v29  ;;  %v13077_v63 = vld [vmem:[%s20680_s9 + $0x70] ss:$8 sps:$4 sm:$0xff]   ;;  %v13082_v29 = vld [vmem:[%s20680_s9 + $0x64] ss:$8 sps:$4 sm:$0xff]  }
 0x86e   :  { %9124 = vmatprep.subr.bf16.mxu0 %v11239_v60  ;;  %v11191_v60 = vcombine.high %v22137_v43, %v22136_v36 }
 0x870   :  { %9062 = vmatpush1.bf16.msra.mxu1 %v11154_v27  ;;  %v13080_v27 = vld [vmem:[%s20680_s9 + $0x60] ss:$8 sps:$4 sm:$0xff]  }
 0x871   :  { %9063 = vmatprep.subr.bf16.mxu1 %v11151_v45  ;;  %9125 = vmatpush2.bf16.msra.mxu0 %v11238_v18  ;;  %v22139_v45 = vld [vmem:[#allocation245_spill] sm:$0xff] }
 0x872   :  { %9184 = vmatprep.subr.bf16.mxu0 %v11347_v41 }
 0x874   :  { %9064 = vmatpush1.bf16.msra.mxu1 %v11150_v2  ;;  %v19994_v39 = vpop.f32.mrf.mxu0  ;;  %9127 = vmatmul.mubr.bf16.vlgmr.msra.gmra.mxu0 %v19507_v24  ;;  %v11142_v24 = vcombine.low %v22125_v26, %v22124_v52  ;;  %v22140_v2 = vld [vmem:[#allocation243_spill] sm:$0xff]  ;;  %v13089_v52 = vld [vmem:[%s20680_s9 + $0x30] ss:$8 sps:$4 sm:$0xff]  }
 0x875   :  { %9065 = vmatprep.subr.bf16.mxu1 %v11147_v9  ;;  %9185 = vmatpush1.bf16.msra.mxu0 %v11346_v14  ;;  %v11183_v20 = vcombine.high %v22141_v15, %v22140_v2  ;;  %v13086_v9 = vld [vmem:[%s20680_s9 + $0x40] ss:$8 sps:$4 sm:$0xff]   ;;  %v13091_v14 = vld [vmem:[%s20680_s9 + $0x34] ss:$8 sps:$4 sm:$0xff]   ;;  %v11182_v16 = vcombine.low %v22141_v15, %v22140_v2  ;;  %v13094_v26 = vld [vmem:[%s20680_s9 + $0x24] ss:$8 sps:$4 sm:$0xff]  }
 0x876   :  { %v20001_v19 = vpop.f32.mrf.mxu0  ;;  %9186 = vmatprep.subr.bf16.mxu0 %v11343_v22  ;;  %9208 = vmatprep.mubr.bf16.mxu0 %v13312_v12  ;;  %v11202_v12 = vcombine.low %v22129_v10, %v22128_v34  ;;  %v22143_v22 = vld [vmem:[#allocation237_spill] sm:$0xff]  ;;  %v22146_v34 = vld [vmem:[#allocation359_spill] sm:$0xff] }
 0x877   :  { %v22147_v10 = vld [vmem:[#allocation357_spill] sm:$0xff] }
 0x878   :  { %9066 = vmatpush1.bf16.msra.mxu1 %v11146_v1  ;;  %v8927_v4 = vpop.f32.mrf.mxu0  ;;  %v11179_v1 = vcombine.high %v22143_v22, %v22142_v50  ;;  %v11298_v40 = vcombine.low %v22147_v10, %v22146_v34  ;;  %v22157_v2 = vld [vmem:[#allocation337_spill] sm:$0xff] }
 0x879   :  { %9067 = vmatprep.subr.bf16.mxu1 %v11143_v59  ;;  %9187 = vmatpush1.bf16.msra.mxu0 %v11342_v3  ;;  %v11178_v59 = vcombine.low %v22143_v22, %v22142_v50  ;;  %v22144_v3 = vld [vmem:[#allocation235_spill] sm:$0xff]  ;;  %v22159_v50 = vld [vmem:[#allocation333_spill] sm:$0xff] }
 0x87a   :  { %v8928_v11 = vpop.f32.mrf.mxu0  ;;  %9188 = vmatprep.subr.bf16.mxu0 %v11339_v21  ;;  %v11175_v8 = vcombine.high %v22145_v28, %v22144_v3  ;;  %v13092_v21 = vld [vmem:[%s20680_s9 + $0x20] ss:$8 sps:$4 sm:$0xff]   ;;  %v11174_v4 = vcombine.low %v22145_v28, %v22144_v3  ;;  %v22161_v28 = vld [vmem:[#allocation329_spill] sm:$0xff] }
 0x87b   :  { %v13100_v11 = vld [vmem:[%s20680_s9 + $0x4] ss:$8 sps:$4 sm:$0xff]  }
 0x87c   :  { %9068 = vmatpush1.bf16.msra.mxu1 %v11142_v24  ;;  %v13097_v24 = vld [vmem:[%s20680_s9 + $0x14] ss:$8 sps:$4 sm:$0xff]   ;;  %v22160_v3 = vld [vmem:[#allocation331_spill] sm:$0xff] }
 0x87d   :  { %9069 = vmatprep.subr.bf16.mxu1 %v11203_v30  ;;  %9189 = vmatpush1.bf16.msra.mxu0 %v11338_v58  ;;  %v11299_v30 = vcombine.high %v22147_v10, %v22146_v34  ;;  %v13095_v58 = vld [vmem:[%s20680_s9 + $0x10] ss:$8 sps:$4 sm:$0xff]   ;;  %v11270_v34 = vcombine.low %v22161_v28, %v22160_v3 }
 0x87e   :  { %9190 = vmatprep.subr.bf16.mxu0 %v11335_v46  ;;  %v22149_v46 = vld [vmem:[#allocation353_spill] sm:$0xff] }
 0x880   :  { %9070 = vmatpush2.bf16.msra.mxu1 %v11202_v12  ;;  %v11295_v12 = vcombine.high %v22149_v46, %v22148_v5 }
 0x881   :  { %9071 = vmatprep.subr.bf16.mxu1 %v11199_v47  ;;  %9191 = vmatpush1.bf16.msra.mxu0 %v11334_v32 }
 0x882   :  { %9427 = vmatprep.subr.bf16.mxu0 %v13079_v13  ;;  %v11294_v13 = vcombine.low %v22149_v46, %v22148_v5  ;;  %v13124_v46 = vld [vmem:[%s20680_s9 + $0x84] ss:$8 sps:$4 sm:$0xff]  }
 0x884   :  { %9072 = vmatpush2.bf16.msra.mxu1 %v11198_v7  ;;  %11349 = vmatmul.mubr.msk.bf16.vlgmr.msra.gmra.mxu0 %vm4556_vm6, %v19544_v33  ;;  %v22138_v33 = vld [vmem:[#allocation247_spill] sm:$0xff] }
 0x885   :  { %9073 = vmatprep.subr.bf16.mxu1 %v11195_v42  ;;  %9428 = vmatpush1.bf16.msra.mxu0 %v13077_v63  ;;  %v11187_v18 = vcombine.high %v22139_v45, %v22138_v33  ;;  %v11186_v41 = vcombine.low %v22139_v45, %v22138_v33  ;;  %v11291_v42 = vcombine.high %v22151_v38, %v22150_v25  ;;  %v13101_v63 = vld [vmem:[%s20680_s9 + $0xf0] ss:$8 sps:$4 sm:$0xff]  }
 0x886   :  { %9429 = vmatprep.subr.bf16.mxu0 %v13082_v29  ;;  %v22155_v33 = vld [vmem:[#allocation341_spill] sm:$0xff] }
 0x888   :  { %9074 = vmatpush2.bf16.msra.mxu1 %v11194_v49  ;;  %v11290_v49 = vcombine.low %v22151_v38, %v22150_v25  ;;  %v22167_v25 = vld [vmem:[#allocation381_spill] sm:$0xff] }
 0x889   :  { %9075 = vmatprep.subr.bf16.mxu1 %v11191_v60  ;;  %9430 = vmatpush1.bf16.msra.mxu0 %v13080_v27  ;;  %v22152_v60 = vld [vmem:[#allocation347_spill] sm:$0xff] }
 0x88a   :  { %9431 = vmatprep.subr.bf16.mxu0 %v13085_v56  ;;  %v13104_v56 = vld [vmem:[%s20680_s9 + $0xe0] ss:$8 sps:$4 sm:$0xff]  }
 0x88c   :  { %9076 = vmatpush2.bf16.msra.mxu1 %v11190_v0  ;;  %v22154_v0 = vld [vmem:[#allocation343_spill] sm:$0xff] }
 0x88d   :  { %9077 = vmatprep.subr.bf16.mxu1 %v11187_v18  ;;  %9432 = vmatpush1.bf16.msra.mxu0 %v13083_v61  ;;  %v11283_v45 = vcombine.high %v22155_v33, %v22154_v0  ;;  %v13107_v18 = vld [vmem:[%s20680_s9 + $0xd0] ss:$8 sps:$4 sm:$0xff]   ;;  %v13112_v61 = vld [vmem:[%s20680_s9 + $0xc4] ss:$8 sps:$4 sm:$0xff]  }
 0x88e   :  { %9433 = vmatprep.subr.bf16.mxu0 %v13088_v53  ;;  %v11282_v53 = vcombine.low %v22155_v33, %v22154_v0  ;;  %v22174_v0 = vld [vmem:[#allocation367_spill] sm:$0xff]  ;;  %v22175_v33 = vld [vmem:[#allocation365_spill] sm:$0xff] }
 0x890   :  { %9078 = vmatpush2.bf16.msra.mxu1 %v11186_v41  ;;  %v22156_v41 = vld [vmem:[#allocation339_spill] sm:$0xff] }
 0x891   :  { %9079 = vmatprep.subr.bf16.mxu1 %v11183_v20  ;;  %9434 = vmatpush1.bf16.msra.mxu0 %v13086_v9  ;;  %v11279_v15 = vcombine.high %v22157_v2, %v22156_v41  ;;  %v13110_v20 = vld [vmem:[%s20680_s9 + $0xc0] ss:$8 sps:$4 sm:$0xff]   ;;  %v13115_v9 = vld [vmem:[%s20680_s9 + $0xb4] ss:$8 sps:$4 sm:$0xff]  }
 0x892   :  { %9435 = vmatprep.subr.bf16.mxu0 %v13091_v14  ;;  %v11278_v14 = vcombine.low %v22157_v2, %v22156_v41 }
 0x894   :  { %9080 = vmatpush2.bf16.msra.mxu1 %v11182_v16  ;;  %v22158_v16 = vld [vmem:[#allocation335_spill] sm:$0xff] }
 0x895   :  { %9081 = vmatprep.subr.bf16.mxu1 %v11179_v1  ;;  %9436 = vmatpush1.bf16.msra.mxu0 %v13089_v52  ;;  %v11275_v22 = vcombine.high %v22159_v50, %v22158_v16  ;;  %v13113_v1 = vld [vmem:[%s20680_s9 + $0xb0] ss:$8 sps:$4 sm:$0xff]   ;;  %v13118_v52 = vld [vmem:[%s20680_s9 + $0xa4] ss:$8 sps:$4 sm:$0xff]  }
 0x896   :  { %9437 = vmatprep.subr.bf16.mxu0 %v13094_v26  ;;  %v11274_v26 = vcombine.low %v22159_v50, %v22158_v16  ;;  %v13125_v50 = vld [vmem:[%s20682_s11 + $0x70] ss:$8 sps:$4 sm:$0xff]  }
 0x898   :  { %9082 = vmatpush2.bf16.msra.mxu1 %v11178_v59 }
 0x899   :  { %9083 = vmatprep.subr.bf16.mxu1 %v11175_v8  ;;  %9438 = vmatpush1.bf16.msra.mxu0 %v13092_v21  ;;  %v11271_v8 = vcombine.high %v22161_v28, %v22160_v3  ;;  %v13116_v21 = vld [vmem:[%s20680_s9 + $0xa0] ss:$8 sps:$4 sm:$0xff]   ;;  %v13133_v3 = vld [vmem:[%s20682_s11 + $0x54] ss:$8 sps:$4 sm:$0xff]  }
 0x89a   :  { %9439 = vmatprep.subr.bf16.mxu0 %v13097_v24 }
 0x89c   :  { %9084 = vmatpush2.bf16.msra.mxu1 %v11174_v4  ;;  %v13121_v4 = vld [vmem:[%s20680_s9 + $0x94] ss:$8 sps:$4 sm:$0xff]  }
 0x89d   :  { %9135 = vmatprep.subr.bf16.mxu1 %v11299_v30  ;;  %9440 = vmatpush1.bf16.msra.mxu0 %v13095_v58  ;;  %v22162_v30 = vld [vmem:[#allocation391_spill] sm:$0xff]  ;;  %v22163_v58 = vld [vmem:[#allocation389_spill] sm:$0xff] }
 0x89e   :  { %9441 = vmatprep.subr.bf16.mxu0 %v13100_v11  ;;  %v11331_v11 = vcombine.high %v22163_v58, %v22162_v30 }
 0x89f   :  { %v8800_v47 = vpop.f32.mrf.mxu1  ;;  %9086 = vmatmul.mubr.bf16.vlgmr.msra.gmra.mxu1 %v19635_v55 }
 0x8a0   :  { %v8801_v32 = vadd.f32 %v8800_v47, %v19951_v23  ;;  %9136 = vmatpush1.bf16.msra.mxu1 %v11298_v40  ;;  %9167 = vmatprep.mubr.bf16.mxu1 %v19639_v57  ;;  %v13106_v23 = vld [vmem:[%s20680_s9 + $0xe4] ss:$8 sps:$4 sm:$0xff]   ;;  %v13119_v40 = vld [vmem:[%s20680_s9 + $0x90] ss:$8 sps:$4 sm:$0xff]  }
 0x8a1   :  { %v8802_v7 = vpop.f32.mrf.mxu1  ;;  %9137 = vmatprep.subr.bf16.mxu1 %v11295_v12  ;;  %9442 = vmatpush1.bf16.msra.mxu0 %v13098_v31  ;;  %v11330_v12 = vcombine.low %v22163_v58, %v22162_v30  ;;  %v22164_v31 = vld [vmem:[#allocation387_spill] sm:$0xff] }
 0x8a2   :  { %v8803_v55 = vadd.f32 %v8802_v7, %v19958_v6  ;;  %9443 = vmatprep.subr.bf16.mxu0 %v13103_v48  ;;  %v20120_v29 = vadd.f32 %v19955_v17, %v8801_v32  ;;  %v22153_v6 = vld [vmem:[#allocation345_spill] sm:$0xff]  ;;  %v13122_v32 = vld [vmem:[%s20680_s9 + $0x80] ss:$8 sps:$4 sm:$0xff]   ;;  %v13142_v30 = vld [vmem:[%s20682_s11 + $0x24] ss:$8 sps:$4 sm:$0xff]  }
 0x8a3   :  { %v8804_v57 = vpop.f32.mrf.mxu1  ;;  %v11287_v27 = vcombine.high %v22153_v6, %v22152_v60  ;;  %v13109_v17 = vld [vmem:[%s20680_s9 + $0xd4] ss:$8 sps:$4 sm:$0xff]   ;;  %v22166_v7 = vld [vmem:[#allocation383_spill] sm:$0xff] }
 0x8a4   :  { %9138 = vmatpush1.bf16.msra.mxu1 %v11294_v13  ;;  %v20125_v36 = vadd.f32 %v19964_v44, %v8803_v55  ;;  %v11286_v44 = vcombine.low %v22153_v6, %v22152_v60  ;;  %v22165_v48 = vld [vmem:[#allocation385_spill] sm:$0xff]  ;;  %v11323_v38 = vcombine.high %v22167_v25, %v22166_v7 }
 0x8a5   :  { %v8805_v43 = vpop.f32.mrf.mxu1  ;;  %9139 = vmatprep.subr.bf16.mxu1 %v11291_v42  ;;  %9444 = vmatpush2.bf16.msra.mxu0 %v13101_v63  ;;  %v11327_v47 = vcombine.high %v22165_v48, %v22164_v31  ;;  %v11326_v13 = vcombine.low %v22165_v48, %v22164_v31  ;;  %v11322_v42 = vcombine.low %v22167_v25, %v22166_v7  ;;  %v22168_v63 = vld [vmem:[#allocation379_spill] sm:$0xff]  ;;  %v22169_v55 = vld [vmem:[#allocation377_spill] sm:$0xff] }
 0x8a6   :  { %9445 = vmatprep.subr.bf16.mxu0 %v13106_v23  ;;  %v11319_v23 = vcombine.high %v22169_v55, %v22168_v63  ;;  %v11318_v57 = vcombine.low %v22169_v55, %v22168_v63  ;;  %v22171_v43 = vld [vmem:[#allocation373_spill] sm:$0xff]  ;;  %v13148_v48 = vld [vmem:[%s20682_s11 + $0x4] ss:$8 sps:$4 sm:$0xff]   ;;  %v13152_v25 = vld [vmem:[%s20682_s11 + $0xe0] ss:$8 sps:$4 sm:$0xff]   ;;  %v6630_v63 = vsub.s32 2, %v19895_v51 }
 0x8a7   :  { %v13154_v7 = vld [vmem:[%s20682_s11 + $0xe4] ss:$8 sps:$4 sm:$0xff]   ;;  %v6634_v55 = vsub.s32 3, %v19895_v51 }
 0x8a8   :  { %9140 = vmatpush1.bf16.msra.mxu1 %v11290_v49  ;;  %v22170_v49 = vld [vmem:[#allocation375_spill] sm:$0xff] }
 0x8a9   :  { %9141 = vmatprep.subr.bf16.mxu1 %v11287_v27  ;;  %9446 = vmatpush2.bf16.msra.mxu0 %v13104_v56  ;;  %v11315_v60 = vcombine.high %v22171_v43, %v22170_v49  ;;  %v11314_v6 = vcombine.low %v22171_v43, %v22170_v49  ;;  %v22172_v27 = vld [vmem:[#allocation371_spill] sm:$0xff]  ;;  %v22173_v56 = vld [vmem:[#allocation369_spill] sm:$0xff] }
 0x8aa   :  { %9447 = vmatprep.subr.bf16.mxu0 %v13109_v17  ;;  %v11311_v17 = vcombine.high %v22173_v56, %v22172_v27 }
 0x8ac   :  { %9142 = vmatpush1.bf16.msra.mxu1 %v11286_v44  ;;  %v11310_v44 = vcombine.low %v22173_v56, %v22172_v27  ;;  %v13158_v56 = vld [vmem:[%s20682_s11 + $0xc0] ss:$8 sps:$4 sm:$0xff]  }
 0x8ad   :  { %9143 = vmatprep.subr.bf16.mxu1 %v11283_v45  ;;  %9448 = vmatpush2.bf16.msra.mxu0 %v13107_v18  ;;  %v11307_v45 = vcombine.high %v22175_v33, %v22174_v0  ;;  %v11306_v18 = vcombine.low %v22175_v33, %v22174_v0 }
 0x8ae   :  { %9449 = vmatprep.subr.bf16.mxu0 %v13112_v61  ;;  %v22176_v61 = vld [vmem:[#allocation363_spill] sm:$0xff] }
 0x8b0   :  { %9144 = vmatpush1.bf16.msra.mxu1 %v11282_v53  ;;  %v22177_v53 = vld [vmem:[#allocation361_spill] sm:$0xff] }
 0x8b1   :  { %9145 = vmatprep.subr.bf16.mxu1 %v11279_v15  ;;  %9450 = vmatpush2.bf16.msra.mxu0 %v13110_v20  ;;  %v11303_v41 = vcombine.high %v22177_v53, %v22176_v61  ;;  %v11302_v2 = vcombine.low %v22177_v53, %v22176_v61  ;;  %v13169_v61 = vld [vmem:[%s20682_s11 + $0x94] ss:$8 sps:$4 sm:$0xff]   ;;  %v13167_v53 = vld [vmem:[%s20682_s11 + $0x90] ss:$8 sps:$4 sm:$0xff]  }
 0x8b2   :  { %9451 = vmatprep.subr.bf16.mxu0 %v13115_v9 }
 0x8b4   :  { %9146 = vmatpush1.bf16.msra.mxu1 %v11278_v14  ;;  %v20167_v59 = vpop.f32.mrf.mxu0 }
 0x8b5   :  { %9147 = vmatprep.subr.bf16.mxu1 %v11275_v22  ;;  %9452 = vmatpush2.bf16.msra.mxu0 %v13113_v1  ;;  %v13127_v22 = vld [vmem:[%s20682_s11 + $0x74] ss:$8 sps:$4 sm:$0xff]  }
 0x8b6   :  { %v20174_v24 = vpop.f32.mrf.mxu0  ;;  %9453 = vmatprep.subr.bf16.mxu0 %v13118_v52 }
 0x8b8   :  { %9148 = vmatpush1.bf16.msra.mxu1 %v11274_v26  ;;  %v8968_v10 = vpop.f32.mrf.mxu0 }
 0x8b9   :  { %9149 = vmatprep.subr.bf16.mxu1 %v11271_v8  ;;  %9454 = vmatpush2.bf16.msra.mxu0 %v13116_v21  ;;  %v13136_v21 = vld [vmem:[%s20682_s11 + $0x44] ss:$8 sps:$4 sm:$0xff]   ;;  %v13137_v10 = vld [vmem:[%s20682_s11 + $0x30] ss:$8 sps:$4 sm:$0xff]  }
 0x8ba   :  { %v8969_v5 = vpop.f32.mrf.mxu0  ;;  %9455 = vmatprep.subr.bf16.mxu0 %v13121_v4  ;;  %v13134_v4 = vld [vmem:[%s20682_s11 + $0x40] ss:$8 sps:$4 sm:$0xff]  }
 0x8bb   :  { %v13145_v5 = vld [vmem:[%s20682_s11 + $0x14] ss:$8 sps:$4 sm:$0xff]  }
 0x8bc   :  { %9150 = vmatpush1.bf16.msra.mxu1 %v11270_v34  ;;  %v13139_v34 = vld [vmem:[%s20682_s11 + $0x34] ss:$8 sps:$4 sm:$0xff]  }
 0x8bd   :  { %9151 = vmatprep.subr.bf16.mxu1 %v11331_v11  ;;  %9456 = vmatpush2.bf16.msra.mxu0 %v13119_v40  ;;  %v13140_v11 = vld [vmem:[%s20682_s11 + $0x20] ss:$8 sps:$4 sm:$0xff]  }
 0x8be   :  { %9457 = vmatprep.subr.bf16.mxu0 %v13124_v46 }
 0x8c0   :  { %9152 = vmatpush2.bf16.msra.mxu1 %v11330_v12  ;;  %v13143_v12 = vld [vmem:[%s20682_s11 + $0x10] ss:$8 sps:$4 sm:$0xff]  }
 0x8c1   :  { %9153 = vmatprep.subr.bf16.mxu1 %v11327_v47  ;;  %9458 = vmatpush2.bf16.msra.mxu0 %v13122_v32  ;;  %v13146_v47 = vld [vmem:[%s20682_s11] ss:$8 sps:$4 sm:$0xff]   ;;  %v13151_v32 = vld [vmem:[%s20682_s11 + $0xf4] ss:$8 sps:$4 sm:$0xff]  }
 0x8c4   :  { %9154 = vmatpush2.bf16.msra.mxu1 %v11326_v13  ;;  %v13149_v13 = vld [vmem:[%s20682_s11 + $0xf0] ss:$8 sps:$4 sm:$0xff]  }
 0x8c5   :  { %9155 = vmatprep.subr.bf16.mxu1 %v11323_v38  ;;  %v13157_v38 = vld [vmem:[%s20682_s11 + $0xd4] ss:$8 sps:$4 sm:$0xff]  }
 0x8c8   :  { %9156 = vmatpush2.bf16.msra.mxu1 %v11322_v42  ;;  %v13155_v42 = vld [vmem:[%s20682_s11 + $0xd0] ss:$8 sps:$4 sm:$0xff]  }
 0x8c9   :  { %9157 = vmatprep.subr.bf16.mxu1 %v11319_v23  ;;  %v6631_v23 = vrot.slane %v19913_v37, %v6630_v63 }
 0x8cb   :  { %v8965_v49 = vadd.f32 %v20167_v59, %v6631_v23  ;;  %v13163_v59 = vld [vmem:[%s20682_s11 + $0xb4] ss:$8 sps:$4 sm:$0xff]   ;;  %v13209_v23 = vld [vmem:[%s20684_s13 + $0xb0] ss:$8 sps:$4 sm:$0xff]  }
 0x8cc   :  { %9158 = vmatpush2.bf16.msra.mxu1 %v11318_v57  ;;  %v6635_v57 = vrot.slane %v19913_v37, %v6634_v55 }
 0x8cd   :  { %9159 = vmatprep.subr.bf16.mxu1 %v11315_v60  ;;  %v13160_v60 = vld [vmem:[%s20682_s11 + $0xc4] ss:$8 sps:$4 sm:$0xff]  }
 0x8d0   :  { %9160 = vmatpush2.bf16.msra.mxu1 %v11314_v6  ;;  %v8967_v6 = vadd.f32 %v20174_v24, %v6635_v57  ;;  %v13161_v24 = vld [vmem:[%s20682_s11 + $0xb0] ss:$8 sps:$4 sm:$0xff]  }
 0x8d1   :  { %9161 = vmatprep.subr.bf16.mxu1 %v11311_v17 }
 0x8d4   :  { %9162 = vmatpush2.bf16.msra.mxu1 %v11310_v44 }
 0x8d5   :  { %9163 = vmatprep.subr.bf16.mxu1 %v11307_v45  ;;  %v13166_v45 = vld [vmem:[%s20682_s11 + $0xa4] ss:$8 sps:$4 sm:$0xff]  }
 0x8d8   :  { %9164 = vmatpush2.bf16.msra.mxu1 %v11306_v18  ;;  %v13164_v18 = vld [vmem:[%s20682_s11 + $0xa0] ss:$8 sps:$4 sm:$0xff]  }
 0x8d9   :  { %9165 = vmatprep.subr.bf16.mxu1 %v11303_v41  ;;  %v13172_v41 = vld [vmem:[%s20682_s11 + $0x84] ss:$8 sps:$4 sm:$0xff]  }
 0x8dc   :  { %9166 = vmatpush2.bf16.msra.mxu1 %v11302_v2  ;;  %v13170_v2 = vld [vmem:[%s20682_s11 + $0x80] ss:$8 sps:$4 sm:$0xff]  }
 0x8dd   :  { %9676 = vmatprep.subr.bf16.mxu1 %v13127_v22  ;;  %v13176_v22 = vld [vmem:[%s20684_s13 + $0x60] ss:$8 sps:$4 sm:$0xff]  }
 0x8df   :  { %v8882_v15 = vpop.f32.mrf.mxu1  ;;  %9168 = vmatmul.mubr.bf16.vlgmr.msra.gmra.mxu1 %v19771_v35  ;;  %v13130_v35 = vld [vmem:[%s20682_s11 + $0x64] ss:$8 sps:$4 sm:$0xff]  }
 0x8e0   :  { %v8883_v20 = vadd.f32 %v8882_v15, %v20120_v29  ;;  %9677 = vmatpush1.bf16.msra.mxu1 %v13125_v50 }
 0x8e1   :  { %v8884_v9 = vpop.f32.mrf.mxu1  ;;  %9678 = vmatprep.subr.bf16.mxu1 %v13130_v35 }
 0x8e2   :  { %v8924_v14 = vadd.f32 %v19994_v39, %v8883_v20  ;;  %v8885_v16 = vadd.f32 %v8884_v9, %v20125_v36  ;;  %v13128_v36 = vld [vmem:[%s20682_s11 + $0x60] ss:$8 sps:$4 sm:$0xff]   ;;  %v13173_v20 = vld [vmem:[%s20684_s13 + $0x70] ss:$8 sps:$4 sm:$0xff]   ;;  %v13175_v9 = vld [vmem:[%s20684_s13 + $0x74] ss:$8 sps:$4 sm:$0xff]  }
 0x8e3   :  { %v8886_v1 = vpop.f32.mrf.mxu1  ;;  %9925 = vmatprep.subr.bf16.mxu0 %v13175_v9  ;;  %v13215_v9 = vld [vmem:[%s20684_s13 + $0x90] ss:$8 sps:$4 sm:$0xff]  }
 0x8e4   :  { %v8926_v29 = vadd.f32 %v20001_v19, %v8885_v16  ;;  %v9217_v52 = vmax.f32 %v8924_v14, 0.0  ;;  %9679 = vmatpush1.bf16.msra.mxu1 %v13128_v36  ;;  %v13131_v19 = vld [vmem:[%s20682_s11 + $0x50] ss:$8 sps:$4 sm:$0xff]   ;;  %v13178_v16 = vld [vmem:[%s20684_s13 + $0x64] ss:$8 sps:$4 sm:$0xff]  }
 0x8e5   :  { %v8887_v39 = vpop.f32.mrf.mxu1  ;;  %9680 = vmatprep.subr.bf16.mxu1 %v13133_v3  ;;  %v13181_v1 = vld [vmem:[%s20684_s13 + $0x54] ss:$8 sps:$4 sm:$0xff]   ;;  %v13185_v3 = vld [vmem:[%s20684_s13 + $0x30] ss:$8 sps:$4 sm:$0xff]  }
 0x8e6   :  { %v9218_v26 = vmax.f32 %v8926_v29, 0.0  ;;  %v9221_v8 = vpack.c.bf16 %v9217_v52, %v9217_v52  ;;  %v13179_v29 = vld [vmem:[%s20684_s13 + $0x50] ss:$8 sps:$4 sm:$0xff]   ;;  %v13184_v52 = vld [vmem:[%s20684_s13 + $0x44] ss:$8 sps:$4 sm:$0xff]  }
 0x8e7   :  { %v13182_v39 = vld [vmem:[%s20684_s13 + $0x40] ss:$8 sps:$4 sm:$0xff]   ;;  %v13187_v36 = vld [vmem:[%s20684_s13 + $0x34] ss:$8 sps:$4 sm:$0xff]  }
 0x8e8   :  { %v9222_v28 = vpack.c.bf16 %v9218_v26, %v9218_v26  ;;  %9681 = vmatpush1.bf16.msra.mxu1 %v13131_v19 }
 0x8e9   :  { %9682 = vmatprep.subr.bf16.mxu1 %v13136_v21  ;;  %v13188_v21 = vld [vmem:[%s20684_s13 + $0x20] ss:$8 sps:$4 sm:$0xff]  }
 0x8ea   :  { %9459 = vmatprep.mubr.bf16.mxu0 %v9222_v28  ;;  %v13190_v28 = vld [vmem:[%s20684_s13 + $0x24] ss:$8 sps:$4 sm:$0xff]  }
 0x8eb   :  { %9460 = vmatmul.mubr.bf16.vlgmr.msra.gmra.mxu0 %v9221_v8 }
 0x8ec   :  { %9683 = vmatpush1.bf16.msra.mxu1 %v13134_v4  ;;  %9926 = vmatpush1.bf16.msra.mxu0 %v13173_v20  ;;  %v13193_v4 = vld [vmem:[%s20684_s13 + $0x14] ss:$8 sps:$4 sm:$0xff]  }
 0x8ed   :  { %9684 = vmatprep.subr.bf16.mxu1 %v13139_v34  ;;  %9927 = vmatprep.subr.bf16.mxu0 %v13178_v16  ;;  %v13217_v20 = vld [vmem:[%s20684_s13 + $0x94] ss:$8 sps:$4 sm:$0xff]   ;;  %v13218_v16 = vld [vmem:[%s20684_s13 + $0x80] ss:$8 sps:$4 sm:$0xff]  }
 0x8f0   :  { %9685 = vmatpush1.bf16.msra.mxu1 %v13137_v10  ;;  %9928 = vmatpush1.bf16.msra.mxu0 %v13176_v22  ;;  %v13191_v10 = vld [vmem:[%s20684_s13 + $0x10] ss:$8 sps:$4 sm:$0xff]  }
 0x8f1   :  { %9686 = vmatprep.subr.bf16.mxu1 %v13142_v30  ;;  %9929 = vmatprep.subr.bf16.mxu0 %v13181_v1  ;;  %v13196_v30 = vld [vmem:[%s20684_s13 + $0x4] ss:$8 sps:$4 sm:$0xff]   ;;  %v13222_v22 = vld [vmem:[%s20686_s15 + $0x38] sm:$0xff]   ;;  %v13223_v1 = vld [vmem:[%s20686_s15 + $0x70] sm:$0xff]  }
 0x8f4   :  { %v9046_v58 = vpop.f32.mrf.mxu0  ;;  %9687 = vmatpush1.bf16.msra.mxu1 %v13140_v11  ;;  %9930 = vmatpush1.bf16.msra.mxu0 %v13179_v29  ;;  %v13199_v11 = vld [vmem:[%s20684_s13 + $0xf4] ss:$8 sps:$4 sm:$0xff]   ;;  %v13225_v29 = vld [vmem:[%s20686_s15 + $0x68] sm:$0xff]  }
 0x8f5   :  { %9688 = vmatprep.subr.bf16.mxu1 %v13145_v5  ;;  %9931 = vmatprep.subr.bf16.mxu0 %v13184_v52  ;;  %v13202_v5 = vld [vmem:[%s20684_s13 + $0xe4] ss:$8 sps:$4 sm:$0xff]  }
 0x8f6   :  { %v9048_v40 = vpop.f32.mrf.mxu0  ;;  %v13226_v52 = vld [vmem:[%s20686_s15 + $0x28] sm:$0xff]  }
 0x8f8   :  { %v9050_v46 = vpop.f32.mrf.mxu0  ;;  %9689 = vmatpush1.bf16.msra.mxu1 %v13143_v12  ;;  %9932 = vmatpush1.bf16.msra.mxu0 %v13182_v39  ;;  %v13205_v12 = vld [vmem:[%s20684_s13 + $0xd4] ss:$8 sps:$4 sm:$0xff]   ;;  %v13227_v39 = vld [vmem:[%s20686_s15 + $0x60] sm:$0xff]  }
 0x8f9   :  { %9690 = vmatprep.subr.bf16.mxu1 %v13148_v48  ;;  %9933 = vmatprep.subr.bf16.mxu0 %v13187_v36  ;;  %v13200_v46 = vld [vmem:[%s20684_s13 + $0xe0] ss:$8 sps:$4 sm:$0xff]   ;;  %v13208_v48 = vld [vmem:[%s20684_s13 + $0xc4] ss:$8 sps:$4 sm:$0xff]  }
 0x8fa   :  { %v9051_v31 = vpop.f32.mrf.mxu0  ;;  %v13228_v36 = vld [vmem:[%s20686_s15 + $0x20] sm:$0xff]  }
 0x8fb   :  { %v13203_v31 = vld [vmem:[%s20684_s13 + $0xd0] ss:$8 sps:$4 sm:$0xff]  }
 0x8fc   :  { %9691 = vmatpush1.bf16.msra.mxu1 %v13146_v47  ;;  %9934 = vmatpush1.bf16.msra.mxu0 %v13185_v3  ;;  %v13229_v3 = vld [vmem:[%s20686_s15 + $0x58] sm:$0xff]  }
 0x8fd   :  { %9692 = vmatprep.subr.bf16.mxu1 %v13151_v32  ;;  %9935 = vmatprep.subr.bf16.mxu0 %v13190_v28  ;;  %v13230_v28 = vld [vmem:[%s20686_s15 + $0x18] sm:$0xff]  }
 0x900   :  { %9693 = vmatpush2.bf16.msra.mxu1 %v13149_v13  ;;  %9936 = vmatpush1.bf16.msra.mxu0 %v13188_v21  ;;  %v13206_v13 = vld [vmem:[%s20684_s13 + $0xc0] ss:$8 sps:$4 sm:$0xff]   ;;  %v13232_v21 = vld [vmem:[%s20686_s15 + $0x10] sm:$0xff]  }
 0x901   :  { %9694 = vmatprep.subr.bf16.mxu1 %v13154_v7  ;;  %9937 = vmatprep.subr.bf16.mxu0 %v13193_v4  ;;  %v9504_v4 = vld [vmem:[%s20683_s12] sm:$0x3] }
 0x904   :  { %9695 = vmatpush2.bf16.msra.mxu1 %v13152_v25  ;;  %9938 = vmatpush1.bf16.msra.mxu0 %v13191_v10  ;;  %v13211_v25 = vld [vmem:[%s20684_s13 + $0xb4] ss:$8 sps:$4 sm:$0xff]   ;;  %v9513_v10 = vrot.slane %v9504_v4, %v19916_v62 }
 0x905   :  { %9696 = vmatprep.subr.bf16.mxu1 %v13157_v38  ;;  %9939 = vmatprep.subr.bf16.mxu0 %v13196_v30 }
 0x908   :  { %9697 = vmatpush2.bf16.msra.mxu1 %v13155_v42 }
 0x909   :  { %9698 = vmatprep.subr.bf16.mxu1 %v13160_v60 }
 0x90c   :  { %9699 = vmatpush2.bf16.msra.mxu1 %v13158_v56 }
 0x90d   :  { %9700 = vmatprep.subr.bf16.mxu1 %v13163_v59 }
 0x910   :  { %9701 = vmatpush2.bf16.msra.mxu1 %v13161_v24 }
 0x911   :  { %9702 = vmatprep.subr.bf16.mxu1 %v13166_v45 }
 0x914   :  { %9703 = vmatpush2.bf16.msra.mxu1 %v13164_v18 }
 0x915   :  { %9704 = vmatprep.subr.bf16.mxu1 %v13169_v61 }
 0x918   :  { %9705 = vmatpush2.bf16.msra.mxu1 %v13167_v53 }
 0x919   :  { %9706 = vmatprep.subr.bf16.mxu1 %v13172_v41 }
 0x91c   :  { %9707 = vmatpush2.bf16.msra.mxu1 %v13170_v2 }
 0x91f   :  { %v9005_v43 = vpop.f32.mrf.mxu1 }
 0x920   :  { %v9006_v27 = vadd.f32 %v9005_v43, %v8965_v49  ;;  %v13214_v49 = vld [vmem:[%s20684_s13 + $0xa4] ss:$8 sps:$4 sm:$0xff]   ;;  %v13212_v43 = vld [vmem:[%s20684_s13 + $0xa0] ss:$8 sps:$4 sm:$0xff]  }
 0x921   :  { %v9007_v17 = vpop.f32.mrf.mxu1 }
 0x922   :  { %v9008_v51 = vadd.f32 %v9007_v17, %v8967_v6  ;;  %v20305_v44 = vadd.f32 %v9046_v58, %v9006_v27  ;;  %v13194_v58 = vld [vmem:[%s20684_s13] ss:$8 sps:$4 sm:$0xff]  }
 0x923   :  { %v9009_v37 = vpop.f32.mrf.mxu1  ;;  %9940 = vmatpush1.bf16.msra.mxu0 %v13194_v58 }
 0x924   :  { %v20310_v0 = vadd.f32 %v9048_v40, %v9008_v51  ;;  %v13197_v40 = vld [vmem:[%s20684_s13 + $0xf0] ss:$8 sps:$4 sm:$0xff]   ;;  %9941 = vmatprep.subr.bf16.mxu0 %v13199_v11  ;;  %v9255_v51 = vld [vmem:[%s20681_s10] sm:$0x3] }
 0x925   :  { %v9010_v33 = vpop.f32.mrf.mxu1  ;;  %v9260_v37 = vrot.slane %v9255_v51, %v19906_v54  ;;  %v9264_v59 = vrot.slane %v9255_v51, %v19916_v62 }
 0x927   :  { %9942 = vmatpush2.bf16.msra.mxu0 %v13197_v40 }
 0x928   :  { %9943 = vmatprep.subr.bf16.mxu0 %v13202_v5 }
 0x92b   :  { %9944 = vmatpush2.bf16.msra.mxu0 %v13200_v46 }
 0x92c   :  { %9945 = vmatprep.subr.bf16.mxu0 %v13205_v12 }
 0x92f   :  { %9946 = vmatpush2.bf16.msra.mxu0 %v13203_v31 }
 0x930   :  { %9947 = vmatprep.subr.bf16.mxu0 %v13208_v48 }
 0x933   :  { %9948 = vmatpush2.bf16.msra.mxu0 %v13206_v13  ;;  %v13234_v13 = vld [vmem:[%s20686_s15 + $0x8] sm:$0xff]  }
 0x934   :  { %v9128_v15 = vpop.f32.mrf.mxu0  ;;  %9949 = vmatprep.subr.bf16.mxu0 %v13211_v25  ;;  %v13236_v25 = vld [vmem:[%s20686_s15] sm:$0xff]  }
 0x936   :  { %v9130_v14 = vpop.f32.mrf.mxu0 }
 0x937   :  { %9950 = vmatpush2.bf16.msra.mxu0 %v13209_v23 }
 0x938   :  { %v9132_v50 = vpop.f32.mrf.mxu0  ;;  %9951 = vmatprep.subr.bf16.mxu0 %v13214_v49 }
 0x939   :  { %v13221_v50 = vld [vmem:[%s20686_s15 + $0x78] sm:$0xff]  }
 0x93a   :  { %v9133_v35 = vpop.f32.mrf.mxu0  ;;  %11906 = vmatprep.subr.bf16.mxu1 %v13221_v50  ;;  %v13258_v50 = vld [vmem:[%s20688_s17] ss:$8 sps:$4 sm:$0xff]  }
 0x93b   :  { %9952 = vmatpush2.bf16.msra.mxu0 %v13212_v43  ;;  %v13224_v35 = vld [vmem:[%s20686_s15 + $0x30] sm:$0xff]  }
 0x93c   :  { %9953 = vmatprep.subr.bf16.mxu0 %v13217_v20  ;;  %v13252_v20 = vld [vmem:[%s20688_s17 + $0x20] ss:$8 sps:$4 sm:$0xff]  }
 0x93f   :  { %9954 = vmatpush2.bf16.msra.mxu0 %v13215_v9  ;;  %v13257_v9 = vld [vmem:[%s20688_s17 + $0x14] ss:$8 sps:$4 sm:$0xff]  }
 0x944   :  { %v20360_v26 = vpop.f32.mrf.mxu0 }
 0x946   :  { %v20368_v8 = vpop.f32.mrf.mxu0 }
 0x948   :  { %v9214_v19 = vpop.f32.mrf.mxu0 }
 0x949   :  { %v13231_v19 = vld [vmem:[%s20686_s15 + $0x50] sm:$0xff]  }
 0x94a   :  { %v9215_v34 = vpop.f32.mrf.mxu0 }
 0x94b   :  { %v9509_v34 = vrot.slane %v9504_v4, %v19906_v54  ;;  %v13276_v4 = vld [vmem:[%s20688_s17 + $0xa0] ss:$8 sps:$4 sm:$0xff]  }
 0x95f   :  { %v9087_v47 = vpop.f32.mrf.mxu1 }
 0x960   :  { %v9088_v32 = vadd.f32 %v9087_v47, %v20305_v44 }
 0x961   :  { %v9089_v7 = vpop.f32.mrf.mxu1 }
 0x962   :  { %v9090_v38 = vadd.f32 %v9089_v7, %v20310_v0  ;;  %v9129_v42 = vadd.f32 %v9128_v15, %v9088_v32  ;;  %v13233_v32 = vld [vmem:[%s20686_s15 + $0x48] sm:$0xff]   ;;  %v13235_v7 = vld [vmem:[%s20686_s15 + $0x40] sm:$0xff]  }
 0x963   :  { %v9091_v63 = vpop.f32.mrf.mxu1 }
 0x964   :  { %v9131_v55 = vadd.f32 %v9130_v14, %v9090_v38  ;;  %v13220_v14 = vld [vmem:[%s20684_s13 + $0x84] ss:$8 sps:$4 sm:$0xff]   ;;  %v13239_v38 = vld [vmem:[%s20688_s17 + $0x74] ss:$8 sps:$4 sm:$0xff]  }
 0x965   :  { %v9092_v57 = vpop.f32.mrf.mxu1  ;;  %9955 = vmatprep.subr.bf16.mxu0 %v13220_v14  ;;  %v13255_v14 = vld [vmem:[%s20688_s17 + $0x10] ss:$8 sps:$4 sm:$0xff]  }
 0x966   :  { %9956 = vmatpush2.bf16.msra.mxu0 %v13218_v16  ;;  %v13260_v16 = vld [vmem:[%s20688_s17 + $0x4] ss:$8 sps:$4 sm:$0xff]  }
 0x99f   :  { %v9169_v60 = vpop.f32.mrf.mxu1 }
 0x9a0   :  { %v20423_v6 = vadd.f32 %v9169_v60, %v9129_v42  ;;  %v9753_v42 = vld [vmem:[%s20685_s14] sm:$0x3] }
 0x9a1   :  { %v9171_v27 = vpop.f32.mrf.mxu1  ;;  %v9758_v63 = vrot.slane %v9753_v42, %v19906_v54 }
 0x9a2   :  { %v20425_v56 = vadd.f32 %v9171_v27, %v9131_v55  ;;  %v9762_v55 = vrot.slane %v9753_v42, %v19916_v62  ;;  %v13297_v42 = vld [vmem:[%s20690_s19 + $0x48] sm:$0xff]  }
 0x9a3   :  { %v9173_v17 = vpop.f32.mrf.mxu1 }
 0x9a4   :  { %v9213_v57 = vadd.f32 %v20368_v8, %v20425_v56  ;;  %v13240_v8 = vld [vmem:[%s20688_s17 + $0x60] ss:$8 sps:$4 sm:$0xff]   ;;  %v13245_v56 = vld [vmem:[%s20688_s17 + $0x54] ss:$8 sps:$4 sm:$0xff]  }
 0x9a5   :  { %v9174_v44 = vpop.f32.mrf.mxu1 }
 0x9a6   :  { %v9220_v51 = vmax.f32 %v9213_v57, 0.0  ;;  %v10571_v57 = vld [vmem:[%s20692_s21] sm:$0x1] }
 0x9ab   :  { %v9461_v0 = vpop.f32.mrf.mxu0 }
 0x9ac   :  { %v9462_v24 = vadd.f32 %v9461_v0, %v9260_v37  ;;  %v13237_v0 = vld [vmem:[%s20688_s17 + $0x70] ss:$8 sps:$4 sm:$0xff]  }
 0x9ad   :  { %v9463_v33 = vpop.f32.mrf.mxu0 }
 0x9ae   :  { %v9464_v45 = vadd.f32 %v9463_v33, %v9264_v59  ;;  %v9468_v18 = vmax.f32 %v9462_v24, 0.0  ;;  %v13242_v33 = vld [vmem:[%s20688_s17 + $0x64] ss:$8 sps:$4 sm:$0xff]  }
 0x9af   :  { %v9465_v61 = vpop.f32.mrf.mxu0 }
 0x9b0   :  { %v9469_v53 = vmax.f32 %v9464_v45, 0.0  ;;  %v9470_v15 = vpack.c.bf16 %v9468_v18, %v9468_v18  ;;  %v10146_v45 = vpack.c.bf16 %v9220_v51, %v9220_v51  ;;  %v13243_v18 = vld [vmem:[%s20688_s17 + $0x50] ss:$8 sps:$4 sm:$0xff]   ;;  %v13248_v61 = vld [vmem:[%s20688_s17 + $0x44] ss:$8 sps:$4 sm:$0xff]  }
 0x9b1   :  { %v9466_v41 = vpop.f32.mrf.mxu0 }
 0x9b2   :  { %v9471_v2 = vpack.c.bf16 %v9469_v53, %v9469_v53  ;;  %v13246_v53 = vld [vmem:[%s20688_s17 + $0x40] ss:$8 sps:$4 sm:$0xff]   ;;  %v13251_v41 = vld [vmem:[%s20688_s17 + $0x34] ss:$8 sps:$4 sm:$0xff]  }
 0x9b4   :  { %9708 = vmatprep.mubr.bf16.mxu1 %v9471_v2  ;;  %v13249_v2 = vld [vmem:[%s20688_s17 + $0x30] ss:$8 sps:$4 sm:$0xff]  }
 0x9b5   :  { %9709 = vmatmul.mubr.bf16.vlgmr.msra.gmra.mxu1 %v9470_v15  ;;  %v13254_v15 = vld [vmem:[%s20688_s17 + $0x24] ss:$8 sps:$4 sm:$0xff]  }
 0x9b6   :  { %11907 = vmatpush3.bf16.msra.mxu1 %v13222_v22  ;;  %v13263_v22 = vld [vmem:[%s20688_s17 + $0xf4] ss:$8 sps:$4 sm:$0xff]  }
 0x9b7   :  { %11908 = vmatprep.subr.bf16.mxu1 %v13223_v1  ;;  %v13261_v1 = vld [vmem:[%s20688_s17 + $0xf0] ss:$8 sps:$4 sm:$0xff]  }
 0x9ba   :  { %11909 = vmatpush3.bf16.msra.mxu1 %v13224_v35  ;;  %v13266_v35 = vld [vmem:[%s20688_s17 + $0xe4] ss:$8 sps:$4 sm:$0xff]  }
 0x9bb   :  { %11910 = vmatprep.subr.bf16.mxu1 %v13225_v29  ;;  %v13264_v29 = vld [vmem:[%s20688_s17 + $0xe0] ss:$8 sps:$4 sm:$0xff]  }
 0x9be   :  { %11911 = vmatpush3.bf16.msra.mxu1 %v13226_v52  ;;  %v13269_v52 = vld [vmem:[%s20688_s17 + $0xd4] ss:$8 sps:$4 sm:$0xff]  }
 0x9bf   :  { %11912 = vmatprep.subr.bf16.mxu1 %v13227_v39  ;;  %v13267_v39 = vld [vmem:[%s20688_s17 + $0xd0] ss:$8 sps:$4 sm:$0xff]  }
 0x9c2   :  { %11913 = vmatpush3.bf16.msra.mxu1 %v13228_v36  ;;  %v13272_v36 = vld [vmem:[%s20688_s17 + $0xc4] ss:$8 sps:$4 sm:$0xff]  }
 0x9c3   :  { %11914 = vmatprep.subr.bf16.mxu1 %v13229_v3  ;;  %v13270_v3 = vld [vmem:[%s20688_s17 + $0xc0] ss:$8 sps:$4 sm:$0xff]  }
 0x9c6   :  { %11915 = vmatpush3.bf16.msra.mxu1 %v13230_v28  ;;  %v13275_v28 = vld [vmem:[%s20688_s17 + $0xb4] ss:$8 sps:$4 sm:$0xff]  }
 0x9c7   :  { %11916 = vmatprep.subr.bf16.mxu1 %v13231_v19  ;;  %v13273_v19 = vld [vmem:[%s20688_s17 + $0xb0] ss:$8 sps:$4 sm:$0xff]  }
 0x9ca   :  { %11917 = vmatpush3.bf16.msra.mxu1 %v13232_v21  ;;  %v13278_v21 = vld [vmem:[%s20688_s17 + $0xa4] ss:$8 sps:$4 sm:$0xff]  }
 0x9cb   :  { %11918 = vmatprep.subr.bf16.mxu1 %v13233_v32  ;;  %v13292_v32 = vld [vmem:[%s20690_s19 + $0x20] sm:$0xff]  }
 0x9ce   :  { %11919 = vmatpush3.bf16.msra.mxu1 %v13234_v13  ;;  %v13293_v13 = vld [vmem:[%s20690_s19 + $0x58] sm:$0xff]  }
 0x9cf   :  { %11920 = vmatprep.subr.bf16.mxu1 %v13235_v7  ;;  %v13294_v7 = vld [vmem:[%s20690_s19 + $0x18] sm:$0xff]  }
 0x9d2   :  { %11921 = vmatpush3.bf16.msra.mxu1 %v13236_v25  ;;  %v13295_v25 = vld [vmem:[%s20690_s19 + $0x50] sm:$0xff]  }
 0x9d3   :  { %10351 = vmatprep.subr.bf16.mxu1 %v13239_v38  ;;  %v13296_v38 = vld [vmem:[%s20690_s19 + $0x10] sm:$0xff]  }
 0xa75   :  { %v9710_v30 = vpop.f32.mrf.mxu1 }
 0xa76   :  { %v9711_v58 = vadd.f32 %v9710_v30, %v9509_v34  ;;  %v13281_v34 = vld [vmem:[%s20688_s17 + $0x94] ss:$8 sps:$4 sm:$0xff]   ;;  %v9211_v30 = vadd.f32 %v20360_v26, %v20423_v6 }
 0xa77   :  { %v9712_v11 = vpop.f32.mrf.mxu1  ;;  %v13286_v26 = vld [vmem:[%s20690_s19 + $0x38] sm:$0xff]   ;;  %v13287_v6 = vld [vmem:[%s20690_s19 + $0x70] sm:$0xff]  }
 0xa78   :  { %v9713_v40 = vadd.f32 %v9712_v11, %v9513_v10  ;;  %v9717_v5 = vmax.f32 %v9711_v58, 0.0  ;;  %v13279_v10 = vld [vmem:[%s20688_s17 + $0x90] ss:$8 sps:$4 sm:$0xff]   ;;  %v13284_v58 = vld [vmem:[%s20688_s17 + $0x84] ss:$8 sps:$4 sm:$0xff]  }
 0xa79   :  { %v9714_v46 = vpop.f32.mrf.mxu1  ;;  %v13282_v11 = vld [vmem:[%s20688_s17 + $0x80] ss:$8 sps:$4 sm:$0xff]  }
 0xa7a   :  { %v9718_v12 = vmax.f32 %v9713_v40, 0.0  ;;  %v9719_v47 = vpack.c.bf16 %v9717_v5, %v9717_v5  ;;  %v9219_v40 = vmax.f32 %v9211_v30, 0.0  ;;  %v13285_v46 = vld [vmem:[%s20690_s19 + $0x78] sm:$0xff]  }
 0xa7b   :  { %v9715_v31 = vpop.f32.mrf.mxu1  ;;  %11928 = vmatprep.subr.bf16.mxu0 %v13285_v46 }
 0xa7c   :  { %v9720_v48 = vpack.c.bf16 %v9718_v12, %v9718_v12  ;;  %v10145_v5 = vpack.c.bf16 %v9219_v40, %v9219_v40  ;;  %v13288_v12 = vld [vmem:[%s20690_s19 + $0x30] sm:$0xff]   ;;  %v13289_v31 = vld [vmem:[%s20690_s19 + $0x68] sm:$0xff]  }
 0xa7e   :  { %9957 = vmatprep.mubr.bf16.mxu0 %v9720_v48  ;;  %v13290_v48 = vld [vmem:[%s20690_s19 + $0x28] sm:$0xff]  }
 0xa7f   :  { %9958 = vmatmul.mubr.bf16.vlgmr.msra.gmra.mxu0 %v9719_v47  ;;  %v13291_v47 = vld [vmem:[%s20690_s19 + $0x60] sm:$0xff]  }
 0xa80   :  { %11929 = vmatpush3.bf16.msra.mxu0 %v13286_v26 }
 0xa81   :  { %11930 = vmatprep.subr.bf16.mxu0 %v13287_v6 }
 0xa84   :  { %11931 = vmatpush3.bf16.msra.mxu0 %v13288_v12 }
 0xa85   :  { %11932 = vmatprep.subr.bf16.mxu0 %v13289_v31 }
 0xa88   :  { %11933 = vmatpush3.bf16.msra.mxu0 %v13290_v48 }
 0xa89   :  { %11934 = vmatprep.subr.bf16.mxu0 %v13291_v47 }
 0xa8c   :  { %11935 = vmatpush3.bf16.msra.mxu0 %v13292_v32 }
 0xa8d   :  { %11936 = vmatprep.subr.bf16.mxu0 %v13293_v13 }
 0xa90   :  { %11937 = vmatpush3.bf16.msra.mxu0 %v13294_v7 }
 0xa91   :  { %11938 = vmatprep.subr.bf16.mxu0 %v13295_v25 }
 0xa94   :  { %11939 = vmatpush3.bf16.msra.mxu0 %v13296_v38 }
 0xa95   :  { %11940 = vmatprep.subr.bf16.mxu0 %v13297_v42 }
 0xb3f   :  { %v9959_v23 = vpop.f32.mrf.mxu0 }
 0xb40   :  { %v9960_v49 = vadd.f32 %v9959_v23, %v9758_v63  ;;  %v13298_v63 = vld [vmem:[%s20690_s19 + $0x8] sm:$0xff]   ;;  %v13300_v23 = vld [vmem:[%s20690_s19] sm:$0xff]  }
 0xb41   :  { %v9961_v43 = vpop.f32.mrf.mxu0  ;;  %11941 = vmatpush3.bf16.msra.mxu0 %v13298_v63 }
 0xb42   :  { %v9962_v60 = vadd.f32 %v9961_v43, %v9762_v55  ;;  %v9966_v27 = vmax.f32 %v9960_v49, 0.0  ;;  %v13299_v55 = vld [vmem:[%s20690_s19 + $0x40] sm:$0xff]   ;;  %v10574_v49 = vsub.f32 0.0, %v10571_v57 }
 0xb43   :  { %v9963_v17 = vpop.f32.mrf.mxu0  ;;  %11942 = vmatprep.subr.bf16.mxu0 %v13299_v55 }
 0xb44   :  { %v9967_v44 = vmax.f32 %v9962_v60, 0.0  ;;  %v9968_v24 = vpack.c.bf16 %v9966_v27, %v9966_v27  ;;  %v10575_v43 = vmul.f32 1.442695, %v10574_v49  ;;  %v11446_v17 = vld [vmem:[%s20687_s16] ss:$0 sm:$0xff] }
 0xb45   :  { %v9964_v37 = vpop.f32.mrf.mxu0  ;;  %11943 = vmatpush3.bf16.msra.mxu0 %v13300_v23 }
 0xb46   :  { %v9969_v59 = vpack.c.bf16 %v9967_v44, %v9967_v44  ;;  %13301 = vpow2.f32 %v10575_v43  ;;  %v10572_v37 = vld [vmem:[%s20693_s22] sm:$0xff] }
 0xb48   :  { %10137 = vmatprep.mubr.bf16.mxu1 %v9969_v59 }
 0xb49   :  { %10138 = vmatmul.mubr.bf16.vlgmr.msra.gmra.mxu1 %v9968_v24 }
 0xb4a   :  { %10352 = vmatpush1.bf16.msra.mxu1 %v13237_v0  ;;  %10383 = vmatprep.mubr.bf16.mxu1 %v10146_v45 }
 0xb4b   :  { %10353 = vmatprep.subr.bf16.mxu1 %v13242_v33 }
 0xb4e   :  { %10354 = vmatpush1.bf16.msra.mxu1 %v13240_v8 }
 0xb4f   :  { %10355 = vmatprep.subr.bf16.mxu1 %v13245_v56 }
 0xb52   :  { %10356 = vmatpush1.bf16.msra.mxu1 %v13243_v18  ;;  %v10590_v18 = vrot.slane %v10571_v57, %v19906_v54 }
 0xb53   :  { %10357 = vmatprep.subr.bf16.mxu1 %v13248_v61  ;;  %v13302_v27 = vpop.eup %13301 }
 0xb54   :  { %v10581_v24 = vrot.slane %v13302_v27, %v19906_v54 }
 0xb56   :  { %10358 = vmatpush1.bf16.msra.mxu1 %v13246_v53 }
 0xb57   :  { %10359 = vmatprep.subr.bf16.mxu1 %v13251_v41 }
 0xb5a   :  { %10360 = vmatpush1.bf16.msra.mxu1 %v13249_v2 }
 0xb5b   :  { %10361 = vmatprep.subr.bf16.mxu1 %v13254_v15  ;;  %v10179_v15 = vld [vmem:[%s20689_s18] sm:$0x3]  ;;  %s13313_s18 = smov 4  }
 0xb5e   :  { %10362 = vmatpush1.bf16.msra.mxu1 %v13252_v20  ;;  %v10184_v20 = vrot.slane %v10179_v15, %v19906_v54 }
 0xb5f   :  { %10363 = vmatprep.subr.bf16.mxu1 %v13257_v9  ;;  %v10188_v9 = vrot.slane %v10179_v15, %v19916_v62 }
 0xb62   :  { %10364 = vmatpush1.bf16.msra.mxu1 %v13255_v14 }
 0xb63   :  { %10365 = vmatprep.subr.bf16.mxu1 %v13260_v16 }
 0xb66   :  { %10366 = vmatpush1.bf16.msra.mxu1 %v13258_v50 }
 0xb67   :  { %10367 = vmatprep.subr.bf16.mxu1 %v13263_v22 }
 0xb6a   :  { %10368 = vmatpush2.bf16.msra.mxu1 %v13261_v1 }
 0xb6b   :  { %10369 = vmatprep.subr.bf16.mxu1 %v13266_v35 }
 0xb6e   :  { %10370 = vmatpush2.bf16.msra.mxu1 %v13264_v29 }
 0xb6f   :  { %10371 = vmatprep.subr.bf16.mxu1 %v13269_v52 }
 0xb72   :  { %10372 = vmatpush2.bf16.msra.mxu1 %v13267_v39 }
 0xb73   :  { %10373 = vmatprep.subr.bf16.mxu1 %v13272_v36 }
 0xb76   :  { %10374 = vmatpush2.bf16.msra.mxu1 %v13270_v3 }
 0xb77   :  { %10375 = vmatprep.subr.bf16.mxu1 %v13275_v28  ;;  %v11495_v28 = vld [vmem:[#allocation5] ss:$0 sm:$0xff] }
 0xb7a   :  { %10376 = vmatpush2.bf16.msra.mxu1 %v13273_v19 }
 0xb7b   :  { %10377 = vmatprep.subr.bf16.mxu1 %v13278_v21 }
 0xb7e   :  { %10378 = vmatpush2.bf16.msra.mxu1 %v13276_v4 }
 0xb7f   :  { %10379 = vmatprep.subr.bf16.mxu1 %v13281_v34 }
 0xb82   :  { %10380 = vmatpush2.bf16.msra.mxu1 %v13279_v10 }
 0xb83   :  { %10381 = vmatprep.subr.bf16.mxu1 %v13284_v58 }
 0xb86   :  { %10382 = vmatpush2.bf16.msra.mxu1 %v13282_v11 }
 0xb89   :  { %10384 = vmatmul.mubr.bf16.vlgmr.msra.gmra.mxu1 %v10145_v5 }
 0xc09   :  { %v11922_v60 = vpop.f32.mrf.mxu1 }
 0xc0b   :  { %v11923_v51 = vpop.f32.mrf.mxu1 }
 0xc0c   :  { %v11924_v44 = vadd.f32 %v11923_v51, %v11922_v60 }
 0xc0d   :  { %v11925_v59 = vpop.f32.mrf.mxu1 }
 0xc0e   :  { %v10140_v0 = vadd.f32 %v11924_v44, %v11446_v17 }
 0xc0f   :  { %v11926_v33 = vpop.f32.mrf.mxu1 }
 0xc10   :  { %v10573_v45 = vsub.f32 %v10572_v37, %v10140_v0 }
 0xc12   :  { %v10583_v8 = vmul.f32 %v10581_v24, %v10573_v45 }
 0xc14   :  { %v10584_v56 = vmul.f32 -0.5, %v10583_v8 }
 0xc16   :  { %v10585_v61 = vmul.f32 %v10584_v56, %v10583_v8 }
 0xc18   :  { %v10592_v53 = vsub.f32 %v10585_v61, %v10590_v18 }
 0xc1a   :  { %v11512_v41 = vadd.f32 -0.9189385, %v10592_v53 }
 0xc1c   :  { %v10595_v2 = vsel %vm10594_vm9, %v11512_v41, 0.0 }
 0xc1d   :  { %10596 = vadd.xlane.f32.xlu0 %v10595_v2 }
 0xc49   :  { %v10385_v14 = vpop.f32.mrf.mxu1 }
 0xc4a   :  { %v10386_v16 = vadd.f32 %v10385_v14, %v10184_v20 }
 0xc4b   :  { %v10387_v50 = vpop.f32.mrf.mxu1 }
 0xc4c   :  { %v10388_v22 = vadd.f32 %v10387_v50, %v10188_v9  ;;  %v10392_v1 = vmax.f32 %v10386_v16, 0.0 }
 0xc4d   :  { %v10389_v35 = vpop.f32.mrf.mxu1 }
 0xc4e   :  { %v10393_v29 = vmax.f32 %v10388_v22, 0.0  ;;  %v10394_v36 = vpack.c.bf16 %v10392_v1, %v10392_v1 }
 0xc4f   :  { %v10390_v52 = vpop.f32.mrf.mxu1 }
 0xc50   :  { %v10395_v39 = vpack.c.bf16 %v10393_v29, %v10393_v29 }
 0xc52   :  { %10563 = vmatprep.mubr.bf16.mxu0 %v10395_v39 }
 0xc53   :  { %10564 = vmatmul.mubr.bf16.vlgmr.msra.gmra.mxu0 %v10394_v36 }
 0xca6   :  { %v10597_v62 = vpop.xlane.xlu0 %10596 }
 0xd13   :  { %v11944_v3 = vpop.f32.mrf.mxu0 }
 0xd15   :  { %v11945_v19 = vpop.f32.mrf.mxu0 }
 0xd16   :  { %v11946_v21 = vadd.f32 %v11945_v19, %v11944_v3 }
 0xd17   :  { %v11947_v4 = vpop.f32.mrf.mxu0 }
 0xd18   :  { %v10566_v54 = vadd.f32 %v11946_v21, %v11495_v28 }
 0xd19   :  { %v11948_v34 = vpop.f32.mrf.mxu0 }
 0xd1a   :  { %10599 = vrot.lane.b32.xlu0 %v10566_v54, %s13313_s18 }
 0xd8c   :  { %v10600_v10 = vpop.permute.xlu0 %10599 }
 0xd8d   :  { %v10602_v30 = vsel %vm10594_vm9, %v10140_v0, %v10600_v10 }
 0xd8e   :  { %v10604_v58 = vsel %vm10603_vm10, %v10602_v30, %v10597_v62 }
 0xd8f   :  { %v10606_v11 = vsel %vm10605_vm11, %v10604_v58, 0.0 }
 0xd90   :  { %10608 = vst.msk [vmem:[%s20694_s23] sm:$0xff] %vm10607_vm12, %v10606_v11 }
 0xd91   :  { %10613 = vsyncmov [#allocation4] }
 0xd94   :  { %s10614_s14 = vpop.sfrf %10613 }
 0xd95   :  { %p11513_p0 = scmp.ne.s32.totalorder %s10614_s14, 0 }
 0xd97   :  { %10618 = shalt.err (%p11513_p0)  }

</bundles_post_ra>
